<compile_context>
chip_gen: v5e
topology: v5e:2x2
jax: 0.10.0
libtpu: 0.0.40
codegen_flags: <defaults>
</compile_context>

<pallas_src>
import jax
import jax.numpy as jnp
from jax import lax
from jax.experimental import pallas as pl
from jax.experimental.pallas import tpu as pltpu


# ---------------------------------------------------------------------------
# Fused kernel: conv1+ReLU+pool -> conv2+ReLU+pool for one batch block
# ---------------------------------------------------------------------------
def _fused_kernel(x1_ref, w1_ref, b1_ref, w2_ref, b2_ref, o_ref,
                  pe_ref, po_ref, x2_ref):
    # Per grid step (B = batch block):
    #   x1_ref : [8, B, Hp1*Wp2, K1] bf16  layer-1 im2col; the leading 8 enumerates
    #            (q, r, p) with conv pixel h = 2*h1 + r, w = 4*v + 2*p + q
    #            (h1, v index the pooled pixel, p = parity of pooled column w1 = 2*v+p)
    #   w1_ref : [K1, C1]   bf16   b1_ref : [1, C1] f32
    #   w2_ref : [9*C1, C2] bf16   b2_ref : [1, C2] f32
    #   o_ref  : [B, Hp2, Wp2*C2] f32  lane-dense pooled output
    #   pe/po  : [B, Hp1+2, Wp2+1, C1] f32 scratch: zero-padded even/odd column-parity
    #            planes of the layer-1 output (layer-2's parity-split, padded input)
    #   x2_ref : [B*Hp1*Wp2, 9*C1] bf16 scratch: layer-2 im2col (K = 288)
    _, B, HV, K1 = x1_ref.shape
    C1 = w1_ref.shape[1]
    C2 = w2_ref.shape[1]
    Hp1 = pe_ref.shape[1] - 2            # layer-1 pooled height (= layer-2 conv height)
    Wp2 = pe_ref.shape[2] - 1            # final pooled width
    Hp2 = Hp1 // 2

    # ---------------- Layer 1: one K1 matmul for the whole batch block ----------------
    xs = x1_ref[...].reshape(8 * B * HV, K1)
    a1 = jnp.dot(xs, w1_ref[...], preferred_element_type=jnp.float32)
    a1 = jnp.maximum(a1 + b1_ref[...], 0.0)             # bias + ReLU (f32, VPU)

    # 2x2 max-pool = two contiguous-half maxes (rows are q-major, then r-major).
    half = 4 * B * HV
    a1 = jnp.maximum(a1[:half], a1[half:])               # horizontal pool (over q)
    half //= 2
    a1 = jnp.maximum(a1[:half], a1[half:])                # vertical pool (over r)
    half //= 2
    y1_even = a1[:half].reshape(B, Hp1, Wp2, C1)          # pooled cols w1 = 2*v   (p=0)
    y1_odd = a1[half:].reshape(B, Hp1, Wp2, C1)           # pooled cols w1 = 2*v+1 (p=1)

    # ------ Pack layer-1 output into zero-padded column-parity planes (VMEM only) ------
    pe_ref[...] = jnp.zeros_like(pe_ref)                  # re-zeroed every step so the
    po_ref[...] = jnp.zeros_like(po_ref)                  # grid stays fully "parallel"
    po_ref[:, 1:Hp1 + 1, 0:Wp2, :] = y1_even              # odd  padded cols 1,3,...,15
    pe_ref[:, 1:Hp1 + 1, 1:Wp2 + 1, :] = y1_odd           # even padded cols 2,4,...,16
    planes = (pe_ref, po_ref)

    # -------- Layer 2: K=288 im2col built in VMEM, one MXU matmul per parity ----------
    pooled = None
    for q in range(2):                                    # output column w = 2*w2 + q
        t = 0
        for kh in range(3):
            for kw in range(3):
                par = (q + kw) % 2                        # plane holding padded col w+kw
                a = (q + kw) // 2                         # column offset inside plane
                slab = planes[par][:, kh:kh + Hp1, a:a + Wp2, :]   # [B, Hp1, Wp2, C1]
                x2_ref[:, t * C1:(t + 1) * C1] = (
                    slab.reshape(B * Hp1 * Wp2, C1).astype(jnp.bfloat16))
                t += 1
        z = jnp.dot(x2_ref[...], w2_ref[...], preferred_element_type=jnp.float32)
        z = jnp.maximum(z + b2_ref[...], 0.0)             # bias + ReLU
        z = z.reshape(B, Hp2, 2, Wp2, C2)
        z = jnp.maximum(z[:, :, 0], z[:, :, 1])           # vertical half of the 2x2 pool
        pooled = z if pooled is None else jnp.maximum(pooled, z)   # horizontal half (q)

    # Lane-dense store: (w2, cout) merged into a 512-lane minor dim.
    for w2 in range(Wp2):
        o_ref[:, :, w2 * C2:(w2 + 1) * C2] = pooled[:, :, w2, :]


# ---------------------------------------------------------------------------
# Wrapper
# ---------------------------------------------------------------------------
def _pick_batch_block(n):
    # Largest block <= 4 (safe for v5e's 16 MiB scoped VMEM) that still leaves
    # >= 2 grid steps so both v7x TensorCores get work.
    for b in (4, 2, 1):
        if n % b == 0 and n // b >= 2:
            return b
    return 1


def cifar_client3_forward(x_nchw, params, *, batch_block=None):
    (w1, b1), (w2, b2) = params
    N, Cin, H, W = x_nchw.shape
    C1, C2 = w1.shape[0], w2.shape[0]
    assert w1.shape == (C1, Cin, 3, 3) and w2.shape == (C2, C1, 3, 3)
    assert H % 4 == 0 and W % 4 == 0
    Hp1, Wp1 = H // 2, W // 2                 # after pool 1
    Hp2, Wp2 = Hp1 // 2, Wp1 // 2             # after pool 2
    K1 = 32                                   # 3*3*Cin = 27, zero-padded to 32
    B = batch_block if batch_block is not None else _pick_batch_block(N)
    assert N % B == 0

    # Layer-1 im2col (wrapper side), rows ordered (q, r, p, n, h1, v), K = (kh,kw,cin).
    x = jnp.transpose(x_nchw, (0, 2, 3, 1)).astype(jnp.float32)        # NHWC
    xp = jnp.pad(x, ((0, 0), (1, 1), (1, 1), (0, 0)))
    taps = jnp.stack([xp[:, kh:kh + H, kw:kw + W, :]
                      for kh in range(3) for kw in range(3)], axis=3)  # [N,H,W,9,Cin]
    cols = taps.reshape(N, H, W, 9 * Cin)
    cols = jnp.pad(cols, ((0, 0), (0, 0), (0, 0), (0, K1 - 9 * Cin)))
    # h = 2*h1 + r ;  w = 4*v + 2*p + q  (pooled column w1 = 2*v + p).
    cols = cols.reshape(N, Hp1, 2, Wp2, 2, 2, K1)          # (n, h1, r, v, p, q, K)
    x1 = cols.transpose(5, 2, 4, 0, 1, 3, 6)               # (q, r, p, n, h1, v, K)
    x1 = x1.reshape(8, N, Hp1 * Wp2, K1).astype(jnp.bfloat16)

    # Weights: (kh, kw, cin)-major contraction dim, bf16 MXU operands, f32 bias.
    w1m = jnp.transpose(w1, (2, 3, 1, 0)).reshape(9 * Cin, C1)
    w1m = jnp.pad(w1m, ((0, K1 - 9 * Cin), (0, 0))).astype(jnp.bfloat16)   # [K1, C1]
    b1r = b1.reshape(1, C1).astype(jnp.float32)
    w2m = jnp.transpose(w2, (2, 3, 1, 0)).reshape(9 * C1, C2).astype(jnp.bfloat16)
    b2r = b2.reshape(1, C2).astype(jnp.float32)

    out = pl.pallas_call(
        _fused_kernel,
        out_shape=jax.ShapeDtypeStruct((N, Hp2, Wp2 * C2), jnp.float32),
        grid=(N // B,),
        in_specs=[
            pl.BlockSpec((8, B, Hp1 * Wp2, K1), lambda g: (0, g, 0, 0)),
            pl.BlockSpec((K1, C1), lambda g: (0, 0)),        # resident weights
            pl.BlockSpec((1, C1), lambda g: (0, 0)),         # resident bias
            pl.BlockSpec((9 * C1, C2), lambda g: (0, 0)),
            pl.BlockSpec((1, C2), lambda g: (0, 0)),
        ],
        out_specs=pl.BlockSpec((B, Hp2, Wp2 * C2), lambda g: (g, 0, 0)),
        scratch_shapes=[
            pltpu.VMEM((B, Hp1 + 2, Wp2 + 1, C1), jnp.float32),   # even-column plane
            pltpu.VMEM((B, Hp1 + 2, Wp2 + 1, C1), jnp.float32),   # odd-column plane
            pltpu.VMEM((B * Hp1 * Wp2, 9 * C1), jnp.bfloat16),    # layer-2 K=288 im2col
        ],
        compiler_params=pltpu.CompilerParams(
            dimension_semantics=("parallel",)),                   # megacore-shard batch
    )(x1, w1m, b1r, w2m, b2r)

    out = out.reshape(N, Hp2, Wp2, C2)
    return jnp.transpose(out, (0, 3, 1, 2))                       # NHWC -> NCHW


# ---------------------------------------------------------------------------
# Params / reference / demo
# ---------------------------------------------------------------------------
def init_conv_params(key, cin, cout, k=3):
    kw_key, kb_key = jax.random.split(key)
    fan_in = cin * k * k
    bound = 1.0 / (fan_in ** 0.5)
    w = jax.random.uniform(kw_key, (cout, cin, k, k), jnp.float32, -bound, bound)
    b = jax.random.uniform(kb_key, (cout,), jnp.float32, -bound, bound)
    return w, b


def _reference_forward(x_nchw, params):
    """Pure-XLA f32 reference for validation."""
    def layer(x, w, b):
        y = lax.conv_general_dilated(
            x, w, window_strides=(1, 1), padding=((1, 1), (1, 1)),
            dimension_numbers=("NCHW", "OIHW", "NCHW"),
            precision=lax.Precision.HIGHEST)
        y = jnp.maximum(y + b[None, :, None, None], 0.0)
        n, c, h, w_ = y.shape
        return jnp.max(y.reshape(n, c, h // 2, 2, w_ // 2, 2), axis=(3, 5))
    (w1, b1), (w2, b2) = params
    return layer(layer(x_nchw, w1, b1), w2, b2)


if __name__ == "__main__":
    key = jax.random.PRNGKey(0)
    k_in, k1, k2 = jax.random.split(key, 3)

    # CIFAR-shaped NCHW input; batch 4 -> batch block 2, grid of 2 (both v7x TCs busy).
    x = jax.random.normal(k_in, (4, 3, 32, 32), jnp.float32)
    params = (init_conv_params(k1, 3, 32), init_conv_params(k2, 32, 64))

    out = jax.jit(cifar_client3_forward)(x, params)
    out = jax.block_until_ready(out)

    assert out.shape == (4, 64, 8, 8), out.shape
    assert bool(jnp.all(jnp.isfinite(out)))
    assert bool(jnp.all(out >= 0.0))             # ReLU + maxpool -> non-negative

    ref = _reference_forward(x, params)
    max_err = float(jnp.max(jnp.abs(out - ref)))
    assert max_err < 1e-1, f"max|err| vs XLA reference = {max_err}"

    print("KERNEL_OK")
</pallas_src>

<mosaic_0001>
module attributes {stable_mosaic.version = 11 : i64} {
  func.func @_fused_kernel(%arg0: i32, %arg1: memref<8x2x128x32xbf16, #tpu.memory_space<vmem>>, %arg2: memref<32x32xbf16, #tpu.memory_space<vmem>>, %arg3: memref<1x32xf32, #tpu.memory_space<vmem>>, %arg4: memref<288x64xbf16, #tpu.memory_space<vmem>>, %arg5: memref<1x64xf32, #tpu.memory_space<vmem>>, %arg6: memref<2x8x512xf32, #tpu.memory_space<vmem>>, %arg7: memref<2x18x9x32xf32, #tpu.memory_space<vmem>>, %arg8: memref<2x18x9x32xf32, #tpu.memory_space<vmem>>, %arg9: memref<256x288xbf16, #tpu.memory_space<vmem>>) attributes {dimension_semantics = [#tpu.dimension_semantics<parallel>], iteration_bounds = array<i64: 2>, scalar_prefetch = 0 : i64, scratch_operands = 3 : i64, tpu.core_type = #tpu.core_type<tc>, window_params = [{transform_indices = @transform_0, window_bounds = array<i64: 8, 2, 128, 32>}, {pipeline_mode = #tpu.pipeline_mode<synchronous>, transform_indices = @transform_1, window_bounds = array<i64: 32, 32>}, {pipeline_mode = #tpu.pipeline_mode<synchronous>, transform_indices = @transform_2, window_bounds = array<i64: 1, 32>}, {pipeline_mode = #tpu.pipeline_mode<synchronous>, transform_indices = @transform_3, window_bounds = array<i64: 288, 64>}, {pipeline_mode = #tpu.pipeline_mode<synchronous>, transform_indices = @transform_4, window_bounds = array<i64: 1, 64>}, {transform_indices = @transform_5, window_bounds = array<i64: 2, 8, 512>}]} {
    %c0 = arith.constant 0 : index
    %c0_0 = arith.constant 0 : index
    %c0_1 = arith.constant 0 : index
    %c0_2 = arith.constant 0 : index
    %0 = vector.load %arg1[%c0, %c0_0, %c0_1, %c0_2] : memref<8x2x128x32xbf16, #tpu.memory_space<vmem>>, vector<8x2x128x32xbf16>
    %1 = vector.shape_cast %0 : vector<8x2x128x32xbf16> to vector<2048x32xbf16>
    %c0_3 = arith.constant 0 : index
    %c0_4 = arith.constant 0 : index
    %2 = vector.load %arg2[%c0_3, %c0_4] : memref<32x32xbf16, #tpu.memory_space<vmem>>, vector<32x32xbf16>
    %cst = arith.constant dense<0.000000e+00> : vector<2048x32xf32>
    %3 = tpu.matmul %1, %2, %cst {dimension_numbers = #tpu.dot_dimension_numbers<[1], [0], [0], [1], [0, 0, 1, 1], [], []>} : vector<2048x32xbf16>, vector<32x32xbf16>, vector<2048x32xf32> -> vector<2048x32xf32>
    %c0_5 = arith.constant 0 : index
    %c0_6 = arith.constant 0 : index
    %4 = vector.load %arg3[%c0_5, %c0_6] : memref<1x32xf32, #tpu.memory_space<vmem>>, vector<1x32xf32>
    %5 = vector.broadcast %4 : vector<1x32xf32> to vector<2048x32xf32>
    %6 = arith.addf %3, %5 : vector<2048x32xf32>
    %cst_7 = arith.constant 0.000000e+00 : f32
    %7 = vector.broadcast %cst_7 : f32 to vector<2048x32xf32>
    %8 = arith.maximumf %6, %7 : vector<2048x32xf32>
    %9 = vector.extract_strided_slice %8 {offsets = [0, 0], sizes = [1024, 32], strides = [1, 1]} : vector<2048x32xf32> to vector<1024x32xf32>
    %10 = vector.extract_strided_slice %8 {offsets = [1024, 0], sizes = [1024, 32], strides = [1, 1]} : vector<2048x32xf32> to vector<1024x32xf32>
    %11 = arith.maximumf %9, %10 : vector<1024x32xf32>
    %12 = vector.extract_strided_slice %11 {offsets = [0, 0], sizes = [512, 32], strides = [1, 1]} : vector<1024x32xf32> to vector<512x32xf32>
    %13 = vector.extract_strided_slice %11 {offsets = [512, 0], sizes = [512, 32], strides = [1, 1]} : vector<1024x32xf32> to vector<512x32xf32>
    %14 = arith.maximumf %12, %13 : vector<512x32xf32>
    %15 = vector.extract_strided_slice %14 {offsets = [0, 0], sizes = [256, 32], strides = [1, 1]} : vector<512x32xf32> to vector<256x32xf32>
    %16 = vector.shape_cast %15 : vector<256x32xf32> to vector<2x16x8x32xf32>
    %17 = vector.extract_strided_slice %14 {offsets = [256, 0], sizes = [256, 32], strides = [1, 1]} : vector<512x32xf32> to vector<256x32xf32>
    %18 = vector.shape_cast %17 : vector<256x32xf32> to vector<2x16x8x32xf32>
    %cst_8 = arith.constant 0.000000e+00 : f32
    %19 = vector.broadcast %cst_8 : f32 to vector<2x18x9x32xf32>
    %c0_9 = arith.constant 0 : index
    %c0_10 = arith.constant 0 : index
    %c0_11 = arith.constant 0 : index
    %c0_12 = arith.constant 0 : index
    %20 = vector.load %arg7[%c0_9, %c0_10, %c0_11, %c0_12] : memref<2x18x9x32xf32, #tpu.memory_space<vmem>>, vector<2x18x9x32xf32>
    tpu.vector_store %arg7[%c0_9, %c0_10, %c0_11, %c0_12], %19 {strides = array<i32>} : memref<2x18x9x32xf32, #tpu.memory_space<vmem>>, vector<2x18x9x32xf32>,
    %cst_13 = arith.constant 0.000000e+00 : f32
    %21 = vector.broadcast %cst_13 : f32 to vector<2x18x9x32xf32>
    %c0_14 = arith.constant 0 : index
    %c0_15 = arith.constant 0 : index
    %c0_16 = arith.constant 0 : index
    %c0_17 = arith.constant 0 : index
    %22 = vector.load %arg8[%c0_14, %c0_15, %c0_16, %c0_17] : memref<2x18x9x32xf32, #tpu.memory_space<vmem>>, vector<2x18x9x32xf32>
    tpu.vector_store %arg8[%c0_14, %c0_15, %c0_16, %c0_17], %21 {strides = array<i32>} : memref<2x18x9x32xf32, #tpu.memory_space<vmem>>, vector<2x18x9x32xf32>,
    %c0_18 = arith.constant 0 : index
    %c1 = arith.constant 1 : index
    %c0_19 = arith.constant 0 : index
    %c0_20 = arith.constant 0 : index
    %23 = vector.load %arg8[%c0_18, %c1, %c0_19, %c0_20] : memref<2x18x9x32xf32, #tpu.memory_space<vmem>>, vector<2x16x8x32xf32>
    tpu.vector_store %arg8[%c0_18, %c1, %c0_19, %c0_20], %16 {strides = array<i32>} : memref<2x18x9x32xf32, #tpu.memory_space<vmem>>, vector<2x16x8x32xf32>,
    %c0_21 = arith.constant 0 : index
    %c1_22 = arith.constant 1 : index
    %c1_23 = arith.constant 1 : index
    %c0_24 = arith.constant 0 : index
    %24 = vector.load %arg7[%c0_21, %c1_22, %c1_23, %c0_24] : memref<2x18x9x32xf32, #tpu.memory_space<vmem>>, vector<2x16x8x32xf32>
    tpu.vector_store %arg7[%c0_21, %c1_22, %c1_23, %c0_24], %18 {strides = array<i32>} : memref<2x18x9x32xf32, #tpu.memory_space<vmem>>, vector<2x16x8x32xf32>,
    %c0_25 = arith.constant 0 : index
    %c0_26 = arith.constant 0 : index
    %c0_27 = arith.constant 0 : index
    %c0_28 = arith.constant 0 : index
    %25 = vector.load %arg7[%c0_25, %c0_26, %c0_27, %c0_28] : memref<2x18x9x32xf32, #tpu.memory_space<vmem>>, vector<2x16x8x32xf32>
    %26 = vector.shape_cast %25 : vector<2x16x8x32xf32> to vector<256x32xf32>
    %27 = arith.truncf %26 : vector<256x32xf32> to vector<256x32xbf16>
    %c0_29 = arith.constant 0 : index
    %c0_30 = arith.constant 0 : index
    %28 = vector.load %arg9[%c0_29, %c0_30] : memref<256x288xbf16, #tpu.memory_space<vmem>>, vector<256x32xbf16>
    tpu.vector_store %arg9[%c0_29, %c0_30], %27 {strides = array<i32>} : memref<256x288xbf16, #tpu.memory_space<vmem>>, vector<256x32xbf16>,
    %c0_31 = arith.constant 0 : index
    %c0_32 = arith.constant 0 : index
    %c0_33 = arith.constant 0 : index
    %c0_34 = arith.constant 0 : index
    %29 = vector.load %arg8[%c0_31, %c0_32, %c0_33, %c0_34] : memref<2x18x9x32xf32, #tpu.memory_space<vmem>>, vector<2x16x8x32xf32>
    %30 = vector.shape_cast %29 : vector<2x16x8x32xf32> to vector<256x32xf32>
    %31 = arith.truncf %30 : vector<256x32xf32> to vector<256x32xbf16>
    %c0_35 = arith.constant 0 : index
    %c32 = arith.constant 32 : index
    %32 = vector.load %arg9[%c0_35, %c32] : memref<256x288xbf16, #tpu.memory_space<vmem>>, vector<256x32xbf16>
    tpu.vector_store %arg9[%c0_35, %c32], %31 {strides = array<i32>} : memref<256x288xbf16, #tpu.memory_space<vmem>>, vector<256x32xbf16>,
    %c0_36 = arith.constant 0 : index
    %c0_37 = arith.constant 0 : index
    %c1_38 = arith.constant 1 : index
    %c0_39 = arith.constant 0 : index
    %33 = vector.load %arg7[%c0_36, %c0_37, %c1_38, %c0_39] : memref<2x18x9x32xf32, #tpu.memory_space<vmem>>, vector<2x16x8x32xf32>
    %34 = vector.shape_cast %33 : vector<2x16x8x32xf32> to vector<256x32xf32>
    %35 = arith.truncf %34 : vector<256x32xf32> to vector<256x32xbf16>
    %c0_40 = arith.constant 0 : index
    %c64 = arith.constant 64 : index
    %36 = vector.load %arg9[%c0_40, %c64] : memref<256x288xbf16, #tpu.memory_space<vmem>>, vector<256x32xbf16>
    tpu.vector_store %arg9[%c0_40, %c64], %35 {strides = array<i32>} : memref<256x288xbf16, #tpu.memory_space<vmem>>, vector<256x32xbf16>,
    %c0_41 = arith.constant 0 : index
    %c1_42 = arith.constant 1 : index
    %c0_43 = arith.constant 0 : index
    %c0_44 = arith.constant 0 : index
    %37 = vector.load %arg7[%c0_41, %c1_42, %c0_43, %c0_44] : memref<2x18x9x32xf32, #tpu.memory_space<vmem>>, vector<2x16x8x32xf32>
    %38 = vector.shape_cast %37 : vector<2x16x8x32xf32> to vector<256x32xf32>
    %39 = arith.truncf %38 : vector<256x32xf32> to vector<256x32xbf16>
    %c0_45 = arith.constant 0 : index
    %c96 = arith.constant 96 : index
    %40 = vector.load %arg9[%c0_45, %c96] : memref<256x288xbf16, #tpu.memory_space<vmem>>, vector<256x32xbf16>
    tpu.vector_store %arg9[%c0_45, %c96], %39 {strides = array<i32>} : memref<256x288xbf16, #tpu.memory_space<vmem>>, vector<256x32xbf16>,
    %c0_46 = arith.constant 0 : index
    %c1_47 = arith.constant 1 : index
    %c0_48 = arith.constant 0 : index
    %c0_49 = arith.constant 0 : index
    %41 = vector.load %arg8[%c0_46, %c1_47, %c0_48, %c0_49] : memref<2x18x9x32xf32, #tpu.memory_space<vmem>>, vector<2x16x8x32xf32>
    %42 = vector.shape_cast %41 : vector<2x16x8x32xf32> to vector<256x32xf32>
    %43 = arith.truncf %42 : vector<256x32xf32> to vector<256x32xbf16>
    %c0_50 = arith.constant 0 : index
    %c128 = arith.constant 128 : index
    %44 = vector.load %arg9[%c0_50, %c128] : memref<256x288xbf16, #tpu.memory_space<vmem>>, vector<256x32xbf16>
    tpu.vector_store %arg9[%c0_50, %c128], %43 {strides = array<i32>} : memref<256x288xbf16, #tpu.memory_space<vmem>>, vector<256x32xbf16>,
    %c0_51 = arith.constant 0 : index
    %c1_52 = arith.constant 1 : index
    %c1_53 = arith.constant 1 : index
    %c0_54 = arith.constant 0 : index
    %45 = vector.load %arg7[%c0_51, %c1_52, %c1_53, %c0_54] : memref<2x18x9x32xf32, #tpu.memory_space<vmem>>, vector<2x16x8x32xf32>
    %46 = vector.shape_cast %45 : vector<2x16x8x32xf32> to vector<256x32xf32>
    %47 = arith.truncf %46 : vector<256x32xf32> to vector<256x32xbf16>
    %c0_55 = arith.constant 0 : index
    %c160 = arith.constant 160 : index
    %48 = vector.load %arg9[%c0_55, %c160] : memref<256x288xbf16, #tpu.memory_space<vmem>>, vector<256x32xbf16>
    tpu.vector_store %arg9[%c0_55, %c160], %47 {strides = array<i32>} : memref<256x288xbf16, #tpu.memory_space<vmem>>, vector<256x32xbf16>,
    %c0_56 = arith.constant 0 : index
    %c2 = arith.constant 2 : index
    %c0_57 = arith.constant 0 : index
    %c0_58 = arith.constant 0 : index
    %49 = vector.load %arg7[%c0_56, %c2, %c0_57, %c0_58] : memref<2x18x9x32xf32, #tpu.memory_space<vmem>>, vector<2x16x8x32xf32>
    %50 = vector.shape_cast %49 : vector<2x16x8x32xf32> to vector<256x32xf32>
    %51 = arith.truncf %50 : vector<256x32xf32> to vector<256x32xbf16>
    %c0_59 = arith.constant 0 : index
    %c192 = arith.constant 192 : index
    %52 = vector.load %arg9[%c0_59, %c192] : memref<256x288xbf16, #tpu.memory_space<vmem>>, vector<256x32xbf16>
    tpu.vector_store %arg9[%c0_59, %c192], %51 {strides = array<i32>} : memref<256x288xbf16, #tpu.memory_space<vmem>>, vector<256x32xbf16>,
    %c0_60 = arith.constant 0 : index
    %c2_61 = arith.constant 2 : index
    %c0_62 = arith.constant 0 : index
    %c0_63 = arith.constant 0 : index
    %53 = vector.load %arg8[%c0_60, %c2_61, %c0_62, %c0_63] : memref<2x18x9x32xf32, #tpu.memory_space<vmem>>, vector<2x16x8x32xf32>
    %54 = vector.shape_cast %53 : vector<2x16x8x32xf32> to vector<256x32xf32>
    %55 = arith.truncf %54 : vector<256x32xf32> to vector<256x32xbf16>
    %c0_64 = arith.constant 0 : index
    %c224 = arith.constant 224 : index
    %56 = vector.load %arg9[%c0_64, %c224] : memref<256x288xbf16, #tpu.memory_space<vmem>>, vector<256x32xbf16>
    tpu.vector_store %arg9[%c0_64, %c224], %55 {strides = array<i32>} : memref<256x288xbf16, #tpu.memory_space<vmem>>, vector<256x32xbf16>,
    %c0_65 = arith.constant 0 : index
    %c2_66 = arith.constant 2 : index
    %c1_67 = arith.constant 1 : index
    %c0_68 = arith.constant 0 : index
    %57 = vector.load %arg7[%c0_65, %c2_66, %c1_67, %c0_68] : memref<2x18x9x32xf32, #tpu.memory_space<vmem>>, vector<2x16x8x32xf32>
    %58 = vector.shape_cast %57 : vector<2x16x8x32xf32> to vector<256x32xf32>
    %59 = arith.truncf %58 : vector<256x32xf32> to vector<256x32xbf16>
    %c0_69 = arith.constant 0 : index
    %c256 = arith.constant 256 : index
    %60 = vector.load %arg9[%c0_69, %c256] : memref<256x288xbf16, #tpu.memory_space<vmem>>, vector<256x32xbf16>
    tpu.vector_store %arg9[%c0_69, %c256], %59 {strides = array<i32>} : memref<256x288xbf16, #tpu.memory_space<vmem>>, vector<256x32xbf16>,
    %c0_70 = arith.constant 0 : index
    %c0_71 = arith.constant 0 : index
    %61 = vector.load %arg9[%c0_70, %c0_71] : memref<256x288xbf16, #tpu.memory_space<vmem>>, vector<256x288xbf16>
    %c0_72 = arith.constant 0 : index
    %c0_73 = arith.constant 0 : index
    %62 = vector.load %arg4[%c0_72, %c0_73] : memref<288x64xbf16, #tpu.memory_space<vmem>>, vector<288x64xbf16>
    %cst_74 = arith.constant dense<0.000000e+00> : vector<256x64xf32>
    %63 = tpu.matmul %61, %62, %cst_74 {dimension_numbers = #tpu.dot_dimension_numbers<[1], [0], [0], [1], [0, 0, 1, 1], [], []>} : vector<256x288xbf16>, vector<288x64xbf16>, vector<256x64xf32> -> vector<256x64xf32>
    %c0_75 = arith.constant 0 : index
    %c0_76 = arith.constant 0 : index
    %64 = vector.load %arg5[%c0_75, %c0_76] : memref<1x64xf32, #tpu.memory_space<vmem>>, vector<1x64xf32>
    %65 = vector.broadcast %64 : vector<1x64xf32> to vector<256x64xf32>
    %66 = arith.addf %63, %65 : vector<256x64xf32>
    %cst_77 = arith.constant 0.000000e+00 : f32
    %67 = vector.broadcast %cst_77 : f32 to vector<256x64xf32>
    %68 = arith.maximumf %66, %67 : vector<256x64xf32>
    %69 = vector.shape_cast %68 : vector<256x64xf32> to vector<2x8x2x8x64xf32>
    %70 = vector.extract_strided_slice %69 {offsets = [0, 0, 0, 0, 0], sizes = [2, 8, 1, 8, 64], strides = [1, 1, 1, 1, 1]} : vector<2x8x2x8x64xf32> to vector<2x8x1x8x64xf32>
    %71 = vector.shape_cast %70 : vector<2x8x1x8x64xf32> to vector<2x8x8x64xf32>
    %72 = vector.extract_strided_slice %69 {offsets = [0, 0, 1, 0, 0], sizes = [2, 8, 1, 8, 64], strides = [1, 1, 1, 1, 1]} : vector<2x8x2x8x64xf32> to vector<2x8x1x8x64xf32>
    %73 = vector.shape_cast %72 : vector<2x8x1x8x64xf32> to vector<2x8x8x64xf32>
    %74 = arith.maximumf %71, %73 : vector<2x8x8x64xf32>
    %c0_78 = arith.constant 0 : index
    %c0_79 = arith.constant 0 : index
    %c0_80 = arith.constant 0 : index
    %c0_81 = arith.constant 0 : index
    %75 = vector.load %arg8[%c0_78, %c0_79, %c0_80, %c0_81] : memref<2x18x9x32xf32, #tpu.memory_space<vmem>>, vector<2x16x8x32xf32>
    %76 = vector.shape_cast %75 : vector<2x16x8x32xf32> to vector<256x32xf32>
    %77 = arith.truncf %76 : vector<256x32xf32> to vector<256x32xbf16>
    %c0_82 = arith.constant 0 : index
    %c0_83 = arith.constant 0 : index
    %78 = vector.load %arg9[%c0_82, %c0_83] : memref<256x288xbf16, #tpu.memory_space<vmem>>, vector<256x32xbf16>
    tpu.vector_store %arg9[%c0_82, %c0_83], %77 {strides = array<i32>} : memref<256x288xbf16, #tpu.memory_space<vmem>>, vector<256x32xbf16>,
    %c0_84 = arith.constant 0 : index
    %c0_85 = arith.constant 0 : index
    %c1_86 = arith.constant 1 : index
    %c0_87 = arith.constant 0 : index
    %79 = vector.load %arg7[%c0_84, %c0_85, %c1_86, %c0_87] : memref<2x18x9x32xf32, #tpu.memory_space<vmem>>, vector<2x16x8x32xf32>
    %80 = vector.shape_cast %79 : vector<2x16x8x32xf32> to vector<256x32xf32>
    %81 = arith.truncf %80 : vector<256x32xf32> to vector<256x32xbf16>
    %c0_88 = arith.constant 0 : index
    %c32_89 = arith.constant 32 : index
    %82 = vector.load %arg9[%c0_88, %c32_89] : memref<256x288xbf16, #tpu.memory_space<vmem>>, vector<256x32xbf16>
    tpu.vector_store %arg9[%c0_88, %c32_89], %81 {strides = array<i32>} : memref<256x288xbf16, #tpu.memory_space<vmem>>, vector<256x32xbf16>,
    %c0_90 = arith.constant 0 : index
    %c0_91 = arith.constant 0 : index
    %c1_92 = arith.constant 1 : index
    %c0_93 = arith.constant 0 : index
    %83 = vector.load %arg8[%c0_90, %c0_91, %c1_92, %c0_93] : memref<2x18x9x32xf32, #tpu.memory_space<vmem>>, vector<2x16x8x32xf32>
    %84 = vector.shape_cast %83 : vector<2x16x8x32xf32> to vector<256x32xf32>
    %85 = arith.truncf %84 : vector<256x32xf32> to vector<256x32xbf16>
    %c0_94 = arith.constant 0 : index
    %c64_95 = arith.constant 64 : index
    %86 = vector.load %arg9[%c0_94, %c64_95] : memref<256x288xbf16, #tpu.memory_space<vmem>>, vector<256x32xbf16>
    tpu.vector_store %arg9[%c0_94, %c64_95], %85 {strides = array<i32>} : memref<256x288xbf16, #tpu.memory_space<vmem>>, vector<256x32xbf16>,
    %c0_96 = arith.constant 0 : index
    %c1_97 = arith.constant 1 : index
    %c0_98 = arith.constant 0 : index
    %c0_99 = arith.constant 0 : index
    %87 = vector.load %arg8[%c0_96, %c1_97, %c0_98, %c0_99] : memref<2x18x9x32xf32, #tpu.memory_space<vmem>>, vector<2x16x8x32xf32>
    %88 = vector.shape_cast %87 : vector<2x16x8x32xf32> to vector<256x32xf32>
    %89 = arith.truncf %88 : vector<256x32xf32> to vector<256x32xbf16>
    %c0_100 = arith.constant 0 : index
    %c96_101 = arith.constant 96 : index
    %90 = vector.load %arg9[%c0_100, %c96_101] : memref<256x288xbf16, #tpu.memory_space<vmem>>, vector<256x32xbf16>
    tpu.vector_store %arg9[%c0_100, %c96_101], %89 {strides = array<i32>} : memref<256x288xbf16, #tpu.memory_space<vmem>>, vector<256x32xbf16>,
    %c0_102 = arith.constant 0 : index
    %c1_103 = arith.constant 1 : index
    %c1_104 = arith.constant 1 : index
    %c0_105 = arith.constant 0 : index
    %91 = vector.load %arg7[%c0_102, %c1_103, %c1_104, %c0_105] : memref<2x18x9x32xf32, #tpu.memory_space<vmem>>, vector<2x16x8x32xf32>
    %92 = vector.shape_cast %91 : vector<2x16x8x32xf32> to vector<256x32xf32>
    %93 = arith.truncf %92 : vector<256x32xf32> to vector<256x32xbf16>
    %c0_106 = arith.constant 0 : index
    %c128_107 = arith.constant 128 : index
    %94 = vector.load %arg9[%c0_106, %c128_107] : memref<256x288xbf16, #tpu.memory_space<vmem>>, vector<256x32xbf16>
    tpu.vector_store %arg9[%c0_106, %c128_107], %93 {strides = array<i32>} : memref<256x288xbf16, #tpu.memory_space<vmem>>, vector<256x32xbf16>,
    %c0_108 = arith.constant 0 : index
    %c1_109 = arith.constant 1 : index
    %c1_110 = arith.constant 1 : index
    %c0_111 = arith.constant 0 : index
    %95 = vector.load %arg8[%c0_108, %c1_109, %c1_110, %c0_111] : memref<2x18x9x32xf32, #tpu.memory_space<vmem>>, vector<2x16x8x32xf32>
    %96 = vector.shape_cast %95 : vector<2x16x8x32xf32> to vector<256x32xf32>
    %97 = arith.truncf %96 : vector<256x32xf32> to vector<256x32xbf16>
    %c0_112 = arith.constant 0 : index
    %c160_113 = arith.constant 160 : index
    %98 = vector.load %arg9[%c0_112, %c160_113] : memref<256x288xbf16, #tpu.memory_space<vmem>>, vector<256x32xbf16>
    tpu.vector_store %arg9[%c0_112, %c160_113], %97 {strides = array<i32>} : memref<256x288xbf16, #tpu.memory_space<vmem>>, vector<256x32xbf16>,
    %c0_114 = arith.constant 0 : index
    %c2_115 = arith.constant 2 : index
    %c0_116 = arith.constant 0 : index
    %c0_117 = arith.constant 0 : index
    %99 = vector.load %arg8[%c0_114, %c2_115, %c0_116, %c0_117] : memref<2x18x9x32xf32, #tpu.memory_space<vmem>>, vector<2x16x8x32xf32>
    %100 = vector.shape_cast %99 : vector<2x16x8x32xf32> to vector<256x32xf32>
    %101 = arith.truncf %100 : vector<256x32xf32> to vector<256x32xbf16>
    %c0_118 = arith.constant 0 : index
    %c192_119 = arith.constant 192 : index
    %102 = vector.load %arg9[%c0_118, %c192_119] : memref<256x288xbf16, #tpu.memory_space<vmem>>, vector<256x32xbf16>
    tpu.vector_store %arg9[%c0_118, %c192_119], %101 {strides = array<i32>} : memref<256x288xbf16, #tpu.memory_space<vmem>>, vector<256x32xbf16>,
    %c0_120 = arith.constant 0 : index
    %c2_121 = arith.constant 2 : index
    %c1_122 = arith.constant 1 : index
    %c0_123 = arith.constant 0 : index
    %103 = vector.load %arg7[%c0_120, %c2_121, %c1_122, %c0_123] : memref<2x18x9x32xf32, #tpu.memory_space<vmem>>, vector<2x16x8x32xf32>
    %104 = vector.shape_cast %103 : vector<2x16x8x32xf32> to vector<256x32xf32>
    %105 = arith.truncf %104 : vector<256x32xf32> to vector<256x32xbf16>
    %c0_124 = arith.constant 0 : index
    %c224_125 = arith.constant 224 : index
    %106 = vector.load %arg9[%c0_124, %c224_125] : memref<256x288xbf16, #tpu.memory_space<vmem>>, vector<256x32xbf16>
    tpu.vector_store %arg9[%c0_124, %c224_125], %105 {strides = array<i32>} : memref<256x288xbf16, #tpu.memory_space<vmem>>, vector<256x32xbf16>,
    %c0_126 = arith.constant 0 : index
    %c2_127 = arith.constant 2 : index
    %c1_128 = arith.constant 1 : index
    %c0_129 = arith.constant 0 : index
    %107 = vector.load %arg8[%c0_126, %c2_127, %c1_128, %c0_129] : memref<2x18x9x32xf32, #tpu.memory_space<vmem>>, vector<2x16x8x32xf32>
    %108 = vector.shape_cast %107 : vector<2x16x8x32xf32> to vector<256x32xf32>
    %109 = arith.truncf %108 : vector<256x32xf32> to vector<256x32xbf16>
    %c0_130 = arith.constant 0 : index
    %c256_131 = arith.constant 256 : index
    %110 = vector.load %arg9[%c0_130, %c256_131] : memref<256x288xbf16, #tpu.memory_space<vmem>>, vector<256x32xbf16>
    tpu.vector_store %arg9[%c0_130, %c256_131], %109 {strides = array<i32>} : memref<256x288xbf16, #tpu.memory_space<vmem>>, vector<256x32xbf16>,
    %c0_132 = arith.constant 0 : index
    %c0_133 = arith.constant 0 : index
    %111 = vector.load %arg9[%c0_132, %c0_133] : memref<256x288xbf16, #tpu.memory_space<vmem>>, vector<256x288xbf16>
    %c0_134 = arith.constant 0 : index
    %c0_135 = arith.constant 0 : index
    %112 = vector.load %arg4[%c0_134, %c0_135] : memref<288x64xbf16, #tpu.memory_space<vmem>>, vector<288x64xbf16>
    %cst_136 = arith.constant dense<0.000000e+00> : vector<256x64xf32>
    %113 = tpu.matmul %111, %112, %cst_136 {dimension_numbers = #tpu.dot_dimension_numbers<[1], [0], [0], [1], [0, 0, 1, 1], [], []>} : vector<256x288xbf16>, vector<288x64xbf16>, vector<256x64xf32> -> vector<256x64xf32>
    %c0_137 = arith.constant 0 : index
    %c0_138 = arith.constant 0 : index
    %114 = vector.load %arg5[%c0_137, %c0_138] : memref<1x64xf32, #tpu.memory_space<vmem>>, vector<1x64xf32>
    %115 = vector.broadcast %114 : vector<1x64xf32> to vector<256x64xf32>
    %116 = arith.addf %113, %115 : vector<256x64xf32>
    %cst_139 = arith.constant 0.000000e+00 : f32
    %117 = vector.broadcast %cst_139 : f32 to vector<256x64xf32>
    %118 = arith.maximumf %116, %117 : vector<256x64xf32>
    %119 = vector.shape_cast %118 : vector<256x64xf32> to vector<2x8x2x8x64xf32>
    %120 = vector.extract_strided_slice %119 {offsets = [0, 0, 0, 0, 0], sizes = [2, 8, 1, 8, 64], strides = [1, 1, 1, 1, 1]} : vector<2x8x2x8x64xf32> to vector<2x8x1x8x64xf32>
    %121 = vector.shape_cast %120 : vector<2x8x1x8x64xf32> to vector<2x8x8x64xf32>
    %122 = vector.extract_strided_slice %119 {offsets = [0, 0, 1, 0, 0], sizes = [2, 8, 1, 8, 64], strides = [1, 1, 1, 1, 1]} : vector<2x8x2x8x64xf32> to vector<2x8x1x8x64xf32>
    %123 = vector.shape_cast %122 : vector<2x8x1x8x64xf32> to vector<2x8x8x64xf32>
    %124 = arith.maximumf %121, %123 : vector<2x8x8x64xf32>
    %125 = arith.maximumf %74, %124 : vector<2x8x8x64xf32>
    %126 = vector.extract_strided_slice %125 {offsets = [0, 0, 0, 0], sizes = [2, 8, 1, 64], strides = [1, 1, 1, 1]} : vector<2x8x8x64xf32> to vector<2x8x1x64xf32>
    %127 = vector.shape_cast %126 : vector<2x8x1x64xf32> to vector<2x8x64xf32>
    %c0_140 = arith.constant 0 : index
    %c0_141 = arith.constant 0 : index
    %c0_142 = arith.constant 0 : index
    %128 = vector.load %arg6[%c0_140, %c0_141, %c0_142] : memref<2x8x512xf32, #tpu.memory_space<vmem>>, vector<2x8x64xf32>
    tpu.vector_store %arg6[%c0_140, %c0_141, %c0_142], %127 {strides = array<i32>} : memref<2x8x512xf32, #tpu.memory_space<vmem>>, vector<2x8x64xf32>,
    %129 = vector.extract_strided_slice %125 {offsets = [0, 0, 1, 0], sizes = [2, 8, 1, 64], strides = [1, 1, 1, 1]} : vector<2x8x8x64xf32> to vector<2x8x1x64xf32>
    %130 = vector.shape_cast %129 : vector<2x8x1x64xf32> to vector<2x8x64xf32>
    %c0_143 = arith.constant 0 : index
    %c0_144 = arith.constant 0 : index
    %c64_145 = arith.constant 64 : index
    %131 = vector.load %arg6[%c0_143, %c0_144, %c64_145] : memref<2x8x512xf32, #tpu.memory_space<vmem>>, vector<2x8x64xf32>
    tpu.vector_store %arg6[%c0_143, %c0_144, %c64_145], %130 {strides = array<i32>} : memref<2x8x512xf32, #tpu.memory_space<vmem>>, vector<2x8x64xf32>,
    %132 = vector.extract_strided_slice %125 {offsets = [0, 0, 2, 0], sizes = [2, 8, 1, 64], strides = [1, 1, 1, 1]} : vector<2x8x8x64xf32> to vector<2x8x1x64xf32>
    %133 = vector.shape_cast %132 : vector<2x8x1x64xf32> to vector<2x8x64xf32>
    %c0_146 = arith.constant 0 : index
    %c0_147 = arith.constant 0 : index
    %c128_148 = arith.constant 128 : index
    %134 = vector.load %arg6[%c0_146, %c0_147, %c128_148] : memref<2x8x512xf32, #tpu.memory_space<vmem>>, vector<2x8x64xf32>
    tpu.vector_store %arg6[%c0_146, %c0_147, %c128_148], %133 {strides = array<i32>} : memref<2x8x512xf32, #tpu.memory_space<vmem>>, vector<2x8x64xf32>,
    %135 = vector.extract_strided_slice %125 {offsets = [0, 0, 3, 0], sizes = [2, 8, 1, 64], strides = [1, 1, 1, 1]} : vector<2x8x8x64xf32> to vector<2x8x1x64xf32>
    %136 = vector.shape_cast %135 : vector<2x8x1x64xf32> to vector<2x8x64xf32>
    %c0_149 = arith.constant 0 : index
    %c0_150 = arith.constant 0 : index
    %c192_151 = arith.constant 192 : index
    %137 = vector.load %arg6[%c0_149, %c0_150, %c192_151] : memref<2x8x512xf32, #tpu.memory_space<vmem>>, vector<2x8x64xf32>
    tpu.vector_store %arg6[%c0_149, %c0_150, %c192_151], %136 {strides = array<i32>} : memref<2x8x512xf32, #tpu.memory_space<vmem>>, vector<2x8x64xf32>,
    %138 = vector.extract_strided_slice %125 {offsets = [0, 0, 4, 0], sizes = [2, 8, 1, 64], strides = [1, 1, 1, 1]} : vector<2x8x8x64xf32> to vector<2x8x1x64xf32>
    %139 = vector.shape_cast %138 : vector<2x8x1x64xf32> to vector<2x8x64xf32>
    %c0_152 = arith.constant 0 : index
    %c0_153 = arith.constant 0 : index
    %c256_154 = arith.constant 256 : index
    %140 = vector.load %arg6[%c0_152, %c0_153, %c256_154] : memref<2x8x512xf32, #tpu.memory_space<vmem>>, vector<2x8x64xf32>
    tpu.vector_store %arg6[%c0_152, %c0_153, %c256_154], %139 {strides = array<i32>} : memref<2x8x512xf32, #tpu.memory_space<vmem>>, vector<2x8x64xf32>,
    %141 = vector.extract_strided_slice %125 {offsets = [0, 0, 5, 0], sizes = [2, 8, 1, 64], strides = [1, 1, 1, 1]} : vector<2x8x8x64xf32> to vector<2x8x1x64xf32>
    %142 = vector.shape_cast %141 : vector<2x8x1x64xf32> to vector<2x8x64xf32>
    %c0_155 = arith.constant 0 : index
    %c0_156 = arith.constant 0 : index
    %c320 = arith.constant 320 : index
    %143 = vector.load %arg6[%c0_155, %c0_156, %c320] : memref<2x8x512xf32, #tpu.memory_space<vmem>>, vector<2x8x64xf32>
    tpu.vector_store %arg6[%c0_155, %c0_156, %c320], %142 {strides = array<i32>} : memref<2x8x512xf32, #tpu.memory_space<vmem>>, vector<2x8x64xf32>,
    %144 = vector.extract_strided_slice %125 {offsets = [0, 0, 6, 0], sizes = [2, 8, 1, 64], strides = [1, 1, 1, 1]} : vector<2x8x8x64xf32> to vector<2x8x1x64xf32>
    %145 = vector.shape_cast %144 : vector<2x8x1x64xf32> to vector<2x8x64xf32>
    %c0_157 = arith.constant 0 : index
    %c0_158 = arith.constant 0 : index
    %c384 = arith.constant 384 : index
    %146 = vector.load %arg6[%c0_157, %c0_158, %c384] : memref<2x8x512xf32, #tpu.memory_space<vmem>>, vector<2x8x64xf32>
    tpu.vector_store %arg6[%c0_157, %c0_158, %c384], %145 {strides = array<i32>} : memref<2x8x512xf32, #tpu.memory_space<vmem>>, vector<2x8x64xf32>,
    %147 = vector.extract_strided_slice %125 {offsets = [0, 0, 7, 0], sizes = [2, 8, 1, 64], strides = [1, 1, 1, 1]} : vector<2x8x8x64xf32> to vector<2x8x1x64xf32>
    %148 = vector.shape_cast %147 : vector<2x8x1x64xf32> to vector<2x8x64xf32>
    %c0_159 = arith.constant 0 : index
    %c0_160 = arith.constant 0 : index
    %c448 = arith.constant 448 : index
    %149 = vector.load %arg6[%c0_159, %c0_160, %c448] : memref<2x8x512xf32, #tpu.memory_space<vmem>>, vector<2x8x64xf32>
    tpu.vector_store %arg6[%c0_159, %c0_160, %c448], %148 {strides = array<i32>} : memref<2x8x512xf32, #tpu.memory_space<vmem>>, vector<2x8x64xf32>,
    return
  }
  func.func @transform_0(%arg0: i32) -> (i32, i32, i32, i32) {
    %c0_i32 = arith.constant 0 : i32
    %c0_i32_0 = arith.constant 0 : i32
    %c0_i32_1 = arith.constant 0 : i32
    %c0_i32_2 = arith.constant 0 : i32
    return %c0_i32, %arg0, %c0_i32_0, %c0_i32_1 : i32, i32, i32, i32
  }
  func.func @transform_1(%arg0: i32) -> (i32, i32) {
    %c0_i32 = arith.constant 0 : i32
    %c0_i32_0 = arith.constant 0 : i32
    %c0_i32_1 = arith.constant 0 : i32
    return %c0_i32, %c0_i32_0 : i32, i32
  }
  func.func @transform_2(%arg0: i32) -> (i32, i32) {
    %c0_i32 = arith.constant 0 : i32
    %c0_i32_0 = arith.constant 0 : i32
    %c0_i32_1 = arith.constant 0 : i32
    return %c0_i32, %c0_i32_0 : i32, i32
  }
  func.func @transform_3(%arg0: i32) -> (i32, i32) {
    %c0_i32 = arith.constant 0 : i32
    %c0_i32_0 = arith.constant 0 : i32
    %c0_i32_1 = arith.constant 0 : i32
    return %c0_i32, %c0_i32_0 : i32, i32
  }
  func.func @transform_4(%arg0: i32) -> (i32, i32) {
    %c0_i32 = arith.constant 0 : i32
    %c0_i32_0 = arith.constant 0 : i32
    %c0_i32_1 = arith.constant 0 : i32
    return %c0_i32, %c0_i32_0 : i32, i32
  }
  func.func @transform_5(%arg0: i32) -> (i32, i32, i32) {
    %c0_i32 = arith.constant 0 : i32
    %c0_i32_0 = arith.constant 0 : i32
    %c0_i32_1 = arith.constant 0 : i32
    return %arg0, %c0_i32, %c0_i32_0 : i32, i32, i32
  }
}

</mosaic_0001>

<bundles_post_ra>
// kernel: cifar_client3_forward.1
= control target key start
LH: loop header
LB: loop body
LE: loop exit
PB: predicated region body
PF: predicated region fallthrough
CT: control target
= control target key end

     0   :  { %s11829_s18 = smov 0   ;;  %s11831_s19 = smov 0   ;;  %s16319_s0 = inlined_call_operand.vmem [shape: bf16[8,4,128,32], index: 0, kind: input, shape index: {}]   ;;  %s16320_s1 = inlined_call_operand.vmem [shape: bf16[32,32], index: 1, kind: input, shape index: {}]   ;;  %s16321_s2 = inlined_call_operand.vmem [shape: f32[1,32], index: 2, kind: input, shape index: {}]   ;;  %s16322_s3 = inlined_call_operand.vmem [shape: bf16[288,64], index: 3, kind: input, shape index: {}]   ;;  %s16323_s4 = inlined_call_operand.vmem [shape: f32[1,64], index: 4, kind: input, shape index: {}]   ;;  %s16324_s5 = inlined_call_operand.vmem [shape: f32[4,8,512], index: 5, kind: output, shape index: {}]  }
   0x1   :  { %s11833_s20 = smov 0  }
   0x2 LB: > { %s10239_s21 = sadd.s32 4294967295, %s11793_s20   ;;  %s11846_s22 = sadd.s32 1, %s11793_s20   ;;  %s11793_s20 = sphi %s11833_s20, %s16659_s20   ;;  %s11789_s19 = sphi %s11831_s19, %s16658_s19   ;;  %s11785_s18 = sphi %s11829_s18, %s16657_s18  }
   0x3   : > { %s19_s23 = ssub.s32 %s11793_s20, %s11846_s22  ;;  %s22_s24 = sadd.s32 1, %s11789_s19 }
   0x4   : > { %p20_p0 = scmp.eq.s32.totalorder %s19_s23, 0  ;;  %p29_p1 = scmp.ne.s32.totalorder %s11789_s19, %s11785_s18 }
   0x5   : > { %p30_p2 = scmp.eq.s32.totalorder %s11793_s20, 0  ;;  %p10242_p4 = scmp.ge.s32.totalorder %s11793_s20, 2 }
   0x6   : > { %s11855_s25 = scalar_select %p20_p0, %s11789_s19, %s22_s24  }
   0x7   : > { %p31_p3 = por %p30_p2, %p29_p1  ;;  %177 = sbr.rel (%p10242_p4) target bundleno = 144 (0x90), region = 32 }
   0xc   : > { %180 = sbr.rel (!%p31_p3) target bundleno = 144 (0x90), region = 36  ;;  %s182_s26 = sand.u32 (%p31_p3), 1, %s11789_s19  }
   0xd   : > { %s11463_s27 = sshll.u32 (%p31_p3), %s11793_s20, 7  ;;  %s10243_s28 = sshll.u32 (%p31_p3), %s182_s26, 10 }
   0xe   : > { %s11863_s6 = scalar_lea.vmem (%p31_p3), %s16319_s0, %s11463_s27  ;;  %s11868_s7 = scalar_lea.vmem (%p31_p3), [#allocation5], %s10243_s28 }
   0xf   : > { %v205_v0 = vld [vmem:[%s11863_s6] sm:$0xff] (%p31_p3)   ;;  %v209_v1 = vld [vmem:[%s11863_s6 + $0x8] sm:$0xff] (%p31_p3)   ;;  %v213_v2 = vld [vmem:[%s11863_s6 + $0x10] sm:$0xff] (%p31_p3)  }
  0x10   : > { %206 = vst [vmem:[%s11868_s7] sm:$0xff] (%p31_p3), %v205_v0   ;;  %v217_v3 = vld [vmem:[%s11863_s6 + $0x18] sm:$0xff] (%p31_p3)   ;;  %v221_v4 = vld [vmem:[%s11863_s6 + $0x20] sm:$0xff] (%p31_p3)   ;;  %v225_v5 = vld [vmem:[%s11863_s6 + $0x28] sm:$0xff] (%p31_p3)  }
  0x11   : > { %210 = vst [vmem:[%s11868_s7 + $0x8] sm:$0xff] %v209_v1   ;;  %v229_v6 = vld [vmem:[%s11863_s6 + $0x30] sm:$0xff]   ;;  %v233_v7 = vld [vmem:[%s11863_s6 + $0x38] sm:$0xff]   ;;  %v237_v8 = vld [vmem:[%s11863_s6 + $0x40] sm:$0xff]  }
  0x12   : > { %214 = vst [vmem:[%s11868_s7 + $0x10] sm:$0xff] %v213_v2   ;;  %v241_v9 = vld [vmem:[%s11863_s6 + $0x48] sm:$0xff]   ;;  %v245_v10 = vld [vmem:[%s11863_s6 + $0x50] sm:$0xff]   ;;  %v249_v11 = vld [vmem:[%s11863_s6 + $0x58] sm:$0xff]  }
  0x13   : > { %218 = vst [vmem:[%s11868_s7 + $0x18] sm:$0xff] %v217_v3   ;;  %v253_v12 = vld [vmem:[%s11863_s6 + $0x60] sm:$0xff]   ;;  %v257_v13 = vld [vmem:[%s11863_s6 + $0x68] sm:$0xff]   ;;  %v261_v14 = vld [vmem:[%s11863_s6 + $0x70] sm:$0xff]  }
  0x14   : > { %222 = vst [vmem:[%s11868_s7 + $0x20] sm:$0xff] %v221_v4   ;;  %v265_v15 = vld [vmem:[%s11863_s6 + $0x78] sm:$0xff]   ;;  %v269_v16 = vld [vmem:[%s11863_s6 + $0x100] sm:$0xff]   ;;  %v273_v17 = vld [vmem:[%s11863_s6 + $0x108] sm:$0xff]  }
  0x15   : > { %226 = vst [vmem:[%s11868_s7 + $0x28] sm:$0xff] %v225_v5   ;;  %v277_v18 = vld [vmem:[%s11863_s6 + $0x110] sm:$0xff]   ;;  %v281_v19 = vld [vmem:[%s11863_s6 + $0x118] sm:$0xff]   ;;  %v285_v20 = vld [vmem:[%s11863_s6 + $0x120] sm:$0xff]  }
  0x16   : > { %230 = vst [vmem:[%s11868_s7 + $0x30] sm:$0xff] %v229_v6   ;;  %v289_v21 = vld [vmem:[%s11863_s6 + $0x128] sm:$0xff]   ;;  %v293_v22 = vld [vmem:[%s11863_s6 + $0x130] sm:$0xff]   ;;  %v297_v23 = vld [vmem:[%s11863_s6 + $0x138] sm:$0xff]  }
  0x17   : > { %234 = vst [vmem:[%s11868_s7 + $0x38] sm:$0xff] %v233_v7   ;;  %v301_v24 = vld [vmem:[%s11863_s6 + $0x140] sm:$0xff]   ;;  %v305_v25 = vld [vmem:[%s11863_s6 + $0x148] sm:$0xff]   ;;  %v309_v26 = vld [vmem:[%s11863_s6 + $0x150] sm:$0xff]  }
  0x18   : > { %238 = vst [vmem:[%s11868_s7 + $0x40] sm:$0xff] %v237_v8   ;;  %v313_v27 = vld [vmem:[%s11863_s6 + $0x158] sm:$0xff]   ;;  %v317_v28 = vld [vmem:[%s11863_s6 + $0x160] sm:$0xff]   ;;  %v321_v29 = vld [vmem:[%s11863_s6 + $0x168] sm:$0xff]  }
  0x19   : > { %242 = vst [vmem:[%s11868_s7 + $0x48] sm:$0xff] %v241_v9   ;;  %v325_v30 = vld [vmem:[%s11863_s6 + $0x170] sm:$0xff]   ;;  %v329_v31 = vld [vmem:[%s11863_s6 + $0x178] sm:$0xff]   ;;  %v333_v32 = vld [vmem:[%s11863_s6 + $0x200] sm:$0xff]  }
  0x1a   : > { %246 = vst [vmem:[%s11868_s7 + $0x50] sm:$0xff] %v245_v10   ;;  %v337_v33 = vld [vmem:[%s11863_s6 + $0x208] sm:$0xff]   ;;  %v341_v34 = vld [vmem:[%s11863_s6 + $0x210] sm:$0xff]   ;;  %v345_v35 = vld [vmem:[%s11863_s6 + $0x218] sm:$0xff]  }
  0x1b   : > { %250 = vst [vmem:[%s11868_s7 + $0x58] sm:$0xff] %v249_v11   ;;  %v349_v36 = vld [vmem:[%s11863_s6 + $0x220] sm:$0xff]   ;;  %v353_v37 = vld [vmem:[%s11863_s6 + $0x228] sm:$0xff]   ;;  %v357_v38 = vld [vmem:[%s11863_s6 + $0x230] sm:$0xff]  }
  0x1c   : > { %254 = vst [vmem:[%s11868_s7 + $0x60] sm:$0xff] %v253_v12   ;;  %v361_v39 = vld [vmem:[%s11863_s6 + $0x238] sm:$0xff]   ;;  %v365_v40 = vld [vmem:[%s11863_s6 + $0x240] sm:$0xff]   ;;  %v369_v41 = vld [vmem:[%s11863_s6 + $0x248] sm:$0xff]  }
  0x1d   : > { %258 = vst [vmem:[%s11868_s7 + $0x68] sm:$0xff] %v257_v13   ;;  %v373_v42 = vld [vmem:[%s11863_s6 + $0x250] sm:$0xff]   ;;  %v377_v43 = vld [vmem:[%s11863_s6 + $0x258] sm:$0xff]   ;;  %v381_v44 = vld [vmem:[%s11863_s6 + $0x260] sm:$0xff]  }
  0x1e   : > { %262 = vst [vmem:[%s11868_s7 + $0x70] sm:$0xff] %v261_v14   ;;  %v385_v45 = vld [vmem:[%s11863_s6 + $0x268] sm:$0xff]   ;;  %v389_v46 = vld [vmem:[%s11863_s6 + $0x270] sm:$0xff]   ;;  %v393_v47 = vld [vmem:[%s11863_s6 + $0x278] sm:$0xff]  }
  0x1f   : > { %266 = vst [vmem:[%s11868_s7 + $0x78] sm:$0xff] %v265_v15   ;;  %v397_v48 = vld [vmem:[%s11863_s6 + $0x300] sm:$0xff]   ;;  %v401_v49 = vld [vmem:[%s11863_s6 + $0x308] sm:$0xff]   ;;  %v405_v50 = vld [vmem:[%s11863_s6 + $0x310] sm:$0xff]  }
  0x20   : > { %270 = vst [vmem:[%s11868_s7 + $0x80] sm:$0xff] %v269_v16   ;;  %v409_v51 = vld [vmem:[%s11863_s6 + $0x318] sm:$0xff]   ;;  %v413_v52 = vld [vmem:[%s11863_s6 + $0x320] sm:$0xff]   ;;  %v417_v53 = vld [vmem:[%s11863_s6 + $0x328] sm:$0xff]  }
  0x21   : > { %274 = vst [vmem:[%s11868_s7 + $0x88] sm:$0xff] %v273_v17   ;;  %v421_v54 = vld [vmem:[%s11863_s6 + $0x330] sm:$0xff]   ;;  %v425_v55 = vld [vmem:[%s11863_s6 + $0x338] sm:$0xff]   ;;  %v429_v56 = vld [vmem:[%s11863_s6 + $0x340] sm:$0xff]  }
  0x22   : > { %278 = vst [vmem:[%s11868_s7 + $0x90] sm:$0xff] %v277_v18   ;;  %v433_v57 = vld [vmem:[%s11863_s6 + $0x348] sm:$0xff]   ;;  %v437_v58 = vld [vmem:[%s11863_s6 + $0x350] sm:$0xff]   ;;  %v441_v59 = vld [vmem:[%s11863_s6 + $0x358] sm:$0xff]  }
  0x23   : > { %282 = vst [vmem:[%s11868_s7 + $0x98] sm:$0xff] %v281_v19   ;;  %v445_v60 = vld [vmem:[%s11863_s6 + $0x360] sm:$0xff]   ;;  %v449_v61 = vld [vmem:[%s11863_s6 + $0x368] sm:$0xff]   ;;  %v453_v62 = vld [vmem:[%s11863_s6 + $0x370] sm:$0xff]  }
  0x24   : > { %286 = vst [vmem:[%s11868_s7 + $0xa0] sm:$0xff] %v285_v20   ;;  %v457_v63 = vld [vmem:[%s11863_s6 + $0x378] sm:$0xff]   ;;  %v461_v0 = vld [vmem:[%s11863_s6 + $0x400] sm:$0xff]   ;;  %v465_v1 = vld [vmem:[%s11863_s6 + $0x408] sm:$0xff]  }
  0x25   : > { %290 = vst [vmem:[%s11868_s7 + $0xa8] sm:$0xff] %v289_v21   ;;  %v469_v2 = vld [vmem:[%s11863_s6 + $0x410] sm:$0xff]   ;;  %v473_v3 = vld [vmem:[%s11863_s6 + $0x418] sm:$0xff]   ;;  %v477_v4 = vld [vmem:[%s11863_s6 + $0x420] sm:$0xff]  }
  0x26   : > { %294 = vst [vmem:[%s11868_s7 + $0xb0] sm:$0xff] %v293_v22   ;;  %v481_v5 = vld [vmem:[%s11863_s6 + $0x428] sm:$0xff]   ;;  %v485_v6 = vld [vmem:[%s11863_s6 + $0x430] sm:$0xff]   ;;  %v489_v7 = vld [vmem:[%s11863_s6 + $0x438] sm:$0xff]  }
  0x27   : > { %298 = vst [vmem:[%s11868_s7 + $0xb8] sm:$0xff] %v297_v23   ;;  %v493_v8 = vld [vmem:[%s11863_s6 + $0x440] sm:$0xff]   ;;  %v497_v9 = vld [vmem:[%s11863_s6 + $0x448] sm:$0xff]   ;;  %v501_v10 = vld [vmem:[%s11863_s6 + $0x450] sm:$0xff]  }
  0x28   : > { %302 = vst [vmem:[%s11868_s7 + $0xc0] sm:$0xff] %v301_v24   ;;  %v505_v11 = vld [vmem:[%s11863_s6 + $0x458] sm:$0xff]   ;;  %v509_v12 = vld [vmem:[%s11863_s6 + $0x460] sm:$0xff]   ;;  %v513_v13 = vld [vmem:[%s11863_s6 + $0x468] sm:$0xff]  }
  0x29   : > { %306 = vst [vmem:[%s11868_s7 + $0xc8] sm:$0xff] %v305_v25   ;;  %v517_v14 = vld [vmem:[%s11863_s6 + $0x470] sm:$0xff]   ;;  %v521_v15 = vld [vmem:[%s11863_s6 + $0x478] sm:$0xff]   ;;  %v525_v16 = vld [vmem:[%s11863_s6 + $0x500] sm:$0xff]  }
  0x2a   : > { %310 = vst [vmem:[%s11868_s7 + $0xd0] sm:$0xff] %v309_v26   ;;  %v529_v17 = vld [vmem:[%s11863_s6 + $0x508] sm:$0xff]   ;;  %v533_v18 = vld [vmem:[%s11863_s6 + $0x510] sm:$0xff]   ;;  %v537_v19 = vld [vmem:[%s11863_s6 + $0x518] sm:$0xff]  }
  0x2b   : > { %314 = vst [vmem:[%s11868_s7 + $0xd8] sm:$0xff] %v313_v27   ;;  %v541_v20 = vld [vmem:[%s11863_s6 + $0x520] sm:$0xff]   ;;  %v545_v21 = vld [vmem:[%s11863_s6 + $0x528] sm:$0xff]   ;;  %v549_v22 = vld [vmem:[%s11863_s6 + $0x530] sm:$0xff]  }
  0x2c   : > { %318 = vst [vmem:[%s11868_s7 + $0xe0] sm:$0xff] %v317_v28   ;;  %v553_v23 = vld [vmem:[%s11863_s6 + $0x538] sm:$0xff]   ;;  %v557_v24 = vld [vmem:[%s11863_s6 + $0x540] sm:$0xff]   ;;  %v561_v25 = vld [vmem:[%s11863_s6 + $0x548] sm:$0xff]  }
  0x2d   : > { %322 = vst [vmem:[%s11868_s7 + $0xe8] sm:$0xff] %v321_v29   ;;  %v565_v26 = vld [vmem:[%s11863_s6 + $0x550] sm:$0xff]   ;;  %v569_v27 = vld [vmem:[%s11863_s6 + $0x558] sm:$0xff]   ;;  %v573_v28 = vld [vmem:[%s11863_s6 + $0x560] sm:$0xff]  }
  0x2e   : > { %326 = vst [vmem:[%s11868_s7 + $0xf0] sm:$0xff] %v325_v30   ;;  %v577_v29 = vld [vmem:[%s11863_s6 + $0x568] sm:$0xff]   ;;  %v581_v30 = vld [vmem:[%s11863_s6 + $0x570] sm:$0xff]  }
  0x2f   : > { %330 = vst [vmem:[%s11868_s7 + $0xf8] sm:$0xff] %v329_v31   ;;  %v585_v31 = vld [vmem:[%s11863_s6 + $0x578] sm:$0xff]  }
  0x30   : > { %334 = vst [vmem:[%s11868_s7 + $0x100] sm:$0xff] %v333_v32   ;;  %v589_v32 = vld [vmem:[%s11863_s6 + $0x600] sm:$0xff]  }
  0x31   : > { %338 = vst [vmem:[%s11868_s7 + $0x108] sm:$0xff] %v337_v33   ;;  %v593_v33 = vld [vmem:[%s11863_s6 + $0x608] sm:$0xff]  }
  0x32   : > { %342 = vst [vmem:[%s11868_s7 + $0x110] sm:$0xff] %v341_v34   ;;  %v597_v34 = vld [vmem:[%s11863_s6 + $0x610] sm:$0xff]  }
  0x33   : > { %346 = vst [vmem:[%s11868_s7 + $0x118] sm:$0xff] %v345_v35   ;;  %v601_v35 = vld [vmem:[%s11863_s6 + $0x618] sm:$0xff]  }
  0x34   : > { %350 = vst [vmem:[%s11868_s7 + $0x120] sm:$0xff] %v349_v36   ;;  %v605_v36 = vld [vmem:[%s11863_s6 + $0x620] sm:$0xff]  }
  0x35   : > { %354 = vst [vmem:[%s11868_s7 + $0x128] sm:$0xff] %v353_v37   ;;  %v609_v37 = vld [vmem:[%s11863_s6 + $0x628] sm:$0xff]  }
  0x36   : > { %358 = vst [vmem:[%s11868_s7 + $0x130] sm:$0xff] %v357_v38   ;;  %v613_v38 = vld [vmem:[%s11863_s6 + $0x630] sm:$0xff]  }
  0x37   : > { %362 = vst [vmem:[%s11868_s7 + $0x138] sm:$0xff] %v361_v39   ;;  %v617_v39 = vld [vmem:[%s11863_s6 + $0x638] sm:$0xff]  }
  0x38   : > { %366 = vst [vmem:[%s11868_s7 + $0x140] sm:$0xff] %v365_v40   ;;  %v621_v40 = vld [vmem:[%s11863_s6 + $0x640] sm:$0xff]  }
  0x39   : > { %370 = vst [vmem:[%s11868_s7 + $0x148] sm:$0xff] %v369_v41   ;;  %v625_v41 = vld [vmem:[%s11863_s6 + $0x648] sm:$0xff]  }
  0x3a   : > { %374 = vst [vmem:[%s11868_s7 + $0x150] sm:$0xff] %v373_v42   ;;  %v629_v42 = vld [vmem:[%s11863_s6 + $0x650] sm:$0xff]  }
  0x3b   : > { %378 = vst [vmem:[%s11868_s7 + $0x158] sm:$0xff] %v377_v43   ;;  %v633_v43 = vld [vmem:[%s11863_s6 + $0x658] sm:$0xff]  }
  0x3c   : > { %382 = vst [vmem:[%s11868_s7 + $0x160] sm:$0xff] %v381_v44   ;;  %v637_v44 = vld [vmem:[%s11863_s6 + $0x660] sm:$0xff]  }
  0x3d   : > { %386 = vst [vmem:[%s11868_s7 + $0x168] sm:$0xff] %v385_v45   ;;  %v641_v45 = vld [vmem:[%s11863_s6 + $0x668] sm:$0xff]  }
  0x3e   : > { %390 = vst [vmem:[%s11868_s7 + $0x170] sm:$0xff] %v389_v46   ;;  %v645_v46 = vld [vmem:[%s11863_s6 + $0x670] sm:$0xff]  }
  0x3f   : > { %394 = vst [vmem:[%s11868_s7 + $0x178] sm:$0xff] %v393_v47   ;;  %v649_v47 = vld [vmem:[%s11863_s6 + $0x678] sm:$0xff]  }
  0x40   : > { %398 = vst [vmem:[%s11868_s7 + $0x180] sm:$0xff] %v397_v48   ;;  %v653_v48 = vld [vmem:[%s11863_s6 + $0x700] sm:$0xff]  }
  0x41   : > { %402 = vst [vmem:[%s11868_s7 + $0x188] sm:$0xff] %v401_v49   ;;  %v657_v49 = vld [vmem:[%s11863_s6 + $0x708] sm:$0xff]  }
  0x42   : > { %406 = vst [vmem:[%s11868_s7 + $0x190] sm:$0xff] %v405_v50   ;;  %v661_v50 = vld [vmem:[%s11863_s6 + $0x710] sm:$0xff]  }
  0x43   : > { %410 = vst [vmem:[%s11868_s7 + $0x198] sm:$0xff] %v409_v51   ;;  %v665_v51 = vld [vmem:[%s11863_s6 + $0x718] sm:$0xff]  }
  0x44   : > { %414 = vst [vmem:[%s11868_s7 + $0x1a0] sm:$0xff] %v413_v52   ;;  %v669_v52 = vld [vmem:[%s11863_s6 + $0x720] sm:$0xff]  }
  0x45   : > { %418 = vst [vmem:[%s11868_s7 + $0x1a8] sm:$0xff] %v417_v53   ;;  %v673_v53 = vld [vmem:[%s11863_s6 + $0x728] sm:$0xff]  }
  0x46   : > { %422 = vst [vmem:[%s11868_s7 + $0x1b0] sm:$0xff] %v421_v54   ;;  %v677_v54 = vld [vmem:[%s11863_s6 + $0x730] sm:$0xff]  }
  0x47   : > { %426 = vst [vmem:[%s11868_s7 + $0x1b8] sm:$0xff] %v425_v55   ;;  %v681_v55 = vld [vmem:[%s11863_s6 + $0x738] sm:$0xff]  }
  0x48   : > { %430 = vst [vmem:[%s11868_s7 + $0x1c0] sm:$0xff] %v429_v56   ;;  %v685_v56 = vld [vmem:[%s11863_s6 + $0x740] sm:$0xff]  }
  0x49   : > { %434 = vst [vmem:[%s11868_s7 + $0x1c8] sm:$0xff] %v433_v57   ;;  %v689_v57 = vld [vmem:[%s11863_s6 + $0x748] sm:$0xff]  }
  0x4a   : > { %438 = vst [vmem:[%s11868_s7 + $0x1d0] sm:$0xff] %v437_v58   ;;  %v693_v58 = vld [vmem:[%s11863_s6 + $0x750] sm:$0xff]  }
  0x4b   : > { %442 = vst [vmem:[%s11868_s7 + $0x1d8] sm:$0xff] %v441_v59   ;;  %v697_v59 = vld [vmem:[%s11863_s6 + $0x758] sm:$0xff]  }
  0x4c   : > { %446 = vst [vmem:[%s11868_s7 + $0x1e0] sm:$0xff] %v445_v60   ;;  %v701_v60 = vld [vmem:[%s11863_s6 + $0x760] sm:$0xff]  }
  0x4d   : > { %450 = vst [vmem:[%s11868_s7 + $0x1e8] sm:$0xff] %v449_v61   ;;  %v705_v61 = vld [vmem:[%s11863_s6 + $0x768] sm:$0xff]  }
  0x4e   : > { %454 = vst [vmem:[%s11868_s7 + $0x1f0] sm:$0xff] %v453_v62   ;;  %v709_v62 = vld [vmem:[%s11863_s6 + $0x770] sm:$0xff]  }
  0x4f   : > { %458 = vst [vmem:[%s11868_s7 + $0x1f8] sm:$0xff] %v457_v63   ;;  %v713_v63 = vld [vmem:[%s11863_s6 + $0x778] sm:$0xff]  }
  0x50   : > { %462 = vst [vmem:[%s11868_s7 + $0x200] sm:$0xff] %v461_v0  }
  0x51   : > { %466 = vst [vmem:[%s11868_s7 + $0x208] sm:$0xff] %v465_v1  }
  0x52   : > { %470 = vst [vmem:[%s11868_s7 + $0x210] sm:$0xff] %v469_v2  }
  0x53   : > { %474 = vst [vmem:[%s11868_s7 + $0x218] sm:$0xff] %v473_v3  }
  0x54   : > { %478 = vst [vmem:[%s11868_s7 + $0x220] sm:$0xff] %v477_v4  }
  0x55   : > { %482 = vst [vmem:[%s11868_s7 + $0x228] sm:$0xff] %v481_v5  }
  0x56   : > { %486 = vst [vmem:[%s11868_s7 + $0x230] sm:$0xff] %v485_v6  }
  0x57   : > { %490 = vst [vmem:[%s11868_s7 + $0x238] sm:$0xff] %v489_v7  }
  0x58   : > { %494 = vst [vmem:[%s11868_s7 + $0x240] sm:$0xff] %v493_v8  }
  0x59   : > { %498 = vst [vmem:[%s11868_s7 + $0x248] sm:$0xff] %v497_v9  }
  0x5a   : > { %502 = vst [vmem:[%s11868_s7 + $0x250] sm:$0xff] %v501_v10  }
  0x5b   : > { %506 = vst [vmem:[%s11868_s7 + $0x258] sm:$0xff] %v505_v11  }
  0x5c   : > { %510 = vst [vmem:[%s11868_s7 + $0x260] sm:$0xff] %v509_v12  }
  0x5d   : > { %514 = vst [vmem:[%s11868_s7 + $0x268] sm:$0xff] %v513_v13  }
  0x5e   : > { %518 = vst [vmem:[%s11868_s7 + $0x270] sm:$0xff] %v517_v14  }
  0x5f   : > { %522 = vst [vmem:[%s11868_s7 + $0x278] sm:$0xff] %v521_v15  }
  0x60   : > { %526 = vst [vmem:[%s11868_s7 + $0x280] sm:$0xff] %v525_v16  }
  0x61   : > { %530 = vst [vmem:[%s11868_s7 + $0x288] sm:$0xff] %v529_v17  }
  0x62   : > { %534 = vst [vmem:[%s11868_s7 + $0x290] sm:$0xff] %v533_v18  }
  0x63   : > { %538 = vst [vmem:[%s11868_s7 + $0x298] sm:$0xff] %v537_v19  }
  0x64   : > { %542 = vst [vmem:[%s11868_s7 + $0x2a0] sm:$0xff] %v541_v20  }
  0x65   : > { %546 = vst [vmem:[%s11868_s7 + $0x2a8] sm:$0xff] %v545_v21  }
  0x66   : > { %550 = vst [vmem:[%s11868_s7 + $0x2b0] sm:$0xff] %v549_v22  }
  0x67   : > { %554 = vst [vmem:[%s11868_s7 + $0x2b8] sm:$0xff] %v553_v23  }
  0x68   : > { %558 = vst [vmem:[%s11868_s7 + $0x2c0] sm:$0xff] %v557_v24  }
  0x69   : > { %562 = vst [vmem:[%s11868_s7 + $0x2c8] sm:$0xff] %v561_v25  }
  0x6a   : > { %566 = vst [vmem:[%s11868_s7 + $0x2d0] sm:$0xff] %v565_v26  }
  0x6b   : > { %570 = vst [vmem:[%s11868_s7 + $0x2d8] sm:$0xff] %v569_v27  }
  0x6c   : > { %574 = vst [vmem:[%s11868_s7 + $0x2e0] sm:$0xff] %v573_v28  }
  0x6d   : > { %578 = vst [vmem:[%s11868_s7 + $0x2e8] sm:$0xff] %v577_v29  }
  0x6e   : > { %582 = vst [vmem:[%s11868_s7 + $0x2f0] sm:$0xff] %v581_v30  }
  0x6f   : > { %586 = vst [vmem:[%s11868_s7 + $0x2f8] sm:$0xff] %v585_v31  }
  0x70   : > { %590 = vst [vmem:[%s11868_s7 + $0x300] sm:$0xff] %v589_v32  }
  0x71   : > { %594 = vst [vmem:[%s11868_s7 + $0x308] sm:$0xff] %v593_v33  }
  0x72   : > { %598 = vst [vmem:[%s11868_s7 + $0x310] sm:$0xff] %v597_v34  }
  0x73   : > { %602 = vst [vmem:[%s11868_s7 + $0x318] sm:$0xff] %v601_v35  }
  0x74   : > { %606 = vst [vmem:[%s11868_s7 + $0x320] sm:$0xff] %v605_v36  }
  0x75   : > { %610 = vst [vmem:[%s11868_s7 + $0x328] sm:$0xff] %v609_v37  }
  0x76   : > { %614 = vst [vmem:[%s11868_s7 + $0x330] sm:$0xff] %v613_v38  }
  0x77   : > { %618 = vst [vmem:[%s11868_s7 + $0x338] sm:$0xff] %v617_v39  }
  0x78   : > { %622 = vst [vmem:[%s11868_s7 + $0x340] sm:$0xff] %v621_v40  }
  0x79   : > { %626 = vst [vmem:[%s11868_s7 + $0x348] sm:$0xff] %v625_v41  }
  0x7a   : > { %630 = vst [vmem:[%s11868_s7 + $0x350] sm:$0xff] %v629_v42  }
  0x7b   : > { %634 = vst [vmem:[%s11868_s7 + $0x358] sm:$0xff] %v633_v43  }
  0x7c   : > { %638 = vst [vmem:[%s11868_s7 + $0x360] sm:$0xff] %v637_v44  }
  0x7d   : > { %642 = vst [vmem:[%s11868_s7 + $0x368] sm:$0xff] %v641_v45  }
  0x7e   : > { %646 = vst [vmem:[%s11868_s7 + $0x370] sm:$0xff] %v645_v46  }
  0x7f   : > { %650 = vst [vmem:[%s11868_s7 + $0x378] sm:$0xff] %v649_v47  }
  0x80   : > { %654 = vst [vmem:[%s11868_s7 + $0x380] sm:$0xff] %v653_v48  }
  0x81   : > { %658 = vst [vmem:[%s11868_s7 + $0x388] sm:$0xff] %v657_v49  }
  0x82   : > { %662 = vst [vmem:[%s11868_s7 + $0x390] sm:$0xff] %v661_v50  }
  0x83   : > { %666 = vst [vmem:[%s11868_s7 + $0x398] sm:$0xff] %v665_v51  }
  0x84   : > { %670 = vst [vmem:[%s11868_s7 + $0x3a0] sm:$0xff] %v669_v52  }
  0x85   : > { %674 = vst [vmem:[%s11868_s7 + $0x3a8] sm:$0xff] %v673_v53  }
  0x86   : > { %678 = vst [vmem:[%s11868_s7 + $0x3b0] sm:$0xff] %v677_v54  }
  0x87   : > { %682 = vst [vmem:[%s11868_s7 + $0x3b8] sm:$0xff] %v681_v55  }
  0x88   : > { %686 = vst [vmem:[%s11868_s7 + $0x3c0] sm:$0xff] %v685_v56  }
  0x89   : > { %690 = vst [vmem:[%s11868_s7 + $0x3c8] sm:$0xff] %v689_v57  }
  0x8a   : > { %694 = vst [vmem:[%s11868_s7 + $0x3d0] sm:$0xff] %v693_v58  }
  0x8b   : > { %698 = vst [vmem:[%s11868_s7 + $0x3d8] sm:$0xff] %v697_v59  }
  0x8c   : > { %702 = vst [vmem:[%s11868_s7 + $0x3e0] sm:$0xff] %v701_v60  }
  0x8d   : > { %706 = vst [vmem:[%s11868_s7 + $0x3e8] sm:$0xff] %v705_v61  }
  0x8e   : > { %710 = vst [vmem:[%s11868_s7 + $0x3f0] sm:$0xff] %v709_v62  }
  0x8f   : > { %714 = vst [vmem:[%s11868_s7 + $0x3f8] sm:$0xff] %v713_v63  }
  0x90 PF: > { %p10247_p5 = scmp.ge.s32.totalorder %s11793_s20, 1  ;;  %p2301_p6 = scmp.lt.s32.totalorder %s11793_s20, 3 }
  0x92   : > { %p2302_p7 = pnand %p10247_p5, %p2301_p6 }
  0x94   : > { %2305 = sbr.rel (%p2302_p7) target bundleno = 2199 (0x897), region = 88 }
  0x99   : > { %v11594_v0 = vld [vmem:[%s16320_s1 + $0x8] sm:$0xff]  ;;  %s2308_s10 = sand.u32 1, %s11785_s18   ;;  %v11593_v1 = vld [vmem:[%s16320_s1] sm:$0xff]  ;;  %vm3261_vm0 = vcmask 261120   ;;  %vm4744_vm1 = vcmask 253952   ;;  %s11796_s17 = smov 64  }
  0x9a   : > { %s10248_s11 = sshll.u32 %s2308_s10, 10  ;;  %3652 = vmatpush.bf16.msra.mxu0 %v11594_v0  ;;  %11727 = vmatpush.bf16.msra.mxu1 %v11594_v0  ;;  %s11797_s18 = smov 32   ;;  %vm5018_vm2 = vcmask 257024   ;;  %vm5243_vm3 = vcmask 519424   ;;  %vm5468_vm4 = vcmask 781824   ;;  %vm5693_vm5 = vcmask 1044224  }
  0x9b   : > { %11729 = vmatpush.bf16.msra.mxu3 %v11594_v0  ;;  %11728 = vmatpush.bf16.msra.mxu2 %v11594_v0  ;;  %s12132_s14 = scalar_lea.vmem [#allocation5], %s10248_s11  ;;  %s11798_s23 = smov 96   ;;  %vm9887_vm6 = vcmask 1041409   ;;  %vm9890_vm7 = vcmask 1042434   ;;  %vm9893_vm8 = vcmask 1043459   ;;  %vm9896_vm9 = vcmask 1044484  }
  0x9c   : > { %v11465_v2 = vld [vmem:[%s12132_s14] sm:$0xff]  ;;  %v11522_v3 = vld [vmem:[%s12132_s14 + $0x1c8] sm:$0xff]  ;;  %v11523_v5 = vld [vmem:[%s12132_s14 + $0x1d0] sm:$0xff]  ;;  %vm9899_vm10 = vcmask 1045509   ;;  %vm9905_vm11 = vcmask 1047559   ;;  %vm9902_vm12 = vcmask 1046534  }
  0x9d   : > { %v11466_v4 = vld [vmem:[%s12132_s14 + $0x8] sm:$0xff]  ;;  %v11467_v6 = vld [vmem:[%s12132_s14 + $0x10] sm:$0xff]  ;;  %v11524_v7 = vld [vmem:[%s12132_s14 + $0x1d8] sm:$0xff]  ;;  %s10249_s28 = sshll.u32 %s10239_s21, 1  ;;  %vm9923_vm13 = vcmask 523264   ;;  %vm9960_vm14 = vcmask 1048064  }
  0x9e   : > { %3653 = vmatpush.bf16.msra.mxu0 %v11593_v1  ;;  %11730 = vmatpush.bf16.msra.mxu1 %v11593_v1  ;;  %v11468_v8 = vld [vmem:[%s12132_s14 + $0x18] sm:$0xff]  ;;  %v11525_v9 = vld [vmem:[%s12132_s14 + $0x1e0] sm:$0xff]  ;;  %v11526_v11 = vld [vmem:[%s12132_s14 + $0x1e8] sm:$0xff]  ;;  %p2338_p8 = scmp.lt.s32.totalorder %s10249_s28, 3 }
  0x9f   : > { %11732 = vmatpush.bf16.msra.mxu3 %v11593_v1  ;;  %11731 = vmatpush.bf16.msra.mxu2 %v11593_v1  ;;  %v11469_v10 = vld [vmem:[%s12132_s14 + $0x20] sm:$0xff]  ;;  %v11568_v12 = vld [vmem:[%s12132_s14 + $0x338] sm:$0xff]  ;;  %v11470_v13 = vld [vmem:[%s12132_s14 + $0x28] sm:$0xff] }
  0xa0   : > { %v11527_v14 = vld [vmem:[%s12132_s14 + $0x1f0] sm:$0xff]  ;;  %v11569_v15 = vld [vmem:[%s12132_s14 + $0x340] sm:$0xff]  ;;  %v11528_v17 = vld [vmem:[%s12132_s14 + $0x1f8] sm:$0xff]  ;;  %s16661_s28 = smov (!%p2338_p8, %s10249_s28), 3 }
  0xa1   : > { %10772 = vmatmul.msk.bf16.vlgmr.msra.gmra.mxu0 %vm3261_vm0, %v11465_v2  ;;  %10829 = vmatmul.msk.bf16.vlgmr.msra.gmra.mxu1 %vm3261_vm0, %v11522_v3  ;;  %v11471_v16 = vld [vmem:[%s12132_s14 + $0x30] sm:$0xff]  ;;  %v11570_v18 = vld [vmem:[%s12132_s14 + $0x348] sm:$0xff]  ;;  %v11472_v19 = vld [vmem:[%s12132_s14 + $0x38] sm:$0xff]  ;;  %s11464_s20 = sshll.u32 %s16661_s28, 5 }
  0xa2   : > { %10875 = vmatmul.msk.bf16.vlgmr.msra.gmra.mxu3 %vm3261_vm0, %v11568_v12  ;;  %v11529_v20 = vld [vmem:[%s12132_s14 + $0x200] sm:$0xff]  ;;  %v11571_v21 = vld [vmem:[%s12132_s14 + $0x350] sm:$0xff]  ;;  %v11530_v23 = vld [vmem:[%s12132_s14 + $0x208] sm:$0xff]  ;;  %s16081_s30 = scalar_lea.vmem %s16324_s5, %s11464_s20 }
  0xa3   : > { %v11473_v22 = vld [vmem:[%s12132_s14 + $0x40] sm:$0xff]  ;;  %v11572_v26 = vld [vmem:[%s12132_s14 + $0x358] sm:$0xff]  ;;  %v11474_v29 = vld [vmem:[%s12132_s14 + $0x48] sm:$0xff] }
  0xa4   : > { %v11531_v30 = vld [vmem:[%s12132_s14 + $0x210] sm:$0xff]  ;;  %v11573_v33 = vld [vmem:[%s12132_s14 + $0x360] sm:$0xff]  ;;  %v11532_v37 = vld [vmem:[%s12132_s14 + $0x218] sm:$0xff] }
  0xa5   : > { %v11475_v36 = vld [vmem:[%s12132_s14 + $0x50] sm:$0xff]  ;;  %v11574_v40 = vld [vmem:[%s12132_s14 + $0x368] sm:$0xff]  ;;  %v11476_v43 = vld [vmem:[%s12132_s14 + $0x58] sm:$0xff] }
  0xa6   : > { %v11533_v44 = vld [vmem:[%s12132_s14 + $0x220] sm:$0xff]  ;;  %v11575_v47 = vld [vmem:[%s12132_s14 + $0x370] sm:$0xff]  ;;  %v11534_v51 = vld [vmem:[%s12132_s14 + $0x228] sm:$0xff] }
  0xa7   : > { %v11477_v50 = vld [vmem:[%s12132_s14 + $0x60] sm:$0xff]  ;;  %v11576_v54 = vld [vmem:[%s12132_s14 + $0x378] sm:$0xff]  ;;  %v11478_v57 = vld [vmem:[%s12132_s14 + $0x68] sm:$0xff] }
  0xa8   : > { %v11535_v58 = vld [vmem:[%s12132_s14 + $0x230] sm:$0xff]  ;;  %v11577_v61 = vld [vmem:[%s12132_s14 + $0x380] sm:$0xff]  ;;  %v11536_v2 = vld [vmem:[%s12132_s14 + $0x238] sm:$0xff] }
  0xa9   : > { %v11479_v1 = vld [vmem:[%s12132_s14 + $0x70] sm:$0xff] }
  0xb1   : > { %10773 = vmatmul.msk.bf16.gmra.mxu0 %vm3261_vm0, %v11466_v4  ;;  %10830 = vmatmul.msk.bf16.gmra.mxu1 %vm3261_vm0, %v11523_v5 }
  0xb2   : > { %10876 = vmatmul.msk.bf16.gmra.mxu3 %vm3261_vm0, %v11569_v15 }
  0xc1   : > { %10774 = vmatmul.msk.bf16.gmra.mxu0 %vm3261_vm0, %v11467_v6  ;;  %10831 = vmatmul.msk.bf16.gmra.mxu1 %vm3261_vm0, %v11524_v7  ;;  %v11546_v6 = vld [vmem:[%s12132_s14 + $0x288] sm:$0xff] }
  0xc2   : > { %10877 = vmatmul.msk.bf16.gmra.mxu3 %vm3261_vm0, %v11570_v18  ;;  %v11578_v7 = vld [vmem:[%s12132_s14 + $0x388] sm:$0xff]  ;;  %10853 = vmatmul.msk.bf16.vlgmr.msra.gmra.mxu2 %vm3261_vm0, %v11546_v6 }
  0xd1   : > { %10775 = vmatmul.msk.bf16.gmra.mxu0 %vm3261_vm0, %v11468_v8  ;;  %10832 = vmatmul.msk.bf16.gmra.mxu1 %vm3261_vm0, %v11525_v9 }
  0xd2   : > { %10878 = vmatmul.msk.bf16.gmra.mxu3 %vm3261_vm0, %v11571_v21  ;;  %v11579_v21 = vld [vmem:[%s12132_s14 + $0x390] sm:$0xff] }
  0xe1   : > { %10776 = vmatmul.msk.bf16.gmra.mxu0 %vm3261_vm0, %v11469_v10  ;;  %10833 = vmatmul.msk.bf16.gmra.mxu1 %vm3261_vm0, %v11526_v11  ;;  %v12281_v10 = vld [vmem:[%s16321_s2] ss:$0 sm:$0xff] }
  0xe2   : > { %10879 = vmatmul.msk.bf16.gmra.mxu3 %vm3261_vm0, %v11572_v26 }
  0xf1   : > { %10777 = vmatmul.msk.bf16.gmra.mxu0 %vm3261_vm0, %v11470_v13  ;;  %10834 = vmatmul.msk.bf16.gmra.mxu1 %vm3261_vm0, %v11527_v14  ;;  %v11480_v13 = vld [vmem:[%s12132_s14 + $0x78] sm:$0xff]  ;;  %v11537_v14 = vld [vmem:[%s12132_s14 + $0x240] sm:$0xff] }
  0xf2   : > { %10880 = vmatmul.msk.bf16.gmra.mxu3 %vm3261_vm0, %v11573_v33 }
 0x101   : > { %10778 = vmatmul.msk.bf16.gmra.mxu0 %vm3261_vm0, %v11471_v16  ;;  %10835 = vmatmul.msk.bf16.gmra.mxu1 %vm3261_vm0, %v11528_v17 }
 0x102   : > { %10881 = vmatmul.msk.bf16.gmra.mxu3 %vm3261_vm0, %v11574_v40 }
 0x111   : > { %10779 = vmatmul.msk.bf16.gmra.mxu0 %vm3261_vm0, %v11472_v19  ;;  %10836 = vmatmul.msk.bf16.gmra.mxu1 %vm3261_vm0, %v11529_v20  ;;  %v11547_v20 = vld [vmem:[%s12132_s14 + $0x290] sm:$0xff] }
 0x112   : > { %10882 = vmatmul.msk.bf16.gmra.mxu3 %vm3261_vm0, %v11575_v47  ;;  %10854 = vmatmul.msk.bf16.gmra.mxu2 %vm3261_vm0, %v11547_v20 }
 0x11e   : > { %v12176_v24 = vpop.f32.mrf.mxu0  ;;  %v12178_v25 = vpop.f32.mrf.mxu1 }
 0x11f   : > { %v3656_v12 = vadd.f32 %v12281_v10, %v12176_v24 }
 0x121   : > { %10780 = vmatmul.msk.bf16.gmra.mxu0 %vm3261_vm0, %v11473_v22  ;;  %10837 = vmatmul.msk.bf16.gmra.mxu1 %vm3261_vm0, %v11530_v23  ;;  %v4295_v18 = vmax.f32 %v3656_v12, 0.0 }
 0x122   : > { %10883 = vmatmul.msk.bf16.gmra.mxu3 %vm3261_vm0, %v11576_v54 }
 0x125   : > { %v12254_v62 = vpop.f32.mrf.mxu3 }
 0x126   : > { %v12184_v27 = vpop.f32.mrf.mxu0  ;;  %v12186_v28 = vpop.f32.mrf.mxu1 }
 0x127   : > { %v3658_v24 = vadd.f32 %v12281_v10, %v12184_v27 }
 0x129   : > { %v4296_v33 = vmax.f32 %v3658_v24, 0.0 }
 0x12d   : > { %v12266_v5 = vpop.f32.mrf.mxu3 }
 0x12e   : > { %v12190_v31 = vpop.f32.mrf.mxu0  ;;  %v12192_v32 = vpop.f32.mrf.mxu1 }
 0x12f   : > { %v3661_v40 = vadd.f32 %v12281_v10, %v12190_v31 }
 0x131   : > { %10781 = vmatmul.msk.bf16.gmra.mxu0 %vm3261_vm0, %v11474_v29  ;;  %10838 = vmatmul.msk.bf16.gmra.mxu1 %vm3261_vm0, %v11531_v30  ;;  %v4297_v54 = vmax.f32 %v3661_v40, 0.0 }
 0x132   : > { %10884 = vmatmul.msk.bf16.gmra.mxu3 %vm3261_vm0, %v11577_v61  ;;  %v11580_v61 = vld [vmem:[%s12132_s14 + $0x398] sm:$0xff] }
 0x135   : > { %v12283_v11 = vpop.f32.mrf.mxu3 }
 0x136   : > { %v12198_v34 = vpop.f32.mrf.mxu0  ;;  %v12200_v35 = vpop.f32.mrf.mxu1 }
 0x13d   : > { %v12298_v23 = vpop.f32.mrf.mxu3 }
 0x13e   : > { %v12204_v38 = vpop.f32.mrf.mxu0  ;;  %v12206_v39 = vpop.f32.mrf.mxu1 }
 0x141   : > { %10782 = vmatmul.msk.bf16.gmra.mxu0 %vm3261_vm0, %v11475_v36  ;;  %10839 = vmatmul.msk.bf16.gmra.mxu1 %vm3261_vm0, %v11532_v37 }
 0x142   : > { %10885 = vmatmul.msk.bf16.gmra.mxu3 %vm3261_vm0, %v11578_v7 }
 0x145   : > { %v12313_v47 = vpop.f32.mrf.mxu3 }
 0x146   : > { %v12212_v41 = vpop.f32.mrf.mxu0  ;;  %v12214_v42 = vpop.f32.mrf.mxu1 }
 0x147   : > { %v3668_v40 = vadd.f32 %v12281_v10, %v12212_v41 }
 0x14d   : > { %v12331_v12 = vpop.f32.mrf.mxu3 }
 0x14e   : > { %v12218_v45 = vpop.f32.mrf.mxu0  ;;  %v12220_v46 = vpop.f32.mrf.mxu1  ;;  %16337 = vst [vmem:[#allocation6_spill] sm:$0xff] %v12331_v12 }
 0x151   : > { %10783 = vmatmul.msk.bf16.gmra.mxu0 %vm3261_vm0, %v11476_v43  ;;  %10840 = vmatmul.msk.bf16.gmra.mxu1 %vm3261_vm0, %v11533_v44  ;;  %v11481_v43 = vld [vmem:[%s12132_s14 + $0x80] sm:$0xff]  ;;  %v11538_v44 = vld [vmem:[%s12132_s14 + $0x248] sm:$0xff] }
 0x152   : > { %10886 = vmatmul.msk.bf16.gmra.mxu3 %vm3261_vm0, %v11579_v21 }
 0x156   : > { %v12226_v48 = vpop.f32.mrf.mxu0  ;;  %v12228_v49 = vpop.f32.mrf.mxu1 }
 0x15e   : > { %v12232_v52 = vpop.f32.mrf.mxu0  ;;  %v12234_v53 = vpop.f32.mrf.mxu1 }
 0x161   : > { %10784 = vmatmul.msk.bf16.gmra.mxu0 %vm3261_vm0, %v11477_v50  ;;  %10841 = vmatmul.msk.bf16.gmra.mxu1 %vm3261_vm0, %v11534_v51 }
 0x162   : > { %10887 = vmatmul.msk.bf16.gmra.mxu3 %vm3261_vm0, %v11580_v61  ;;  %v3671_v61 = vadd.f32 %v12281_v10, %v12218_v45  ;;  %v3673_v45 = vadd.f32 %v12281_v10, %v12226_v48 }
 0x166   : > { %v12240_v55 = vpop.f32.mrf.mxu0  ;;  %v12242_v56 = vpop.f32.mrf.mxu1 }
 0x16e   : > { %v12246_v59 = vpop.f32.mrf.mxu0  ;;  %v12248_v60 = vpop.f32.mrf.mxu1 }
 0x171   : > { %10785 = vmatmul.msk.bf16.gmra.mxu0 %vm3261_vm0, %v11478_v57  ;;  %10842 = vmatmul.msk.bf16.gmra.mxu1 %vm3261_vm0, %v11535_v58  ;;  %v11548_v58 = vld [vmem:[%s12132_s14 + $0x298] sm:$0xff] }
 0x172   : > { %10855 = vmatmul.msk.bf16.gmra.mxu2 %vm3261_vm0, %v11548_v58 }
 0x176   : > { %v12256_v63 = vpop.f32.mrf.mxu0  ;;  %v12258_v0 = vpop.f32.mrf.mxu1 }
 0x17e   : > { %v12262_v3 = vpop.f32.mrf.mxu0  ;;  %v12264_v4 = vpop.f32.mrf.mxu1 }
 0x181   : > { %10786 = vmatmul.msk.bf16.gmra.mxu0 %vm3261_vm0, %v11479_v1  ;;  %10843 = vmatmul.msk.bf16.gmra.mxu1 %vm3261_vm0, %v11536_v2  ;;  %v3663_v1 = vadd.f32 %v12281_v10, %v12198_v34 }
 0x186   : > { %v12274_v8 = vpop.f32.mrf.mxu0  ;;  %v12276_v9 = vpop.f32.mrf.mxu1 }
 0x18e   : > { %v12289_v15 = vpop.f32.mrf.mxu0  ;;  %v3975_v16 = vpop.f32.mrf.mxu1 }
 0x18f   : > { %v3976_v17 = vadd.f32 %v12281_v10, %v3975_v16 }
 0x191   : > { %v4423_v19 = vmax.f32 %v3976_v17, 0.0  ;;  %10787 = vmatmul.msk.bf16.gmra.mxu0 %vm3261_vm0, %v11480_v13  ;;  %10844 = vmatmul.msk.bf16.gmra.mxu1 %vm3261_vm0, %v11537_v14  ;;  %v4298_v13 = vmax.f32 %v3663_v1, 0.0  ;;  %v3666_v17 = vadd.f32 %v12281_v10, %v12204_v38  ;;  %v11483_v1 = vld [vmem:[%s12132_s14 + $0x90] sm:$0xff] }
 0x193   : > { %v12296_v22 = vmax.f32 %v4295_v18, %v4423_v19  ;;  %v11482_v18 = vld [vmem:[%s12132_s14 + $0x88] sm:$0xff]  ;;  %v11539_v19 = vld [vmem:[%s12132_s14 + $0x250] sm:$0xff]  ;;  %v4299_v24 = vmax.f32 %v3666_v17, 0.0 }
 0x196   : > { %v12304_v26 = vpop.f32.mrf.mxu0  ;;  %v3977_v29 = vpop.f32.mrf.mxu1 }
 0x197   : > { %v3978_v30 = vadd.f32 %v12281_v10, %v3977_v29 }
 0x199   : > { %v4424_v36 = vmax.f32 %v3978_v30, 0.0  ;;  %v12344_v30 = vpop.f32.mrf.mxu3 }
 0x19a   : > { %16338 = vst [vmem:[#allocation7_spill] sm:$0xff] %v12344_v30 }
 0x19b   : > { %v12307_v37 = vmax.f32 %v4296_v33, %v4424_v36  ;;  %v11549_v33 = vld [vmem:[%s12132_s14 + $0x2a0] sm:$0xff] }
 0x19c   : > { %v11581_v36 = vld [vmem:[%s12132_s14 + $0x3a0] sm:$0xff]  ;;  %10856 = vmatmul.msk.bf16.gmra.mxu2 %vm3261_vm0, %v11549_v33 }
 0x19d   : > { %10888 = vmatmul.msk.bf16.gmra.mxu3 %vm3261_vm0, %v11581_v36  ;;  %v4302_v36 = vmax.f32 %v3673_v45, 0.0 }
 0x19e   : > { %v12315_v50 = vpop.f32.mrf.mxu0  ;;  %v3980_v27 = vpop.f32.mrf.mxu1 }
 0x19f   : > { %v3981_v51 = vadd.f32 %v12281_v10, %v3980_v27 }
 0x1a1   : > { %v4425_v57 = vmax.f32 %v3981_v51, 0.0  ;;  %10788 = vmatmul.msk.bf16.gmra.mxu0 %vm3261_vm0, %v11481_v43  ;;  %10845 = vmatmul.msk.bf16.gmra.mxu1 %vm3261_vm0, %v11538_v44  ;;  %v4300_v51 = vmax.f32 %v3668_v40, 0.0  ;;  %v12359_v58 = vpop.f32.mrf.mxu3 }
 0x1a2   : > { %16340 = vst [vmem:[#allocation9_spill] sm:$0xff] %v12359_v58 }
 0x1a3   : > { %v12322_v31 = vmax.f32 %v4297_v54, %v4425_v57 }
 0x1a6   : > { %v12328_v2 = vpop.f32.mrf.mxu0  ;;  %v3982_v6 = vpop.f32.mrf.mxu1 }
 0x1a7   : > { %v3983_v7 = vadd.f32 %v12281_v10, %v3982_v6  ;;  %v11540_v6 = vld [vmem:[%s12132_s14 + $0x258] sm:$0xff] }
 0x1a9   : > { %v4426_v14 = vmax.f32 %v3983_v7, 0.0 }
 0x1ab   : > { %v12333_v16 = vmax.f32 %v4298_v13, %v4426_v14  ;;  %v4301_v14 = vmax.f32 %v3671_v61, 0.0 }
 0x1ae   : > { %v12339_v20 = vpop.f32.mrf.mxu0  ;;  %v3985_v34 = vpop.f32.mrf.mxu1 }
 0x1af   : > { %v3986_v21 = vadd.f32 %v12281_v10, %v3985_v34 }
 0x1b1   : > { %v4427_v29 = vmax.f32 %v3986_v21, 0.0  ;;  %10789 = vmatmul.msk.bf16.gmra.mxu0 %vm3261_vm0, %v11482_v18  ;;  %10846 = vmatmul.msk.bf16.gmra.mxu1 %vm3261_vm0, %v11539_v19  ;;  %v11550_v18 = vld [vmem:[%s12132_s14 + $0x2a8] sm:$0xff]  ;;  %v12378_v21 = vpop.f32.mrf.mxu3 }
 0x1b2   : > { %v11582_v19 = vld [vmem:[%s12132_s14 + $0x3a8] sm:$0xff]  ;;  %10857 = vmatmul.msk.bf16.gmra.mxu2 %vm3261_vm0, %v11550_v18  ;;  %16342 = vst [vmem:[#allocation11_spill] sm:$0xff] %v12378_v21  ;;  %v3678_v18 = vadd.f32 %v12281_v10, %v12240_v55  ;;  %v11552_v55 = vld [vmem:[%s12132_s14 + $0x2b8] sm:$0xff] }
 0x1b3   : > { %v12348_v38 = vmax.f32 %v4299_v24, %v4427_v29  ;;  %10889 = vmatmul.msk.bf16.gmra.mxu3 %vm3261_vm0, %v11582_v19 }
 0x1b6   : > { %v12354_v43 = vpop.f32.mrf.mxu0  ;;  %v3987_v44 = vpop.f32.mrf.mxu1 }
 0x1b7   : > { %16339 = vst [vmem:[#allocation8_spill] sm:$0xff] %v12354_v43  ;;  %v3988_v27 = vadd.f32 %v12281_v10, %v3987_v44 }
 0x1b9   : > { %v4428_v54 = vmax.f32 %v3988_v27, 0.0  ;;  %v3676_v27 = vadd.f32 %v12281_v10, %v12232_v52 }
 0x1bb   : > { %v12357_v57 = vmax.f32 %v4300_v51, %v4428_v54  ;;  %v11484_v51 = vld [vmem:[%s12132_s14 + $0x98] sm:$0xff]  ;;  %v11541_v54 = vld [vmem:[%s12132_s14 + $0x260] sm:$0xff] }
 0x1be   : > { %v12365_v7 = vpop.f32.mrf.mxu0  ;;  %v3990_v41 = vpop.f32.mrf.mxu1 }
 0x1bf   : > { %16341 = vst [vmem:[#allocation10_spill] sm:$0xff] %v12365_v7  ;;  %v3991_v13 = vadd.f32 %v12281_v10, %v3990_v41  ;;  %v4303_v41 = vmax.f32 %v3676_v27, 0.0 }
 0x1c1   : > { %v4429_v17 = vmax.f32 %v3991_v13, 0.0  ;;  %10790 = vmatmul.msk.bf16.gmra.mxu0 %vm3261_vm0, %v11483_v1  ;;  %10847 = vmatmul.msk.bf16.gmra.mxu1 %vm3261_vm0, %v11540_v6  ;;  %v12392_v6 = vpop.f32.mrf.mxu3 }
 0x1c2   : > { %16345 = vst [vmem:[#allocation14_spill] sm:$0xff] %v12392_v6 }
 0x1c3   : > { %v12372_v34 = vmax.f32 %v4301_v14, %v4429_v17  ;;  %v11551_v14 = vld [vmem:[%s12132_s14 + $0x2b0] sm:$0xff] }
 0x1c4   : > { %v11583_v17 = vld [vmem:[%s12132_s14 + $0x3b0] sm:$0xff]  ;;  %10858 = vmatmul.msk.bf16.gmra.mxu2 %vm3261_vm0, %v11551_v14  ;;  %v11486_v14 = vld [vmem:[%s12132_s14 + $0xa8] sm:$0xff] }
 0x1c5   : > { %10890 = vmatmul.msk.bf16.gmra.mxu3 %vm3261_vm0, %v11583_v17  ;;  %v11543_v17 = vld [vmem:[%s12132_s14 + $0x270] sm:$0xff] }
 0x1c6   : > { %v12380_v24 = vpop.f32.mrf.mxu0  ;;  %v3992_v29 = vpop.f32.mrf.mxu1 }
 0x1c7   : > { %16343 = vst [vmem:[#allocation12_spill] sm:$0xff] %v12380_v24  ;;  %v3993_v33 = vadd.f32 %v12281_v10, %v3992_v29 }
 0x1c9   : > { %v4430_v40 = vmax.f32 %v3993_v33, 0.0  ;;  %v4304_v33 = vmax.f32 %v3678_v18, 0.0 }
 0x1cb   : > { %v12383_v44 = vmax.f32 %v4302_v36, %v4430_v40  ;;  %v12407_v40 = vpop.f32.mrf.mxu3 }
 0x1cc   : > { %16347 = vst [vmem:[#allocation16_spill] sm:$0xff] %v12407_v40 }
 0x1ce   : > { %v12389_v61 = vpop.f32.mrf.mxu0  ;;  %v3995_v48 = vpop.f32.mrf.mxu1 }
 0x1cf   : > { %16344 = vst [vmem:[#allocation13_spill] sm:$0xff] %v12389_v61  ;;  %v3996_v1 = vadd.f32 %v12281_v10, %v3995_v48  ;;  %v11557_v61 = vld [vmem:[%s12132_s14 + $0x2e0] sm:$0xff] }
 0x1d1   : > { %v4431_v13 = vmax.f32 %v3996_v1, 0.0  ;;  %10791 = vmatmul.msk.bf16.gmra.mxu0 %vm3261_vm0, %v11484_v51  ;;  %10848 = vmatmul.msk.bf16.gmra.mxu1 %vm3261_vm0, %v11541_v54  ;;  %v11485_v51 = vld [vmem:[%s12132_s14 + $0xa0] sm:$0xff]  ;;  %v11542_v54 = vld [vmem:[%s12132_s14 + $0x268] sm:$0xff]  ;;  %v11584_v1 = vld [vmem:[%s12132_s14 + $0x3b8] sm:$0xff] }
 0x1d3   : > { %v12398_v52 = vmax.f32 %v4303_v41, %v4431_v13  ;;  %v12421_v41 = vpop.f32.mrf.mxu3 }
 0x1d4   : > { %10859 = vmatmul.msk.bf16.gmra.mxu2 %vm3261_vm0, %v11552_v55  ;;  %16349 = vst [vmem:[#allocation18_spill] sm:$0xff] %v12421_v41  ;;  %v11544_v55 = vld [vmem:[%s12132_s14 + $0x278] sm:$0xff] }
 0x1d5   : > { %10891 = vmatmul.msk.bf16.gmra.mxu3 %vm3261_vm0, %v11584_v1 }
 0x1d6   : > { %v12404_v19 = vpop.f32.mrf.mxu0  ;;  %v3997_v45 = vpop.f32.mrf.mxu1 }
 0x1d7   : > { %16346 = vst [vmem:[#allocation15_spill] sm:$0xff] %v12404_v19  ;;  %v3998_v29 = vadd.f32 %v12281_v10, %v3997_v45 }
 0x1d9   : > { %v4432_v36 = vmax.f32 %v3998_v29, 0.0  ;;  %v11553_v29 = vld [vmem:[%s12132_s14 + $0x2c0] sm:$0xff] }
 0x1db   : > { %v12409_v27 = vmax.f32 %v4304_v33, %v4432_v36  ;;  %v12427_v18 = vpop.f32.mrf.mxu3  ;;  %v11585_v33 = vld [vmem:[%s12132_s14 + $0x3c0] sm:$0xff] }
 0x1dc   : > { %16351 = vst [vmem:[#allocation20_spill] sm:$0xff] %v12427_v18 }
 0x1de   : > { %v12413_v48 = vpop.f32.mrf.mxu0 }
 0x1df   : > { %16348 = vst [vmem:[#allocation17_spill] sm:$0xff] %v12413_v48 }
 0x1e1   : > { %10792 = vmatmul.msk.bf16.gmra.mxu0 %vm3261_vm0, %v11485_v51  ;;  %10849 = vmatmul.msk.bf16.gmra.mxu1 %vm3261_vm0, %v11542_v54  ;;  %v11487_v54 = vld [vmem:[%s12132_s14 + $0xb0] sm:$0xff] }
 0x1e3   : > { %v12439_v51 = vpop.f32.mrf.mxu3 }
 0x1e4   : > { %10860 = vmatmul.msk.bf16.gmra.mxu2 %vm3261_vm0, %v11553_v29  ;;  %16354 = vst [vmem:[#allocation23_spill] sm:$0xff] %v12439_v51  ;;  %v11545_v51 = vld [vmem:[%s12132_s14 + $0x280] sm:$0xff] }
 0x1e5   : > { %10892 = vmatmul.msk.bf16.gmra.mxu3 %vm3261_vm0, %v11585_v33 }
 0x1e6   : > { %v12423_v13 = vpop.f32.mrf.mxu0 }
 0x1e7   : > { %16350 = vst [vmem:[#allocation19_spill] sm:$0xff] %v12423_v13  ;;  %v11556_v13 = vld [vmem:[%s12132_s14 + $0x2d8] sm:$0xff] }
 0x1eb   : > { %v12449_v29 = vpop.f32.mrf.mxu3 }
 0x1ec   : > { %16356 = vst [vmem:[#allocation25_spill] sm:$0xff] %v12449_v29 }
 0x1ee   : > { %v12429_v45 = vpop.f32.mrf.mxu0 }
 0x1ef   : > { %16352 = vst [vmem:[#allocation21_spill] sm:$0xff] %v12429_v45 }
 0x1f1   : > { %10793 = vmatmul.msk.bf16.gmra.mxu0 %vm3261_vm0, %v11486_v14  ;;  %10850 = vmatmul.msk.bf16.gmra.mxu1 %vm3261_vm0, %v11543_v17  ;;  %v11554_v14 = vld [vmem:[%s12132_s14 + $0x2c8] sm:$0xff] }
 0x1f2   : > { %v11586_v17 = vld [vmem:[%s12132_s14 + $0x3c8] sm:$0xff] }
 0x1f4   : > { %10861 = vmatmul.msk.bf16.gmra.mxu2 %vm3261_vm0, %v11554_v14  ;;  %v11587_v14 = vld [vmem:[%s12132_s14 + $0x3d0] sm:$0xff] }
 0x1f5   : > { %10893 = vmatmul.msk.bf16.gmra.mxu3 %vm3261_vm0, %v11586_v17 }
 0x1f6   : > { %v12437_v36 = vpop.f32.mrf.mxu0 }
 0x1f7   : > { %16353 = vst [vmem:[#allocation22_spill] sm:$0xff] %v12437_v36  ;;  %v12455_v36 = vpop.f32.mrf.mxu3 }
 0x1f8   : > { %16358 = vst [vmem:[#allocation27_spill] sm:$0xff] %v12455_v36 }
 0x1fe   : > { %v12443_v1 = vpop.f32.mrf.mxu0 }
 0x1ff   : > { %16355 = vst [vmem:[#allocation24_spill] sm:$0xff] %v12443_v1  ;;  %v11488_v1 = vld [vmem:[%s12132_s14 + $0xb8] sm:$0xff]  ;;  %v12467_v17 = vpop.f32.mrf.mxu3 }
 0x200   : > { %16360 = vst [vmem:[#allocation29_spill] sm:$0xff] %v12467_v17 }
 0x201   : > { %10794 = vmatmul.msk.bf16.gmra.mxu0 %vm3261_vm0, %v11487_v54  ;;  %10851 = vmatmul.msk.bf16.gmra.mxu1 %vm3261_vm0, %v11544_v55  ;;  %v4060_v54 = vpop.f32.mrf.mxu2  ;;  %v11555_v55 = vld [vmem:[%s12132_s14 + $0x2d0] sm:$0xff] }
 0x204   : > { %10862 = vmatmul.msk.bf16.gmra.mxu2 %vm3261_vm0, %v11555_v55  ;;  %v11588_v55 = vld [vmem:[%s12132_s14 + $0x3d8] sm:$0xff] }
 0x205   : > { %10894 = vmatmul.msk.bf16.gmra.mxu3 %vm3261_vm0, %v11587_v14  ;;  %v4061_v14 = vadd.f32 %v12281_v10, %v4060_v54 }
 0x206   : > { %v12453_v33 = vpop.f32.mrf.mxu0 }
 0x207   : > { %16357 = vst [vmem:[#allocation26_spill] sm:$0xff] %v12453_v33  ;;  %v12474_v18 = vpop.f32.mrf.mxu3  ;;  %v4457_v17 = vmax.f32 %v4061_v14, 0.0  ;;  %v11589_v14 = vld [vmem:[%s12132_s14 + $0x3e0] sm:$0xff] }
 0x208   : > { %16363 = vst [vmem:[#allocation32_spill] sm:$0xff] %v12474_v18 }
 0x209   : > { %v4062_v36 = vpop.f32.mrf.mxu2 }
 0x20e   : > { %v12459_v45 = vpop.f32.mrf.mxu0 }
 0x20f   : > { %16359 = vst [vmem:[#allocation28_spill] sm:$0xff] %v12459_v45  ;;  %v11489_v45 = vld [vmem:[%s12132_s14 + $0xc0] sm:$0xff]  ;;  %v12481_v41 = vpop.f32.mrf.mxu3 }
 0x210   : > { %16365 = vst [vmem:[#allocation34_spill] sm:$0xff] %v12481_v41 }
 0x211   : > { %10795 = vmatmul.msk.bf16.gmra.mxu0 %vm3261_vm0, %v11488_v1  ;;  %10852 = vmatmul.msk.bf16.gmra.mxu1 %vm3261_vm0, %v11545_v51  ;;  %v4065_v51 = vpop.f32.mrf.mxu2 }
 0x214   : > { %10863 = vmatmul.msk.bf16.gmra.mxu2 %vm3261_vm0, %v11556_v13  ;;  %v4063_v13 = vadd.f32 %v12281_v10, %v4062_v36 }
 0x215   : > { %10895 = vmatmul.msk.bf16.gmra.mxu3 %vm3261_vm0, %v11588_v55 }
 0x216   : > { %v12469_v33 = vpop.f32.mrf.mxu0  ;;  %v4458_v19 = vmax.f32 %v4063_v13, 0.0 }
 0x217   : > { %16361 = vst [vmem:[#allocation30_spill] sm:$0xff] %v12469_v33  ;;  %v12491_v41 = vpop.f32.mrf.mxu3 }
 0x218   : > { %16367 = vst [vmem:[#allocation36_spill] sm:$0xff] %v12491_v41 }
 0x219   : > { %v4067_v33 = vpop.f32.mrf.mxu2 }
 0x21e   : > { %v12472_v29 = vpop.f32.mrf.mxu0 }
 0x21f   : > { %16362 = vst [vmem:[#allocation31_spill] sm:$0xff] %v12472_v29  ;;  %v11490_v29 = vld [vmem:[%s12132_s14 + $0xc8] sm:$0xff] }
 0x221   : > { %10796 = vmatmul.msk.bf16.gmra.mxu0 %vm3261_vm0, %v11489_v45  ;;  %v4070_v55 = vpop.f32.mrf.mxu2 }
 0x224   : > { %10864 = vmatmul.msk.bf16.gmra.mxu2 %vm3261_vm0, %v11557_v61 }
 0x225   : > { %10896 = vmatmul.msk.bf16.gmra.mxu3 %vm3261_vm0, %v11589_v14 }
 0x226   : > { %v12477_v1 = vpop.f32.mrf.mxu0 }
 0x227   : > { %16364 = vst [vmem:[#allocation33_spill] sm:$0xff] %v12477_v1 }
 0x22e   : > { %v3740_v18 = vpop.f32.mrf.mxu0 }
 0x22f   : > { %v3741_v45 = vadd.f32 %v12281_v10, %v3740_v18  ;;  %v4066_v18 = vadd.f32 %v12281_v10, %v4065_v51 }
 0x231   : > { %v4329_v48 = vmax.f32 %v3741_v45, 0.0  ;;  %10797 = vmatmul.msk.bf16.gmra.mxu0 %vm3261_vm0, %v11490_v29  ;;  %v12503_v29 = vpop.f32.mrf.mxu3 }
 0x232   : > { %16369 = vst [vmem:[#allocation38_spill] sm:$0xff] %v12503_v29 }
 0x233   : > { %v12489_v1 = vmax.f32 %v4329_v48, %v4457_v17  ;;  %v11491_v48 = vld [vmem:[%s12132_s14 + $0xd0] sm:$0xff]  ;;  %v4459_v17 = vmax.f32 %v4066_v18, 0.0  ;;  %v11558_v18 = vld [vmem:[%s12132_s14 + $0x2e8] sm:$0xff] }
 0x234   : > { %10865 = vmatmul.msk.bf16.gmra.mxu2 %vm3261_vm0, %v11558_v18 }
 0x235   : > { %16366 = vst [vmem:[#allocation35_spill] sm:$0xff] %v12489_v1 }
 0x236   : > { %v3742_v54 = vpop.f32.mrf.mxu0 }
 0x237   : > { %v3743_v40 = vadd.f32 %v12281_v10, %v3742_v54 }
 0x239   : > { %v4330_v6 = vmax.f32 %v3743_v40, 0.0  ;;  %v4072_v40 = vpop.f32.mrf.mxu2  ;;  %v12511_v54 = vpop.f32.mrf.mxu3 }
 0x23a   : > { %16371 = vst [vmem:[#allocation40_spill] sm:$0xff] %v12511_v54 }
 0x23b   : > { %v12497_v21 = vmax.f32 %v4330_v6, %v4458_v19  ;;  %v4068_v19 = vadd.f32 %v12281_v10, %v4067_v33 }
 0x23d   : > { %16368 = vst [vmem:[#allocation37_spill] sm:$0xff] %v12497_v21  ;;  %v4460_v14 = vmax.f32 %v4068_v19, 0.0  ;;  %v11590_v19 = vld [vmem:[%s12132_s14 + $0x3e8] sm:$0xff] }
 0x23e   : > { %v3745_v36 = vpop.f32.mrf.mxu0  ;;  %10897 = vmatmul.msk.bf16.gmra.mxu3 %vm3261_vm0, %v11590_v19 }
 0x23f   : > { %v3746_v45 = vadd.f32 %v12281_v10, %v3745_v36 }
 0x241   : > { %v4331_v13 = vmax.f32 %v3746_v45, 0.0  ;;  %10798 = vmatmul.msk.bf16.gmra.mxu0 %vm3261_vm0, %v11491_v48  ;;  %v4075_v1 = vpop.f32.mrf.mxu2  ;;  %v4071_v45 = vadd.f32 %v12281_v10, %v4070_v55  ;;  %v11492_v48 = vld [vmem:[%s12132_s14 + $0xd8] sm:$0xff]  ;;  %v4073_v55 = vadd.f32 %v12281_v10, %v4072_v40 }
 0x243   : > { %v12507_v6 = vmax.f32 %v4331_v13, %v4459_v17  ;;  %v4461_v33 = vmax.f32 %v4071_v45, 0.0  ;;  %v4462_v45 = vmax.f32 %v4073_v55, 0.0  ;;  %v11591_v55 = vld [vmem:[%s12132_s14 + $0x3f0] sm:$0xff] }
 0x245   : > { %16370 = vst [vmem:[#allocation39_spill] sm:$0xff] %v12507_v6 }
 0x246   : > { %v3747_v61 = vpop.f32.mrf.mxu0 }
 0x247   : > { %v3748_v51 = vadd.f32 %v12281_v10, %v3747_v61  ;;  %v12522_v61 = vpop.f32.mrf.mxu3 }
 0x248   : > { %16373 = vst [vmem:[#allocation42_spill] sm:$0xff] %v12522_v61 }
 0x249   : > { %v4332_v21 = vmax.f32 %v3748_v51, 0.0 }
 0x24b   : > { %v12514_v36 = vmax.f32 %v4332_v21, %v4460_v14  ;;  %v12527_v21 = vpop.f32.mrf.mxu2 }
 0x24c   : > { %16375 = vst [vmem:[#allocation44_spill] sm:$0xff] %v12527_v21 }
 0x24d   : > { %16372 = vst [vmem:[#allocation41_spill] sm:$0xff] %v12514_v36  ;;  %v4076_v36 = vadd.f32 %v12281_v10, %v4075_v1 }
 0x24e   : > { %v3750_v17 = vpop.f32.mrf.mxu0 }
 0x24f   : > { %v3751_v13 = vadd.f32 %v12281_v10, %v3750_v17  ;;  %v4463_v21 = vmax.f32 %v4076_v36, 0.0 }
 0x251   : > { %v4333_v6 = vmax.f32 %v3751_v13, 0.0  ;;  %10799 = vmatmul.msk.bf16.gmra.mxu0 %vm3261_vm0, %v11492_v48  ;;  %v11559_v13 = vld [vmem:[%s12132_s14 + $0x2f0] sm:$0xff] }
 0x252   : > { %10866 = vmatmul.msk.bf16.gmra.mxu2 %vm3261_vm0, %v11559_v13  ;;  %v11560_v13 = vld [vmem:[%s12132_s14 + $0x2f8] sm:$0xff] }
 0x253   : > { %v12524_v51 = vmax.f32 %v4333_v6, %v4461_v33  ;;  %v12536_v6 = vpop.f32.mrf.mxu3  ;;  %v11493_v33 = vld [vmem:[%s12132_s14 + $0xe0] sm:$0xff]  ;;  %v4080_v40 = vpop.f32.mrf.mxu2  ;;  %10898 = vmatmul.msk.bf16.gmra.mxu3 %vm3261_vm0, %v11591_v55 }
 0x254   : > { %16377 = vst [vmem:[#allocation46_spill] sm:$0xff] %v12536_v6  ;;  %v4081_v36 = vadd.f32 %v12281_v10, %v4080_v40 }
 0x255   : > { %16374 = vst [vmem:[#allocation43_spill] sm:$0xff] %v12524_v51 }
 0x256   : > { %v3752_v14 = vpop.f32.mrf.mxu0 }
 0x257   : > { %v3753_v18 = vadd.f32 %v12281_v10, %v3752_v14 }
 0x259   : > { %v4334_v17 = vmax.f32 %v3753_v18, 0.0 }
 0x25b   : > { %v12532_v48 = vmax.f32 %v4334_v17, %v4462_v45  ;;  %v12545_v1 = vpop.f32.mrf.mxu3  ;;  %v12549_v17 = vpop.f32.mrf.mxu2 }
 0x25c   : > { %16379 = vst [vmem:[#allocation48_spill] sm:$0xff] %v12545_v1 }
 0x25d   : > { %16376 = vst [vmem:[#allocation45_spill] sm:$0xff] %v12532_v48  ;;  %v11498_v48 = vld [vmem:[%s12132_s14 + $0x108] sm:$0xff] }
 0x25e   : > { %v3755_v19 = vpop.f32.mrf.mxu0  ;;  %16381 = vst [vmem:[#allocation50_spill] sm:$0xff] %v12549_v17 }
 0x25f   : > { %v3756_v51 = vadd.f32 %v12281_v10, %v3755_v19  ;;  %v4465_v19 = vmax.f32 %v4081_v36, 0.0  ;;  %v11561_v36 = vld [vmem:[%s12132_s14 + $0x300] sm:$0xff] }
 0x261   : > { %v4335_v14 = vmax.f32 %v3756_v51, 0.0  ;;  %10800 = vmatmul.msk.bf16.gmra.mxu0 %vm3261_vm0, %v11493_v33  ;;  %v11494_v51 = vld [vmem:[%s12132_s14 + $0xe8] sm:$0xff] }
 0x262   : > { %10867 = vmatmul.msk.bf16.gmra.mxu2 %vm3261_vm0, %v11560_v13  ;;  %v11795_v13 = vmov 0.0  }
 0x263   : > { %v12542_v18 = vmax.f32 %v4335_v14, %v4463_v21  ;;  %v12556_v14 = vpop.f32.mrf.mxu3  ;;  %4743 = vst.msk [vmem:[#allocation2] sm:$0xff] %vm3261_vm0, %v11795_v13 }
 0x264   : > { %16382 = vst [vmem:[#allocation51_spill] sm:$0xff] %v12556_v14 }
 0x265   : > { %16378 = vst [vmem:[#allocation47_spill] sm:$0xff] %v12542_v18  ;;  %v11592_v18 = vld [vmem:[%s12132_s14 + $0x3f8] sm:$0xff] }
 0x266   : > { %v12547_v45 = vpop.f32.mrf.mxu0  ;;  %10899 = vmatmul.msk.bf16.gmra.mxu3 %vm3261_vm0, %v11592_v18  ;;  %4745 = vst.msk [vmem:[#allocation2 + $0x8] sm:$0x1] %vm4744_vm1, %v11795_v13 }
 0x267   : > { %16380 = vst [vmem:[#allocation49_spill] sm:$0xff] %v12547_v45  ;;  %v4085_v45 = vpop.f32.mrf.mxu2 }
 0x268   : > { %4746 = vst.msk [vmem:[#allocation2 + $0x10] sm:$0xff] %vm3261_vm0, %v11795_v13  ;;  %v4086_v18 = vadd.f32 %v12281_v10, %v4085_v45 }
 0x269   : > { %4747 = vst.msk [vmem:[#allocation2 + $0x18] sm:$0x1] %vm4744_vm1, %v11795_v13 }
 0x26a   : > { %4748 = vst.msk [vmem:[#allocation2 + $0x20] sm:$0xff] %vm3261_vm0, %v11795_v13 }
 0x26b   : > { %4749 = vst.msk [vmem:[#allocation2 + $0x28] sm:$0x1] %vm4744_vm1, %v11795_v13 }
 0x26c   : > { %4750 = vst.msk [vmem:[#allocation2 + $0x30] sm:$0xff] %vm3261_vm0, %v11795_v13 }
 0x26d   : > { %4751 = vst.msk [vmem:[#allocation2 + $0x38] sm:$0x1] %vm4744_vm1, %v11795_v13 }
 0x26e   : > { %v3760_v33 = vpop.f32.mrf.mxu0  ;;  %4752 = vst.msk [vmem:[#allocation2 + $0x40] sm:$0xff] %vm3261_vm0, %v11795_v13 }
 0x26f   : > { %v3761_v21 = vadd.f32 %v12281_v10, %v3760_v33  ;;  %v12578_v33 = vpop.f32.mrf.mxu2  ;;  %4753 = vst.msk [vmem:[#allocation2 + $0x48] sm:$0x1] %vm4744_vm1, %v11795_v13 }
 0x270   : > { %16386 = vst [vmem:[#allocation55_spill] sm:$0xff] %v12578_v33 }
 0x271   : > { %v4337_v55 = vmax.f32 %v3761_v21, 0.0  ;;  %10801 = vmatmul.msk.bf16.gmra.mxu0 %vm3261_vm0, %v11494_v51  ;;  %v12572_v51 = vpop.f32.mrf.mxu3  ;;  %4754 = vst.msk [vmem:[#allocation2 + $0x50] sm:$0xff] %vm3261_vm0, %v11795_v13 }
 0x272   : > { %16385 = vst [vmem:[#allocation54_spill] sm:$0xff] %v12572_v51  ;;  %10868 = vmatmul.msk.bf16.gmra.mxu2 %vm3261_vm0, %v11561_v36 }
 0x273   : > { %v12560_v17 = vmax.f32 %v4337_v55, %v4465_v19  ;;  %v11495_v19 = vld [vmem:[%s12132_s14 + $0xf0] sm:$0xff]  ;;  %v4467_v55 = vmax.f32 %v4086_v18, 0.0  ;;  %4755 = vst.msk [vmem:[#allocation2 + $0x58] sm:$0x1] %vm4744_vm1, %v11795_v13 }
 0x274   : > { %4756 = vst.msk [vmem:[#allocation2 + $0x60] sm:$0xff] %vm3261_vm0, %v11795_v13 }
 0x275   : > { %16383 = vst [vmem:[#allocation52_spill] sm:$0xff] %v12560_v17 }
 0x276   : > { %v12563_v40 = vpop.f32.mrf.mxu0  ;;  %4757 = vst.msk [vmem:[#allocation2 + $0x68] sm:$0x1] %vm4744_vm1, %v11795_v13 }
 0x277   : > { %16384 = vst [vmem:[#allocation53_spill] sm:$0xff] %v12563_v40  ;;  %v5276_v40 = vld [vmem:[#allocation2 + $0x1] sm:$0xff] }
 0x278   : > { %v12590_v45 = vpack.c.bf16 %v5276_v40, %v5276_v40  ;;  %4758 = vst.msk [vmem:[#allocation2 + $0x70] sm:$0xff] %vm3261_vm0, %v11795_v13 }
 0x279   : > { %v12605_v40 = vpop.f32.mrf.mxu3  ;;  %4759 = vst.msk [vmem:[#allocation2 + $0x78] sm:$0x1] %vm4744_vm1, %v11795_v13 }
 0x27a   : > { %5372 = vrot.lane.b32.xlu2 %v12590_v45, %s11796_s17  ;;  %16388 = vst [vmem:[#allocation57_spill] sm:$0xff] %v12605_v40 }
 0x27b   : > { %4760 = vst.msk [vmem:[#allocation2 + $0x80] sm:$0xff] %vm3261_vm0, %v11795_v13 }
 0x27c   : > { %4761 = vst.msk [vmem:[#allocation2 + $0x88] sm:$0x1] %vm4744_vm1, %v11795_v13 }
 0x27d   : > { %4762 = vst.msk [vmem:[#allocation2 + $0x90] sm:$0xff] %vm3261_vm0, %v11795_v13 }
 0x27e   : > { %v3765_v21 = vpop.f32.mrf.mxu0  ;;  %4763 = vst.msk [vmem:[#allocation2 + $0x98] sm:$0x1] %vm4744_vm1, %v11795_v13 }
 0x27f   : > { %v3766_v17 = vadd.f32 %v12281_v10, %v3765_v21  ;;  %4764 = vst.msk [vmem:[#allocation2 + $0xa0] sm:$0xff] %vm3261_vm0, %v11795_v13 }
 0x280   : > { %4765 = vst.msk [vmem:[#allocation2 + $0xa8] sm:$0x1] %vm4744_vm1, %v11795_v13 }
 0x281   : > { %v4339_v36 = vmax.f32 %v3766_v17, 0.0  ;;  %10802 = vmatmul.msk.bf16.gmra.mxu0 %vm3261_vm0, %v11495_v19  ;;  %v4090_v19 = vpop.f32.mrf.mxu2  ;;  %4766 = vst.msk [vmem:[#allocation2 + $0xb0] sm:$0xff] %vm3261_vm0, %v11795_v13 }
 0x282   : > { %v4091_v21 = vadd.f32 %v12281_v10, %v4090_v19  ;;  %4767 = vst.msk [vmem:[#allocation2 + $0xb8] sm:$0x1] %vm4744_vm1, %v11795_v13 }
 0x283   : > { %v12601_v18 = vmax.f32 %v4339_v36, %v4467_v55  ;;  %v11496_v55 = vld [vmem:[%s12132_s14 + $0xf8] sm:$0xff]  ;;  %v12631_v36 = vpop.f32.mrf.mxu3  ;;  %4768 = vst.msk [vmem:[#allocation2 + $0xc0] sm:$0xff] %vm3261_vm0, %v11795_v13 }
 0x284   : > { %16390 = vst [vmem:[#allocation59_spill] sm:$0xff] %v12631_v36 }
 0x285   : > { %16387 = vst [vmem:[#allocation56_spill] sm:$0xff] %v12601_v18  ;;  %v4469_v18 = vmax.f32 %v4091_v21, 0.0 }
 0x286   : > { %v12611_v17 = vpop.f32.mrf.mxu0  ;;  %4769 = vst.msk [vmem:[#allocation2 + $0xc8] sm:$0x1] %vm4744_vm1, %v11795_v13 }
 0x287   : > { %16389 = vst [vmem:[#allocation58_spill] sm:$0xff] %v12611_v17 }
 0x288   : > { %4770 = vst.msk [vmem:[#allocation2 + $0xd0] sm:$0xff] %vm3261_vm0, %v11795_v13 }
 0x289   : > { %v12638_v19 = vpop.f32.mrf.mxu2  ;;  %4771 = vst.msk [vmem:[#allocation2 + $0xd8] sm:$0x1] %vm4744_vm1, %v11795_v13 }
 0x28a   : > { %16391 = vst [vmem:[#allocation60_spill] sm:$0xff] %v12638_v19 }
 0x28b   : > { %4772 = vst.msk [vmem:[#allocation2 + $0xe0] sm:$0xff] %vm3261_vm0, %v11795_v13 }
 0x28c   : > { %4773 = vst.msk [vmem:[#allocation2 + $0xe8] sm:$0x1] %vm4744_vm1, %v11795_v13 }
 0x28d   : > { %4774 = vst.msk [vmem:[#allocation2 + $0xf0] sm:$0xff] %vm3261_vm0, %v11795_v13 }
 0x28e   : > { %v3770_v33 = vpop.f32.mrf.mxu0  ;;  %4775 = vst.msk [vmem:[#allocation2 + $0xf8] sm:$0x1] %vm4744_vm1, %v11795_v13 }
 0x28f   : > { %v3771_v17 = vadd.f32 %v12281_v10, %v3770_v33  ;;  %4776 = vst.msk [vmem:[#allocation2 + $0x100] sm:$0xff] %vm3261_vm0, %v11795_v13 }
 0x290   : > { %4777 = vst.msk [vmem:[#allocation2 + $0x108] sm:$0x1] %vm4744_vm1, %v11795_v13 }
 0x291   : > { %v4341_v40 = vmax.f32 %v3771_v17, 0.0  ;;  %10803 = vmatmul.msk.bf16.gmra.mxu0 %vm3261_vm0, %v11496_v55  ;;  %v12661_v17 = vpop.f32.mrf.mxu3  ;;  %4778 = vst.msk [vmem:[#allocation2 + $0x110] sm:$0xff] %vm3261_vm0, %v11795_v13 }
 0x292   : > { %16394 = vst [vmem:[#allocation63_spill] sm:$0xff] %v12661_v17 }
 0x293   : > { %v12647_v21 = vmax.f32 %v4341_v40, %v4469_v18  ;;  %v4095_v18 = vpop.f32.mrf.mxu2  ;;  %4779 = vst.msk [vmem:[#allocation2 + $0x118] sm:$0x1] %vm4744_vm1, %v11795_v13 }
 0x294   : > { %v4096_v40 = vadd.f32 %v12281_v10, %v4095_v18  ;;  %4780 = vst.msk [vmem:[#allocation2 + $0x120] sm:$0xff] %vm3261_vm0, %v11795_v13 }
 0x295   : > { %16392 = vst [vmem:[#allocation61_spill] sm:$0xff] %v12647_v21 }
 0x296   : > { %v12655_v33 = vpop.f32.mrf.mxu0  ;;  %4781 = vst.msk [vmem:[#allocation2 + $0x128] sm:$0x1] %vm4744_vm1, %v11795_v13  ;;  %v4471_v19 = vmax.f32 %v4096_v40, 0.0 }
 0x297   : > { %16393 = vst [vmem:[#allocation62_spill] sm:$0xff] %v12655_v33 }
 0x298   : > { %4782 = vst.msk [vmem:[#allocation2 + $0x130] sm:$0xff] %vm3261_vm0, %v11795_v13 }
 0x299   : > { %4783 = vst.msk [vmem:[#allocation2 + $0x138] sm:$0x1] %vm4744_vm1, %v11795_v13  ;;  %v12685_v21 = vpop.f32.mrf.mxu3 }
 0x29a   : > { %4784 = vst.msk [vmem:[#allocation2 + $0x140] sm:$0xff] %vm3261_vm0, %v11795_v13 }
 0x29b   : > { %4785 = vst.msk [vmem:[#allocation2 + $0x148] sm:$0x1] %vm4744_vm1, %v11795_v13 }
 0x29c   : > { %16395 = vst [vmem:[#allocation64_spill] sm:$0xff] %v12685_v21 }
 0x29d   : > { %4786 = vst.msk [vmem:[#allocation2 + $0x150] sm:$0xff] %vm3261_vm0, %v11795_v13 }
 0x29e   : > { %v3775_v55 = vpop.f32.mrf.mxu0  ;;  %4787 = vst.msk [vmem:[#allocation2 + $0x158] sm:$0x1] %vm4744_vm1, %v11795_v13 }
 0x29f   : > { %v3776_v33 = vadd.f32 %v12281_v10, %v3775_v55  ;;  %4788 = vst.msk [vmem:[#allocation2 + $0x160] sm:$0xff] %vm3261_vm0, %v11795_v13 }
 0x2a0   : > { %4789 = vst.msk [vmem:[#allocation2 + $0x168] sm:$0x1] %vm4744_vm1, %v11795_v13 }
 0x2a1   : > { %v4343_v18 = vmax.f32 %v3776_v33, 0.0  ;;  %4790 = vst.msk [vmem:[#allocation2 + $0x170] sm:$0xff] %vm3261_vm0, %v11795_v13 }
 0x2a2   : > { %4791 = vst.msk [vmem:[#allocation2 + $0x178] sm:$0x1] %vm4744_vm1, %v11795_v13 }
 0x2a3   : > { %v12689_v17 = vmax.f32 %v4343_v18, %v4471_v19  ;;  %4792 = vst.msk [vmem:[#allocation2 + $0x180] sm:$0xff] %vm3261_vm0, %v11795_v13  ;;  %v12709_v19 = vpop.f32.mrf.mxu3  ;;  %v12795_v18 = vpop.f32.mrf.mxu2 }
 0x2a4   : > { %4793 = vst.msk [vmem:[#allocation2 + $0x188] sm:$0x1] %vm4744_vm1, %v11795_v13 }
 0x2a5   : > { %16396 = vst [vmem:[#allocation65_spill] sm:$0xff] %v12689_v17 }
 0x2a6   : > { %4794 = vst.msk [vmem:[#allocation2 + $0x190] sm:$0xff] %vm3261_vm0, %v11795_v13 }
 0x2a7   : > { %4795 = vst.msk [vmem:[#allocation2 + $0x198] sm:$0x1] %vm4744_vm1, %v11795_v13 }
 0x2a8   : > { %16397 = vst [vmem:[#allocation66_spill] sm:$0xff] %v12709_v19 }
 0x2a9   : > { %4796 = vst.msk [vmem:[#allocation2 + $0x1a0] sm:$0xff] %vm3261_vm0, %v11795_v13 }
 0x2aa   : > { %4797 = vst.msk [vmem:[#allocation2 + $0x1a8] sm:$0x1] %vm4744_vm1, %v11795_v13 }
 0x2ab   : > { %4798 = vst.msk [vmem:[#allocation2 + $0x1b0] sm:$0xff] %vm3261_vm0, %v11795_v13  ;;  %v12731_v33 = vpop.f32.mrf.mxu3 }
 0x2ac   : > { %4799 = vst.msk [vmem:[#allocation2 + $0x1b8] sm:$0x1] %vm4744_vm1, %v11795_v13 }
 0x2ad   : > { %4800 = vst.msk [vmem:[#allocation2 + $0x1c0] sm:$0xff] %vm3261_vm0, %v11795_v13 }
 0x2ae   : > { %4801 = vst.msk [vmem:[#allocation2 + $0x1c8] sm:$0x1] %vm4744_vm1, %v11795_v13 }
 0x2af   : > { %4802 = vst.msk [vmem:[#allocation2 + $0x1d0] sm:$0xff] %vm3261_vm0, %v11795_v13 }
 0x2b0   : > { %4803 = vst.msk [vmem:[#allocation2 + $0x1d8] sm:$0x1] %vm4744_vm1, %v11795_v13 }
 0x2b1   : > { %4804 = vst.msk [vmem:[#allocation2 + $0x1e0] sm:$0xff] %vm3261_vm0, %v11795_v13 }
 0x2b2   : > { %4805 = vst.msk [vmem:[#allocation2 + $0x1e8] sm:$0x1] %vm4744_vm1, %v11795_v13 }
 0x2b3   : > { %16398 = vst [vmem:[#allocation67_spill] sm:$0xff] %v12731_v33  ;;  %v12753_v40 = vpop.f32.mrf.mxu3 }
 0x2b4   : > { %4806 = vst.msk [vmem:[#allocation2 + $0x1f0] sm:$0xff] %vm3261_vm0, %v11795_v13 }
 0x2b5   : > { %4807 = vst.msk [vmem:[#allocation2 + $0x1f8] sm:$0x1] %vm4744_vm1, %v11795_v13 }
 0x2b6   : > { %4808 = vst.msk [vmem:[#allocation2 + $0x200] sm:$0xff] %vm3261_vm0, %v11795_v13 }
 0x2b7   : > { %4809 = vst.msk [vmem:[#allocation2 + $0x208] sm:$0x1] %vm4744_vm1, %v11795_v13 }
 0x2b8   : > { %4810 = vst.msk [vmem:[#allocation2 + $0x210] sm:$0xff] %vm3261_vm0, %v11795_v13 }
 0x2b9   : > { %4811 = vst.msk [vmem:[#allocation2 + $0x218] sm:$0x1] %vm4744_vm1, %v11795_v13 }
 0x2ba   : > { %4812 = vst.msk [vmem:[#allocation2 + $0x220] sm:$0xff] %vm3261_vm0, %v11795_v13 }
 0x2bb   : > { %4813 = vst.msk [vmem:[#allocation2 + $0x228] sm:$0x1] %vm4744_vm1, %v11795_v13  ;;  %v12775_v55 = vpop.f32.mrf.mxu3 }
 0x2bc   : > { %4814 = vst.msk [vmem:[#allocation2 + $0x230] sm:$0xff] %vm3261_vm0, %v11795_v13 }
 0x2bd   : > { %4815 = vst.msk [vmem:[#allocation2 + $0x238] sm:$0x1] %vm4744_vm1, %v11795_v13 }
 0x2be   : > { %16399 = vst [vmem:[#allocation68_spill] sm:$0xff] %v12753_v40  ;;  %v6062_v40 = vld [vmem:[#allocation2 + $0x110] sm:$0xff] }
 0x2bf   : > { %4816 = vst.msk [vmem:[#allocation3] sm:$0xff] %vm3261_vm0, %v11795_v13  ;;  %v6094_v21 = vpack.c.bf16 %v6062_v40, %v6062_v40  ;;  %v5292_v40 = vld [vmem:[#allocation2 + $0x121] sm:$0xff] }
 0x2c0   : > { %4817 = vst.msk [vmem:[#allocation3 + $0x8] sm:$0x1] %vm4744_vm1, %v11795_v13 }
 0x2c1   : > { %4818 = vst.msk [vmem:[#allocation3 + $0x10] sm:$0xff] %vm3261_vm0, %v11795_v13  ;;  %6173 = vrot.lane.b32.xlu2 %v6094_v21, %s11796_s17 }
 0x2c2   : > { %4819 = vst.msk [vmem:[#allocation3 + $0x18] sm:$0x1] %vm4744_vm1, %v11795_v13 }
 0x2c3   : > { %4820 = vst.msk [vmem:[#allocation3 + $0x20] sm:$0xff] %vm3261_vm0, %v11795_v13  ;;  %v12799_v17 = vpop.f32.mrf.mxu3 }
 0x2c4   : > { %4821 = vst.msk [vmem:[#allocation3 + $0x28] sm:$0x1] %vm4744_vm1, %v11795_v13 }
 0x2c5   : > { %4822 = vst.msk [vmem:[#allocation3 + $0x30] sm:$0xff] %vm3261_vm0, %v11795_v13 }
 0x2c6   : > { %4823 = vst.msk [vmem:[#allocation3 + $0x38] sm:$0x1] %vm4744_vm1, %v11795_v13 }
 0x2c7   : > { %4824 = vst.msk [vmem:[#allocation3 + $0x40] sm:$0xff] %vm3261_vm0, %v11795_v13 }
 0x2c8   : > { %4825 = vst.msk [vmem:[#allocation3 + $0x48] sm:$0x1] %vm4744_vm1, %v11795_v13 }
 0x2c9   : > { %16400 = vst [vmem:[#allocation69_spill] sm:$0xff] %v12775_v55  ;;  %v11497_v55 = vld [vmem:[%s12132_s14 + $0x100] sm:$0xff] }
 0x2ca   : > { %4826 = vst.msk [vmem:[#allocation3 + $0x50] sm:$0xff] %vm3261_vm0, %v11795_v13  ;;  %10804 = vmatmul.msk.bf16.gmra.mxu0 %vm3261_vm0, %v11497_v55  ;;  %v5051_v55 = vld [vmem:[#allocation3] sm:$0xff] }
 0x2cb   : > { %4827 = vst.msk [vmem:[#allocation3 + $0x58] sm:$0x1] %vm4744_vm1, %v11795_v13  ;;  %v4260_v33 = vpop.f32.mrf.mxu3  ;;  %v5083_v19 = vpack.c.bf16 %v5051_v55, %v5051_v55  ;;  %v6078_v55 = vld [vmem:[#allocation2 + $0x230] sm:$0xff] }
 0x2cc   : > { %4828 = vst.msk [vmem:[#allocation3 + $0x60] sm:$0xff] %vm3261_vm0, %v11795_v13  ;;  %v6110_v51 = vpack.c.bf16 %v6078_v55, %v6078_v55  ;;  %v4261_v61 = vadd.f32 %v12281_v10, %v4260_v33 }
 0x2cd   : > { %4829 = vst.msk [vmem:[#allocation3 + $0x68] sm:$0x1] %vm4744_vm1, %v11795_v13  ;;  %5147 = vrot.lane.b32.xlu0 %v5083_v19, %s11797_s18 }
 0x2ce   : > { %4830 = vst.msk [vmem:[#allocation3 + $0x70] sm:$0xff] %vm3261_vm0, %v11795_v13  ;;  %6205 = vrot.lane.b32.xlu2 %v6110_v51, %s11796_s17 }
 0x2cf   : > { %4831 = vst.msk [vmem:[#allocation3 + $0x78] sm:$0x1] %vm4744_vm1, %v11795_v13 }
 0x2d0   : > { %4832 = vst.msk [vmem:[#allocation3 + $0x80] sm:$0xff] %vm3261_vm0, %v11795_v13 }
 0x2d1   : > { %4833 = vst.msk [vmem:[#allocation3 + $0x88] sm:$0x1] %vm4744_vm1, %v11795_v13 }
 0x2d2   : > { %4834 = vst.msk [vmem:[#allocation3 + $0x90] sm:$0xff] %vm3261_vm0, %v11795_v13 }
 0x2d3   : > { %16401 = vst [vmem:[#allocation70_spill] sm:$0xff] %v12795_v18  ;;  %v12823_v18 = vpop.f32.mrf.mxu0  ;;  %v4262_v36 = vpop.f32.mrf.mxu3 }
 0x2d4   : > { %4835 = vst.msk [vmem:[#allocation3 + $0x98] sm:$0x1] %vm4744_vm1, %v11795_v13  ;;  %v4263_v24 = vadd.f32 %v12281_v10, %v4262_v36 }
 0x2d5   : > { %16402 = vst [vmem:[#allocation71_spill] sm:$0xff] %v12799_v17  ;;  %v12825_v17 = vpop.f32.mrf.mxu2 }
 0x2d6   : > { %4836 = vst.msk [vmem:[#allocation3 + $0xa0] sm:$0xff] %vm3261_vm0, %v11795_v13 }
 0x2d7   : > { %4837 = vst.msk [vmem:[#allocation3 + $0xa8] sm:$0x1] %vm4744_vm1, %v11795_v13 }
 0x2d8   : > { %4838 = vst.msk [vmem:[#allocation3 + $0xb0] sm:$0xff] %vm3261_vm0, %v11795_v13 }
 0x2d9   : > { %4839 = vst.msk [vmem:[#allocation3 + $0xb8] sm:$0x1] %vm4744_vm1, %v11795_v13 }
 0x2da   : > { %4840 = vst.msk [vmem:[#allocation3 + $0xc0] sm:$0xff] %vm3261_vm0, %v11795_v13  ;;  %10805 = vmatmul.msk.bf16.gmra.mxu0 %vm3261_vm0, %v11498_v48 }
 0x2db   : > { %4841 = vst.msk [vmem:[#allocation3 + $0xc8] sm:$0x1] %vm4744_vm1, %v11795_v13  ;;  %v3780_v19 = vpop.f32.mrf.mxu0  ;;  %v4265_v14 = vpop.f32.mrf.mxu3 }
 0x2dc   : > { %4842 = vst.msk [vmem:[#allocation3 + $0xd0] sm:$0xff] %vm3261_vm0, %v11795_v13  ;;  %v3781_v54 = vadd.f32 %v12281_v10, %v3780_v19  ;;  %v4266_v33 = vadd.f32 %v12281_v10, %v4265_v14 }
 0x2dd   : > { %4843 = vst.msk [vmem:[#allocation3 + $0xd8] sm:$0x1] %vm4744_vm1, %v11795_v13  ;;  %v4102_v21 = vpop.f32.mrf.mxu2 }
 0x2de   : > { %4844 = vst.msk [vmem:[#allocation3 + $0xe0] sm:$0xff] %vm3261_vm0, %v11795_v13 }
 0x2df   : > { %4845 = vst.msk [vmem:[#allocation3 + $0xe8] sm:$0x1] %vm4744_vm1, %v11795_v13 }
 0x2e0   : > { %16403 = vst [vmem:[#allocation72_spill] sm:$0xff] %v12823_v18  ;;  %v11562_v18 = vld [vmem:[%s12132_s14 + $0x308] sm:$0xff] }
 0x2e1   : > { %4846 = vst.msk [vmem:[#allocation3 + $0xf0] sm:$0xff] %vm3261_vm0, %v11795_v13  ;;  %10869 = vmatmul.msk.bf16.gmra.mxu2 %vm3261_vm0, %v11562_v18  ;;  %v12852_v18 = vpack.c.bf16 %v5292_v40, %v5292_v40 }
 0x2e2   : > { %4847 = vst.msk [vmem:[#allocation3 + $0xf8] sm:$0x1] %vm4744_vm1, %v11795_v13 }
 0x2e3   : > { %4848 = vst.msk [vmem:[#allocation3 + $0x100] sm:$0xff] %vm3261_vm0, %v11795_v13  ;;  %5404 = vrot.lane.b32.xlu0 %v12852_v18, %s11796_s17  ;;  %v3782_v55 = vpop.f32.mrf.mxu0  ;;  %v4267_v41 = vpop.f32.mrf.mxu3 }
 0x2e4   : > { %4849 = vst.msk [vmem:[#allocation3 + $0x108] sm:$0x1] %vm4744_vm1, %v11795_v13 }
 0x2e5   : > { %4850 = vst.msk [vmem:[#allocation3 + $0x110] sm:$0xff] %vm3261_vm0, %v11795_v13  ;;  %v4105_v51 = vpop.f32.mrf.mxu2 }
 0x2e6   : > { %4851 = vst.msk [vmem:[#allocation3 + $0x118] sm:$0x1] %vm4744_vm1, %v11795_v13 }
 0x2e7   : > { %4852 = vst.msk [vmem:[#allocation3 + $0x120] sm:$0xff] %vm3261_vm0, %v11795_v13 }
 0x2e8   : > { %4853 = vst.msk [vmem:[#allocation3 + $0x128] sm:$0x1] %vm4744_vm1, %v11795_v13 }
 0x2e9   : > { %4854 = vst.msk [vmem:[#allocation3 + $0x130] sm:$0xff] %vm3261_vm0, %v11795_v13 }
 0x2ea   : > { %4855 = vst.msk [vmem:[#allocation3 + $0x138] sm:$0x1] %vm4744_vm1, %v11795_v13 }
 0x2eb   : > { %4856 = vst.msk [vmem:[#allocation3 + $0x140] sm:$0xff] %vm3261_vm0, %v11795_v13  ;;  %7599 = vrot.lane.b32.xlu0 %v12590_v45, %s11797_s18  ;;  %v3785_v6 = vpop.f32.mrf.mxu0  ;;  %v11499_v45 = vld [vmem:[%s12132_s14 + $0x110] sm:$0xff]  ;;  %v4270_v12 = vpop.f32.mrf.mxu3 }
 0x2ec   : > { %4857 = vst.msk [vmem:[#allocation3 + $0x148] sm:$0x1] %vm4744_vm1, %v11795_v13  ;;  %v6287_v1 = vld [vmem:[#allocation3 + $0x110] sm:$0xff]  ;;  %10806 = vmatmul.msk.bf16.gmra.mxu0 %vm3261_vm0, %v11499_v45  ;;  %v3786_v19 = vadd.f32 %v12281_v10, %v3785_v6  ;;  %v3943_v45 = vadd.f32 %v12281_v10, %v12186_v28  ;;  %v4345_v6 = vmax.f32 %v3781_v54, 0.0 }
 0x2ed   : > { %4858 = vst.msk [vmem:[#allocation3 + $0x150] sm:$0xff] %vm3261_vm0, %v11795_v13  ;;  %v4107_v29 = vpop.f32.mrf.mxu2 }
 0x2ee   : > { %4859 = vst.msk [vmem:[#allocation3 + $0x158] sm:$0x1] %vm4744_vm1, %v11795_v13  ;;  %v5067_v40 = vld [vmem:[#allocation3 + $0x120] sm:$0xff] }
 0x2ef   : > { %4860 = vst.msk [vmem:[#allocation3 + $0x160] sm:$0xff] %vm3261_vm0, %v11795_v13  ;;  %v5099_v48 = vpack.c.bf16 %v5067_v40, %v5067_v40  ;;  %v11563_v40 = vld [vmem:[%s12132_s14 + $0x310] sm:$0xff] }
 0x2f0   : > { %4861 = vst.msk [vmem:[#allocation3 + $0x168] sm:$0x1] %vm4744_vm1, %v11795_v13 }
 0x2f1   : > { %4862 = vst.msk [vmem:[#allocation3 + $0x170] sm:$0xff] %vm3261_vm0, %v11795_v13  ;;  %5179 = vrot.lane.b32.xlu1 %v5099_v48, %s11797_s18  ;;  %v6319_v48 = vpack.c.bf16 %v6287_v1, %v6287_v1  ;;  %10870 = vmatmul.msk.bf16.gmra.mxu2 %vm3261_vm0, %v11563_v40  ;;  %v3941_v1 = vadd.f32 %v12281_v10, %v12178_v25 }
 0x2f2   : > { %4863 = vst.msk [vmem:[#allocation3 + $0x178] sm:$0x1] %vm4744_vm1, %v11795_v13  ;;  %v4101_v40 = vadd.f32 %v12281_v10, %v12825_v17  ;;  %v3946_v25 = vadd.f32 %v12281_v10, %v12192_v32  ;;  %v4106_v17 = vadd.f32 %v12281_v10, %v4105_v51  ;;  %v3948_v32 = vadd.f32 %v12281_v10, %v12200_v35  ;;  %v12931_v35 = vld [vmem:[%s16321_s2] ss:$0 sm:$0xff] }
 0x2f3   : > { %4864 = vst.msk [vmem:[#allocation3 + $0x180] sm:$0xff] %vm3261_vm0, %v11795_v13  ;;  %v4409_v58 = vmax.f32 %v3941_v1, 0.0  ;;  %v4537_v51 = vmax.f32 %v4261_v61, 0.0  ;;  %v3787_v36 = vpop.f32.mrf.mxu0  ;;  %v4539_v61 = vmax.f32 %v4266_v33, 0.0  ;;  %v4347_v1 = vmax.f32 %v3786_v19, 0.0 }
 0x2f4   : > { %4865 = vst.msk [vmem:[#allocation3 + $0x188] sm:$0x1] %vm4744_vm1, %v11795_v13  ;;  %v4473_v14 = vmax.f32 %v4101_v40, 0.0  ;;  %v4411_v7 = vmax.f32 %v3946_v25, 0.0  ;;  %v4475_v54 = vmax.f32 %v4106_v17, 0.0  ;;  %v3788_v40 = vadd.f32 %v12931_v35, %v3787_v36 }
 0x2f5   : > { %4866 = vst.msk [vmem:[#allocation3 + $0x190] sm:$0xff] %vm3261_vm0, %v11795_v13  ;;  %v4410_v25 = vmax.f32 %v3943_v45, 0.0  ;;  %v3951_v30 = vadd.f32 %v12931_v35, %v12206_v39  ;;  %v4665_v17 = vmax.f32 %v4409_v58, %v4537_v51  ;;  %v4110_v19 = vpop.f32.mrf.mxu2 }
 0x2f6   : > { %4867 = vst.msk [vmem:[#allocation3 + $0x198] sm:$0x1] %vm4744_vm1, %v11795_v13  ;;  %v4601_v33 = vmax.f32 %v4345_v6, %v4473_v14  ;;  %v4348_v43 = vmax.f32 %v3788_v40, 0.0  ;;  %v4667_v39 = vmax.f32 %v4411_v7, %v4539_v61  ;;  %v4603_v36 = vmax.f32 %v4347_v1, %v4475_v54 }
 0x2f7   : > { %4868 = vst.msk [vmem:[#allocation3 + $0x1a0] sm:$0xff] %vm3261_vm0, %v11795_v13  ;;  %v4111_v58 = vadd.f32 %v12931_v35, %v4110_v19  ;;  %v4413_v6 = vmax.f32 %v3951_v30, 0.0  ;;  %v3953_v30 = vadd.f32 %v12931_v35, %v12214_v42 }
 0x2f8   : > { %4869 = vst.msk [vmem:[#allocation3 + $0x1a8] sm:$0x1] %vm4744_vm1, %v11795_v13  ;;  %v4731_v61 = vmax.f32 %v4603_v36, %v4667_v39  ;;  %v3956_v36 = vadd.f32 %v12931_v35, %v12220_v46 }
 0x2f9   : > { %4870 = vst.msk [vmem:[#allocation3 + $0x1b0] sm:$0xff] %vm3261_vm0, %v11795_v13  ;;  %6398 = vrot.lane.b32.xlu1 %v6319_v48, %s11798_s23  ;;  %v3783_v48 = vadd.f32 %v12281_v10, %v3782_v55  ;;  %v4103_v55 = vadd.f32 %v12281_v10, %v4102_v21  ;;  %v4108_v21 = vadd.f32 %v12931_v35, %v4107_v29 }
 0x2fa   : > { %4871 = vst.msk [vmem:[#allocation3 + $0x1b8] sm:$0x1] %vm4744_vm1, %v11795_v13  ;;  %v4268_v10 = vadd.f32 %v12931_v35, %v4267_v41  ;;  %v4538_v41 = vmax.f32 %v4263_v24, 0.0  ;;  %v4271_v24 = vadd.f32 %v12931_v35, %v4270_v12 }
 0x2fb   : > { %4872 = vst.msk [vmem:[#allocation3 + $0x1c0] sm:$0xff] %vm3261_vm0, %v11795_v13  ;;  %v4346_v28 = vmax.f32 %v3783_v48, 0.0  ;;  %v4412_v48 = vmax.f32 %v3948_v32, 0.0  ;;  %v4474_v29 = vmax.f32 %v4103_v55, 0.0  ;;  %v4476_v32 = vmax.f32 %v4108_v21, 0.0  ;;  %v11500_v21 = vld [vmem:[%s12132_s14 + $0x118] sm:$0xff]  ;;  %v3790_v54 = vpop.f32.mrf.mxu0 }
 0x2fc   : > { %4873 = vst.msk [vmem:[#allocation3 + $0x1c8] sm:$0x1] %vm4744_vm1, %v11795_v13  ;;  %v4540_v55 = vmax.f32 %v4268_v10, 0.0  ;;  %v4666_v14 = vmax.f32 %v4410_v25, %v4538_v41  ;;  %v4541_v12 = vmax.f32 %v4271_v24, 0.0  ;;  %v3791_v1 = vadd.f32 %v12931_v35, %v3790_v54  ;;  %10807 = vmatmul.msk.bf16.gmra.mxu0 %vm3261_vm0, %v11500_v21  ;;  %v4272_v41 = vpop.f32.mrf.mxu3 }
 0x2fd   : > { %4874 = vst.msk [vmem:[#allocation3 + $0x1d0] sm:$0xff] %vm3261_vm0, %v11795_v13  ;;  %v4602_v45 = vmax.f32 %v4346_v28, %v4474_v29  ;;  %v4604_v51 = vmax.f32 %v4348_v43, %v4476_v32  ;;  %v4729_v28 = vmax.f32 %v4601_v33, %v4665_v17  ;;  %v4477_v43 = vmax.f32 %v4111_v58, 0.0 }
 0x2fe   : > { %4875 = vst.msk [vmem:[#allocation3 + $0x1d8] sm:$0x1] %vm4744_vm1, %v11795_v13  ;;  %v4668_v10 = vmax.f32 %v4412_v48, %v4540_v55  ;;  %v4349_v25 = vmax.f32 %v3791_v1, 0.0  ;;  %v4669_v29 = vmax.f32 %v4413_v6, %v4541_v12  ;;  %v4112_v48 = vpop.f32.mrf.mxu2  ;;  %v4273_v17 = vadd.f32 %v12931_v35, %v4272_v41  ;;  %v7727_v1 = vld [vmem:[#allocation3 + $0x1] sm:$0xff] }
 0x2ff   : > { %4876 = vst.msk [vmem:[#allocation3 + $0x1e0] sm:$0xff] %vm3261_vm0, %v11795_v13  ;;  %v4730_v7 = vmax.f32 %v4602_v45, %v4666_v14  ;;  %v4113_v42 = vadd.f32 %v12931_v35, %v4112_v48  ;;  %v7759_v48 = vpack.c.bf16 %v7727_v1, %v7727_v1 }
 0x300   : > { %4877 = vst.msk [vmem:[#allocation3 + $0x1e8] sm:$0x1] %vm4744_vm1, %v11795_v13  ;;  %v4732_v40 = vmax.f32 %v4604_v51, %v4668_v10  ;;  %v4605_v33 = vmax.f32 %v4349_v25, %v4477_v43  ;;  %v4415_v25 = vmax.f32 %v3956_v36, 0.0 }
 0x301   : > { %4878 = vst.msk [vmem:[#allocation3 + $0x1f0] sm:$0xff] %vm3261_vm0, %v11795_v13  ;;  %7631 = vrot.lane.b32.xlu1 %v12852_v18, %s11797_s18  ;;  %v11564_v18 = vld [vmem:[%s12132_s14 + $0x318] sm:$0xff]  ;;  %v4478_v39 = vmax.f32 %v4113_v42, 0.0 }
 0x302   : > { %4879 = vst.msk [vmem:[#allocation3 + $0x1f8] sm:$0x1] %vm4744_vm1, %v11795_v13  ;;  %10871 = vmatmul.msk.bf16.gmra.mxu2 %vm3261_vm0, %v11564_v18  ;;  %v4414_v18 = vmax.f32 %v3953_v30, 0.0  ;;  %v4733_v19 = vmax.f32 %v4605_v33, %v4669_v29  ;;  %v11501_v33 = vld [vmem:[%s12132_s14 + $0x120] sm:$0xff] }
 0x303   : > { %4880 = vst.msk [vmem:[#allocation3 + $0x200] sm:$0xff] %vm3261_vm0, %v11795_v13  ;;  %v3792_v32 = vpop.f32.mrf.mxu0 }
 0x304   : > { %4881 = vst.msk [vmem:[#allocation3 + $0x208] sm:$0x1] %vm4744_vm1, %v11795_v13  ;;  %v3793_v24 = vadd.f32 %v12931_v35, %v3792_v32  ;;  %v4275_v54 = vpop.f32.mrf.mxu3 }
 0x305   : > { %4882 = vst.msk [vmem:[#allocation3 + $0x210] sm:$0xff] %vm3261_vm0, %v11795_v13  ;;  %v4276_v43 = vadd.f32 %v12931_v35, %v4275_v54 }
 0x306   : > { %4883 = vst.msk [vmem:[#allocation3 + $0x218] sm:$0x1] %vm4744_vm1, %v11795_v13  ;;  %v4350_v21 = vmax.f32 %v3793_v24, 0.0  ;;  %v4115_v10 = vpop.f32.mrf.mxu2 }
 0x307   : > { %4884 = vst.msk [vmem:[#allocation3 + $0x220] sm:$0xff] %vm3261_vm0, %v11795_v13  ;;  %v4116_v30 = vadd.f32 %v12931_v35, %v4115_v10 }
 0x308   : > { %4885 = vst.msk [vmem:[#allocation3 + $0x228] sm:$0x1] %vm4744_vm1, %v11795_v13  ;;  %v4606_v46 = vmax.f32 %v4350_v21, %v4478_v39 }
 0x309   : > { %4886 = vst.msk [vmem:[#allocation3 + $0x230] sm:$0xff] %vm3261_vm0, %v11795_v13  ;;  %v4479_v24 = vmax.f32 %v4116_v30, 0.0 }
 0x30a   : > { %4887 = vst.msk [vmem:[#allocation3 + $0x238] sm:$0x1] %vm4744_vm1, %v11795_v13  ;;  %v4542_v13 = vmax.f32 %v4273_v17, 0.0  ;;  %v4543_v17 = vmax.f32 %v4276_v43, 0.0  ;;  %v3958_v43 = vadd.f32 %v12931_v35, %v12228_v49 }
 0x30b   : > { %4940 = vst.msk [vmem:[#allocation2 + $0x151] sm:$0xff] %vm3261_vm0, %v4729_v28 }
 0x30c   : > { %4941 = vst.msk [vmem:[#allocation2 + $0x161] sm:$0xff] %vm3261_vm0, %v4730_v7  ;;  %v4670_v51 = vmax.f32 %v4414_v18, %v4542_v13  ;;  %v11565_v7 = vld [vmem:[%s12132_s14 + $0x320] sm:$0xff]  ;;  %10808 = vmatmul.msk.bf16.gmra.mxu0 %vm3261_vm0, %v11501_v33 }
 0x30d   : > { %4942 = vst.msk [vmem:[#allocation2 + $0x171] sm:$0xff] %vm3261_vm0, %v4731_v61 }
 0x30e   : > { %4943 = vst.msk [vmem:[#allocation2 + $0x181] sm:$0xff] %vm3261_vm0, %v4732_v40  ;;  %v4734_v41 = vmax.f32 %v4606_v46, %v4670_v51 }
 0x30f   : > { %4944 = vst.msk [vmem:[#allocation2 + $0x191] sm:$0xff] %vm3261_vm0, %v4733_v19  ;;  %v3795_v19 = vpop.f32.mrf.mxu0 }
 0x310   : > { %v6303_v45 = vld [vmem:[#allocation3 + $0x230] sm:$0xff]  ;;  %4945 = vst.msk [vmem:[#allocation2 + $0x1a1] sm:$0xff] %vm3261_vm0, %v4734_v41  ;;  %v4277_v41 = vpop.f32.mrf.mxu3 }
 0x311   : > { %v6335_v55 = vpack.c.bf16 %v6303_v45, %v6303_v45  ;;  %v4278_v33 = vadd.f32 %v12931_v35, %v4277_v41  ;;  %v3963_v41 = vadd.f32 %v12931_v35, %v12242_v56 }
 0x312   : > { %v5519_v58 = vld [vmem:[#allocation2 + $0x150] sm:$0xff]  ;;  %10872 = vmatmul.msk.bf16.gmra.mxu2 %vm3261_vm0, %v11565_v7 }
 0x313   : > { %v5295_v14 = vld [vmem:[#allocation2 + $0x151] sm:$0xff]  ;;  %6430 = vrot.lane.b32.xlu2 %v6335_v55, %s11798_s23  ;;  %v5551_v28 = vpack.c.bf16 %v5519_v58, %v5519_v58  ;;  %v4974_v40 = vld [vmem:[#allocation2 + $0x160] sm:$0xff]  ;;  %v3796_v55 = vadd.f32 %v12931_v35, %v3795_v19  ;;  %v4671_v58 = vmax.f32 %v4415_v25, %v4543_v17  ;;  %v4416_v17 = vmax.f32 %v3958_v43, 0.0 }
 0x314   : > { %v4973_v6 = vld [vmem:[#allocation2 + $0x150] sm:$0xff]  ;;  %v12980_v12 = vpack.c.bf16 %v5295_v14, %v5295_v14  ;;  %v5006_v42 = vpack.c.bf16 %v4974_v40, %v4974_v40  ;;  %v4117_v14 = vpop.f32.mrf.mxu2  ;;  %v3961_v19 = vadd.f32 %v12931_v35, %v12234_v53 }
 0x315   : > { %v5005_v61 = vpack.c.bf16 %v4973_v6, %v4973_v6  ;;  %5633 = vrot.lane.b32.xlu1 %v5551_v28, %s11798_s23  ;;  %v4976_v29 = vld [vmem:[#allocation2 + $0x180] sm:$0xff]  ;;  %v4975_v18 = vld [vmem:[#allocation2 + $0x170] sm:$0xff]  ;;  %v4351_v36 = vmax.f32 %v3796_v55, 0.0  ;;  %v4118_v54 = vadd.f32 %v12931_v35, %v4117_v14 }
 0x316   : > { %5410 = vrot.lane.b32.xlu0 %v12980_v12, %s11796_s17  ;;  %v8195_v13 = vld [vmem:[#allocation2 + $0x171] sm:$0xff]  ;;  %v5008_v45 = vpack.c.bf16 %v4976_v29, %v4976_v29  ;;  %v5007_v32 = vpack.c.bf16 %v4975_v18, %v4975_v18  ;;  %5039 = vst.msk [vmem:[#allocation4 + $0xf0] sm:$0xf] %vm5018_vm2, %v5006_v42  ;;  %v5520_v6 = vld [vmem:[#allocation2 + $0x160] sm:$0xff]  ;;  %v11566_v29 = vld [vmem:[%s12132_s14 + $0x328] sm:$0xff]  ;;  %v4544_v18 = vmax.f32 %v4278_v33, 0.0 }
 0x317   : > { %5038 = vst.msk [vmem:[#allocation4 + $0xe4] sm:$0xf] %vm5018_vm2, %v5005_v61  ;;  %v12993_v39 = vpack.c.bf16 %v8195_v13, %v8195_v13  ;;  %v6513_v51 = vld [vmem:[#allocation2 + $0x151] sm:$0xff]  ;;  %v4607_v7 = vmax.f32 %v4351_v36, %v4479_v24  ;;  %v5552_v61 = vpack.c.bf16 %v5520_v6, %v5520_v6  ;;  %v3797_v46 = vpop.f32.mrf.mxu0  ;;  %v4480_v40 = vmax.f32 %v4118_v54, 0.0  ;;  %v11502_v13 = vld [vmem:[%s12132_s14 + $0x128] sm:$0xff] }
 0x318   : > { %5041 = vst.msk [vmem:[#allocation4 + $0x108] sm:$0xf] %vm5018_vm2, %v5008_v45  ;;  %v6545_v21 = vpack.c.bf16 %v6513_v51, %v6513_v51  ;;  %v5521_v10 = vld [vmem:[#allocation2 + $0x170] sm:$0xff]  ;;  %v3798_v30 = vadd.f32 %v12931_v35, %v3797_v46  ;;  %v7523_v45 = vld [vmem:[#allocation2 + $0x161] sm:$0xff]  ;;  %v4672_v24 = vmax.f32 %v4416_v17, %v4544_v18  ;;  %v4280_v54 = vpop.f32.mrf.mxu3  ;;  %v4417_v43 = vmax.f32 %v3961_v19, 0.0 }
 0x319   : > { %16404 = vst [vmem:[#allocation73_spill] sm:$0xff] %v12993_v39  ;;  %v4735_v1 = vmax.f32 %v4607_v7, %v4671_v58  ;;  %v6514_v6 = vld [vmem:[#allocation2 + $0x161] sm:$0xff]  ;;  %v4281_v46 = vadd.f32 %v12931_v35, %v4280_v54 }
 0x31a   : > { %5040 = vst.msk [vmem:[#allocation4 + $0xfc] sm:$0xf] %vm5018_vm2, %v5007_v32  ;;  %v4352_v25 = vmax.f32 %v3798_v30, 0.0  ;;  %v7524_v32 = vld [vmem:[#allocation2 + $0x171] sm:$0xff] }
 0x31b   : > { %7823 = vrot.lane.b32.xlu2 %v7759_v48, %s11796_s17  ;;  %6579 = vst.msk [vmem:[#allocation4 + $0xec] sm:$0xf] %vm5018_vm2, %v12993_v39  ;;  %v13027_v7 = vpack.c.bf16 %v7524_v32, %v7524_v32  ;;  %v4545_v30 = vmax.f32 %v4281_v46, 0.0 }
 0x31c   : > { %6577 = vst.msk [vmem:[#allocation4 + $0xd4] sm:$0xf] %vm5018_vm2, %v6545_v21  ;;  %v4120_v48 = vpop.f32.mrf.mxu2  ;;  %v4608_v49 = vmax.f32 %v4352_v25, %v4480_v40  ;;  %v7555_v21 = vpack.c.bf16 %v7523_v45, %v7523_v45  ;;  %10809 = vmatmul.msk.bf16.gmra.mxu0 %vm3261_vm0, %v11502_v13  ;;  %v5298_v25 = vld [vmem:[#allocation2 + $0x181] sm:$0xff]  ;;  %v11567_v13 = vld [vmem:[%s12132_s14 + $0x330] sm:$0xff] }
 0x31d   : > { %6177 = vrot.lane.b32.xlu1 %v5551_v28, %s11796_s17  ;;  %v13009_v28 = vpack.c.bf16 %v5521_v10, %v5521_v10  ;;  %4946 = vst.msk [vmem:[#allocation2 + $0x1b1] sm:$0xff] %vm3261_vm0, %v4735_v1  ;;  %v4121_v42 = vadd.f32 %v12931_v35, %v4120_v48  ;;  %v6546_v1 = vpack.c.bf16 %v6514_v6, %v6514_v6  ;;  %v4978_v45 = vld [vmem:[#allocation2 + $0x1a0] sm:$0xff]  ;;  %v11503_v6 = vld [vmem:[%s12132_s14 + $0x130] sm:$0xff] }
 0x31e   : > { %5954 = vrot.lane.b32.xlu0 %v12980_v12, %s11797_s18  ;;  %v4736_v14 = vmax.f32 %v4608_v49, %v4672_v24  ;;  %v4673_v48 = vmax.f32 %v4417_v43, %v4545_v30  ;;  %v5330_v49 = vpack.c.bf16 %v5298_v25, %v5298_v25  ;;  %v8198_v24 = vld [vmem:[#allocation2 + $0x1a1] sm:$0xff] }
 0x31f   : > { %v3800_v55 = vpop.f32.mrf.mxu0  ;;  %v4481_v58 = vmax.f32 %v4121_v42, 0.0  ;;  %6578 = vst.msk [vmem:[#allocation4 + $0xe0] sm:$0xf] %vm5018_vm2, %v6546_v1  ;;  %v6516_v43 = vld [vmem:[#allocation2 + $0x181] sm:$0xff] }
 0x320   : > { %v3801_v36 = vadd.f32 %v12931_v35, %v3800_v55  ;;  %4947 = vst.msk [vmem:[#allocation2 + $0x1c1] sm:$0xff] %vm3261_vm0, %v4736_v14  ;;  %v4282_v32 = vpop.f32.mrf.mxu3  ;;  %v5010_v55 = vpack.c.bf16 %v4978_v45, %v4978_v45  ;;  %v6548_v46 = vpack.c.bf16 %v6516_v43, %v6516_v43 }
 0x321   : > { %v4283_v56 = vadd.f32 %v12931_v35, %v4282_v32 }
 0x322   : > { %10873 = vmatmul.msk.bf16.gmra.mxu2 %vm3261_vm0, %v11566_v29  ;;  %v4353_v10 = vmax.f32 %v3801_v36, 0.0  ;;  %v4418_v36 = vmax.f32 %v3963_v41, 0.0  ;;  %5043 = vst.msk [vmem:[#allocation4 + $0x120] sm:$0xf] %vm5018_vm2, %v5010_v55  ;;  %v6517_v55 = vld [vmem:[#allocation2 + $0x191] sm:$0xff] }
 0x323   : > { %5635 = vrot.lane.b32.xlu2 %v5552_v61, %s11798_s23  ;;  %6580 = vst.msk [vmem:[#allocation4 + $0xf8] sm:$0xf] %vm5018_vm2, %v6548_v46 }
 0x324   : > { %v4122_v53 = vpop.f32.mrf.mxu2 }
 0x325   : > { %7637 = vrot.lane.b32.xlu1 %v12980_v12, %s11797_s18  ;;  %v4977_v12 = vld [vmem:[#allocation2 + $0x190] sm:$0xff]  ;;  %v4123_v40 = vadd.f32 %v12931_v35, %v4122_v53  ;;  %v3966_v53 = vadd.f32 %v12931_v35, %v12248_v60 }
 0x326   : > { %5637 = vrot.lane.b32.xlu0 %v13009_v28, %s11798_s23  ;;  %v5009_v51 = vpack.c.bf16 %v4977_v12, %v4977_v12  ;;  %v13047_v12 = vpack.c.bf16 %v8198_v24, %v8198_v24 }
 0x327   : > { %v3802_v29 = vpop.f32.mrf.mxu0  ;;  %v4482_v18 = vmax.f32 %v4123_v40, 0.0  ;;  %v4419_v41 = vmax.f32 %v3966_v53, 0.0  ;;  %v4980_v32 = vld [vmem:[#allocation2 + $0x1c0] sm:$0xff]  ;;  %v11504_v53 = vld [vmem:[%s12132_s14 + $0x138] sm:$0xff] }
 0x328   : > { %5042 = vst.msk [vmem:[#allocation4 + $0x114] sm:$0xf] %vm5018_vm2, %v5009_v51  ;;  %v3803_v17 = vadd.f32 %v12931_v35, %v3802_v29  ;;  %v4546_v51 = vmax.f32 %v4283_v56, 0.0  ;;  %v5012_v24 = vpack.c.bf16 %v4980_v32, %v4980_v32 }
 0x329   : > { %16405 = vst [vmem:[#allocation74_spill] sm:$0xff] %v13047_v12 }
 0x32a   : > { %v4354_v42 = vmax.f32 %v3803_v17, 0.0  ;;  %6582 = vst.msk [vmem:[#allocation4 + $0x110] sm:$0xf] %vm5018_vm2, %v13047_v12  ;;  %v4674_v1 = vmax.f32 %v4418_v36, %v4546_v51  ;;  %v6549_v36 = vpack.c.bf16 %v6517_v55, %v6517_v55 }
 0x32b   : > { %6179 = vrot.lane.b32.xlu2 %v5552_v61, %s11796_s17  ;;  %v4609_v61 = vmax.f32 %v4353_v10, %v4481_v58  ;;  %v5522_v10 = vld [vmem:[#allocation2 + $0x180] sm:$0xff]  ;;  %5045 = vst.msk [vmem:[#allocation4 + $0x138] sm:$0xf] %vm5018_vm2, %v5012_v24 }
 0x32c   : > { %v4125_v19 = vpop.f32.mrf.mxu2  ;;  %v4610_v58 = vmax.f32 %v4354_v42, %v4482_v18  ;;  %10810 = vmatmul.msk.bf16.gmra.mxu0 %vm3261_vm0, %v11503_v6  ;;  %6581 = vst.msk [vmem:[#allocation4 + $0x104] sm:$0xf] %vm5018_vm2, %v6549_v36  ;;  %v6519_v36 = vld [vmem:[#allocation2 + $0x1b1] sm:$0xff] }
 0x32d   : > { %5412 = vrot.lane.b32.xlu1 %v7555_v21, %s11796_s17  ;;  %v4737_v33 = vmax.f32 %v4609_v61, %v4673_v48  ;;  %v4126_v14 = vadd.f32 %v12931_v35, %v4125_v19  ;;  %v5554_v61 = vpack.c.bf16 %v5522_v10, %v5522_v10  ;;  %v4285_v48 = vpop.f32.mrf.mxu3 }
 0x32e   : > { %7641 = vrot.lane.b32.xlu0 %v13027_v7, %s11797_s18  ;;  %v4738_v25 = vmax.f32 %v4610_v58, %v4674_v1  ;;  %v4286_v60 = vadd.f32 %v12931_v35, %v4285_v48  ;;  %v5524_v1 = vld [vmem:[#allocation2 + $0x1a0] sm:$0xff]  ;;  %v4979_v48 = vld [vmem:[#allocation2 + $0x1b0] sm:$0xff] }
 0x32f   : > { %4948 = vst.msk [vmem:[#allocation2 + $0x1d1] sm:$0xff] %vm3261_vm0, %v4737_v33  ;;  %v4483_v40 = vmax.f32 %v4126_v14, 0.0 }
 0x330   : > { %4949 = vst.msk [vmem:[#allocation2 + $0x1e1] sm:$0xff] %vm3261_vm0, %v4738_v25  ;;  %v4547_v42 = vmax.f32 %v4286_v60, 0.0  ;;  %v13085_v25 = vpack.c.bf16 %v5524_v1, %v5524_v1 }
 0x332   : > { %10874 = vmatmul.msk.bf16.gmra.mxu2 %vm3261_vm0, %v11567_v13  ;;  %v3968_v13 = vadd.f32 %v12931_v35, %v12258_v0  ;;  %v4675_v45 = vmax.f32 %v4419_v41, %v4547_v42  ;;  %v5523_v42 = vld [vmem:[#allocation2 + $0x190] sm:$0xff] }
 0x333   : > { %7639 = vrot.lane.b32.xlu2 %v7555_v21, %s11797_s18  ;;  %v5555_v24 = vpack.c.bf16 %v5523_v42, %v5523_v42 }
 0x334   : > { %v4127_v29 = vpop.f32.mrf.mxu2  ;;  %v4420_v10 = vmax.f32 %v3968_v13, 0.0  ;;  %v5373_v13 = vpop.permute.xlu2 %5372 }
 0x335   : > { %5956 = vrot.lane.b32.xlu1 %v7555_v21, %s11797_s18  ;;  %v3805_v21 = vpop.f32.mrf.mxu0  ;;  %v4128_v33 = vadd.f32 %v12931_v35, %v4127_v29  ;;  %v4287_v6 = vpop.f32.mrf.mxu3 }
 0x336   : > { %5416 = vrot.lane.b32.xlu0 %v5330_v49, %s11796_s17  ;;  %v3806_v54 = vadd.f32 %v12931_v35, %v3805_v21  ;;  %v4288_v0 = vadd.f32 %v12931_v35, %v4287_v6  ;;  %v4970_v6 = vld [vmem:[#allocation2 + $0x120] sm:$0xff] }
 0x337   : > { %v4484_v58 = vmax.f32 %v4128_v33, 0.0 }
 0x338   : > { %v4355_v30 = vmax.f32 %v3806_v54, 0.0  ;;  %v5299_v54 = vld [vmem:[#allocation2 + $0x191] sm:$0xff] }
 0x33a   : > { %v4611_v17 = vmax.f32 %v4355_v30, %v4483_v40 }
 0x33b   : > { %5414 = vrot.lane.b32.xlu2 %v13027_v7, %s11796_s17 }
 0x33c   : > { %v4739_v14 = vmax.f32 %v4611_v17, %v4675_v45  ;;  %v4130_v51 = vpop.f32.mrf.mxu2  ;;  %10811 = vmatmul.msk.bf16.gmra.mxu0 %vm3261_vm0, %v11504_v53  ;;  %v5011_v17 = vpack.c.bf16 %v4979_v48, %v4979_v48 }
 0x33d   : > { %5639 = vrot.lane.b32.xlu1 %v5554_v61, %s11798_s23  ;;  %v3807_v18 = vpop.f32.mrf.mxu0  ;;  %v4131_v46 = vadd.f32 %v12931_v35, %v4130_v51  ;;  %v4290_v33 = vpop.f32.mrf.mxu3 }
 0x33e   : > { %5960 = vrot.lane.b32.xlu0 %v5330_v49, %s11797_s18  ;;  %v3808_v19 = vadd.f32 %v12931_v35, %v3807_v18  ;;  %4950 = vst.msk [vmem:[#allocation2 + $0x1f1] sm:$0xff] %vm3261_vm0, %v4739_v14  ;;  %v4291_v18 = vadd.f32 %v12931_v35, %v4290_v33  ;;  %v6551_v14 = vpack.c.bf16 %v6519_v36, %v6519_v36 }
 0x33f   : > { %v4485_v60 = vmax.f32 %v4131_v46, 0.0  ;;  %5044 = vst.msk [vmem:[#allocation4 + $0x12c] sm:$0xf] %vm5018_vm2, %v5011_v17 }
 0x340   : > { %v4356_v56 = vmax.f32 %v3808_v19, 0.0  ;;  %v7527_v19 = vld [vmem:[#allocation2 + $0x1a1] sm:$0xff]  ;;  %v4549_v55 = vmax.f32 %v4291_v18, 0.0  ;;  %6583 = vst.msk [vmem:[#allocation4 + $0x11c] sm:$0xf] %vm5018_vm2, %v6551_v14 }
 0x341   : > { %v13095_v51 = vpack.c.bf16 %v7527_v19, %v7527_v19  ;;  %v8201_v19 = vld [vmem:[#allocation2 + $0x1d1] sm:$0xff] }
 0x342   : > { %v4612_v21 = vmax.f32 %v4356_v56, %v4484_v58  ;;  %v4954_v58 = vld [vmem:[#allocation2] sm:$0xff] }
 0x343   : > { %5958 = vrot.lane.b32.xlu2 %v13027_v7, %s11797_s18  ;;  %v4548_v7 = vmax.f32 %v4288_v0, 0.0 }
 0x345   : > { %7643 = vrot.lane.b32.xlu1 %v5330_v49, %s11797_s18  ;;  %v3810_v43 = vpop.f32.mrf.mxu0  ;;  %v4676_v40 = vmax.f32 %v4420_v10, %v4548_v7  ;;  %v3971_v49 = vadd.f32 %v12931_v35, %v12264_v4  ;;  %v4132_v4 = vpop.f32.mrf.mxu2  ;;  %v4986_v10 = vpack.c.bf16 %v4954_v58, %v4954_v58 }
 0x346   : > { %6183 = vrot.lane.b32.xlu0 %v5554_v61, %s11796_s17  ;;  %v3811_v30 = vadd.f32 %v12931_v35, %v3810_v43  ;;  %v5331_v61 = vpack.c.bf16 %v5299_v54, %v5299_v54  ;;  %v5148_v7 = vpop.permute.xlu0 %5147  ;;  %v5301_v54 = vld [vmem:[#allocation2 + $0x1b1] sm:$0xff]  ;;  %v11505_v43 = vld [vmem:[%s12132_s14 + $0x140] sm:$0xff]  ;;  %v4292_v18 = vpop.f32.mrf.mxu3 }
 0x347   : > { %v4740_v29 = vmax.f32 %v4612_v21, %v4676_v40  ;;  %v5002_v21 = vpack.c.bf16 %v4970_v6, %v4970_v6  ;;  %5019 = vst.msk [vmem:[#allocation4] sm:$0xf] %vm5018_vm2, %v4986_v10 }
 0x348   : > { %v4357_v41 = vmax.f32 %v3811_v30, 0.0  ;;  %v4133_v30 = vadd.f32 %v12931_v35, %v4132_v4  ;;  %5244 = vst.msk [vmem:[#allocation4] sm:$0xf] %vm5243_vm3, %v5148_v7 }
 0x349   : > { %4951 = vst.msk [vmem:[#allocation2 + $0x201] sm:$0xff] %vm3261_vm0, %v4740_v29  ;;  %v5333_v29 = vpack.c.bf16 %v5301_v54, %v5301_v54 }
 0x34a   : > { %v4613_v45 = vmax.f32 %v4357_v41, %v4485_v60  ;;  %5035 = vst.msk [vmem:[#allocation4 + $0xc0] sm:$0xf] %vm5018_vm2, %v5002_v21  ;;  %v3973_v60 = vadd.f32 %v12931_v35, %v12276_v9  ;;  %v4486_v33 = vmax.f32 %v4133_v30, 0.0  ;;  %v4293_v9 = vadd.f32 %v12931_v35, %v4292_v18  ;;  %v4982_v18 = vld [vmem:[#allocation2 + $0x1e0] sm:$0xff] }
 0x34b   : > { %6181 = vrot.lane.b32.xlu2 %v13009_v28, %s11796_s17  ;;  %v4421_v28 = vmax.f32 %v3971_v49, 0.0  ;;  %v13109_v49 = vpop.permute.xlu2 %6173  ;;  %5469 = vst.msk [vmem:[#allocation4] sm:$0xf] %vm5468_vm4, %v5373_v13 }
 0x34c   : > { %16406 = vst [vmem:[#allocation75_spill] sm:$0xff] %v13109_v49  ;;  %10812 = vmatmul.msk.bf16.gmra.mxu0 %vm3261_vm0, %v11505_v43  ;;  %v4550_v58 = vmax.f32 %v4293_v9, 0.0  ;;  %v11506_v43 = vld [vmem:[%s12132_s14 + $0x148] sm:$0xff] }
 0x34d   : > { %5418 = vrot.lane.b32.xlu1 %v5331_v61, %s11796_s17  ;;  %v3812_v32 = vpop.f32.mrf.mxu0  ;;  %v4677_v56 = vmax.f32 %v4421_v28, %v4549_v55  ;;  %v4135_v53 = vpop.f32.mrf.mxu2  ;;  %v5525_v55 = vld [vmem:[#allocation2 + $0x1b0] sm:$0xff]  ;;  %v5302_v9 = vld [vmem:[#allocation2 + $0x1c1] sm:$0xff] }
 0x34e   : > { %5643 = vrot.lane.b32.xlu0 %v13085_v25, %s11798_s23  ;;  %v4136_v1 = vadd.f32 %v12931_v35, %v4135_v53  ;;  %v3813_v46 = vadd.f32 %v12931_v35, %v3812_v32  ;;  %v13121_v32 = vpack.c.bf16 %v8201_v19, %v8201_v19  ;;  %v4981_v19 = vld [vmem:[#allocation2 + $0x1d0] sm:$0xff] }
 0x34f   : > { %v4741_v0 = vmax.f32 %v4613_v45, %v4677_v56  ;;  %v4422_v45 = vmax.f32 %v3973_v60, 0.0 }
 0x350   : > { %v4487_v41 = vmax.f32 %v4136_v1, 0.0  ;;  %v4358_v4 = vmax.f32 %v3813_v46, 0.0  ;;  %16407 = vst [vmem:[#allocation76_spill] sm:$0xff] %v13121_v32  ;;  %v6071_v46 = vld [vmem:[#allocation2 + $0x1c0] sm:$0xff] }
 0x351   : > { %4952 = vst.msk [vmem:[#allocation2 + $0x211] sm:$0xff] %vm3261_vm0, %v4741_v0  ;;  %v4678_v10 = vmax.f32 %v4422_v45, %v4550_v58  ;;  %v13147_v60 = vpack.c.bf16 %v6071_v46, %v6071_v46  ;;  %v5013_v45 = vpack.c.bf16 %v4981_v19, %v4981_v19  ;;  %v13161_v58 = vpop.f32.mrf.mxu1 }
 0x352   : > { %v4614_v36 = vmax.f32 %v4358_v4, %v4486_v33  ;;  %6585 = vst.msk [vmem:[#allocation4 + $0x134] sm:$0xf] %vm5018_vm2, %v13121_v32 }
 0x353   : > { %5641 = vrot.lane.b32.xlu2 %v5555_v24, %s11798_s23  ;;  %v13130_v0 = vpop.permute.xlu2 %6205  ;;  %5046 = vst.msk [vmem:[#allocation4 + $0x144] sm:$0xf] %vm5018_vm2, %v5013_v45 }
 0x354   : > { %v4742_v53 = vmax.f32 %v4614_v36, %v4678_v10 }
 0x355   : > { %5962 = vrot.lane.b32.xlu1 %v5331_v61, %s11797_s18  ;;  %v3815_v40 = vpop.f32.mrf.mxu0  ;;  %v4137_v42 = vpop.f32.mrf.mxu2 }
 0x356   : > { %7647 = vrot.lane.b32.xlu0 %v13095_v51, %s11797_s18  ;;  %v3816_v48 = vadd.f32 %v12931_v35, %v3815_v40  ;;  %v4138_v13 = vadd.f32 %v12931_v35, %v4137_v42  ;;  %v5405_v6 = vpop.permute.xlu0 %5404  ;;  %4953 = vst.msk [vmem:[#allocation2 + $0x221] sm:$0xff] %vm3261_vm0, %v4742_v53 }
 0x358   : > { %v4359_v17 = vmax.f32 %v3816_v48, 0.0  ;;  %v4488_v14 = vmax.f32 %v4138_v13, 0.0 }
 0x35a   : > { %v4615_v28 = vmax.f32 %v4359_v17, %v4487_v41 }
 0x35b   : > { %7645 = vrot.lane.b32.xlu2 %v5331_v61, %s11797_s18 }
 0x35c   : > { %v4679_v61 = vmax.f32 %v12296_v22, %v4615_v28  ;;  %v13132_v22 = vpack.c.bf16 %v5525_v55, %v5525_v55  ;;  %10813 = vmatmul.msk.bf16.gmra.mxu0 %vm3261_vm0, %v11506_v43 }
 0x35d   : > { %6185 = vrot.lane.b32.xlu1 %v5555_v24, %s11796_s17  ;;  %v3817_v56 = vpop.f32.mrf.mxu0 }
 0x35e   : > { %5422 = vrot.lane.b32.xlu0 %v5333_v29, %s11796_s17  ;;  %4889 = vst.msk [vmem:[#allocation3 + $0x10] sm:$0xff] %vm3261_vm0, %v4679_v61  ;;  %v3818_v24 = vadd.f32 %v12931_v35, %v3817_v56  ;;  %v5527_v61 = vld [vmem:[#allocation2 + $0x1d0] sm:$0xff] }
 0x360   : > { %v4360_v7 = vmax.f32 %v3818_v24, 0.0  ;;  %v5559_v24 = vpack.c.bf16 %v5527_v61, %v5527_v61 }
 0x362   : > { %v4616_v54 = vmax.f32 %v4360_v7, %v4488_v14 }
 0x363   : > { %5420 = vrot.lane.b32.xlu2 %v13095_v51, %s11796_s17  ;;  %v5180_v21 = vpop.permute.xlu1 %5179 }
 0x364   : > { %5260 = vst.msk [vmem:[#allocation4 + $0xc0] sm:$0xf] %vm5243_vm3, %v5180_v21  ;;  %v4680_v1 = vmax.f32 %v12307_v37, %v4616_v54  ;;  %v4140_v40 = vpop.f32.mrf.mxu2  ;;  %v4983_v37 = vld [vmem:[#allocation2 + $0x1f0] sm:$0xff] }
 0x365   : > { %5645 = vrot.lane.b32.xlu1 %v13132_v22, %s11798_s23  ;;  %5485 = vst.msk [vmem:[#allocation4 + $0xc0] sm:$0xf] %vm5468_vm4, %v5405_v6  ;;  %v3820_v30 = vpop.f32.mrf.mxu0  ;;  %v4141_v41 = vadd.f32 %v12931_v35, %v4140_v40  ;;  %v5015_v33 = vpack.c.bf16 %v4983_v37, %v4983_v37  ;;  %v11507_v54 = vld [vmem:[%s12132_s14 + $0x150] sm:$0xff] }
 0x366   : > { %5966 = vrot.lane.b32.xlu0 %v5333_v29, %s11797_s18  ;;  %4890 = vst.msk [vmem:[#allocation3 + $0x20] sm:$0xff] %vm3261_vm0, %v4680_v1  ;;  %v3821_v48 = vadd.f32 %v12931_v35, %v3820_v30  ;;  %v7530_v1 = vld [vmem:[#allocation2 + $0x1d1] sm:$0xff] }
 0x367   : > { %v4489_v4 = vmax.f32 %v4141_v41, 0.0  ;;  %5048 = vst.msk [vmem:[#allocation4 + $0x15c] sm:$0xf] %vm5018_vm2, %v5015_v33  ;;  %v13179_v40 = vpack.c.bf16 %v7530_v1, %v7530_v1 }
 0x368   : > { %v4361_v17 = vmax.f32 %v3821_v48, 0.0 }
 0x36a   : > { %v4617_v42 = vmax.f32 %v4361_v17, %v4489_v4  ;;  %v13184_v17 = vpop.permute.xlu0 %7599 }
 0x36b   : > { %5964 = vrot.lane.b32.xlu2 %v13095_v51, %s11797_s18  ;;  %v5014_v51 = vpack.c.bf16 %v4982_v18, %v4982_v18  ;;  %v13166_v14 = vpop.permute.xlu1 %6398  ;;  %16410 = vst [vmem:[#allocation79_spill] sm:$0xff] %v13184_v17  ;;  %v5304_v18 = vld [vmem:[#allocation2 + $0x1e1] sm:$0xff] }
 0x36c   : > { %v4681_v13 = vmax.f32 %v12322_v31, %v4617_v42  ;;  %v4142_v36 = vpop.f32.mrf.mxu2  ;;  %v5334_v31 = vpack.c.bf16 %v5302_v9, %v5302_v9  ;;  %16408 = vst [vmem:[#allocation77_spill] sm:$0xff] %v13166_v14  ;;  %10814 = vmatmul.msk.bf16.gmra.mxu0 %vm3261_vm0, %v11507_v54  ;;  %v4984_v42 = vld [vmem:[#allocation2 + $0x200] sm:$0xff]  ;;  %v13200_v61 = vpack.c.bf16 %v5304_v18, %v5304_v18  ;;  %v4985_v18 = vld [vmem:[#allocation2 + $0x210] sm:$0xff] }
 0x36d   : > { %v13150_v28 = vpop.permute.xlu2 %6430  ;;  %7649 = vrot.lane.b32.xlu1 %v5333_v29, %s11797_s18  ;;  %v3822_v55 = vpop.f32.mrf.mxu0  ;;  %5047 = vst.msk [vmem:[#allocation4 + $0x150] sm:$0xf] %vm5018_vm2, %v5014_v51  ;;  %v4143_v56 = vadd.f32 %v12931_v35, %v4142_v36  ;;  %v5016_v45 = vpack.c.bf16 %v4984_v42, %v4984_v42 }
 0x36e   : > { %6191 = vrot.lane.b32.xlu0 %v13147_v60, %s11796_s17  ;;  %4891 = vst.msk [vmem:[#allocation3 + $0x30] sm:$0xff] %vm3261_vm0, %v4681_v13  ;;  %v3823_v29 = vadd.f32 %v12931_v35, %v3822_v55 }
 0x36f   : > { %v4490_v10 = vmax.f32 %v4143_v56, 0.0  ;;  %5049 = vst.msk [vmem:[#allocation4 + $0x168] sm:$0xf] %vm5018_vm2, %v5016_v45 }
 0x370   : > { %v4362_v6 = vmax.f32 %v3823_v29, 0.0 }
 0x372   : > { %v4618_v7 = vmax.f32 %v4362_v6, %v4490_v10 }
 0x373   : > { %6187 = vrot.lane.b32.xlu2 %v13085_v25, %s11796_s17  ;;  %v13191_v37 = vpop.permute.xlu1 %7631 }
 0x374   : > { %v4682_v53 = vmax.f32 %v12333_v16, %v4618_v7  ;;  %v4145_v46 = vpop.f32.mrf.mxu2  ;;  %v13182_v16 = vpop.f32.mrf.mxu1  ;;  %16411 = vst [vmem:[#allocation80_spill] sm:$0xff] %v13191_v37  ;;  %v11508_v7 = vld [vmem:[%s12132_s14 + $0x158] sm:$0xff] }
 0x375   : > { %v13168_v21 = vpop.permute.xlu2 %7823  ;;  %5424 = vrot.lane.b32.xlu1 %v5334_v31, %s11796_s17  ;;  %v3825_v43 = vpop.f32.mrf.mxu0  ;;  %v4146_v30 = vadd.f32 %v12931_v35, %v4145_v46 }
 0x376   : > { %16409 = vst [vmem:[#allocation78_spill] sm:$0xff] %v13168_v21  ;;  %5649 = vrot.lane.b32.xlu0 %v5559_v24, %s11798_s23  ;;  %v3826_v25 = vadd.f32 %v12931_v35, %v3825_v43 }
 0x377   : > { %4892 = vst.msk [vmem:[#allocation3 + $0x40] sm:$0xff] %vm3261_vm0, %v4682_v53  ;;  %v4491_v41 = vmax.f32 %v4146_v30, 0.0  ;;  %v5528_v53 = vld [vmem:[#allocation2 + $0x1e0] sm:$0xff] }
 0x378   : > { %v4363_v48 = vmax.f32 %v3826_v25, 0.0  ;;  %v5560_v46 = vpack.c.bf16 %v5528_v53, %v5528_v53 }
 0x37b   : > { %6189 = vrot.lane.b32.xlu2 %v13132_v22, %s11796_s17  ;;  %v4619_v22 = vmax.f32 %v4363_v48, %v4491_v41  ;;  %v7408_v48 = vld [vmem:[#allocation3 + $0x10] sm:$0xff] }
 0x37c   : > { %v4147_v51 = vpop.f32.mrf.mxu2  ;;  %v13207_v56 = vpop.f32.mrf.mxu1  ;;  %10815 = vmatmul.msk.bf16.gmra.mxu0 %vm3261_vm0, %v11508_v7  ;;  %v13220_v41 = vpack.c.bf16 %v7408_v48, %v7408_v48 }
 0x37d   : > { %v13186_v4 = vpop.permute.xlu2 %5635  ;;  %5968 = vrot.lane.b32.xlu1 %v5334_v31, %s11797_s18  ;;  %v4683_v33 = vmax.f32 %v12348_v38, %v4619_v22  ;;  %v3827_v19 = vpop.f32.mrf.mxu0  ;;  %v4148_v9 = vadd.f32 %v12931_v35, %v4147_v51 }
 0x37e   : > { %7653 = vrot.lane.b32.xlu0 %v13179_v40, %s11797_s18  ;;  %v3828_v13 = vadd.f32 %v12931_v35, %v3827_v19  ;;  %16413 = vst [vmem:[#allocation82_spill] sm:$0xff] %v13220_v41  ;;  %v5530_v19 = vld [vmem:[#allocation2 + $0x200] sm:$0xff] }
 0x37f   : > { %4893 = vst.msk [vmem:[#allocation3 + $0x50] sm:$0xff] %vm3261_vm0, %v4683_v33  ;;  %v4492_v55 = vmax.f32 %v4148_v9, 0.0  ;;  %v7411_v49 = vld [vmem:[#allocation3 + $0x40] sm:$0xff] }
 0x380   : > { %v4364_v38 = vmax.f32 %v3828_v13, 0.0  ;;  %5790 = vst.msk [vmem:[#allocation4 + $0x4] sm:$0xf] %vm5018_vm2, %v13220_v41  ;;  %v5017_v13 = vpack.c.bf16 %v4985_v18, %v4985_v18 }
 0x382   : > { %v4620_v29 = vmax.f32 %v4364_v38, %v4492_v55  ;;  %5050 = vst.msk [vmem:[#allocation4 + $0x174] sm:$0xf] %vm5018_vm2, %v5017_v13 }
 0x383   : > { %5647 = vrot.lane.b32.xlu2 %v13147_v60, %s11798_s23 }
 0x384   : > { %v4684_v60 = vmax.f32 %v12357_v57, %v4620_v29  ;;  %v13237_v55 = vpop.f32.mrf.mxu1 }
 0x385   : > { %v13202_v36 = vpop.permute.xlu2 %6179  ;;  %6193 = vrot.lane.b32.xlu1 %v5559_v24, %s11796_s17  ;;  %v3830_v54 = vpop.f32.mrf.mxu0 }
 0x386   : > { %5428 = vrot.lane.b32.xlu0 %v13200_v61, %s11796_s17  ;;  %v4150_v1 = vpop.f32.mrf.mxu2  ;;  %4894 = vst.msk [vmem:[#allocation3 + $0x60] sm:$0xff] %vm3261_vm0, %v4684_v60  ;;  %v3831_v24 = vadd.f32 %v12931_v35, %v3830_v54 }
 0x387   : > { %v13209_v6 = vpop.permute.xlu1 %5633  ;;  %v4151_v43 = vadd.f32 %v12931_v35, %v4150_v1 }
 0x388   : > { %16412 = vst [vmem:[#allocation81_spill] sm:$0xff] %v13209_v6  ;;  %v13211_v10 = vpop.permute.xlu0 %5410  ;;  %v4365_v25 = vmax.f32 %v3831_v24, 0.0 }
 0x389   : > { %v4493_v30 = vmax.f32 %v4151_v43, 0.0  ;;  %v11509_v43 = vld [vmem:[%s12132_s14 + $0x160] sm:$0xff] }
 0x38b   : > { %7651 = vrot.lane.b32.xlu2 %v5334_v31, %s11797_s18  ;;  %v4621_v22 = vmax.f32 %v4365_v25, %v4493_v30 }
 0x38c   : > { %10816 = vmatmul.msk.bf16.gmra.mxu0 %vm3261_vm0, %v11509_v43 }
 0x38d   : > { %v13222_v57 = vpop.permute.xlu2 %7639  ;;  %5651 = vrot.lane.b32.xlu1 %v5560_v46, %s11798_s23  ;;  %v4685_v42 = vmax.f32 %v12372_v34, %v4621_v22  ;;  %v3832_v51 = vpop.f32.mrf.mxu0  ;;  %v5562_v34 = vpack.c.bf16 %v5530_v19, %v5530_v19  ;;  %v5727_v22 = vld [vmem:[#allocation3 + $0x20] sm:$0xff]  ;;  %v5728_v19 = vld [vmem:[#allocation3 + $0x30] sm:$0xff] }
 0x38e   : > { %5972 = vrot.lane.b32.xlu0 %v13200_v61, %s11797_s18  ;;  %v4152_v45 = vpop.f32.mrf.mxu2  ;;  %v3833_v9 = vadd.f32 %v12931_v35, %v3832_v51 }
 0x38f   : > { %v13229_v31 = vpop.permute.xlu1 %6177  ;;  %4895 = vst.msk [vmem:[#allocation3 + $0x70] sm:$0xff] %vm3261_vm0, %v4685_v42  ;;  %v4153_v38 = vadd.f32 %v12931_v35, %v4152_v45  ;;  %v13262_v45 = vpack.c.bf16 %v5728_v19, %v5728_v19 }
 0x390   : > { %16414 = vst [vmem:[#allocation83_spill] sm:$0xff] %v13229_v31  ;;  %v13231_v33 = vpop.permute.xlu0 %5954  ;;  %v4366_v29 = vmax.f32 %v3833_v9, 0.0 }
 0x391   : > { %v4494_v60 = vmax.f32 %v4153_v38, 0.0  ;;  %16416 = vst [vmem:[#allocation85_spill] sm:$0xff] %v13262_v45 }
 0x392   : > { %5792 = vst.msk [vmem:[#allocation4 + $0x1c] sm:$0xf] %vm5018_vm2, %v13262_v45 }
 0x393   : > { %5426 = vrot.lane.b32.xlu2 %v13179_v40, %s11796_s17  ;;  %v4622_v53 = vmax.f32 %v4366_v29, %v4494_v60  ;;  %v5305_v29 = vld [vmem:[#allocation2 + $0x1f1] sm:$0xff]  ;;  %v7533_v60 = vld [vmem:[#allocation2 + $0x201] sm:$0xff] }
 0x395   : > { %v13242_v7 = vpop.permute.xlu2 %5414  ;;  %6195 = vrot.lane.b32.xlu1 %v5560_v46, %s11796_s17  ;;  %v4686_v24 = vmax.f32 %v12383_v44, %v4622_v53  ;;  %v3835_v25 = vpop.f32.mrf.mxu0  ;;  %v13255_v46 = vpack.c.bf16 %v5727_v22, %v5727_v22  ;;  %v13287_v22 = vpack.c.bf16 %v7533_v60, %v7533_v60  ;;  %v11510_v60 = vld [vmem:[%s12132_s14 + $0x168] sm:$0xff] }
 0x396   : > { %5655 = vrot.lane.b32.xlu0 %v5562_v34, %s11798_s23  ;;  %v3836_v30 = vadd.f32 %v12931_v35, %v3835_v25  ;;  %v4155_v48 = vpop.f32.mrf.mxu2  ;;  %v13260_v44 = vpop.f32.mrf.mxu1 }
 0x397   : > { %v13246_v54 = vpop.permute.xlu1 %7637  ;;  %4896 = vst.msk [vmem:[#allocation3 + $0x80] sm:$0xff] %vm3261_vm0, %v4686_v24  ;;  %v4156_v42 = vadd.f32 %v12931_v35, %v4155_v48  ;;  %v5529_v35 = vld [vmem:[#allocation2 + $0x1f0] sm:$0xff]  ;;  %v5337_v48 = vpack.c.bf16 %v5305_v29, %v5305_v29 }
 0x398   : > { %v13248_v1 = vpop.permute.xlu0 %5637  ;;  %16415 = vst [vmem:[#allocation84_spill] sm:$0xff] %v13255_v46  ;;  %v4367_v18 = vmax.f32 %v3836_v30, 0.0  ;;  %v5561_v43 = vpack.c.bf16 %v5529_v35, %v5529_v35 }
 0x399   : > { %v4495_v51 = vmax.f32 %v4156_v42, 0.0  ;;  %5791 = vst.msk [vmem:[#allocation4 + $0x10] sm:$0xf] %vm5018_vm2, %v13255_v46 }
 0x39b   : > { %5970 = vrot.lane.b32.xlu2 %v13179_v40, %s11797_s18  ;;  %v4623_v40 = vmax.f32 %v4367_v18, %v4495_v51 }
 0x39c   : > { %10817 = vmatmul.msk.bf16.gmra.mxu0 %vm3261_vm0, %v11510_v60 }
 0x39d   : > { %v13266_v13 = vpop.permute.xlu2 %5958  ;;  %7655 = vrot.lane.b32.xlu1 %v13200_v61, %s11797_s18  ;;  %v4687_v53 = vmax.f32 %v12398_v52, %v4623_v40  ;;  %v3837_v24 = vpop.f32.mrf.mxu0  ;;  %v13281_v61 = vld [vmem:[%s16321_s2] ss:$0 sm:$0xff] }
 0x39e   : > { %6199 = vrot.lane.b32.xlu0 %v5562_v34, %s11796_s17  ;;  %v3838_v34 = vadd.f32 %v13281_v61, %v3837_v24  ;;  %v4157_v25 = vpop.f32.mrf.mxu2  ;;  %v4001_v19 = vadd.f32 %v13281_v61, %v13161_v58  ;;  %v13296_v51 = vpop.f32.mrf.mxu1  ;;  %v5307_v24 = vld [vmem:[#allocation2 + $0x211] sm:$0xff]  ;;  %v3683_v60 = vadd.f32 %v13281_v61, %v12256_v63 }
 0x39f   : > { %v13273_v9 = vpop.permute.xlu1 %5412  ;;  %4897 = vst.msk [vmem:[#allocation3 + $0x90] sm:$0xff] %vm3261_vm0, %v4687_v53  ;;  %v4158_v30 = vadd.f32 %v13281_v61, %v4157_v25  ;;  %v3681_v53 = vadd.f32 %v13281_v61, %v12246_v59  ;;  %v5339_v31 = vpack.c.bf16 %v5307_v24, %v5307_v24  ;;  %v4013_v17 = vadd.f32 %v13281_v61, %v13296_v51 }
 0x3a0   : > { %v13275_v38 = vpop.permute.xlu0 %7641  ;;  %v4368_v52 = vmax.f32 %v3838_v34, 0.0  ;;  %v4433_v58 = vmax.f32 %v4001_v19, 0.0 }
 0x3a1   : > { %v4496_v42 = vmax.f32 %v4158_v30, 0.0  ;;  %v4305_v59 = vmax.f32 %v3681_v53, 0.0 }
 0x3a3   : > { %5653 = vrot.lane.b32.xlu2 %v5561_v43, %s11798_s23  ;;  %v4624_v35 = vmax.f32 %v4368_v52, %v4496_v42  ;;  %v13309_v42 = vpack.c.bf16 %v7411_v49, %v7411_v49  ;;  %v4003_v49 = vadd.f32 %v13281_v61, %v13182_v16 }
 0x3a5   : > { %v13289_v18 = vpop.permute.xlu2 %6181  ;;  %5430 = vrot.lane.b32.xlu1 %v5337_v48, %s11796_s17  ;;  %v4688_v34 = vmax.f32 %v12409_v27, %v4624_v35  ;;  %v3840_v25 = vpop.f32.mrf.mxu0  ;;  %16417 = vst [vmem:[#allocation86_spill] sm:$0xff] %v13309_v42 }
 0x3a6   : > { %7659 = vrot.lane.b32.xlu0 %v13287_v22, %s11797_s18  ;;  %v3841_v30 = vadd.f32 %v13281_v61, %v3840_v25  ;;  %v4160_v14 = vpop.f32.mrf.mxu2  ;;  %5793 = vst.msk [vmem:[#allocation4 + $0x28] sm:$0xf] %vm5018_vm2, %v13309_v42  ;;  %v13327_v53 = vpop.f32.mrf.mxu1  ;;  %v4306_v42 = vmax.f32 %v3683_v60, 0.0  ;;  %v11511_v60 = vld [vmem:[%s12132_s14 + $0x170] sm:$0xff] }
 0x3a7   : > { %v13298_v40 = vpop.permute.xlu1 %5956  ;;  %4898 = vst.msk [vmem:[#allocation3 + $0xa0] sm:$0xff] %vm3261_vm0, %v4688_v34  ;;  %v4161_v52 = vadd.f32 %v13281_v61, %v4160_v14  ;;  %v4561_v14 = vmax.f32 %v4305_v59, %v4433_v58  ;;  %v5531_v34 = vld [vmem:[#allocation2 + $0x210] sm:$0xff]  ;;  %v4434_v59 = vmax.f32 %v4003_v49, 0.0 }
 0x3a8   : > { %v13300_v29 = vpop.permute.xlu0 %5416  ;;  %v4369_v6 = vmax.f32 %v3841_v30, 0.0  ;;  %v7412_v58 = vld [vmem:[#allocation3 + $0x50] sm:$0xff]  ;;  %v5563_v63 = vpack.c.bf16 %v5531_v34, %v5531_v34  ;;  %v3686_v34 = vadd.f32 %v13281_v61, %v12262_v3 }
 0x3a9   : > { %v4497_v27 = vmax.f32 %v4161_v52, 0.0  ;;  %v4562_v49 = vmax.f32 %v4306_v42, %v4434_v59 }
 0x3aa   : > { %v4307_v3 = vmax.f32 %v3686_v34, 0.0  ;;  %v5853_v34 = vld [vmem:[#allocation2 + $0x221] sm:$0xff] }
 0x3ab   : > { %6197 = vrot.lane.b32.xlu2 %v5561_v43, %s11796_s17  ;;  %v4625_v43 = vmax.f32 %v4369_v6, %v4497_v27  ;;  %v13332_v6 = vpack.c.bf16 %v7412_v58, %v7412_v58 }
 0x3ac   : > { %10818 = vmatmul.msk.bf16.gmra.mxu0 %vm3261_vm0, %v11511_v60  ;;  %v3688_v60 = vadd.f32 %v13281_v61, %v12274_v8 }
 0x3ad   : > { %v13315_v35 = vpop.permute.xlu2 %5641  ;;  %5974 = vrot.lane.b32.xlu1 %v5337_v48, %s11797_s18  ;;  %v4689_v25 = vmax.f32 %v4561_v14, %v4625_v43  ;;  %v3842_v30 = vpop.f32.mrf.mxu0  ;;  %16418 = vst [vmem:[#allocation87_spill] sm:$0xff] %v13332_v6 }
 0x3ae   : > { %5434 = vrot.lane.b32.xlu0 %v5339_v31, %s11796_s17  ;;  %v3843_v52 = vadd.f32 %v13281_v61, %v3842_v30  ;;  %v4162_v37 = vpop.f32.mrf.mxu2  ;;  %5794 = vst.msk [vmem:[#allocation4 + $0x34] sm:$0xf] %vm5018_vm2, %v13332_v6  ;;  %v5731_v6 = vld [vmem:[#allocation3 + $0x60] sm:$0xff]  ;;  %v13351_v42 = vpop.f32.mrf.mxu1  ;;  %v4308_v8 = vmax.f32 %v3688_v60, 0.0  ;;  %v3691_v60 = vadd.f32 %v13281_v61, %v12289_v15 }
 0x3af   : > { %v13321_v19 = vpop.permute.xlu1 %5639  ;;  %4899 = vst.msk [vmem:[#allocation3 + $0xb0] sm:$0xff] %vm3261_vm0, %v4689_v25  ;;  %v4163_v16 = vadd.f32 %v13281_v61, %v4162_v37  ;;  %v4006_v37 = vadd.f32 %v13281_v61, %v13207_v56 }
 0x3b0   : > { %v13323_v24 = vpop.permute.xlu0 %5960  ;;  %v4370_v27 = vmax.f32 %v3843_v52, 0.0 }
 0x3b1   : > { %v4498_v45 = vmax.f32 %v4163_v16, 0.0  ;;  %v4435_v46 = vmax.f32 %v4006_v37, 0.0 }
 0x3b3   : > { %7657 = vrot.lane.b32.xlu2 %v5337_v48, %s11797_s18  ;;  %v4626_v43 = vmax.f32 %v4370_v27, %v4498_v45  ;;  %v13355_v45 = vpack.c.bf16 %v5731_v6, %v5731_v6  ;;  %v4563_v37 = vmax.f32 %v4307_v3, %v4435_v46  ;;  %v4008_v6 = vadd.f32 %v13281_v61, %v13237_v55 }
 0x3b4   : > { %v5885_v46 = vpack.c.bf16 %v5853_v34, %v5853_v34  ;;  %v4171_v34 = vadd.f32 %v13281_v61, %v12254_v62 }
 0x3b5   : > { %v13337_v14 = vpop.permute.xlu2 %7645  ;;  %5657 = vrot.lane.b32.xlu1 %v5563_v63, %s11798_s23  ;;  %v4690_v30 = vmax.f32 %v4562_v49, %v4626_v43  ;;  %v3845_v52 = vpop.f32.mrf.mxu0  ;;  %16419 = vst [vmem:[#allocation88_spill] sm:$0xff] %v13355_v45 }
 0x3b6   : > { %5978 = vrot.lane.b32.xlu0 %v5339_v31, %s11797_s18  ;;  %v3846_v58 = vadd.f32 %v13281_v61, %v3845_v52  ;;  %v4165_v16 = vpop.f32.mrf.mxu2  ;;  %5795 = vst.msk [vmem:[#allocation4 + $0x40] sm:$0xf] %vm5018_vm2, %v13355_v45 }
 0x3b7   : > { %v13343_v25 = vpop.permute.xlu1 %7643  ;;  %4900 = vst.msk [vmem:[#allocation3 + $0xc0] sm:$0xff] %vm3261_vm0, %v4690_v30  ;;  %v4166_v56 = vadd.f32 %v13281_v61, %v4165_v16 }
 0x3b8   : > { %v13345_v48 = vpop.permute.xlu0 %6183  ;;  %v4371_v59 = vmax.f32 %v3846_v58, 0.0  ;;  %v5052_v58 = vld [vmem:[#allocation3 + $0x10] sm:$0xff] }
 0x3b9   : > { %v4499_v27 = vmax.f32 %v4166_v56, 0.0 }
 0x3bb   : > { %5432 = vrot.lane.b32.xlu2 %v13287_v22, %s11796_s17  ;;  %v4627_v43 = vmax.f32 %v4371_v59, %v4499_v27  ;;  %v5084_v59 = vpack.c.bf16 %v5052_v58, %v5052_v58  ;;  %v13379_v27 = vpop.f32.mrf.mxu1 }
 0x3bd   : > { %v13362_v49 = vpop.permute.xlu2 %5420  ;;  %7661 = vrot.lane.b32.xlu1 %v5339_v31, %s11797_s18  ;;  %v4691_v16 = vmax.f32 %v4563_v37, %v4627_v43  ;;  %v3847_v56 = vpop.f32.mrf.mxu0  ;;  %v4011_v43 = vadd.f32 %v13281_v61, %v13260_v44  ;;  %v11512_v44 = vld [vmem:[%s12132_s14 + $0x178] sm:$0xff] }
 0x3be   : > { %16420 = vst [vmem:[#allocation89_spill] sm:$0xff] %v13362_v49  ;;  %6201 = vrot.lane.b32.xlu0 %v5563_v63, %s11796_s17  ;;  %v3848_v31 = vadd.f32 %v13281_v61, %v3847_v56  ;;  %v4167_v45 = vpop.f32.mrf.mxu2  ;;  %v4436_v63 = vmax.f32 %v4008_v6, 0.0  ;;  %v5532_v6 = vld [vmem:[#allocation2 + $0x220] sm:$0xff]  ;;  %10819 = vmatmul.msk.bf16.gmra.mxu0 %vm3261_vm0, %v11512_v44 }
 0x3bf   : > { %v13368_v30 = vpop.permute.xlu1 %5418  ;;  %4901 = vst.msk [vmem:[#allocation3 + $0xd0] sm:$0xff] %vm3261_vm0, %v4691_v16  ;;  %v4168_v55 = vadd.f32 %v13281_v61, %v4167_v45  ;;  %v5564_v21 = vpack.c.bf16 %v5532_v6, %v5532_v6  ;;  %v5053_v44 = vld [vmem:[#allocation3 + $0x20] sm:$0xff] }
 0x3c0   : > { %v13370_v52 = vpop.permute.xlu0 %5643  ;;  %v4372_v3 = vmax.f32 %v3848_v31, 0.0  ;;  %v4564_v45 = vmax.f32 %v4308_v8, %v4436_v63  ;;  %v8271_v31 = vld [vmem:[#allocation3 + $0x11] sm:$0xff]  ;;  %v4309_v8 = vmax.f32 %v3691_v60, 0.0 }
 0x3c1   : > { %v4500_v37 = vmax.f32 %v4168_v55, 0.0  ;;  %v8303_v62 = vpack.c.bf16 %v8271_v31, %v8271_v31 }
 0x3c3   : > { %5976 = vrot.lane.b32.xlu2 %v13287_v22, %s11797_s18  ;;  %v4628_v22 = vmax.f32 %v4372_v3, %v4500_v37  ;;  %v4501_v3 = vmax.f32 %v4171_v34, 0.0  ;;  %v13409_v6 = vpop.f32.mrf.mxu1  ;;  %v3693_v34 = vadd.f32 %v13281_v61, %v12304_v26 }
 0x3c5   : > { %v13383_v56 = vpop.permute.xlu2 %5964  ;;  %5980 = vrot.lane.b32.xlu1 %v5885_v46, %s11797_s18  ;;  %v4692_v55 = vmax.f32 %v4564_v45, %v4628_v22  ;;  %v3850_v41 = vpop.f32.mrf.mxu0  ;;  %v4437_v46 = vmax.f32 %v4011_v43, 0.0  ;;  %v11660_v43 = vld [vmem:[%s16322_s3 + $0x88] sm:$0xff]  ;;  %v4173_v22 = vadd.f32 %v13281_v61, %v12266_v5  ;;  %v13422_v5 = vpack.c.bf16 %v5053_v44, %v5053_v44 }
 0x3c6   : > { %5149 = vrot.lane.b32.xlu0 %v5084_v59, %s11797_s18  ;;  %v3851_v63 = vadd.f32 %v13281_v61, %v3850_v41  ;;  %7276 = vmatpush.bf16.msrb.mxu3 %v11660_v43  ;;  %v4176_v43 = vadd.f32 %v13281_v61, %v12283_v11 }
 0x3c7   : > { %v13391_v58 = vpop.permute.xlu1 %5962  ;;  %4902 = vst.msk [vmem:[#allocation3 + $0xe0] sm:$0xff] %vm3261_vm0, %v4692_v55  ;;  %v4565_v37 = vmax.f32 %v4309_v8, %v4437_v46  ;;  %v4438_v55 = vmax.f32 %v4013_v17, 0.0 }
 0x3c8   : > { %v13393_v16 = vpop.permute.xlu0 %7647  ;;  %v4373_v15 = vmax.f32 %v3851_v63, 0.0  ;;  %v4502_v63 = vmax.f32 %v4173_v22, 0.0 }
 0x3c9   : > { %16421 = vst [vmem:[#allocation90_spill] sm:$0xff] %v13393_v16 }
 0x3ca   : > { %v4629_v41 = vmax.f32 %v4373_v15, %v4501_v3  ;;  %v4310_v3 = vmax.f32 %v3693_v34, 0.0  ;;  %v4016_v15 = vadd.f32 %v13281_v61, %v13327_v53 }
 0x3cb   : > { %5659 = vrot.lane.b32.xlu2 %v5564_v21, %s11798_s23  ;;  %v13440_v44 = vpop.f32.mrf.mxu1 }
 0x3cc   : > { %v4566_v8 = vmax.f32 %v4310_v3, %v4438_v55 }
 0x3cd   : > { %v13402_v45 = vpop.permute.xlu2 %6187  ;;  %6203 = vrot.lane.b32.xlu1 %v5564_v21, %s11796_s17  ;;  %v4693_v21 = vmax.f32 %v4565_v37, %v4629_v41  ;;  %v3852_v31 = vpop.f32.mrf.mxu0  ;;  %v7730_v41 = vld [vmem:[#allocation3 + $0x31] sm:$0xff] }
 0x3ce   : > { %7825 = vrot.lane.b32.xlu0 %v8303_v62, %s11796_s17  ;;  %v3853_v46 = vadd.f32 %v13281_v61, %v3852_v31  ;;  %v7729_v31 = vld [vmem:[#allocation3 + $0x21] sm:$0xff] }
 0x3cf   : > { %v13415_v51 = vpop.permute.xlu1 %6185  ;;  %4903 = vst.msk [vmem:[#allocation3 + $0xf0] sm:$0xff] %vm3261_vm0, %v4693_v21  ;;  %v11513_v21 = vld [vmem:[%s12132_s14 + $0x180] sm:$0xff] }
 0x3d0   : > { %v13417_v60 = vpop.permute.xlu0 %5422  ;;  %v4374_v26 = vmax.f32 %v3853_v46, 0.0  ;;  %v4439_v46 = vmax.f32 %v4016_v15, 0.0  ;;  %10820 = vmatmul.msk.bf16.gmra.mxu0 %vm3261_vm0, %v11513_v21 }
 0x3d1   : > { %16422 = vst [vmem:[#allocation91_spill] sm:$0xff] %v13417_v60 }
 0x3d2   : > { %v4630_v17 = vmax.f32 %v4374_v26, %v4502_v63  ;;  %v4503_v63 = vmax.f32 %v4176_v43, 0.0  ;;  %v8496_v43 = vld [vmem:[#allocation3 + $0x30] sm:$0xff] }
 0x3d3   : > { %8367 = vrot.lane.b32.xlu2 %v8303_v62, %s11797_s18  ;;  %v3696_v62 = vadd.f32 %v13281_v61, %v12315_v50  ;;  %v7761_v50 = vpack.c.bf16 %v7729_v31, %v7729_v31  ;;  %v13468_v32 = vpop.f32.mrf.mxu1 }
 0x3d4   : > { %v4694_v53 = vmax.f32 %v4566_v8, %v4630_v17  ;;  %v4018_v17 = vadd.f32 %v13281_v61, %v13351_v42 }
 0x3d5   : > { %v13426_v37 = vpop.permute.xlu2 %6189  ;;  %5151 = vrot.lane.b32.xlu1 %v13422_v5, %s11797_s18  ;;  %v3855_v55 = vpop.f32.mrf.mxu0  ;;  %v4311_v3 = vmax.f32 %v3696_v62, 0.0  ;;  %v4178_v62 = vadd.f32 %v13281_v61, %v12298_v23 }
 0x3d6   : > { %8047 = vrot.lane.b32.xlu0 %v5084_v59, %s11798_s23  ;;  %v13442_v59 = vpack.c.bf16 %v7730_v41, %v7730_v41  ;;  %4904 = vst.msk [vmem:[#allocation3 + $0x100] sm:$0xff] %vm3261_vm0, %v4694_v53  ;;  %v3856_v11 = vadd.f32 %v13281_v61, %v3855_v55  ;;  %v3698_v53 = vadd.f32 %v13281_v61, %v12328_v2 }
 0x3d7   : > { %v13435_v22 = vpop.permute.xlu1 %5645  ;;  %v4567_v8 = vmax.f32 %v4311_v3, %v4439_v46  ;;  %v6520_v46 = vld [vmem:[#allocation2 + $0x1c1] sm:$0xff]  ;;  %v13464_v3 = vpack.c.bf16 %v8496_v43, %v8496_v43  ;;  %v4504_v23 = vmax.f32 %v4178_v62, 0.0  ;;  %v11650_v62 = vld [vmem:[%s16322_s3 + $0x38] sm:$0xff] }
 0x3d8   : > { %16423 = vst [vmem:[#allocation92_spill] sm:$0xff] %v13435_v22  ;;  %v13437_v34 = vpop.permute.xlu0 %5966  ;;  %v4375_v26 = vmax.f32 %v3856_v11, 0.0  ;;  %v4440_v11 = vmax.f32 %v4018_v17, 0.0  ;;  %v4312_v12 = vmax.f32 %v3698_v53, 0.0  ;;  %v4021_v17 = vadd.f32 %v13281_v61, %v13379_v27  ;;  %7092 = vmatpush.bf16.msrb.mxu1 %v11650_v62 }
 0x3d9   : > { %v4181_v53 = vadd.f32 %v13281_v61, %v12313_v47 }
 0x3da   : > { %v4631_v41 = vmax.f32 %v4375_v26, %v4503_v63  ;;  %v6552_v26 = vpack.c.bf16 %v6520_v46, %v6520_v46  ;;  %v11514_v46 = vld [vmem:[%s12132_s14 + $0x188] sm:$0xff] }
 0x3db   : > { %7829 = vrot.lane.b32.xlu2 %v13442_v59, %s11796_s17 }
 0x3dc   : > { %v4695_v42 = vmax.f32 %v4567_v8, %v4631_v41  ;;  %6584 = vst.msk [vmem:[#allocation4 + $0x128] sm:$0xf] %vm5018_vm2, %v6552_v26  ;;  %v4568_v8 = vmax.f32 %v4312_v12, %v4440_v11  ;;  %v3701_v12 = vadd.f32 %v13281_v61, %v12339_v20  ;;  %v5055_v11 = vld [vmem:[#allocation3 + $0x40] sm:$0xff] }
 0x3dd   : > { %v13451_v15 = vpop.permute.xlu2 %5647  ;;  %7827 = vrot.lane.b32.xlu1 %v7761_v50, %s11796_s17  ;;  %v3857_v55 = vpop.f32.mrf.mxu0  ;;  %v13496_v47 = vpack.c.bf16 %v5055_v11, %v5055_v11  ;;  %v16428_v11 = vld [vmem:[#allocation8_spill] sm:$0xff] }
 0x3de   : > { %16424 = vst [vmem:[#allocation93_spill] sm:$0xff] %v13451_v15  ;;  %6368 = vrot.lane.b32.xlu0 %v13422_v5, %s11798_s23  ;;  %v3858_v63 = vadd.f32 %v13281_v61, %v3857_v55 }
 0x3df   : > { %v13460_v21 = vpop.permute.xlu1 %7649  ;;  %4905 = vst.msk [vmem:[#allocation3 + $0x130] sm:$0xff] %vm3261_vm0, %v4695_v42 }
 0x3e0   : > { %16425 = vst [vmem:[#allocation94_spill] sm:$0xff] %v13460_v21  ;;  %v13462_v31 = vpop.permute.xlu0 %6191  ;;  %v4376_v2 = vmax.f32 %v3858_v63, 0.0  ;;  %v4441_v63 = vmax.f32 %v4021_v17, 0.0  ;;  %10821 = vmatmul.msk.bf16.gmra.mxu0 %vm3261_vm0, %v11514_v46  ;;  %v4023_v17 = vadd.f32 %v13281_v61, %v13409_v6  ;;  %v3703_v46 = vadd.f32 %v13281_v61, %v16428_v11 }
 0x3e2   : > { %v4632_v43 = vmax.f32 %v4376_v2, %v4504_v23  ;;  %v4505_v23 = vmax.f32 %v4181_v53, 0.0  ;;  %v4313_v2 = vmax.f32 %v3701_v12, 0.0  ;;  %v16427_v12 = vld [vmem:[#allocation6_spill] sm:$0xff] }
 0x3e3   : > { %8593 = vrot.lane.b32.xlu2 %v13464_v3, %s11796_s17 }
 0x3e4   : > { %v4696_v55 = vmax.f32 %v4568_v8, %v4632_v43  ;;  %v13499_v8 = vpop.f32.mrf.mxu1  ;;  %v4569_v43 = vmax.f32 %v4313_v2, %v4441_v63 }
 0x3e5   : > { %v13475_v41 = vpop.permute.xlu2 %7651  ;;  %8049 = vrot.lane.b32.xlu1 %v13422_v5, %s11798_s23 }
 0x3e6   : > { %8369 = vrot.lane.b32.xlu0 %v7761_v50, %s11797_s18  ;;  %v3860_v50 = vpop.f32.mrf.mxu0  ;;  %4906 = vst.msk [vmem:[#allocation3 + $0x140] sm:$0xff] %vm3261_vm0, %v4696_v55  ;;  %v4183_v55 = vadd.f32 %v13281_v61, %v16427_v12 }
 0x3e7   : > { %v13487_v42 = vpop.permute.xlu1 %5424  ;;  %v3861_v26 = vadd.f32 %v13281_v61, %v3860_v50 }
 0x3e8   : > { %v13489_v27 = vpop.permute.xlu0 %5649  ;;  %v4506_v16 = vmax.f32 %v4183_v55, 0.0  ;;  %v16430_v55 = vld [vmem:[#allocation7_spill] sm:$0xff] }
 0x3e9   : > { %v4377_v20 = vmax.f32 %v3861_v26, 0.0  ;;  %v8274_v26 = vld [vmem:[#allocation3 + $0x41] sm:$0xff] }
 0x3eb   : > { %8051 = vrot.lane.b32.xlu2 %v13464_v3, %s11798_s23  ;;  %v4633_v53 = vmax.f32 %v4377_v20, %v4505_v23  ;;  %v4314_v23 = vmax.f32 %v3703_v46, 0.0  ;;  %v8306_v20 = vpack.c.bf16 %v8274_v26, %v8274_v26  ;;  %v4186_v46 = vadd.f32 %v13281_v61, %v16430_v55 }
 0x3ed   : > { %v13503_v62 = vpop.permute.xlu2 %5426  ;;  %8591 = vrot.lane.b32.xlu1 %v13422_v5, %s11796_s17  ;;  %v4697_v6 = vmax.f32 %v4569_v43, %v4633_v53  ;;  %v13528_v53 = vpop.f32.mrf.mxu1  ;;  %v4507_v49 = vmax.f32 %v4186_v46, 0.0  ;;  %v16434_v46 = vld [vmem:[#allocation9_spill] sm:$0xff] }
 0x3ee   : > { %16426 = vst [vmem:[#allocation95_spill] sm:$0xff] %v13503_v62  ;;  %6372 = vrot.lane.b32.xlu0 %v13496_v47, %s11798_s23  ;;  %v3862_v2 = vpop.f32.mrf.mxu0  ;;  %v4442_v62 = vmax.f32 %v4023_v17, 0.0 }
 0x3ef   : > { %v13513_v50 = vpop.permute.xlu1 %5968  ;;  %4907 = vst.msk [vmem:[#allocation3 + $0x150] sm:$0xff] %vm3261_vm0, %v4697_v6  ;;  %v3863_v5 = vadd.f32 %v13281_v61, %v3862_v2  ;;  %v16431_v6 = vld [vmem:[#allocation10_spill] sm:$0xff] }
 0x3f0   : > { %v13515_v63 = vpop.permute.xlu0 %7653  ;;  %v4570_v11 = vmax.f32 %v4314_v23, %v4442_v62  ;;  %v3706_v26 = vadd.f32 %v13281_v61, %v16431_v6 }
 0x3f1   : > { %16429 = vst [vmem:[#allocation6_spill] sm:$0xff] %v13515_v63  ;;  %v4378_v12 = vmax.f32 %v3863_v5, 0.0  ;;  %v4026_v63 = vadd.f32 %v13281_v61, %v13440_v44  ;;  %v11515_v5 = vld [vmem:[%s12132_s14 + $0x190] sm:$0xff] }
 0x3f2   : > { %v4315_v55 = vmax.f32 %v3706_v26, 0.0  ;;  %10822 = vmatmul.msk.bf16.gmra.mxu0 %vm3261_vm0, %v11515_v5 }
 0x3f3   : > { %5155 = vrot.lane.b32.xlu2 %v13496_v47, %s11797_s18  ;;  %v4634_v17 = vmax.f32 %v4378_v12, %v4506_v16  ;;  %v4443_v22 = vmax.f32 %v4026_v63, 0.0 }
 0x3f5   : > { %v13523_v43 = vpop.permute.xlu2 %5970  ;;  %5153 = vrot.lane.b32.xlu1 %v13464_v3, %s11797_s18  ;;  %v4698_v44 = vmax.f32 %v4570_v11, %v4634_v17  ;;  %v4571_v63 = vmax.f32 %v4315_v55, %v4443_v22  ;;  %v4028_v11 = vadd.f32 %v13281_v61, %v13468_v32  ;;  %v16435_v22 = vld [vmem:[#allocation12_spill] sm:$0xff] }
 0x3f6   : > { %7831 = vrot.lane.b32.xlu0 %v8306_v20, %s11796_s17  ;;  %v3865_v23 = vpop.f32.mrf.mxu0  ;;  %v5070_v21 = vld [vmem:[#allocation3 + $0x150] sm:$0xff]  ;;  %v3708_v26 = vadd.f32 %v13281_v61, %v16435_v22 }
 0x3f7   : > { %v13534_v62 = vpop.permute.xlu1 %6193  ;;  %4908 = vst.msk [vmem:[#allocation3 + $0x160] sm:$0xff] %vm3261_vm0, %v4698_v44  ;;  %v3866_v16 = vadd.f32 %v13281_v61, %v3865_v23  ;;  %v13541_v12 = vpack.c.bf16 %v5070_v21, %v5070_v21 }
 0x3f8   : > { %v13536_v2 = vpop.permute.xlu0 %5428 }
 0x3f9   : > { %16432 = vst [vmem:[#allocation8_spill] sm:$0xff] %v13536_v2  ;;  %v4379_v6 = vmax.f32 %v3866_v16, 0.0 }
 0x3fa   : > { %5808 = vst.msk [vmem:[#allocation4 + $0xdc] sm:$0xf] %vm5018_vm2, %v13541_v12 }
 0x3fb   : > { %8373 = vrot.lane.b32.xlu2 %v8306_v20, %s11797_s18  ;;  %6032 = vst.msk [vmem:[#allocation4 + $0xdc] sm:$0xf] %vm5243_vm3, %v13231_v33  ;;  %v4635_v21 = vmax.f32 %v4379_v6, %v4507_v49  ;;  %v5056_v20 = vld [vmem:[#allocation3 + $0x50] sm:$0xff]  ;;  %v4188_v33 = vadd.f32 %v13281_v61, %v16434_v46  ;;  %v4444_v49 = vmax.f32 %v4028_v11, 0.0 }
 0x3fc   : > { %6257 = vst.msk [vmem:[#allocation4 + $0xdc] sm:$0xf] %vm5468_vm4, %v13202_v36  ;;  %v5088_v55 = vpack.c.bf16 %v5056_v20, %v5056_v20 }
 0x3fd   : > { %v13551_v17 = vpop.permute.xlu2 %5653  ;;  %6370 = vrot.lane.b32.xlu1 %v13464_v3, %s11798_s23  ;;  %v4699_v5 = vmax.f32 %v4571_v63, %v4635_v21  ;;  %v13567_v3 = vpop.f32.mrf.mxu1  ;;  %v4508_v46 = vmax.f32 %v4188_v33, 0.0  ;;  %v11658_v63 = vld [vmem:[%s16322_s3 + $0x78] sm:$0xff]  ;;  %v4031_v21 = vadd.f32 %v13281_v61, %v13499_v8 }
 0x3fe   : > { %16433 = vst [vmem:[#allocation7_spill] sm:$0xff] %v13551_v17  ;;  %8053 = vrot.lane.b32.xlu0 %v13496_v47, %s11798_s23  ;;  %v3867_v23 = vpop.f32.mrf.mxu0  ;;  %v6290_v16 = vld [vmem:[#allocation3 + $0x160] sm:$0xff]  ;;  %v4316_v17 = vmax.f32 %v3708_v26, 0.0  ;;  %7181 = vmatpush.bf16.msrb.mxu2 %v11658_v63 }
 0x3ff   : > { %v13563_v32 = vpop.permute.xlu1 %5651  ;;  %4909 = vst.msk [vmem:[#allocation3 + $0x170] sm:$0xff] %vm3261_vm0, %v4699_v5  ;;  %v3868_v36 = vadd.f32 %v13281_v61, %v3867_v23  ;;  %v13571_v6 = vpack.c.bf16 %v6290_v16, %v6290_v16  ;;  %v6276_v26 = vld [vmem:[#allocation3 + $0x60] sm:$0xff]  ;;  %v16437_v5 = vld [vmem:[#allocation11_spill] sm:$0xff] }
 0x400   : > { %16436 = vst [vmem:[#allocation10_spill] sm:$0xff] %v13563_v32  ;;  %v13565_v44 = vpop.permute.xlu0 %5972  ;;  %v4572_v11 = vmax.f32 %v4316_v17, %v4444_v49  ;;  %v16438_v17 = vld [vmem:[#allocation13_spill] sm:$0xff] }
 0x401   : > { %v4380_v22 = vmax.f32 %v3868_v36, 0.0  ;;  %5809 = vst.msk [vmem:[#allocation4 + $0xe8] sm:$0xf] %vm5018_vm2, %v13571_v6  ;;  %v3711_v8 = vadd.f32 %v13281_v61, %v16438_v17  ;;  %v11516_v49 = vld [vmem:[%s12132_s14 + $0x198] sm:$0xff] }
 0x402   : > { %6033 = vst.msk [vmem:[#allocation4 + $0xe8] sm:$0xf] %vm5243_vm3, %v13298_v40  ;;  %v4191_v40 = vadd.f32 %v13281_v61, %v16437_v5  ;;  %10823 = vmatmul.msk.bf16.gmra.mxu0 %vm3261_vm0, %v11516_v49  ;;  %v16442_v49 = vld [vmem:[#allocation15_spill] sm:$0xff] }
 0x403   : > { %5157 = vrot.lane.b32.xlu2 %v5088_v55, %s11797_s18  ;;  %v4636_v33 = vmax.f32 %v4380_v22, %v4508_v46  ;;  %6258 = vst.msk [vmem:[#allocation4 + $0xe8] sm:$0xf] %vm5468_vm4, %v13289_v18  ;;  %v4445_v46 = vmax.f32 %v4031_v21, 0.0  ;;  %v6308_v22 = vpack.c.bf16 %v6276_v26, %v6276_v26  ;;  %v4317_v17 = vmax.f32 %v3711_v8, 0.0 }
 0x404   : > { %v4509_v32 = vmax.f32 %v4191_v40, 0.0  ;;  %v4033_v21 = vadd.f32 %v13281_v61, %v13528_v53  ;;  %v16441_v40 = vld [vmem:[#allocation14_spill] sm:$0xff] }
 0x405   : > { %v13583_v20 = vpop.permute.xlu2 %6197  ;;  %8371 = vrot.lane.b32.xlu1 %v13442_v59, %s11797_s18  ;;  %v4700_v59 = vmax.f32 %v4572_v11, %v4636_v33  ;;  %v13604_v5 = vpop.f32.mrf.mxu1  ;;  %v4573_v11 = vmax.f32 %v4317_v17, %v4445_v46  ;;  %v4193_v8 = vadd.f32 %v13281_v61, %v16441_v40  ;;  %v7732_v46 = vld [vmem:[#allocation3 + $0x51] sm:$0xff] }
 0x406   : > { %8595 = vrot.lane.b32.xlu0 %v13496_v47, %s11796_s17  ;;  %v3870_v36 = vpop.f32.mrf.mxu0  ;;  %v6291_v47 = vld [vmem:[#allocation3 + $0x170] sm:$0xff] }
 0x407   : > { %v13595_v23 = vpop.permute.xlu1 %6195  ;;  %4910 = vst.msk [vmem:[#allocation3 + $0x180] sm:$0xff] %vm3261_vm0, %v4700_v59  ;;  %v3871_v18 = vadd.f32 %v13281_v61, %v3870_v36  ;;  %v13602_v63 = vpack.c.bf16 %v6291_v47, %v6291_v47  ;;  %v7733_v59 = vld [vmem:[#allocation3 + $0x61] sm:$0xff]  ;;  %v4510_v40 = vmax.f32 %v4193_v8, 0.0 }
 0x408   : > { %v13597_v16 = vpop.permute.xlu0 %5655 }
 0x409   : > { %16439 = vst [vmem:[#allocation9_spill] sm:$0xff] %v13597_v16  ;;  %v4381_v2 = vmax.f32 %v3871_v18, 0.0 }
 0x40a   : > { %5810 = vst.msk [vmem:[#allocation4 + $0xf4] sm:$0xf] %vm5018_vm2, %v13602_v63 }
 0x40b   : > { %6376 = vrot.lane.b32.xlu2 %v6308_v22, %s11798_s23  ;;  %6034 = vst.msk [vmem:[#allocation4 + $0xf4] sm:$0xf] %vm5243_vm3, %v13266_v13  ;;  %v4637_v26 = vmax.f32 %v4381_v2, %v4509_v32  ;;  %v3713_v13 = vadd.f32 %v13281_v61, %v16442_v49  ;;  %v4446_v2 = vmax.f32 %v4033_v21, 0.0  ;;  %v7765_v32 = vpack.c.bf16 %v7733_v59, %v7733_v59 }
 0x40c   : > { %6259 = vst.msk [vmem:[#allocation4 + $0xf4] sm:$0xf] %vm5468_vm4, %v13345_v48  ;;  %v13633_v49 = vpack.c.bf16 %v7732_v46, %v7732_v46  ;;  %v4036_v59 = vadd.f32 %v13281_v61, %v13567_v3  ;;  %v16446_v3 = vld [vmem:[#allocation17_spill] sm:$0xff] }
 0x40d   : > { %v13614_v33 = vpop.permute.xlu2 %7657  ;;  %6374 = vrot.lane.b32.xlu1 %v5088_v55, %s11798_s23  ;;  %v4701_v47 = vmax.f32 %v4573_v11, %v4637_v26  ;;  %v6277_v55 = vld [vmem:[#allocation3 + $0x70] sm:$0xff]  ;;  %v4040_v26 = vpop.f32.mrf.mxu1 }
 0x40e   : > { %16440 = vst [vmem:[#allocation12_spill] sm:$0xff] %v13614_v33  ;;  %5159 = vrot.lane.b32.xlu0 %v6308_v22, %s11797_s18  ;;  %v3872_v18 = vpop.f32.mrf.mxu0  ;;  %v5073_v22 = vld [vmem:[#allocation3 + $0x180] sm:$0xff]  ;;  %v4318_v33 = vmax.f32 %v3713_v13, 0.0 }
 0x40f   : > { %v13624_v36 = vpop.permute.xlu1 %7655  ;;  %4911 = vst.msk [vmem:[#allocation3 + $0x190] sm:$0xff] %vm3261_vm0, %v4701_v47  ;;  %v3873_v48 = vadd.f32 %v13281_v61, %v3872_v18  ;;  %v13630_v17 = vpack.c.bf16 %v5073_v22, %v5073_v22  ;;  %v11649_v47 = vld [vmem:[%s16322_s3 + $0x30] sm:$0xff] }
 0x410   : > { %16443 = vst [vmem:[#allocation11_spill] sm:$0xff] %v13624_v36  ;;  %v13626_v53 = vpop.permute.xlu0 %6199  ;;  %v6309_v36 = vpack.c.bf16 %v6277_v55, %v6277_v55  ;;  %v4574_v21 = vmax.f32 %v4318_v33, %v4446_v2  ;;  %v16445_v33 = vld [vmem:[#allocation16_spill] sm:$0xff]  ;;  %v3716_v55 = vadd.f32 %v13281_v61, %v16446_v3  ;;  %7093 = vmatpush.bf16.msrb.mxu1 %v11649_v47 }
 0x411   : > { %v4382_v11 = vmax.f32 %v3873_v48, 0.0  ;;  %5811 = vst.msk [vmem:[#allocation4 + $0x100] sm:$0xf] %vm5018_vm2, %v13630_v17  ;;  %v4196_v46 = vadd.f32 %v13281_v61, %v16445_v33  ;;  %v6279_v48 = vld [vmem:[#allocation3 + $0x90] sm:$0xff] }
 0x412   : > { %6035 = vst.msk [vmem:[#allocation4 + $0x100] sm:$0xf] %vm5243_vm3, %v13323_v24  ;;  %v5059_v24 = vld [vmem:[#allocation3 + $0x80] sm:$0xff]  ;;  %v4319_v3 = vmax.f32 %v3716_v55, 0.0 }
 0x413   : > { %7835 = vrot.lane.b32.xlu2 %v7765_v32, %s11796_s17  ;;  %v4638_v13 = vmax.f32 %v4382_v11, %v4510_v40  ;;  %6260 = vst.msk [vmem:[#allocation4 + $0x100] sm:$0xf] %vm5468_vm4, %v13415_v51  ;;  %v11517_v32 = vld [vmem:[%s12132_s14 + $0x1a0] sm:$0xff]  ;;  %v5091_v16 = vpack.c.bf16 %v5059_v24, %v5059_v24  ;;  %v4511_v15 = vmax.f32 %v4196_v46, 0.0 }
 0x414   : > { %10824 = vmatmul.msk.bf16.gmra.mxu0 %vm3261_vm0, %v11517_v32  ;;  %v16449_v46 = vld [vmem:[#allocation18_spill] sm:$0xff] }
 0x415   : > { %v13641_v8 = vpop.permute.xlu2 %5432  ;;  %7833 = vrot.lane.b32.xlu1 %v13633_v49, %s11796_s17  ;;  %v4702_v2 = vmax.f32 %v4574_v21, %v4638_v13  ;;  %v4042_v24 = vpop.f32.mrf.mxu1  ;;  %v4198_v55 = vadd.f32 %v13281_v61, %v16449_v46 }
 0x416   : > { %16444 = vst [vmem:[#allocation13_spill] sm:$0xff] %v13641_v8  ;;  %6378 = vrot.lane.b32.xlu0 %v6309_v36, %s11798_s23  ;;  %v3875_v40 = vpop.f32.mrf.mxu0  ;;  %v6293_v11 = vld [vmem:[#allocation3 + $0x190] sm:$0xff]  ;;  %v4447_v8 = vmax.f32 %v4036_v59, 0.0  ;;  %v4038_v59 = vadd.f32 %v13281_v61, %v13604_v5 }
 0x417   : > { %v13655_v18 = vpop.permute.xlu1 %5430  ;;  %4912 = vst.msk [vmem:[#allocation3 + $0x1a0] sm:$0xff] %vm3261_vm0, %v4702_v2  ;;  %v3876_v51 = vadd.f32 %v13281_v61, %v3875_v40  ;;  %v13662_v33 = vpack.c.bf16 %v6293_v11, %v6293_v11  ;;  %v16450_v2 = vld [vmem:[#allocation19_spill] sm:$0xff]  ;;  %v4512_v11 = vmax.f32 %v4198_v55, 0.0 }
 0x418   : > { %16447 = vst [vmem:[#allocation14_spill] sm:$0xff] %v13655_v18  ;;  %v13657_v22 = vpop.permute.xlu0 %7659  ;;  %v6311_v18 = vpack.c.bf16 %v6279_v48, %v6279_v48  ;;  %v4575_v21 = vmax.f32 %v4319_v3, %v4447_v8  ;;  %v6280_v48 = vld [vmem:[#allocation3 + $0xa0] sm:$0xff]  ;;  %v4448_v40 = vmax.f32 %v4038_v59, 0.0  ;;  %v4041_v59 = vadd.f32 %v13281_v61, %v4040_v26  ;;  %v11518_v26 = vld [vmem:[%s12132_s14 + $0x1a8] sm:$0xff] }
 0x419   : > { %16448 = vst [vmem:[#allocation15_spill] sm:$0xff] %v13657_v22  ;;  %v4383_v22 = vmax.f32 %v3876_v51, 0.0  ;;  %v6312_v3 = vpack.c.bf16 %v6280_v48, %v6280_v48  ;;  %v16455_v48 = vld [vmem:[#allocation21_spill] sm:$0xff] }
 0x41a   : > { %5812 = vst.msk [vmem:[#allocation4 + $0x10c] sm:$0xf] %vm5018_vm2, %v13662_v33 }
 0x41b   : > { %5163 = vrot.lane.b32.xlu2 %v5091_v16, %s11797_s18  ;;  %6036 = vst.msk [vmem:[#allocation4 + $0x10c] sm:$0xf] %vm5243_vm3, %v13391_v58  ;;  %v4639_v47 = vmax.f32 %v4383_v22, %v4511_v15  ;;  %v3718_v58 = vadd.f32 %v13281_v61, %v16450_v2  ;;  %v13689_v2 = vld [vmem:[#allocation4 + $0xd0] sm:$0xf0] }
 0x41c   : > { %6261 = vst.msk [vmem:[#allocation4 + $0x10c] sm:$0xf] %vm5468_vm4, %v13402_v45  ;;  %v8960_v45 = vld [vmem:[#allocation3 + $0x151] sm:$0xff] }
 0x41d   : > { %v13672_v13 = vpop.permute.xlu2 %5976  ;;  %5161 = vrot.lane.b32.xlu1 %v6309_v36, %s11797_s18  ;;  %v4703_v32 = vmax.f32 %v4575_v21, %v4639_v47  ;;  %v8992_v22 = vpack.c.bf16 %v8960_v45, %v8960_v45  ;;  %v4320_v51 = vmax.f32 %v3718_v58, 0.0  ;;  %16452 = vst [vmem:[#allocation17_spill] sm:$0xff] %v13689_v2  ;;  %v5062_v58 = vld [vmem:[#allocation3 + $0xb0] sm:$0xff] }
 0x41e   : > { %5165 = vrot.lane.b32.xlu0 %v6311_v18, %s11797_s18  ;;  %v3877_v36 = vpop.f32.mrf.mxu0 }
 0x41f   : > { %v13682_v8 = vpop.permute.xlu1 %5974  ;;  %4913 = vst.msk [vmem:[#allocation3 + $0x1b0] sm:$0xff] %vm3261_vm0, %v4703_v32  ;;  %v3878_v15 = vadd.f32 %v13281_v61, %v3877_v36  ;;  %v4576_v21 = vmax.f32 %v4320_v51, %v4448_v40  ;;  %v16454_v32 = vld [vmem:[#allocation20_spill] sm:$0xff]  ;;  %v3721_v36 = vadd.f32 %v13281_v61, %v16455_v48  ;;  %v6282_v51 = vld [vmem:[#allocation3 + $0xc0] sm:$0xff] }
 0x420   : > { %v13684_v5 = vpop.permute.xlu0 %5434  ;;  %9024 = vst.msk [vmem:[#allocation4 + $0xd4] sm:$0xf] %vm5018_vm2, %v8992_v22  ;;  %v4045_v22 = vpop.f32.mrf.mxu1  ;;  %v6314_v48 = vpack.c.bf16 %v6282_v51, %v6282_v51 }
 0x421   : > { %16451 = vst [vmem:[#allocation16_spill] sm:$0xff] %v13684_v5  ;;  %v4384_v46 = vmax.f32 %v3878_v15, 0.0  ;;  %v4321_v60 = vmax.f32 %v3721_v36, 0.0  ;;  %v11657_v36 = vld [vmem:[%s16322_s3 + $0x70] sm:$0xff] }
 0x422   : > { %7182 = vmatpush.bf16.msrb.mxu2 %v11657_v36 }
 0x423   : > { %6382 = vrot.lane.b32.xlu2 %v6311_v18, %s11798_s23  ;;  %v4640_v55 = vmax.f32 %v4384_v46, %v4512_v11  ;;  %v4201_v18 = vadd.f32 %v13281_v61, %v16454_v32  ;;  %v8961_v46 = vld [vmem:[#allocation3 + $0x161] sm:$0xff] }
 0x424   : > { %v8993_v32 = vpack.c.bf16 %v8961_v46, %v8961_v46  ;;  %10825 = vmatmul.msk.bf16.gmra.mxu0 %vm3261_vm0, %v11518_v26 }
 0x425   : > { %v13693_v47 = vpop.permute.xlu2 %5659  ;;  %6380 = vrot.lane.b32.xlu1 %v5091_v16, %s11798_s23  ;;  %v4704_v40 = vmax.f32 %v4576_v21, %v4640_v55  ;;  %v4449_v16 = vmax.f32 %v4041_v59, 0.0  ;;  %v4513_v5 = vmax.f32 %v4201_v18, 0.0  ;;  %v7431_v21 = vld [vmem:[#allocation3 + $0x1a0] sm:$0xff] }
 0x426   : > { %16453 = vst [vmem:[#allocation18_spill] sm:$0xff] %v13693_v47  ;;  %6384 = vrot.lane.b32.xlu0 %v6312_v3, %s11798_s23  ;;  %v3880_v2 = vpop.f32.mrf.mxu0  ;;  %v5094_v47 = vpack.c.bf16 %v5062_v58, %v5062_v58  ;;  %v13710_v55 = vld [vmem:[#allocation4 + $0xe0] sm:$0xf]  ;;  %v13712_v39 = vpack.c.bf16 %v7431_v21, %v7431_v21  ;;  %v5750_v36 = vld [vmem:[#allocation3 + $0x1b0] sm:$0xff] }
 0x427   : > { %v13701_v15 = vpop.permute.xlu1 %5657  ;;  %4914 = vst.msk [vmem:[#allocation3 + $0x1c0] sm:$0xff] %vm3261_vm0, %v4704_v40  ;;  %v3881_v11 = vadd.f32 %v13281_v61, %v3880_v2  ;;  %v4577_v59 = vmax.f32 %v4321_v60, %v4449_v16  ;;  %v4043_v2 = vadd.f32 %v13281_v61, %v4042_v24  ;;  %v16459_v40 = vld [vmem:[#allocation23_spill] sm:$0xff]  ;;  %v16460_v60 = vld [vmem:[#allocation22_spill] sm:$0xff] }
 0x428   : > { %16456 = vst [vmem:[#allocation19_spill] sm:$0xff] %v13701_v15  ;;  %v13703_v45 = vpop.permute.xlu0 %5978  ;;  %v4203_v26 = vadd.f32 %v13281_v61, %v16459_v40  ;;  %v3723_v24 = vadd.f32 %v13281_v61, %v16460_v60  ;;  %v4047_v60 = vpop.f32.mrf.mxu1 }
 0x429   : > { %v4385_v15 = vmax.f32 %v3881_v11, 0.0  ;;  %16457 = vst [vmem:[#allocation20_spill] sm:$0xff] %v13710_v55  ;;  %v4450_v46 = vmax.f32 %v4043_v2, 0.0  ;;  %v8962_v55 = vld [vmem:[#allocation3 + $0x171] sm:$0xff] }
 0x42a   : > { %9025 = vst.msk [vmem:[#allocation4 + $0xe0] sm:$0xf] %vm5018_vm2, %v8993_v32  ;;  %v4514_v40 = vmax.f32 %v4203_v26, 0.0 }
 0x42b   : > { %5169 = vrot.lane.b32.xlu2 %v5094_v47, %s11797_s18  ;;  %v4641_v18 = vmax.f32 %v4385_v15, %v4513_v5  ;;  %5813 = vst.msk [vmem:[#allocation4 + $0x118] sm:$0xf] %vm5018_vm2, %v13712_v39  ;;  %v6283_v5 = vld [vmem:[#allocation3 + $0xd0] sm:$0xff] }
 0x42c   : > { %6037 = vst.msk [vmem:[#allocation4 + $0x118] sm:$0xf] %vm5243_vm3, %v13383_v56 }
 0x42d   : > { %v13716_v58 = vpop.permute.xlu2 %8367  ;;  %5167 = vrot.lane.b32.xlu1 %v6312_v3, %s11797_s18  ;;  %v4705_v3 = vmax.f32 %v4577_v59, %v4641_v18  ;;  %6262 = vst.msk [vmem:[#allocation4 + $0x118] sm:$0xf] %vm5468_vm4, %v13426_v37  ;;  %v4322_v59 = vmax.f32 %v3723_v24, 0.0  ;;  %v6315_v18 = vpack.c.bf16 %v6283_v5, %v6283_v5  ;;  %v5782_v37 = vpack.c.bf16 %v5750_v36, %v5750_v36  ;;  %v5065_v24 = vld [vmem:[#allocation3 + $0xe0] sm:$0xff] }
 0x42e   : > { %16458 = vst [vmem:[#allocation21_spill] sm:$0xff] %v13716_v58  ;;  %5171 = vrot.lane.b32.xlu0 %v6314_v48, %s11797_s18  ;;  %v3882_v15 = vpop.f32.mrf.mxu0  ;;  %v6296_v11 = vld [vmem:[#allocation3 + $0x1c0] sm:$0xff]  ;;  %v8994_v5 = vpack.c.bf16 %v8962_v55, %v8962_v55 }
 0x42f   : > { %v13729_v51 = vpop.permute.xlu1 %7661  ;;  %4915 = vst.msk [vmem:[#allocation3 + $0x1d0] sm:$0xff] %vm3261_vm0, %v4705_v3  ;;  %v3883_v32 = vadd.f32 %v13281_v61, %v3882_v15  ;;  %v13739_v21 = vpack.c.bf16 %v6296_v11, %v6296_v11  ;;  %v4578_v2 = vmax.f32 %v4322_v59, %v4450_v46  ;;  %v4046_v3 = vadd.f32 %v13281_v61, %v4045_v22  ;;  %v16464_v11 = vld [vmem:[#allocation24_spill] sm:$0xff]  ;;  %v8965_v58 = vld [vmem:[#allocation3 + $0x1a1] sm:$0xff] }
 0x430   : > { %16461 = vst [vmem:[#allocation23_spill] sm:$0xff] %v13729_v51  ;;  %v13731_v16 = vpop.permute.xlu0 %6201  ;;  %v3726_v22 = vadd.f32 %v13281_v61, %v16464_v11  ;;  %v11519_v59 = vld [vmem:[%s12132_s14 + $0x1b0] sm:$0xff]  ;;  %v4050_v11 = vpop.f32.mrf.mxu1 }
 0x431   : > { %v4386_v56 = vmax.f32 %v3883_v32, 0.0  ;;  %5815 = vst.msk [vmem:[#allocation4 + $0x130] sm:$0xf] %vm5018_vm2, %v13739_v21  ;;  %v4451_v55 = vmax.f32 %v4046_v3, 0.0 }
 0x432   : > { %6039 = vst.msk [vmem:[#allocation4 + $0x130] sm:$0xf] %vm5243_vm3, %v13513_v50  ;;  %v16463_v50 = vld [vmem:[#allocation25_spill] sm:$0xff] }
 0x433   : > { %6388 = vrot.lane.b32.xlu2 %v6314_v48, %s11798_s23  ;;  %v4642_v48 = vmax.f32 %v4386_v56, %v4514_v40  ;;  %6264 = vst.msk [vmem:[#allocation4 + $0x130] sm:$0xf] %vm5468_vm4, %v13534_v62  ;;  %v4206_v15 = vadd.f32 %v13281_v61, %v16463_v50  ;;  %v6285_v62 = vld [vmem:[#allocation3 + $0xf0] sm:$0xff]  ;;  %v5097_v56 = vpack.c.bf16 %v5065_v24, %v5065_v24  ;;  %v13771_v61 = vld [vmem:[%s16321_s2] ss:$0 sm:$0xff]  ;;  %v4323_v50 = vmax.f32 %v3726_v22, 0.0 }
 0x434   : > { %5814 = vst.msk [vmem:[#allocation4 + $0x124] sm:$0xf] %vm5018_vm2, %v5782_v37  ;;  %v13774_v37 = vld [vmem:[#allocation4 + $0xe8] sm:$0xf0]  ;;  %10826 = vmatmul.msk.bf16.gmra.mxu0 %vm3261_vm0, %v11519_v59  ;;  %v13779_v24 = vld [vmem:[#allocation4 + $0xf8] sm:$0xf] }
 0x435   : > { %v13747_v26 = vpop.permute.xlu2 %7829  ;;  %6386 = vrot.lane.b32.xlu1 %v5094_v47, %s11798_s23  ;;  %v4706_v47 = vmax.f32 %v4578_v2, %v4642_v48  ;;  %6038 = vst.msk [vmem:[#allocation4 + $0x124] sm:$0xf] %vm5243_vm3, %v13437_v34  ;;  %v8963_v2 = vld [vmem:[#allocation3 + $0x181] sm:$0xff]  ;;  %v4515_v48 = vmax.f32 %v4206_v15, 0.0 }
 0x436   : > { %16462 = vst [vmem:[#allocation22_spill] sm:$0xff] %v13747_v26  ;;  %6390 = vrot.lane.b32.xlu0 %v6315_v18, %s11798_s23  ;;  %v3885_v40 = vpop.f32.mrf.mxu0  ;;  %v8995_v34 = vpack.c.bf16 %v8963_v2, %v8963_v2  ;;  %v16468_v15 = vld [vmem:[#allocation27_spill] sm:$0xff] }
 0x437   : > { %v13758_v46 = vpop.permute.xlu1 %5980  ;;  %6263 = vst.msk [vmem:[#allocation4 + $0x124] sm:$0xf] %vm5468_vm4, %v13462_v31  ;;  %v3886_v36 = vadd.f32 %v13771_v61, %v3885_v40  ;;  %v6317_v31 = vpack.c.bf16 %v6285_v62, %v6285_v62  ;;  %v4048_v40 = vadd.f32 %v13771_v61, %v4047_v60  ;;  %v4208_v22 = vadd.f32 %v13771_v61, %v16468_v15  ;;  %v16469_v62 = vld [vmem:[#allocation26_spill] sm:$0xff] }
 0x438   : > { %v13760_v32 = vpop.permute.xlu0 %5149  ;;  %4916 = vst.msk [vmem:[#allocation3 + $0x1e0] sm:$0xff] %vm3261_vm0, %v4706_v47  ;;  %v4579_v47 = vmax.f32 %v4323_v50, %v4451_v55  ;;  %v3728_v59 = vadd.f32 %v13771_v61, %v16469_v62 }
 0x439   : > { %16465 = vst [vmem:[#allocation25_spill] sm:$0xff] %v13774_v37  ;;  %v4387_v3 = vmax.f32 %v3886_v36, 0.0  ;;  %v4452_v50 = vmax.f32 %v4048_v40, 0.0  ;;  %v4051_v40 = vadd.f32 %v13771_v61, %v4050_v11 }
 0x43a   : > { %9026 = vst.msk [vmem:[#allocation4 + $0xec] sm:$0xf] %vm5018_vm2, %v8994_v5  ;;  %v4324_v37 = vmax.f32 %v3728_v59, 0.0  ;;  %v5068_v59 = vld [vmem:[#allocation3 + $0x130] sm:$0xff] }
 0x43b   : > { %5175 = vrot.lane.b32.xlu2 %v5097_v56, %s11797_s18  ;;  %16466 = vst [vmem:[#allocation24_spill] sm:$0xff] %v13779_v24  ;;  %v4643_v5 = vmax.f32 %v4387_v3, %v4515_v48  ;;  %v8964_v24 = vld [vmem:[#allocation3 + $0x191] sm:$0xff]  ;;  %v4516_v3 = vmax.f32 %v4208_v22, 0.0  ;;  %v4052_v22 = vpop.f32.mrf.mxu1 }
 0x43c   : > { %9027 = vst.msk [vmem:[#allocation4 + $0xf8] sm:$0xf] %vm5018_vm2, %v8995_v34  ;;  %v6286_v34 = vld [vmem:[#allocation3 + $0x100] sm:$0xff]  ;;  %v8996_v48 = vpack.c.bf16 %v8964_v24, %v8964_v24 }
 0x43d   : > { %v13783_v26 = vpop.permute.xlu2 %8593  ;;  %5173 = vrot.lane.b32.xlu1 %v6315_v18, %s11797_s18  ;;  %v4707_v55 = vmax.f32 %v4579_v47, %v4643_v5  ;;  %v6318_v15 = vpack.c.bf16 %v6286_v34, %v6286_v34  ;;  %v4580_v47 = vmax.f32 %v4324_v37, %v4452_v50 }
 0x43e   : > { %16467 = vst [vmem:[#allocation96_spill] sm:$0xff] %v13783_v26  ;;  %5177 = vrot.lane.b32.xlu0 %v6317_v31, %s11797_s18  ;;  %v3887_v60 = vpop.f32.mrf.mxu0  ;;  %v13798_v26 = vld [vmem:[#allocation4 + $0x100] sm:$0xf0] }
 0x43f   : > { %v13791_v36 = vpop.permute.xlu1 %6203  ;;  %4917 = vst.msk [vmem:[#allocation3 + $0x1f0] sm:$0xff] %vm3261_vm0, %v4707_v55  ;;  %v3888_v18 = vadd.f32 %v13771_v61, %v3887_v60  ;;  %v16473_v55 = vld [vmem:[#allocation29_spill] sm:$0xff]  ;;  %v16474_v60 = vld [vmem:[#allocation28_spill] sm:$0xff] }
 0x440   : > { %v13793_v2 = vpop.permute.xlu0 %7825  ;;  %16471 = vst [vmem:[#allocation26_spill] sm:$0xff] %v13798_v26  ;;  %v4211_v34 = vadd.f32 %v13771_v61, %v16473_v55  ;;  %v3731_v37 = vadd.f32 %v13771_v61, %v16474_v60  ;;  %v5100_v26 = vpack.c.bf16 %v5068_v59, %v5068_v59  ;;  %v8997_v60 = vpack.c.bf16 %v8965_v58, %v8965_v58 }
 0x441   : > { %16470 = vst [vmem:[#allocation27_spill] sm:$0xff] %v13793_v2  ;;  %v4388_v62 = vmax.f32 %v3888_v18, 0.0  ;;  %v11520_v18 = vld [vmem:[%s12132_s14 + $0x1b8] sm:$0xff] }
 0x442   : > { %9028 = vst.msk [vmem:[#allocation4 + $0x104] sm:$0xf] %vm5018_vm2, %v8996_v48  ;;  %v6288_v48 = vld [vmem:[#allocation3 + $0x140] sm:$0xff]  ;;  %v4517_v2 = vmax.f32 %v4211_v34, 0.0  ;;  %v4325_v51 = vmax.f32 %v3731_v37, 0.0 }
 0x443   : > { %6394 = vrot.lane.b32.xlu2 %v6317_v31, %s11798_s23  ;;  %v4644_v24 = vmax.f32 %v4388_v62, %v4516_v3  ;;  %v11648_v31 = vld [vmem:[%s16322_s3 + $0x28] sm:$0xff]  ;;  %v4453_v62 = vmax.f32 %v4051_v40, 0.0 }
 0x444   : > { %7094 = vmatpush.bf16.msrb.mxu1 %v11648_v31  ;;  %10827 = vmatmul.msk.bf16.gmra.mxu0 %vm3261_vm0, %v11520_v18  ;;  %v4053_v31 = vadd.f32 %v13771_v61, %v4052_v22  ;;  %v4055_v18 = vpop.f32.mrf.mxu1 }
 0x445   : > { %v13802_v5 = vpop.permute.xlu2 %8051  ;;  %6392 = vrot.lane.b32.xlu1 %v5097_v56, %s11798_s23  ;;  %v4708_v56 = vmax.f32 %v4580_v47, %v4644_v24  ;;  %v6320_v47 = vpack.c.bf16 %v6288_v48, %v6288_v48  ;;  %v4581_v40 = vmax.f32 %v4325_v51, %v4453_v62  ;;  %v16477_v51 = vld [vmem:[#allocation30_spill] sm:$0xff] }
 0x446   : > { %16472 = vst [vmem:[#allocation97_spill] sm:$0xff] %v13802_v5  ;;  %6396 = vrot.lane.b32.xlu0 %v6318_v15, %s11798_s23  ;;  %v3890_v3 = vpop.f32.mrf.mxu0  ;;  %v6299_v15 = vld [vmem:[#allocation3 + $0x1f0] sm:$0xff]  ;;  %v3733_v22 = vadd.f32 %v13771_v61, %v16477_v51  ;;  %v4454_v48 = vmax.f32 %v4053_v31, 0.0 }
 0x447   : > { %v13813_v11 = vpop.permute.xlu1 %5151  ;;  %4918 = vst.msk [vmem:[#allocation3 + $0x200] sm:$0xff] %vm3261_vm0, %v4708_v56  ;;  %v3891_v5 = vadd.f32 %v13771_v61, %v3890_v3  ;;  %v13820_v55 = vpack.c.bf16 %v6299_v15, %v6299_v15  ;;  %v8966_v3 = vld [vmem:[#allocation3 + $0x1b1] sm:$0xff] }
 0x448   : > { %v13815_v50 = vpop.permute.xlu0 %8047  ;;  %v8998_v15 = vpack.c.bf16 %v8966_v3, %v8966_v3  ;;  %v7434_v51 = vld [vmem:[#allocation3 + $0x1d0] sm:$0xff] }
 0x449   : > { %v4389_v24 = vmax.f32 %v3891_v5, 0.0  ;;  %5818 = vst.msk [vmem:[#allocation4 + $0x154] sm:$0xf] %vm5018_vm2, %v13820_v55  ;;  %v16476_v5 = vld [vmem:[#allocation32_spill] sm:$0xff] }
 0x44a   : > { %6042 = vst.msk [vmem:[#allocation4 + $0x154] sm:$0xf] %vm5243_vm3, %v13682_v8  ;;  %v4213_v8 = vadd.f32 %v13771_v61, %v16476_v5  ;;  %v13850_v5 = vld [vmem:[#allocation4 + $0x118] sm:$0xf0] }
 0x44b   : > { %5181 = vrot.lane.b32.xlu2 %v5100_v26, %s11797_s18  ;;  %v4645_v58 = vmax.f32 %v4389_v24, %v4517_v2  ;;  %6267 = vst.msk [vmem:[#allocation4 + $0x154] sm:$0xf] %vm5468_vm4, %v13626_v53  ;;  %v13836_v26 = vld [vmem:[#allocation4 + $0x110] sm:$0xf] }
 0x44c   : > { %16475 = vst [vmem:[#allocation29_spill] sm:$0xff] %v13836_v26  ;;  %v4518_v62 = vmax.f32 %v4213_v8, 0.0 }
 0x44d   : > { %v13829_v59 = vpop.permute.xlu2 %5155  ;;  %5185 = vrot.lane.b32.xlu1 %v13541_v12, %s11797_s18  ;;  %9029 = vst.msk [vmem:[#allocation4 + $0x110] sm:$0xf] %vm5018_vm2, %v8997_v60  ;;  %v4709_v56 = vmax.f32 %v4581_v40, %v4645_v58  ;;  %v4326_v60 = vmax.f32 %v3733_v22, 0.0  ;;  %v4056_v58 = vadd.f32 %v13771_v61, %v4055_v18  ;;  %v16481_v22 = vld [vmem:[#allocation34_spill] sm:$0xff] }
 0x44e   : > { %5183 = vrot.lane.b32.xlu0 %v6320_v47, %s11797_s18  ;;  %v3892_v2 = vpop.f32.mrf.mxu0  ;;  %16479 = vst [vmem:[#allocation32_spill] sm:$0xff] %v13850_v5 }
 0x44f   : > { %v13843_v34 = vpop.permute.xlu1 %7827  ;;  %4919 = vst.msk [vmem:[#allocation3 + $0x210] sm:$0xff] %vm3261_vm0, %v4709_v56  ;;  %v3893_v53 = vadd.f32 %v13771_v61, %v3892_v2  ;;  %v4582_v40 = vmax.f32 %v4326_v60, %v4454_v48  ;;  %v4216_v56 = vadd.f32 %v13771_v61, %v16481_v22  ;;  %v16482_v2 = vld [vmem:[#allocation31_spill] sm:$0xff] }
 0x450   : > { %16478 = vst [vmem:[#allocation28_spill] sm:$0xff] %v13843_v34  ;;  %v13845_v37 = vpop.permute.xlu0 %6368  ;;  %v3736_v48 = vadd.f32 %v13771_v61, %v16482_v2 }
 0x451   : > { %v4390_v24 = vmax.f32 %v3893_v53, 0.0  ;;  %9030 = vst.msk [vmem:[#allocation4 + $0x11c] sm:$0xf] %vm5018_vm2, %v8998_v15  ;;  %v11521_v15 = vld [vmem:[%s12132_s14 + $0x1c0] sm:$0xff]  ;;  %v4519_v22 = vmax.f32 %v4216_v56, 0.0 }
 0x452   : > { %v4327_v2 = vmax.f32 %v3736_v48, 0.0  ;;  %v7435_v56 = vld [vmem:[#allocation3 + $0x1e0] sm:$0xff] }
 0x453   : > { %6400 = vrot.lane.b32.xlu2 %v6320_v47, %s11798_s23  ;;  %v4646_v8 = vmax.f32 %v4390_v24, %v4518_v62  ;;  %v13860_v47 = vpack.c.bf16 %v7434_v51, %v7434_v51  ;;  %v4455_v62 = vmax.f32 %v4056_v58, 0.0  ;;  %v4057_v51 = vpop.f32.mrf.mxu1  ;;  %v11656_v58 = vld [vmem:[%s16322_s3 + $0x68] sm:$0xff]  ;;  %v13892_v48 = vpack.c.bf16 %v7435_v56, %v7435_v56 }
 0x454   : > { %10828 = vmatmul.msk.bf16.gmra.mxu0 %vm3261_vm0, %v11521_v15  ;;  %7183 = vmatpush.bf16.msrb.mxu2 %v11656_v58  ;;  %v16485_v15 = vld [vmem:[#allocation36_spill] sm:$0xff] }
 0x455   : > { %v13854_v31 = vpop.permute.xlu2 %8373  ;;  %6404 = vrot.lane.b32.xlu1 %v13571_v6, %s11798_s23  ;;  %v4710_v3 = vmax.f32 %v4582_v40, %v4646_v8  ;;  %5816 = vst.msk [vmem:[#allocation4 + $0x13c] sm:$0xf] %vm5018_vm2, %v13860_v47  ;;  %v4583_v8 = vmax.f32 %v4327_v2, %v4455_v62 }
 0x456   : > { %16480 = vst [vmem:[#allocation30_spill] sm:$0xff] %v13854_v31  ;;  %6402 = vrot.lane.b32.xlu0 %v13541_v12, %s11798_s23  ;;  %v3895_v60 = vpop.f32.mrf.mxu0 }
 0x457   : > { %v13866_v53 = vpop.permute.xlu1 %8049  ;;  %4920 = vst.msk [vmem:[#allocation3 + $0x220] sm:$0xff] %vm3261_vm0, %v4710_v3  ;;  %v3896_v24 = vadd.f32 %v13771_v61, %v3895_v60  ;;  %v4058_v3 = vadd.f32 %v13771_v61, %v4057_v51 }
 0x458   : > { %16483 = vst [vmem:[#allocation34_spill] sm:$0xff] %v13866_v53  ;;  %v13868_v18 = vpop.permute.xlu0 %8369 }
 0x459   : > { %16484 = vst [vmem:[#allocation31_spill] sm:$0xff] %v13868_v18  ;;  %v4391_v40 = vmax.f32 %v3896_v24, 0.0  ;;  %v4218_v24 = vadd.f32 %v13771_v61, %v16485_v15 }
 0x45a   : > { %6040 = vst.msk [vmem:[#allocation4 + $0x13c] sm:$0xf] %vm5243_vm3, %v13523_v43 }
 0x45b   : > { %5187 = vrot.lane.b32.xlu2 %v13571_v6, %s11797_s18  ;;  %6265 = vst.msk [vmem:[#allocation4 + $0x13c] sm:$0xf] %vm5468_vm4, %v13595_v23  ;;  %v4647_v43 = vmax.f32 %v4391_v40, %v4519_v22  ;;  %v16486_v23 = vld [vmem:[#allocation33_spill] sm:$0xff]  ;;  %v4456_v22 = vmax.f32 %v4058_v3, 0.0  ;;  %v4520_v56 = vmax.f32 %v4218_v24, 0.0 }
 0x45c   : > { %v3738_v62 = vadd.f32 %v13771_v61, %v16486_v23  ;;  %5817 = vst.msk [vmem:[#allocation4 + $0x148] sm:$0xf] %vm5018_vm2, %v13892_v48  ;;  %v5076_v23 = vld [vmem:[#allocation3 + $0x1b0] sm:$0xff] }
 0x45d   : > { %v13886_v60 = vpop.permute.xlu2 %5157  ;;  %5191 = vrot.lane.b32.xlu1 %v13630_v17, %s11797_s18  ;;  %v4711_v5 = vmax.f32 %v4583_v8, %v4647_v43  ;;  %6041 = vst.msk [vmem:[#allocation4 + $0x148] sm:$0xf] %vm5243_vm3, %v13565_v44 }
 0x45e   : > { %5189 = vrot.lane.b32.xlu0 %v13602_v63, %s11797_s18  ;;  %v5757_v26 = vld [vmem:[#allocation3 + $0x220] sm:$0xff]  ;;  %v3897_v31 = vpop.f32.mrf.mxu0  ;;  %v4328_v15 = vmax.f32 %v3738_v62, 0.0  ;;  %6266 = vst.msk [vmem:[#allocation4 + $0x148] sm:$0xf] %vm5468_vm4, %v13583_v20 }
 0x45f   : > { %v13898_v51 = vpop.permute.xlu1 %8591  ;;  %v13904_v40 = vpack.c.bf16 %v5757_v26, %v5757_v26  ;;  %4922 = vst.msk [vmem:[#allocation2 + $0x11] sm:$0xff] %vm3261_vm0, %v4711_v5  ;;  %v3898_v58 = vadd.f32 %v13771_v61, %v3897_v31  ;;  %v16490_v5 = vld [vmem:[#allocation38_spill] sm:$0xff] }
 0x460   : > { %16487 = vst [vmem:[#allocation36_spill] sm:$0xff] %v13898_v51  ;;  %v13900_v2 = vpop.permute.xlu0 %6372  ;;  %v4584_v26 = vmax.f32 %v4328_v15, %v4456_v22  ;;  %v6294_v62 = vld [vmem:[#allocation3 + $0x1a0] sm:$0xff] }
 0x461   : > { %16488 = vst [vmem:[#allocation33_spill] sm:$0xff] %v13900_v2  ;;  %v4392_v8 = vmax.f32 %v3898_v58, 0.0 }
 0x462   : > { %5821 = vst.msk [vmem:[#allocation4 + $0x178] sm:$0xf] %vm5018_vm2, %v13904_v40 }
 0x463   : > { %6406 = vrot.lane.b32.xlu2 %v13602_v63, %s11798_s23  ;;  %6045 = vst.msk [vmem:[#allocation4 + $0x178] sm:$0xf] %vm5243_vm3, %v13758_v46  ;;  %v4648_v44 = vmax.f32 %v4392_v8, %v4520_v56  ;;  %v4221_v46 = vadd.f32 %v13771_v61, %v16490_v5  ;;  %v6326_v56 = vpack.c.bf16 %v6294_v62, %v6294_v62 }
 0x464   : > { %6270 = vst.msk [vmem:[#allocation4 + $0x178] sm:$0xf] %vm5468_vm4, %v13130_v0 }
 0x465   : > { %v13916_v3 = vpop.permute.xlu2 %6376  ;;  %6410 = vrot.lane.b32.xlu1 %v13662_v33, %s11798_s23  ;;  %6495 = vst.msk [vmem:[#allocation4 + $0x178] sm:$0xf] %vm5693_vm5, %v13150_v28  ;;  %v4712_v24 = vmax.f32 %v4584_v26, %v4648_v44  ;;  %v4521_v58 = vmax.f32 %v4221_v46, 0.0  ;;  %v13938_v28 = vpack.c.bf16 %v5076_v23, %v5076_v23  ;;  %v16493_v26 = vld [vmem:[#allocation40_spill] sm:$0xff] }
 0x466   : > { %16489 = vst [vmem:[#allocation98_spill] sm:$0xff] %v13916_v3  ;;  %6408 = vrot.lane.b32.xlu0 %v13630_v17, %s11798_s23  ;;  %v3900_v22 = vpop.f32.mrf.mxu0  ;;  %v4223_v44 = vadd.f32 %v13771_v61, %v16493_v26 }
 0x467   : > { %v13928_v31 = vpop.permute.xlu1 %5153  ;;  %4923 = vst.msk [vmem:[#allocation2 + $0x21] sm:$0xff] %vm3261_vm0, %v4712_v24  ;;  %v3901_v0 = vadd.f32 %v13771_v61, %v3900_v22  ;;  %v16496_v24 = vld [vmem:[#allocation35_spill] sm:$0xff]  ;;  %v7437_v22 = vld [vmem:[#allocation3 + $0x200] sm:$0xff] }
 0x468   : > { %v13930_v43 = vpop.permute.xlu0 %7831  ;;  %v13952_v3 = vpack.c.bf16 %v7437_v22, %v7437_v22 }
 0x469   : > { %16491 = vst [vmem:[#allocation38_spill] sm:$0xff] %v13930_v43  ;;  %v4393_v15 = vmax.f32 %v3901_v0, 0.0 }
 0x46a   : > { %5819 = vst.msk [vmem:[#allocation4 + $0x160] sm:$0xf] %vm5018_vm2, %v13952_v3 }
 0x46b   : > { %5193 = vrot.lane.b32.xlu2 %v13662_v33, %s11797_s18  ;;  %v4649_v20 = vmax.f32 %v4393_v15, %v4521_v58  ;;  %v4522_v58 = vmax.f32 %v4223_v44, 0.0  ;;  %6043 = vst.msk [vmem:[#allocation4 + $0x160] sm:$0xf] %vm5243_vm3, %v13672_v13 }
 0x46c   : > { %6268 = vst.msk [vmem:[#allocation4 + $0x160] sm:$0xf] %vm5468_vm4, %v13731_v16 }
 0x46d   : > { %v13940_v8 = vpop.permute.xlu2 %7835  ;;  %5197 = vrot.lane.b32.xlu1 %v13938_v28, %s11797_s18  ;;  %v4713_v23 = vmax.f32 %v16496_v24, %v4649_v20 }
 0x46e   : > { %16492 = vst [vmem:[#allocation99_spill] sm:$0xff] %v13940_v8  ;;  %5195 = vrot.lane.b32.xlu0 %v6326_v56, %s11797_s18  ;;  %v3902_v62 = vpop.f32.mrf.mxu0  ;;  %v6496_v0 = vld [vmem:[#allocation2 + $0x21] sm:$0xff] }
 0x46f   : > { %v13947_v5 = vpop.permute.xlu1 %6370  ;;  %4924 = vst.msk [vmem:[#allocation2 + $0x31] sm:$0xff] %vm3261_vm0, %v4713_v23  ;;  %v3903_v8 = vadd.f32 %v13771_v61, %v3902_v62  ;;  %v13956_v43 = vpack.c.bf16 %v6496_v0, %v6496_v0  ;;  %v16501_v23 = vld [vmem:[#allocation37_spill] sm:$0xff]  ;;  %v8943_v62 = vld [vmem:[#allocation3 + $0x21] sm:$0xff]  ;;  %v7438_v0 = vld [vmem:[#allocation3 + $0x210] sm:$0xff] }
 0x470   : > { %16494 = vst [vmem:[#allocation40_spill] sm:$0xff] %v13947_v5  ;;  %v13949_v46 = vpop.permute.xlu0 %8053  ;;  %v8975_v18 = vpack.c.bf16 %v8943_v62, %v8943_v62  ;;  %v16503_v62 = vld [vmem:[#allocation46_spill] sm:$0xff] }
 0x471   : > { %16495 = vst [vmem:[#allocation100_spill] sm:$0xff] %v13949_v46  ;;  %v4394_v15 = vmax.f32 %v3903_v8, 0.0  ;;  %v16498_v8 = vld [vmem:[#allocation42_spill] sm:$0xff]  ;;  %v13983_v46 = vpack.c.bf16 %v7438_v0, %v7438_v0 }
 0x472   : > { %6560 = vst.msk [vmem:[#allocation4 + $0x8] sm:$0xf] %vm5018_vm2, %v13956_v43  ;;  %v4226_v44 = vadd.f32 %v13771_v61, %v16498_v8 }
 0x473   : > { %6412 = vrot.lane.b32.xlu2 %v6326_v56, %s11798_s23  ;;  %v4650_v26 = vmax.f32 %v4394_v15, %v4522_v58  ;;  %v11647_v56 = vld [vmem:[%s16322_s3 + $0x20] sm:$0xff]  ;;  %v6297_v15 = vld [vmem:[#allocation3 + $0x1d0] sm:$0xff]  ;;  %5820 = vst.msk [vmem:[#allocation4 + $0x16c] sm:$0xf] %vm5018_vm2, %v13983_v46 }
 0x474   : > { %7095 = vmatpush.bf16.msrb.mxu1 %v11647_v56  ;;  %v5079_v58 = vld [vmem:[#allocation3 + $0x1e0] sm:$0xff]  ;;  %6044 = vst.msk [vmem:[#allocation4 + $0x16c] sm:$0xf] %vm5243_vm3, %v13703_v45 }
 0x475   : > { %v13965_v20 = vpop.permute.xlu2 %5163  ;;  %6416 = vrot.lane.b32.xlu1 %v13739_v21, %s11798_s23  ;;  %v4714_v22 = vmax.f32 %v16501_v23, %v4650_v26  ;;  %v4523_v26 = vmax.f32 %v4226_v44, 0.0  ;;  %v5111_v56 = vpack.c.bf16 %v5079_v58, %v5079_v58  ;;  %v6329_v23 = vpack.c.bf16 %v6297_v15, %v6297_v15  ;;  %v11659_v44 = vld [vmem:[%s16322_s3 + $0x80] sm:$0xff]  ;;  %6269 = vst.msk [vmem:[#allocation4 + $0x16c] sm:$0xf] %vm5468_vm4, %v13791_v36  ;;  %v16505_v15 = vld [vmem:[#allocation39_spill] sm:$0xff] }
 0x476   : > { %16497 = vst [vmem:[#allocation35_spill] sm:$0xff] %v13965_v20  ;;  %6414 = vrot.lane.b32.xlu0 %v13938_v28, %s11798_s23  ;;  %v3905_v20 = vpop.f32.mrf.mxu0  ;;  %v6497_v2 = vld [vmem:[#allocation2 + $0x31] sm:$0xff]  ;;  %7277 = vmatpush.bf16.msrb.mxu3 %v11659_v44 }
 0x477   : > { %v13978_v13 = vpop.permute.xlu1 %8371  ;;  %4925 = vst.msk [vmem:[#allocation2 + $0x41] sm:$0xff] %vm3261_vm0, %v4714_v22  ;;  %v3906_v16 = vadd.f32 %v13771_v61, %v3905_v20  ;;  %v13987_v8 = vpack.c.bf16 %v6497_v2, %v6497_v2  ;;  %v8944_v22 = vld [vmem:[#allocation3 + $0x31] sm:$0xff] }
 0x478   : > { %16499 = vst [vmem:[#allocation42_spill] sm:$0xff] %v13978_v13  ;;  %v13980_v24 = vpop.permute.xlu0 %8595 }
 0x479   : > { %16500 = vst [vmem:[#allocation101_spill] sm:$0xff] %v13980_v24  ;;  %v10910_v13 = vld [vmem:[#allocation4 + $0x8] sm:$0xf]  ;;  %v4395_v24 = vmax.f32 %v3906_v16, 0.0 }
 0x47a   : > { %6561 = vst.msk [vmem:[#allocation4 + $0x14] sm:$0xf] %vm5018_vm2, %v13987_v8 }
 0x47b   : > { %5199 = vrot.lane.b32.xlu2 %v13739_v21, %s11797_s18  ;;  %9007 = vst.msk [vmem:[#allocation4 + $0x8] sm:$0xf] %vm5018_vm2, %v8975_v18  ;;  %v4651_v2 = vmax.f32 %v4395_v24, %v4523_v26  ;;  %v4228_v18 = vadd.f32 %v13771_v61, %v16503_v62 }
 0x47d   : > { %v13996_v20 = vpop.permute.xlu2 %6382  ;;  %5203 = vrot.lane.b32.xlu1 %v5111_v56, %s11797_s18  ;;  %v4715_v24 = vmax.f32 %v16505_v15, %v4651_v2  ;;  %v4524_v5 = vmax.f32 %v4228_v18, 0.0  ;;  %v16510_v15 = vld [vmem:[#allocation41_spill] sm:$0xff] }
 0x47e   : > { %16502 = vst [vmem:[#allocation37_spill] sm:$0xff] %v13996_v20  ;;  %5201 = vrot.lane.b32.xlu0 %v6329_v23, %s11797_s18  ;;  %v3907_v16 = vpop.f32.mrf.mxu0  ;;  %v6498_v26 = vld [vmem:[#allocation2 + $0x41] sm:$0xff]  ;;  %v8976_v20 = vpack.c.bf16 %v8944_v22, %v8944_v22 }
 0x47f   : > { %v14009_v0 = vpop.permute.xlu1 %6374  ;;  %4926 = vst.msk [vmem:[#allocation2 + $0x51] sm:$0xff] %vm3261_vm0, %v4715_v24  ;;  %v3908_v45 = vadd.f32 %v13771_v61, %v3907_v16  ;;  %v14016_v34 = vpack.c.bf16 %v6498_v26, %v6498_v26  ;;  %v11655_v22 = vld [vmem:[%s16322_s3 + $0x60] sm:$0xff]  ;;  %v5082_v26 = vld [vmem:[#allocation3 + $0x210] sm:$0xff] }
 0x480   : > { %16504 = vst [vmem:[#allocation46_spill] sm:$0xff] %v14009_v0  ;;  %v14011_v58 = vpop.permute.xlu0 %5159  ;;  %7184 = vmatpush.bf16.msrb.mxu2 %v11655_v22  ;;  %v8945_v16 = vld [vmem:[#allocation3 + $0x41] sm:$0xff] }
 0x481   : > { %v11597_v36 = vld [vmem:[#allocation4 + $0x10] sm:$0xf0]  ;;  %v4396_v62 = vmax.f32 %v3908_v45, 0.0  ;;  %6562 = vst.msk [vmem:[#allocation4 + $0x20] sm:$0xf] %vm5018_vm2, %v14016_v34 }
 0x482   : > { %v10911_v0 = vor.u32 %v11597_v36, %v10910_v13  ;;  %9008 = vst.msk [vmem:[#allocation4 + $0x14] sm:$0xf] %vm5018_vm2, %v8976_v20 }
 0x483   : > { %6418 = vrot.lane.b32.xlu2 %v6329_v23, %s11798_s23  ;;  %v4652_v44 = vmax.f32 %v4396_v62, %v4524_v5  ;;  %v16507_v23 = vld [vmem:[#allocation48_spill] sm:$0xff] }
 0x484   : > { %v4231_v13 = vadd.f32 %v13771_v61, %v16507_v23  ;;  %11164 = vmatmul.msk.bf16.vlgmr.msrb.gmra.mxu3 %vm3261_vm0, %v10911_v0  ;;  %v8977_v0 = vpack.c.bf16 %v8945_v16, %v8945_v16  ;;  %v16512_v16 = vld [vmem:[#allocation51_spill] sm:$0xff] }
 0x485   : > { %v14022_v2 = vpop.permute.xlu2 %5169  ;;  %6422 = vrot.lane.b32.xlu1 %v13820_v55, %s11798_s23  ;;  %v4716_v24 = vmax.f32 %v16510_v15, %v4652_v44  ;;  %v4955_v15 = vld [vmem:[#allocation2 + $0x10] sm:$0xff] }
 0x486   : > { %16506 = vst [vmem:[#allocation39_spill] sm:$0xff] %v14022_v2  ;;  %6420 = vrot.lane.b32.xlu0 %v5111_v56, %s11798_s23  ;;  %v6300_v56 = vld [vmem:[#allocation3 + $0x200] sm:$0xff]  ;;  %v3910_v5 = vpop.f32.mrf.mxu0  ;;  %v6499_v45 = vld [vmem:[#allocation2 + $0x51] sm:$0xff]  ;;  %v4525_v23 = vmax.f32 %v4231_v13, 0.0  ;;  %v5114_v2 = vpack.c.bf16 %v5082_v26, %v5082_v26  ;;  %v4233_v26 = vadd.f32 %v13771_v61, %v16512_v16 }
 0x487   : > { %v14033_v20 = vpop.permute.xlu1 %7833  ;;  %4927 = vst.msk [vmem:[#allocation2 + $0x61] sm:$0xff] %vm3261_vm0, %v4716_v24  ;;  %v3911_v36 = vadd.f32 %v13771_v61, %v3910_v5  ;;  %v14040_v62 = vpack.c.bf16 %v6499_v45, %v6499_v45  ;;  %v4987_v24 = vpack.c.bf16 %v4955_v15, %v4955_v15  ;;  %v16515_v45 = vld [vmem:[#allocation43_spill] sm:$0xff] }
 0x488   : > { %16508 = vst [vmem:[#allocation48_spill] sm:$0xff] %v14033_v20  ;;  %v14035_v18 = vpop.permute.xlu0 %6378  ;;  %v10922_v22 = vld [vmem:[#allocation4 + $0x20] sm:$0xf] }
 0x489   : > { %16509 = vst [vmem:[#allocation102_spill] sm:$0xff] %v14035_v18  ;;  %v6332_v18 = vpack.c.bf16 %v6300_v56, %v6300_v56  ;;  %v4397_v44 = vmax.f32 %v3911_v36, 0.0 }
 0x48a   : > { %6563 = vst.msk [vmem:[#allocation4 + $0x2c] sm:$0xf] %vm5018_vm2, %v14040_v62 }
 0x48b   : > { %5205 = vrot.lane.b32.xlu2 %v13820_v55, %s11797_s18  ;;  %9009 = vst.msk [vmem:[#allocation4 + $0x20] sm:$0xf] %vm5018_vm2, %v8977_v0  ;;  %v4653_v13 = vmax.f32 %v4397_v44, %v4525_v23 }
 0x48c   : > { %5020 = vst.msk [vmem:[#allocation4 + $0xc] sm:$0xf] %vm5018_vm2, %v4987_v24 }
 0x48d   : > { %v14047_v20 = vpop.permute.xlu2 %6388  ;;  %5209 = vrot.lane.b32.xlu1 %v5114_v2, %s11797_s18  ;;  %v4717_v36 = vmax.f32 %v16515_v45, %v4653_v13  ;;  %5245 = vst.msk [vmem:[#allocation4 + $0xc] sm:$0xf] %vm5243_vm3, %v13760_v32 }
 0x48e   : > { %16511 = vst [vmem:[#allocation41_spill] sm:$0xff] %v14047_v20  ;;  %5207 = vrot.lane.b32.xlu0 %v6332_v18, %s11797_s18  ;;  %v3912_v0 = vpop.f32.mrf.mxu0  ;;  %v6500_v15 = vld [vmem:[#allocation2 + $0x61] sm:$0xff]  ;;  %v4526_v20 = vmax.f32 %v4233_v26, 0.0 }
 0x48f   : > { %v14054_v56 = vpop.permute.xlu1 %5161  ;;  %4928 = vst.msk [vmem:[#allocation2 + $0x71] sm:$0xff] %vm3261_vm0, %v4717_v36  ;;  %v3913_v23 = vadd.f32 %v13771_v61, %v3912_v0  ;;  %v14063_v44 = vpack.c.bf16 %v6500_v15, %v6500_v15  ;;  %v5506_v45 = vld [vmem:[#allocation2 + $0x60] sm:$0xff]  ;;  %v16520_v15 = vld [vmem:[#allocation45_spill] sm:$0xff] }
 0x490   : > { %16513 = vst [vmem:[#allocation51_spill] sm:$0xff] %v14054_v56  ;;  %v14056_v5 = vpop.permute.xlu0 %5165  ;;  %v5502_v26 = vld [vmem:[#allocation2 + $0x20] sm:$0xff] }
 0x491   : > { %16514 = vst [vmem:[#allocation103_spill] sm:$0xff] %v14056_v5  ;;  %v11600_v24 = vld [vmem:[#allocation4 + $0x28] sm:$0xf0]  ;;  %v4398_v16 = vmax.f32 %v3913_v23, 0.0 }
 0x492   : > { %v10923_v56 = vor.u32 %v11600_v24, %v10922_v22  ;;  %9010 = vst.msk [vmem:[#allocation4 + $0x2c] sm:$0xf] %vm5018_vm2, %v13633_v49  ;;  %v16517_v22 = vld [vmem:[#allocation54_spill] sm:$0xff] }
 0x493   : > { %6424 = vrot.lane.b32.xlu2 %v6332_v18, %s11798_s23  ;;  %6564 = vst.msk [vmem:[#allocation4 + $0x38] sm:$0xf] %vm5018_vm2, %v14063_v44  ;;  %v4654_v13 = vmax.f32 %v4398_v16, %v4526_v20  ;;  %v14076_v18 = vpack.c.bf16 %v5506_v45, %v5506_v45  ;;  %v4236_v49 = vadd.f32 %v13771_v61, %v16517_v22  ;;  %v8947_v24 = vld [vmem:[#allocation3 + $0x61] sm:$0xff] }
 0x494   : > { %11165 = vmatmul.msk.bf16.gmra.mxu3 %vm3261_vm0, %v10923_v56  ;;  %v5534_v56 = vpack.c.bf16 %v5502_v26, %v5502_v26 }
 0x495   : > { %v14070_v32 = vpop.permute.xlu2 %5175  ;;  %6428 = vrot.lane.b32.xlu1 %v13904_v40, %s11798_s23  ;;  %v4718_v23 = vmax.f32 %v16520_v15, %v4654_v13  ;;  %v4957_v40 = vld [vmem:[#allocation2 + $0x30] sm:$0xff]  ;;  %5025 = vst.msk [vmem:[#allocation4 + $0x48] sm:$0xf] %vm5018_vm2, %v14076_v18  ;;  %v4527_v15 = vmax.f32 %v4236_v49, 0.0 }
 0x496   : > { %16516 = vst [vmem:[#allocation43_spill] sm:$0xff] %v14070_v32  ;;  %6426 = vrot.lane.b32.xlu0 %v5114_v2, %s11798_s23  ;;  %v5501_v32 = vld [vmem:[#allocation2 + $0x10] sm:$0xff]  ;;  %v3915_v20 = vpop.f32.mrf.mxu0  ;;  %v4989_v5 = vpack.c.bf16 %v4957_v40, %v4957_v40 }
 0x497   : > { %v14080_v36 = vpop.permute.xlu1 %6380  ;;  %v5277_v2 = vld [vmem:[#allocation2 + $0x11] sm:$0xff]  ;;  %4929 = vst.msk [vmem:[#allocation2 + $0x81] sm:$0xff] %vm3261_vm0, %v4718_v23  ;;  %v3916_v45 = vadd.f32 %v13771_v61, %v3915_v20  ;;  %v5533_v51 = vpack.c.bf16 %v5501_v32, %v5501_v32 }
 0x498   : > { %16518 = vst [vmem:[#allocation54_spill] sm:$0xff] %v14080_v36  ;;  %v14082_v0 = vpop.permute.xlu0 %6384  ;;  %v6501_v16 = vld [vmem:[#allocation2 + $0x71] sm:$0xff]  ;;  %v8979_v36 = vpack.c.bf16 %v8947_v24, %v8947_v24  ;;  %v5309_v40 = vpack.c.bf16 %v5277_v2, %v5277_v2 }
 0x499   : > { %16519 = vst [vmem:[#allocation104_spill] sm:$0xff] %v14082_v0  ;;  %v14089_v22 = vpack.c.bf16 %v6501_v16, %v6501_v16  ;;  %v4956_v0 = vld [vmem:[#allocation2 + $0x20] sm:$0xff]  ;;  %v4399_v53 = vmax.f32 %v3916_v45, 0.0  ;;  %v16521_v23 = vld [vmem:[#allocation49_spill] sm:$0xff]  ;;  %v16523_v49 = vld [vmem:[#allocation44_spill] sm:$0xff] }
 0x49a   : > { %5022 = vst.msk [vmem:[#allocation4 + $0x24] sm:$0xf] %vm5018_vm2, %v4989_v5  ;;  %v4988_v13 = vpack.c.bf16 %v4956_v0, %v4956_v0  ;;  %v10934_v26 = vld [vmem:[#allocation4 + $0x38] sm:$0xf]  ;;  %v3758_v20 = vadd.f32 %v13771_v61, %v16521_v23  ;;  %v4078_v0 = vadd.f32 %v13771_v61, %v16523_v49 }
 0x49b   : > { %5599 = vrot.lane.b32.xlu2 %v5534_v56, %s11798_s23  ;;  %6565 = vst.msk [vmem:[#allocation4 + $0x44] sm:$0xf] %vm5018_vm2, %v14089_v22  ;;  %v4655_v5 = vmax.f32 %v4399_v53, %v4527_v15  ;;  %v8948_v32 = vld [vmem:[#allocation3 + $0x71] sm:$0xff] }
 0x49c   : > { %9011 = vst.msk [vmem:[#allocation4 + $0x38] sm:$0xf] %vm5018_vm2, %v8979_v36  ;;  %v16524_v36 = vld [vmem:[#allocation57_spill] sm:$0xff]  ;;  %v8980_v15 = vpack.c.bf16 %v8948_v32, %v8948_v32 }
 0x49d   : > { %v14098_v16 = vpop.permute.xlu2 %6394  ;;  %5597 = vrot.lane.b32.xlu1 %v5533_v51, %s11798_s23  ;;  %5247 = vst.msk [vmem:[#allocation4 + $0x24] sm:$0xf] %vm5243_vm3, %v13928_v31  ;;  %v4238_v24 = vadd.f32 %v13771_v61, %v16524_v36  ;;  %v16527_v51 = vld [vmem:[#allocation47_spill] sm:$0xff]  ;;  %v4336_v31 = vmax.f32 %v3758_v20, 0.0 }
 0x49e   : > { %16522 = vst [vmem:[#allocation45_spill] sm:$0xff] %v14098_v16  ;;  %5374 = vrot.lane.b32.xlu0 %v5309_v40, %s11796_s17  ;;  %v4719_v23 = vmax.f32 %v16527_v51, %v4655_v5  ;;  %v3917_v53 = vpop.f32.mrf.mxu0  ;;  %v6502_v49 = vld [vmem:[#allocation2 + $0x81] sm:$0xff] }
 0x49f   : > { %5021 = vst.msk [vmem:[#allocation4 + $0x18] sm:$0xf] %vm5018_vm2, %v4988_v13  ;;  %v14109_v2 = vpop.permute.xlu1 %5167  ;;  %v3918_v13 = vadd.f32 %v13771_v61, %v3917_v53  ;;  %v14120_v16 = vpack.c.bf16 %v6502_v49, %v6502_v49 }
 0x4a0   : > { %16525 = vst [vmem:[#allocation49_spill] sm:$0xff] %v14109_v2  ;;  %v14111_v45 = vpop.permute.xlu0 %5171  ;;  %v4464_v2 = vmax.f32 %v4078_v0, 0.0 }
 0x4a1   : > { %16526 = vst [vmem:[#allocation44_spill] sm:$0xff] %v14111_v45  ;;  %v4528_v45 = vmax.f32 %v4238_v24, 0.0  ;;  %v4400_v5 = vmax.f32 %v3918_v13, 0.0  ;;  %v16530_v24 = vld [vmem:[#allocation59_spill] sm:$0xff] }
 0x4a2   : > { %5246 = vst.msk [vmem:[#allocation4 + $0x18] sm:$0xf] %vm5243_vm3, %v13813_v11  ;;  %v11603_v36 = vld [vmem:[#allocation4 + $0x40] sm:$0xf0]  ;;  %v4241_v51 = vadd.f32 %v13771_v61, %v16530_v24 }
 0x4a3   : > { %5250 = vst.msk [vmem:[#allocation4 + $0x48] sm:$0xf] %vm5243_vm3, %v14011_v58  ;;  %6143 = vrot.lane.b32.xlu2 %v5534_v56, %s11796_s17  ;;  %v10935_v11 = vor.u32 %v11603_v36, %v10934_v26  ;;  %v4592_v58 = vmax.f32 %v4336_v31, %v4464_v2  ;;  %v4656_v32 = vmax.f32 %v4400_v5, %v4528_v45  ;;  %v4958_v31 = vld [vmem:[#allocation2 + $0x40] sm:$0xff] }
 0x4a4   : > { %4930 = vst.msk [vmem:[#allocation2 + $0x91] sm:$0xff] %vm3261_vm0, %v4719_v23  ;;  %v8949_v23 = vld [vmem:[#allocation3 + $0x81] sm:$0xff]  ;;  %v4990_v45 = vpack.c.bf16 %v4958_v31, %v4958_v31  ;;  %v4529_v36 = vmax.f32 %v4241_v51, 0.0 }
 0x4a5   : > { %9012 = vst.msk [vmem:[#allocation4 + $0x44] sm:$0xf] %vm5018_vm2, %v8980_v15  ;;  %v14126_v20 = vpop.permute.xlu2 %5181  ;;  %7601 = vrot.lane.b32.xlu1 %v5309_v40, %s11797_s18  ;;  %11166 = vmatmul.msk.bf16.gmra.mxu3 %vm3261_vm0, %v10935_v11  ;;  %v4720_v26 = vmax.f32 %v4592_v58, %v4656_v32  ;;  %v8981_v49 = vpack.c.bf16 %v8949_v23, %v8949_v23  ;;  %v16532_v58 = vld [vmem:[#allocation53_spill] sm:$0xff]  ;;  %v16536_v31 = vld [vmem:[#allocation63_spill] sm:$0xff] }
 0x4a6   : > { %6566 = vst.msk [vmem:[#allocation4 + $0x50] sm:$0xf] %vm5018_vm2, %v14120_v16  ;;  %5918 = vrot.lane.b32.xlu0 %v5309_v40, %s11797_s18  ;;  %v3920_v2 = vpop.f32.mrf.mxu0  ;;  %v3763_v32 = vadd.f32 %v13771_v61, %v16532_v58  ;;  %v8950_v23 = vld [vmem:[#allocation3 + $0x91] sm:$0xff] }
 0x4a7   : > { %16528 = vst [vmem:[#allocation57_spill] sm:$0xff] %v14126_v20  ;;  %v14131_v0 = vpop.permute.xlu1 %6386  ;;  %v3921_v13 = vadd.f32 %v13771_v61, %v3920_v2  ;;  %v16535_v2 = vld [vmem:[#allocation50_spill] sm:$0xff]  ;;  %v11646_v20 = vld [vmem:[%s16322_s3 + $0x18] sm:$0xff] }
 0x4a8   : > { %v14133_v56 = vpop.permute.xlu0 %6390  ;;  %4931 = vst.msk [vmem:[#allocation2 + $0xa1] sm:$0xff] %vm3261_vm0, %v4720_v26  ;;  %7096 = vmatpush.bf16.msrb.mxu1 %v11646_v20  ;;  %v11654_v20 = vld [vmem:[%s16322_s3 + $0x58] sm:$0xff] }
 0x4a9   : > { %16529 = vst [vmem:[#allocation47_spill] sm:$0xff] %v14133_v56  ;;  %v4401_v5 = vmax.f32 %v3921_v13, 0.0  ;;  %v4243_v13 = vadd.f32 %v13771_v61, %v16536_v31  ;;  %7185 = vmatpush.bf16.msrb.mxu2 %v11654_v20  ;;  %v16540_v20 = vld [vmem:[#allocation56_spill] sm:$0xff] }
 0x4aa   : > { %5023 = vst.msk [vmem:[#allocation4 + $0x30] sm:$0xf] %vm5018_vm2, %v4990_v45  ;;  %v4338_v45 = vmax.f32 %v3763_v32, 0.0 }
 0x4ab   : > { %v6503_v53 = vld [vmem:[#allocation2 + $0x91] sm:$0xff]  ;;  %7603 = vrot.lane.b32.xlu2 %v13956_v43, %s11797_s18  ;;  %v4657_v26 = vmax.f32 %v4401_v5, %v4529_v36  ;;  %5248 = vst.msk [vmem:[#allocation4 + $0x30] sm:$0xf] %vm5243_vm3, %v13829_v59 }
 0x4ac   : > { %v14139_v40 = vpack.c.bf16 %v6503_v53, %v6503_v53  ;;  %v4083_v53 = vadd.f32 %v13771_v61, %v16535_v2  ;;  %v4959_v5 = vld [vmem:[#allocation2 + $0x50] sm:$0xff] }
 0x4ad   : > { %v10946_v15 = vld [vmem:[#allocation4 + $0x50] sm:$0xf]  ;;  %v14145_v11 = vpop.permute.xlu2 %6400  ;;  %5376 = vrot.lane.b32.xlu1 %v13956_v43, %s11796_s17  ;;  %v4991_v56 = vpack.c.bf16 %v4959_v5, %v4959_v5 }
 0x4ae   : > { %6567 = vst.msk [vmem:[#allocation4 + $0x5c] sm:$0xf] %vm5018_vm2, %v14139_v40  ;;  %8815 = vrot.lane.b32.xlu0 %v13956_v43, %s11798_s23  ;;  %v3922_v36 = vpop.f32.mrf.mxu0  ;;  %v5505_v5 = vld [vmem:[#allocation2 + $0x50] sm:$0xff] }
 0x4af   : > { %16531 = vst [vmem:[#allocation59_spill] sm:$0xff] %v14145_v11  ;;  %v14155_v24 = vpop.permute.xlu1 %5173  ;;  %v16537_v11 = vld [vmem:[#allocation52_spill] sm:$0xff]  ;;  %v3923_v59 = vadd.f32 %v13771_v61, %v3922_v36 }
 0x4b0   : > { %9013 = vst.msk [vmem:[#allocation4 + $0x50] sm:$0xf] %vm5018_vm2, %v8981_v49  ;;  %v14157_v51 = vpop.permute.xlu0 %5177  ;;  %v5503_v49 = vld [vmem:[#allocation2 + $0x30] sm:$0xff]  ;;  %v4721_v58 = vmax.f32 %v16537_v11, %v4657_v26  ;;  %v4530_v11 = vmax.f32 %v4243_v13, 0.0 }
 0x4b1   : > { %16533 = vst [vmem:[#allocation53_spill] sm:$0xff] %v14155_v24  ;;  %v8982_v24 = vpack.c.bf16 %v8950_v23, %v8950_v23  ;;  %v5535_v2 = vpack.c.bf16 %v5503_v49, %v5503_v49  ;;  %v4402_v26 = vmax.f32 %v3923_v59, 0.0  ;;  %v6504_v23 = vld [vmem:[#allocation2 + $0xa1] sm:$0xff] }
 0x4b2   : > { %16534 = vst [vmem:[#allocation105_spill] sm:$0xff] %v14157_v51  ;;  %v4466_v51 = vmax.f32 %v4083_v53, 0.0 }
 0x4b3   : > { %4932 = vst.msk [vmem:[#allocation2 + $0xb1] sm:$0xff] %vm3261_vm0, %v4721_v58  ;;  %5378 = vrot.lane.b32.xlu2 %v13987_v8, %s11796_s17  ;;  %v4658_v49 = vmax.f32 %v4402_v26, %v4530_v11 }
 0x4b4   : > { %5024 = vst.msk [vmem:[#allocation4 + $0x3c] sm:$0xf] %vm5018_vm2, %v4991_v56  ;;  %v4594_v36 = vmax.f32 %v4338_v45, %v4466_v51  ;;  %v16538_v51 = vld [vmem:[#allocation64_spill] sm:$0xff] }
 0x4b5   : > { %v11606_v31 = vld [vmem:[#allocation4 + $0x58] sm:$0xf0]  ;;  %v5188_v58 = vpop.permute.xlu2 %5187  ;;  %5920 = vrot.lane.b32.xlu1 %v13956_v43, %s11797_s18  ;;  %v4246_v53 = vadd.f32 %v13771_v61, %v16538_v51  ;;  %5249 = vst.msk [vmem:[#allocation4 + $0x3c] sm:$0xf] %vm5243_vm3, %v13886_v60  ;;  %v5504_v60 = vld [vmem:[#allocation2 + $0x40] sm:$0xff] }
 0x4b6   : > { %v10947_v32 = vor.u32 %v11606_v31, %v10946_v15  ;;  %9014 = vst.msk [vmem:[#allocation4 + $0x5c] sm:$0xf] %vm5018_vm2, %v8982_v24  ;;  %5601 = vrot.lane.b32.xlu0 %v5535_v2, %s11798_s23  ;;  %v14183_v15 = vpack.c.bf16 %v6504_v23, %v6504_v23  ;;  %v4722_v56 = vmax.f32 %v4594_v36, %v4658_v49  ;;  %v16539_v23 = vld [vmem:[#allocation58_spill] sm:$0xff] }
 0x4b7   : > { %5264 = vst.msk [vmem:[#allocation4 + $0xf0] sm:$0xf] %vm5243_vm3, %v5188_v58  ;;  %v14187_v43 = vpop.permute.xlu1 %6392  ;;  %v4531_v45 = vmax.f32 %v4246_v53, 0.0  ;;  %v3768_v36 = vadd.f32 %v13771_v61, %v16539_v23  ;;  %v5536_v49 = vpack.c.bf16 %v5504_v60, %v5504_v60 }
 0x4b8   : > { %11167 = vmatmul.msk.bf16.gmra.mxu3 %vm3261_vm0, %v10947_v32  ;;  %5489 = vst.msk [vmem:[#allocation4 + $0xf0] sm:$0xf] %vm5468_vm4, %v13273_v9  ;;  %v14189_v24 = vpop.permute.xlu0 %6396  ;;  %v3925_v9 = vpop.f32.mrf.mxu0  ;;  %v5537_v32 = vpack.c.bf16 %v5505_v5, %v5505_v5 }
 0x4b9   : > { %5714 = vst.msk [vmem:[#allocation4 + $0xf0] sm:$0xf] %vm5693_vm5, %v13248_v1  ;;  %v3926_v1 = vadd.f32 %v13771_v61, %v3925_v9 }
 0x4ba   : > { %6568 = vst.msk [vmem:[#allocation4 + $0x68] sm:$0xf] %vm5018_vm2, %v14183_v15 }
 0x4bb   : > { %4933 = vst.msk [vmem:[#allocation2 + $0xc1] sm:$0xff] %vm3261_vm0, %v4722_v56  ;;  %5922 = vrot.lane.b32.xlu2 %v13987_v8, %s11797_s18  ;;  %v4403_v26 = vmax.f32 %v3926_v1, 0.0  ;;  %v16541_v56 = vld [vmem:[#allocation55_spill] sm:$0xff] }
 0x4bc   : > { %v4088_v51 = vadd.f32 %v13771_v61, %v16541_v56 }
 0x4bd   : > { %v6407_v13 = vpop.permute.xlu2 %6406  ;;  %8817 = vrot.lane.b32.xlu1 %v13987_v8, %s11798_s23  ;;  %v4659_v58 = vmax.f32 %v4403_v26, %v4531_v45  ;;  %v4340_v45 = vmax.f32 %v3768_v36, 0.0 }
 0x4be   : > { %6145 = vrot.lane.b32.xlu0 %v5535_v2, %s11796_s17  ;;  %6483 = vst.msk [vmem:[#allocation4 + $0xe8] sm:$0xf] %vm5693_vm5, %v6407_v13  ;;  %v8194_v2 = vld [vmem:[#allocation2 + $0x161] sm:$0xff]  ;;  %v6505_v13 = vld [vmem:[#allocation2 + $0xb1] sm:$0xff] }
 0x4bf   : > { %v5186_v31 = vpop.permute.xlu1 %5185  ;;  %v8226_v9 = vpack.c.bf16 %v8194_v2, %v8194_v2  ;;  %v14239_v60 = vpack.c.bf16 %v6505_v13, %v6505_v13  ;;  %v4468_v2 = vmax.f32 %v4088_v51, 0.0  ;;  %v14270_v51 = vld [vmem:[%s16321_s2] ss:$0 sm:$0xff] }
 0x4c0   : > { %v14207_v59 = vld [vmem:[#allocation4 + $0xf0] sm:$0xf]  ;;  %v14209_v11 = vpop.permute.xlu0 %5183  ;;  %5263 = vst.msk [vmem:[#allocation4 + $0xe4] sm:$0xf] %vm5243_vm3, %v5186_v31 }
 0x4c1   : > { %7491 = vst.msk [vmem:[#allocation4 + $0xf0] sm:$0xf] %vm5018_vm2, %v13571_v6  ;;  %v4723_v6 = vmax.f32 %v16540_v20, %v4659_v58  ;;  %v4596_v23 = vmax.f32 %v4340_v45, %v4468_v2 }
 0x4c2   : > { %7715 = vst.msk [vmem:[#allocation4 + $0xf0] sm:$0xf] %vm5243_vm3, %v13222_v57  ;;  %v16542_v57 = vld [vmem:[#allocation66_spill] sm:$0xff] }
 0x4c3   : > { %5605 = vrot.lane.b32.xlu2 %v5537_v32, %s11798_s23  ;;  %5488 = vst.msk [vmem:[#allocation4 + $0xe4] sm:$0xf] %vm5468_vm4, %v13211_v10  ;;  %v4248_v53 = vadd.f32 %v13771_v61, %v16542_v57  ;;  %v3927_v10 = vpop.f32.mrf.mxu0  ;;  %v16543_v57 = vld [vmem:[#allocation67_spill] sm:$0xff] }
 0x4c4   : > { %5713 = vst.msk [vmem:[#allocation4 + $0xe4] sm:$0xf] %vm5693_vm5, %v13186_v4  ;;  %v3928_v31 = vadd.f32 %v13771_v61, %v3927_v10 }
 0x4c5   : > { %v14228_v1 = vld [vmem:[#allocation4 + $0xe4] sm:$0xf0]  ;;  %v5194_v5 = vpop.permute.xlu2 %5193  ;;  %5603 = vrot.lane.b32.xlu1 %v5536_v49, %s11798_s23  ;;  %4934 = vst.msk [vmem:[#allocation2 + $0xd1] sm:$0xff] %vm3261_vm0, %v4723_v6  ;;  %v4532_v58 = vmax.f32 %v4248_v53, 0.0  ;;  %v4251_v53 = vadd.f32 %v14270_v51, %v16543_v57 }
 0x4c6   : > { %7605 = vrot.lane.b32.xlu0 %v13987_v8, %s11797_s18  ;;  %8258 = vst.msk [vmem:[#allocation4 + $0xe8] sm:$0xf] %vm5018_vm2, %v8226_v9  ;;  %v4404_v8 = vmax.f32 %v3928_v31, 0.0  ;;  %v10958_v9 = vld [vmem:[#allocation4 + $0x68] sm:$0xf] }
 0x4c7   : > { %5267 = vst.msk [vmem:[#allocation4 + $0x114] sm:$0xf] %vm5243_vm3, %v5194_v5  ;;  %v6405_v4 = vpop.permute.xlu1 %6404 }
 0x4c8   : > { %v14237_v26 = vpop.permute.xlu0 %6402  ;;  %5492 = vst.msk [vmem:[#allocation4 + $0x114] sm:$0xf] %vm5468_vm4, %v13368_v30  ;;  %v4660_v61 = vmax.f32 %v4404_v8, %v4532_v58 }
 0x4c9   : > { %5717 = vst.msk [vmem:[#allocation4 + $0x114] sm:$0xf] %vm5693_vm5, %v13370_v52  ;;  %v8193_v52 = vld [vmem:[#allocation2 + $0x151] sm:$0xff] }
 0x4ca   : > { %6482 = vst.msk [vmem:[#allocation4 + $0xdc] sm:$0xf] %vm5693_vm5, %v6405_v4  ;;  %v4724_v20 = vmax.f32 %v4596_v23, %v4660_v61  ;;  %v4533_v4 = vmax.f32 %v4251_v53, 0.0 }
 0x4cb   : > { %v14246_v36 = vld [vmem:[#allocation4 + $0xe0] sm:$0xf0]  ;;  %6149 = vrot.lane.b32.xlu2 %v5537_v32, %s11796_s17  ;;  %6569 = vst.msk [vmem:[#allocation4 + $0x74] sm:$0xf] %vm5018_vm2, %v14239_v60  ;;  %v3930_v5 = vpop.f32.mrf.mxu0 }
 0x4cc   : > { %7490 = vst.msk [vmem:[#allocation4 + $0xe4] sm:$0xf] %vm5018_vm2, %v13541_v12  ;;  %v3931_v45 = vadd.f32 %v14270_v51, %v3930_v5  ;;  %v16546_v5 = vld [vmem:[#allocation91_spill] sm:$0xff] }
 0x4cd   : > { %7714 = vst.msk [vmem:[#allocation4 + $0xe4] sm:$0xf] %vm5243_vm3, %v13246_v54  ;;  %v6413_v30 = vpop.permute.xlu2 %6412  ;;  %6147 = vrot.lane.b32.xlu1 %v5536_v49, %s11796_s17  ;;  %v8225_v54 = vpack.c.bf16 %v8193_v52, %v8193_v52  ;;  %v8197_v49 = vld [vmem:[#allocation2 + $0x191] sm:$0xff] }
 0x4ce   : > { %5380 = vrot.lane.b32.xlu0 %v14016_v34, %s11796_s17  ;;  %6486 = vst.msk [vmem:[#allocation4 + $0x10c] sm:$0xf] %vm5693_vm5, %v6413_v30  ;;  %v8229_v10 = vpack.c.bf16 %v8197_v49, %v8197_v49  ;;  %v8200_v30 = vld [vmem:[#allocation2 + $0x1c1] sm:$0xff] }
 0x4cf   : > { %v5192_v32 = vpop.permute.xlu1 %5191  ;;  %4935 = vst.msk [vmem:[#allocation2 + $0xe1] sm:$0xff] %vm3261_vm0, %v4724_v20 }
 0x4d0   : > { %v5190_v6 = vpop.permute.xlu0 %5189  ;;  %v14260_v56 = vld [vmem:[#allocation4 + $0x110] sm:$0xf0]  ;;  %5266 = vst.msk [vmem:[#allocation4 + $0x108] sm:$0xf] %vm5243_vm3, %v5192_v32 }
 0x4d1   : > { %7494 = vst.msk [vmem:[#allocation4 + $0x114] sm:$0xf] %vm5018_vm2, %v13662_v33  ;;  %v14265_v12 = vld [vmem:[#allocation4 + $0xdc] sm:$0xf] }
 0x4d2   : > { %7718 = vst.msk [vmem:[#allocation4 + $0x114] sm:$0xf] %vm5243_vm3, %v13337_v14  ;;  %v11609_v13 = vld [vmem:[#allocation4 + $0x70] sm:$0xf0] }
 0x4d3   : > { %8257 = vst.msk [vmem:[#allocation4 + $0xdc] sm:$0xf] %vm5018_vm2, %v8225_v54  ;;  %7609 = vrot.lane.b32.xlu2 %v14040_v62, %s11797_s18  ;;  %v10959_v33 = vor.u32 %v11609_v13, %v10958_v9  ;;  %v5508_v54 = vld [vmem:[#allocation2 + $0x80] sm:$0xff]  ;;  %v3932_v9 = vpop.f32.mrf.mxu0  ;;  %v16545_v13 = vld [vmem:[#allocation73_spill] sm:$0xff] }
 0x4d4   : > { %5491 = vst.msk [vmem:[#allocation4 + $0x108] sm:$0xf] %vm5468_vm4, %v13300_v29  ;;  %v4405_v29 = vmax.f32 %v3931_v45, 0.0 }
 0x4d5   : > { %v14282_v31 = vld [vmem:[#allocation4 + $0x10c] sm:$0xf]  ;;  %5716 = vst.msk [vmem:[#allocation4 + $0x108] sm:$0xf] %vm5693_vm5, %v13315_v35  ;;  %v5200_v14 = vpop.permute.xlu2 %5199  ;;  %7607 = vrot.lane.b32.xlu1 %v14016_v34, %s11797_s18  ;;  %11168 = vmatmul.msk.bf16.gmra.mxu3 %vm3261_vm0, %v10959_v33 }
 0x4d6   : > { %5924 = vrot.lane.b32.xlu0 %v14016_v34, %s11797_s18  ;;  %8261 = vst.msk [vmem:[#allocation4 + $0x10c] sm:$0xf] %vm5018_vm2, %v8229_v10  ;;  %v14295_v35 = vmax.f32 %v4405_v29, %v4533_v4  ;;  %v16544_v34 = vld [vmem:[#allocation61_spill] sm:$0xff]  ;;  %v16548_v4 = vld [vmem:[#allocation14_spill] sm:$0xff] }
 0x4d7   : > { %5270 = vst.msk [vmem:[#allocation4 + $0x138] sm:$0xf] %vm5243_vm3, %v5200_v14  ;;  %v6411_v2 = vpop.permute.xlu1 %6410  ;;  %v16547_v10 = vld [vmem:[#allocation93_spill] sm:$0xff]  ;;  %v3933_v14 = vadd.f32 %v14270_v51, %v3932_v9  ;;  %v11645_v9 = vld [vmem:[%s16322_s3 + $0x10] sm:$0xff] }
 0x4d8   : > { %v6409_v58 = vpop.permute.xlu0 %6408  ;;  %5495 = vst.msk [vmem:[#allocation4 + $0x138] sm:$0xf] %vm5468_vm4, %v13487_v42  ;;  %v4725_v8 = vmax.f32 %v16544_v34, %v14295_v35  ;;  %v16556_v34 = vld [vmem:[#allocation94_spill] sm:$0xff]  ;;  %7097 = vmatpush.bf16.msrb.mxu1 %v11645_v9  ;;  %v5509_v9 = vld [vmem:[#allocation2 + $0x90] sm:$0xff] }
 0x4d9   : > { %5720 = vst.msk [vmem:[#allocation4 + $0x138] sm:$0xf] %vm5693_vm5, %v13489_v27 }
 0x4da   : > { %5265 = vst.msk [vmem:[#allocation4 + $0xfc] sm:$0xf] %vm5243_vm3, %v5190_v6  ;;  %v8232_v6 = vpack.c.bf16 %v8200_v30, %v8200_v30 }
 0x4db   : > { %5490 = vst.msk [vmem:[#allocation4 + $0xfc] sm:$0xf] %vm5468_vm4, %v13242_v7  ;;  %5384 = vrot.lane.b32.xlu2 %v14063_v44, %s11796_s17 }
 0x4dc   : > { %v14306_v23 = vld [vmem:[#allocation4 + $0x108] sm:$0xf]  ;;  %5715 = vst.msk [vmem:[#allocation4 + $0xfc] sm:$0xf] %vm5693_vm5, %v13321_v19 }
 0x4dd   : > { %7493 = vst.msk [vmem:[#allocation4 + $0x108] sm:$0xf] %vm5018_vm2, %v13630_v17  ;;  %v6419_v42 = vpop.permute.xlu2 %6418  ;;  %5382 = vrot.lane.b32.xlu1 %v14040_v62, %s11796_s17  ;;  %v8951_v19 = vld [vmem:[#allocation3 + $0xa1] sm:$0xff] }
 0x4de   : > { %5607 = vrot.lane.b32.xlu0 %v14076_v18, %s11798_s23  ;;  %7717 = vst.msk [vmem:[#allocation4 + $0x108] sm:$0xf] %vm5243_vm3, %v13343_v25  ;;  %v8196_v17 = vld [vmem:[#allocation2 + $0x181] sm:$0xff]  ;;  %v8952_v25 = vld [vmem:[#allocation3 + $0xb1] sm:$0xff]  ;;  %v8983_v52 = vpack.c.bf16 %v8951_v19, %v8951_v19 }
 0x4df   : > { %6485 = vst.msk [vmem:[#allocation4 + $0x100] sm:$0xf] %vm5693_vm5, %v6411_v2  ;;  %v5198_v7 = vpop.permute.xlu1 %5197  ;;  %v8984_v49 = vpack.c.bf16 %v8952_v25, %v8952_v25  ;;  %v16549_v2 = vld [vmem:[#allocation68_spill] sm:$0xff]  ;;  %v16551_v19 = vld [vmem:[#allocation9_spill] sm:$0xff] }
 0x4e0   : > { %v5196_v27 = vpop.permute.xlu0 %5195  ;;  %v14319_v61 = vld [vmem:[#allocation4 + $0x138] sm:$0xf]  ;;  %6489 = vst.msk [vmem:[#allocation4 + $0x130] sm:$0xf] %vm5693_vm5, %v6419_v42  ;;  %v16550_v42 = vld [vmem:[#allocation62_spill] sm:$0xff] }
 0x4e1   : > { %7497 = vst.msk [vmem:[#allocation4 + $0x138] sm:$0xf] %vm5018_vm2, %v13739_v21  ;;  %v8228_v21 = vpack.c.bf16 %v8196_v17, %v8196_v17  ;;  %v16553_v25 = vld [vmem:[#allocation89_spill] sm:$0xff] }
 0x4e2   : > { %7721 = vst.msk [vmem:[#allocation4 + $0x138] sm:$0xf] %vm5243_vm3, %v13475_v41 }
 0x4e3   : > { %v14326_v20 = vld [vmem:[#allocation4 + $0xf8] sm:$0xf0]  ;;  %6484 = vst.msk [vmem:[#allocation4 + $0xf4] sm:$0xf] %vm5693_vm5, %v6409_v58  ;;  %5928 = vrot.lane.b32.xlu2 %v14063_v44, %s11797_s18  ;;  %v4253_v58 = vadd.f32 %v14270_v51, %v16549_v2  ;;  %v16557_v2 = vld [vmem:[#allocation12_spill] sm:$0xff] }
 0x4e4   : > { %7492 = vst.msk [vmem:[#allocation4 + $0xfc] sm:$0xf] %vm5018_vm2, %v13602_v63 }
 0x4e5   : > { %7716 = vst.msk [vmem:[#allocation4 + $0xfc] sm:$0xf] %vm5243_vm3, %v13275_v38  ;;  %v5206_v32 = vpop.permute.xlu2 %5205  ;;  %5926 = vrot.lane.b32.xlu1 %v14040_v62, %s11797_s18  ;;  %v5507_v62 = vld [vmem:[#allocation2 + $0x70] sm:$0xff] }
 0x4e6   : > { %6151 = vrot.lane.b32.xlu0 %v14076_v18, %s11796_s17  ;;  %v14339_v41 = vld [vmem:[#allocation4 + $0xfc] sm:$0xf0]  ;;  %9015 = vst.msk [vmem:[#allocation4 + $0x68] sm:$0xf] %vm5018_vm2, %v8983_v52  ;;  %v5540_v18 = vpack.c.bf16 %v5508_v54, %v5508_v54  ;;  %v5539_v33 = vpack.c.bf16 %v5507_v62, %v5507_v62  ;;  %v4406_v52 = vmax.f32 %v3933_v14, 0.0  ;;  %v4534_v54 = vmax.f32 %v4253_v58, 0.0 }
 0x4e7   : > { %8260 = vst.msk [vmem:[#allocation4 + $0x100] sm:$0xf] %vm5018_vm2, %v8228_v21  ;;  %v14343_v63 = vld [vmem:[#allocation4 + $0x12c] sm:$0xf0]  ;;  %v6417_v38 = vpop.permute.xlu1 %6416  ;;  %v16554_v21 = vld [vmem:[#allocation69_spill] sm:$0xff]  ;;  %v6506_v58 = vld [vmem:[#allocation2 + $0xc1] sm:$0xff] }
 0x4e8   : > { %v14345_v57 = vpop.permute.xlu0 %6414  ;;  %8264 = vst.msk [vmem:[#allocation4 + $0x130] sm:$0xf] %vm5018_vm2, %v8232_v6  ;;  %v16555_v6 = vld [vmem:[#allocation92_spill] sm:$0xff] }
 0x4e9   : > { %9016 = vst.msk [vmem:[#allocation4 + $0x74] sm:$0xf] %vm5018_vm2, %v8984_v49 }
 0x4ea   : > { %v14349_v53 = vld [vmem:[#allocation4 + $0xf4] sm:$0xf]  ;;  %5269 = vst.msk [vmem:[#allocation4 + $0x12c] sm:$0xf] %vm5243_vm3, %v5198_v7  ;;  %v3773_v7 = vadd.f32 %v14270_v51, %v16550_v42 }
 0x4eb   : > { %8259 = vst.msk [vmem:[#allocation4 + $0xf4] sm:$0xf] %vm5018_vm2, %v16545_v13  ;;  %5611 = vrot.lane.b32.xlu2 %v5540_v18, %s11798_s23 }
 0x4ec   : > { %5494 = vst.msk [vmem:[#allocation4 + $0x12c] sm:$0xf] %vm5468_vm4, %v16546_v5  ;;  %v4342_v49 = vmax.f32 %v3773_v7, 0.0 }
 0x4ed   : > { %5719 = vst.msk [vmem:[#allocation4 + $0x12c] sm:$0xf] %vm5693_vm5, %v16547_v10  ;;  %v6425_v45 = vpop.permute.xlu2 %6424  ;;  %5609 = vrot.lane.b32.xlu1 %v5539_v33, %s11798_s23 }
 0x4ee   : > { %7611 = vrot.lane.b32.xlu0 %v14063_v44, %s11797_s18  ;;  %5273 = vst.msk [vmem:[#allocation4 + $0x15c] sm:$0xf] %vm5243_vm3, %v5206_v32  ;;  %v16552_v44 = vld [vmem:[#allocation60_spill] sm:$0xff]  ;;  %v4256_v32 = vadd.f32 %v14270_v51, %v16554_v21  ;;  %v14432_v21 = vpack.c.bf16 %v6506_v58, %v6506_v58 }
 0x4ef   : > { %5498 = vst.msk [vmem:[#allocation4 + $0x15c] sm:$0xf] %vm5468_vm4, %v16548_v4  ;;  %v14366_v29 = vpop.permute.xlu1 %5203  ;;  %v4093_v30 = vadd.f32 %v14270_v51, %v16552_v44  ;;  %v6507_v44 = vld [vmem:[#allocation2 + $0xd1] sm:$0xff] }
 0x4f0   : > { %5723 = vst.msk [vmem:[#allocation4 + $0x15c] sm:$0xf] %vm5693_vm5, %v16551_v19  ;;  %v14374_v17 = vpop.permute.xlu0 %5201  ;;  %v4535_v5 = vmax.f32 %v4256_v32, 0.0  ;;  %v8203_v32 = vld [vmem:[#allocation2 + $0x1f1] sm:$0xff] }
 0x4f1   : > { %5268 = vst.msk [vmem:[#allocation4 + $0x120] sm:$0xf] %vm5243_vm3, %v5196_v27  ;;  %v3935_v27 = vpop.f32.mrf.mxu0  ;;  %v4470_v35 = vmax.f32 %v4093_v30, 0.0  ;;  %v16562_v58 = vld [vmem:[#allocation8_spill] sm:$0xff] }
 0x4f2   : > { %5493 = vst.msk [vmem:[#allocation4 + $0x120] sm:$0xf] %vm5468_vm4, %v16553_v25 }
 0x4f3   : > { %5718 = vst.msk [vmem:[#allocation4 + $0x120] sm:$0xf] %vm5693_vm5, %v16555_v6  ;;  %6155 = vrot.lane.b32.xlu2 %v5540_v18, %s11796_s17  ;;  %v3936_v18 = vadd.f32 %v14270_v51, %v3935_v27  ;;  %v4598_v4 = vmax.f32 %v4342_v49, %v4470_v35  ;;  %v14436_v6 = vpack.c.bf16 %v6507_v44, %v6507_v44  ;;  %v16560_v35 = vld [vmem:[#allocation71_spill] sm:$0xff]  ;;  %v16564_v44 = vld [vmem:[#allocation74_spill] sm:$0xff] }
 0x4f4   : > { %v14386_v62 = vld [vmem:[#allocation4 + $0x128] sm:$0xf0]  ;;  %4936 = vst.msk [vmem:[#allocation2 + $0xf1] sm:$0xff] %vm3261_vm0, %v4725_v8  ;;  %v4662_v8 = vmax.f32 %v4406_v52, %v4534_v54  ;;  %v16559_v52 = vld [vmem:[#allocation90_spill] sm:$0xff]  ;;  %v8235_v27 = vpack.c.bf16 %v8203_v32, %v8203_v32 }
 0x4f5   : > { %7496 = vst.msk [vmem:[#allocation4 + $0x12c] sm:$0xf] %vm5018_vm2, %v13938_v28  ;;  %v14397_v13 = vpop.permute.xlu2 %5599  ;;  %6153 = vrot.lane.b32.xlu1 %v5539_v33, %s11796_s17  ;;  %v4407_v28 = vmax.f32 %v3936_v18, 0.0  ;;  %v11653_v33 = vld [vmem:[%s16322_s3 + $0x50] sm:$0xff] }
 0x4f6   : > { %5386 = vrot.lane.b32.xlu0 %v14089_v22, %s11796_s17  ;;  %7720 = vst.msk [vmem:[#allocation4 + $0x12c] sm:$0xf] %vm5243_vm3, %v16556_v34  ;;  %v4726_v19 = vmax.f32 %v4598_v4, %v4662_v8  ;;  %7186 = vmatpush.bf16.msrb.mxu2 %v11653_v33  ;;  %v4258_v34 = vadd.f32 %v14270_v51, %v16560_v35  ;;  %v16561_v8 = vld [vmem:[#allocation72_spill] sm:$0xff] }
 0x4f7   : > { %v14405_v10 = vld [vmem:[#allocation4 + $0x158] sm:$0xf0]  ;;  %6488 = vst.msk [vmem:[#allocation4 + $0x124] sm:$0xf] %vm5693_vm5, %v6417_v38  ;;  %v14408_v14 = vpop.permute.xlu1 %6422  ;;  %v14417_v42 = vmax.f32 %v4407_v28, %v4535_v5  ;;  %v8199_v38 = vld [vmem:[#allocation2 + $0x1b1] sm:$0xff]  ;;  %v3778_v5 = vadd.f32 %v14270_v51, %v16561_v8  ;;  %v8953_v28 = vld [vmem:[#allocation3 + $0xc1] sm:$0xff]  ;;  %v14466_v4 = vpack.c.bf16 %v5509_v9, %v5509_v9 }
 0x4f8   : > { %7500 = vst.msk [vmem:[#allocation4 + $0x15c] sm:$0xf] %vm5018_vm2, %v13820_v55  ;;  %v14422_v30 = vpop.permute.xlu0 %6420  ;;  %v16558_v55 = vld [vmem:[#allocation65_spill] sm:$0xff]  ;;  %v4536_v32 = vmax.f32 %v4258_v34, 0.0 }
 0x4f9   : > { %7724 = vst.msk [vmem:[#allocation4 + $0x15c] sm:$0xf] %vm5243_vm3, %v16557_v2  ;;  %v4727_v25 = vmax.f32 %v16558_v55, %v14417_v42  ;;  %v3937_v49 = vpop.f32.mrf.mxu0  ;;  %v8954_v2 = vld [vmem:[#allocation3 + $0xd1] sm:$0xff] }
 0x4fa   : > { %v14419_v7 = vld [vmem:[#allocation4 + $0x120] sm:$0xf]  ;;  %6492 = vst.msk [vmem:[#allocation4 + $0x154] sm:$0xf] %vm5693_vm5, %v6425_v45  ;;  %v8231_v45 = vpack.c.bf16 %v8199_v38, %v8199_v38 }
 0x4fb   : > { %7495 = vst.msk [vmem:[#allocation4 + $0x120] sm:$0xf] %vm5018_vm2, %v13712_v39  ;;  %7615 = vrot.lane.b32.xlu2 %v14120_v16, %s11797_s18  ;;  %v16563_v38 = vld [vmem:[#allocation70_spill] sm:$0xff] }
 0x4fc   : > { %7719 = vst.msk [vmem:[#allocation4 + $0x120] sm:$0xf] %vm5243_vm3, %v16559_v52  ;;  %v8985_v52 = vpack.c.bf16 %v8953_v28, %v8953_v28 }
 0x4fd   : > { %6487 = vst.msk [vmem:[#allocation4 + $0x118] sm:$0xf] %vm5693_vm5, %v14345_v57  ;;  %v14438_v54 = vpop.permute.xlu2 %6143  ;;  %7613 = vrot.lane.b32.xlu1 %v14089_v22, %s11797_s18 }
 0x4fe   : > { %5930 = vrot.lane.b32.xlu0 %v14089_v22, %s11797_s18  ;;  %v14444_v39 = vld [vmem:[#allocation4 + $0x124] sm:$0xf]  ;;  %4937 = vst.msk [vmem:[#allocation2 + $0x101] sm:$0xff] %vm3261_vm0, %v4726_v19  ;;  %v3938_v22 = vadd.f32 %v14270_v51, %v3937_v49  ;;  %v4098_v19 = vadd.f32 %v14270_v51, %v16563_v38  ;;  %v4344_v49 = vmax.f32 %v3778_v5, 0.0  ;;  %v8986_v51 = vpack.c.bf16 %v8954_v2, %v8954_v2 }
 0x4ff   : > { %8263 = vst.msk [vmem:[#allocation4 + $0x124] sm:$0xf] %vm5018_vm2, %v8231_v45  ;;  %v14450_v57 = vpop.permute.xlu1 %5209  ;;  %v16565_v45 = vld [vmem:[#allocation7_spill] sm:$0xff]  ;;  %v16567_v5 = vld [vmem:[#allocation10_spill] sm:$0xff] }
 0x500   : > { %6570 = vst.msk [vmem:[#allocation4 + $0x80] sm:$0xf] %vm5018_vm2, %v14432_v21  ;;  %v14472_v42 = vpop.permute.xlu0 %5207  ;;  %v4472_v35 = vmax.f32 %v4098_v19, 0.0 }
 0x501   : > { %v14452_v18 = vld [vmem:[#allocation4 + $0x154] sm:$0xf]  ;;  %6571 = vst.msk [vmem:[#allocation4 + $0x8c] sm:$0xf] %vm5018_vm2, %v14436_v6 }
 0x502   : > { %8267 = vst.msk [vmem:[#allocation4 + $0x154] sm:$0xf] %vm5018_vm2, %v8235_v27  ;;  %v4600_v34 = vmax.f32 %v4344_v49, %v4472_v35 }
 0x503   : > { %5272 = vst.msk [vmem:[#allocation4 + $0x150] sm:$0xf] %vm5243_vm3, %v14366_v29  ;;  %5390 = vrot.lane.b32.xlu2 %v14139_v40, %s11796_s17  ;;  %v4408_v29 = vmax.f32 %v3938_v22, 0.0 }
 0x504   : > { %v14468_v33 = vld [vmem:[#allocation4 + $0x114] sm:$0xf0]  ;;  %5497 = vst.msk [vmem:[#allocation4 + $0x150] sm:$0xf] %vm5468_vm4, %v16562_v58  ;;  %v16566_v58 = vld [vmem:[#allocation95_spill] sm:$0xff] }
 0x505   : > { %8262 = vst.msk [vmem:[#allocation4 + $0x118] sm:$0xf] %vm5018_vm2, %v16564_v44  ;;  %v14478_v55 = vpop.permute.xlu2 %7603  ;;  %5388 = vrot.lane.b32.xlu1 %v14120_v16, %s11796_s17  ;;  %v4664_v28 = vmax.f32 %v4408_v29, %v4536_v32  ;;  %v8202_v32 = vld [vmem:[#allocation2 + $0x1e1] sm:$0xff] }
 0x506   : > { %5613 = vrot.lane.b32.xlu0 %v14466_v4, %s11798_s23  ;;  %5722 = vst.msk [vmem:[#allocation4 + $0x150] sm:$0xf] %vm5693_vm5, %v16565_v45  ;;  %v6509_v45 = vld [vmem:[#allocation2 + $0xf1] sm:$0xff] }
 0x507   : > { %v10970_v27 = vld [vmem:[#allocation4 + $0x80] sm:$0xf]  ;;  %5271 = vst.msk [vmem:[#allocation4 + $0x144] sm:$0xf] %vm5243_vm3, %v14374_v17  ;;  %v14489_v22 = vpop.permute.xlu1 %6428  ;;  %v4728_v19 = vmax.f32 %v4600_v34, %v4664_v28 }
 0x508   : > { %v11612_v9 = vld [vmem:[#allocation4 + $0x88] sm:$0xf0]  ;;  %9017 = vst.msk [vmem:[#allocation4 + $0x80] sm:$0xf] %vm5018_vm2, %v8985_v52  ;;  %v6508_v17 = vld [vmem:[#allocation2 + $0xe1] sm:$0xff]  ;;  %v14500_v2 = vpop.permute.xlu0 %6426 }
 0x509   : > { %v10971_v8 = vor.u32 %v11612_v9, %v10970_v27  ;;  %9018 = vst.msk [vmem:[#allocation4 + $0x8c] sm:$0xf] %vm5018_vm2, %v8986_v51  ;;  %v14512_v29 = vpack.c.bf16 %v6508_v17, %v6508_v17  ;;  %v16568_v52 = vld [vmem:[#allocation11_spill] sm:$0xff]  ;;  %v14521_v27 = vpack.c.bf16 %v6509_v45, %v6509_v45  ;;  %v8234_v51 = vpack.c.bf16 %v8202_v32, %v8202_v32  ;;  %v16569_v9 = vld [vmem:[#allocation6_spill] sm:$0xff] }
 0x50a   : > { %5496 = vst.msk [vmem:[#allocation4 + $0x144] sm:$0xf] %vm5468_vm4, %v16566_v58  ;;  %v11644_v58 = vld [vmem:[%s16322_s3 + $0x8] sm:$0xff] }
 0x50b   : > { %11169 = vmatmul.msk.bf16.gmra.mxu3 %vm3261_vm0, %v10971_v8  ;;  %5721 = vst.msk [vmem:[#allocation4 + $0x144] sm:$0xf] %vm5693_vm5, %v16567_v5  ;;  %5934 = vrot.lane.b32.xlu2 %v14139_v40, %s11797_s18  ;;  %v8955_v8 = vld [vmem:[#allocation3 + $0xe1] sm:$0xff]  ;;  %v16570_v5 = vld [vmem:[#allocation76_spill] sm:$0xff] }
 0x50c   : > { %4938 = vst.msk [vmem:[#allocation2 + $0x131] sm:$0xff] %vm3261_vm0, %v4727_v25  ;;  %v5511_v25 = vld [vmem:[#allocation2 + $0xb0] sm:$0xff]  ;;  %7098 = vmatpush.bf16.msrb.mxu1 %v11644_v58 }
 0x50d   : > { %v14502_v38 = vld [vmem:[#allocation4 + $0x150] sm:$0xf]  ;;  %6491 = vst.msk [vmem:[#allocation4 + $0x148] sm:$0xf] %vm5693_vm5, %v14408_v14  ;;  %v5379_v44 = vpop.permute.xlu2 %5378  ;;  %5932 = vrot.lane.b32.xlu1 %v14120_v16, %s11797_s18  ;;  %v5510_v14 = vld [vmem:[#allocation2 + $0xa0] sm:$0xff]  ;;  %v5543_v16 = vpack.c.bf16 %v5511_v25, %v5511_v25 }
 0x50e   : > { %6157 = vrot.lane.b32.xlu0 %v14466_v4, %s11796_s17  ;;  %7499 = vst.msk [vmem:[#allocation4 + $0x150] sm:$0xf] %vm5018_vm2, %v13892_v48  ;;  %v16571_v25 = vld [vmem:[#allocation16_spill] sm:$0xff] }
 0x50f   : > { %7723 = vst.msk [vmem:[#allocation4 + $0x150] sm:$0xf] %vm5243_vm3, %v16568_v52  ;;  %v14525_v48 = vpop.permute.xlu1 %5597  ;;  %v16572_v52 = vld [vmem:[#allocation18_spill] sm:$0xff] }
 0x510   : > { %6490 = vst.msk [vmem:[#allocation4 + $0x13c] sm:$0xf] %vm5693_vm5, %v14422_v30  ;;  %v5542_v30 = vpack.c.bf16 %v5510_v14, %v5510_v14  ;;  %v14542_v28 = vpop.permute.xlu0 %5374 }
 0x511   : > { %4939 = vst.msk [vmem:[#allocation2 + $0x141] sm:$0xff] %vm3261_vm0, %v4728_v19  ;;  %v8956_v19 = vld [vmem:[#allocation3 + $0xf1] sm:$0xff] }
 0x512   : > { %v14519_v49 = vld [vmem:[#allocation4 + $0x140] sm:$0xf0]  ;;  %6572 = vst.msk [vmem:[#allocation4 + $0x98] sm:$0xf] %vm5018_vm2, %v14512_v29  ;;  %v8988_v45 = vpack.c.bf16 %v8956_v19, %v8956_v19  ;;  %v16576_v19 = vld [vmem:[#allocation23_spill] sm:$0xff] }
 0x513   : > { %7498 = vst.msk [vmem:[#allocation4 + $0x144] sm:$0xf] %vm5018_vm2, %v13860_v47  ;;  %5617 = vrot.lane.b32.xlu2 %v5543_v16, %s11798_s23 }
 0x514   : > { %7722 = vst.msk [vmem:[#allocation4 + $0x144] sm:$0xf] %vm5243_vm3, %v16569_v9  ;;  %v14532_v35 = vld [vmem:[#allocation4 + $0x144] sm:$0xf0] }
 0x515   : > { %8266 = vst.msk [vmem:[#allocation4 + $0x148] sm:$0xf] %vm5018_vm2, %v8234_v51  ;;  %5615 = vrot.lane.b32.xlu1 %v5542_v30, %s11798_s23  ;;  %v14540_v47 = vpop.permute.xlu2 %5922  ;;  %v16573_v51 = vld [vmem:[#allocation13_spill] sm:$0xff] }
 0x516   : > { %7617 = vrot.lane.b32.xlu0 %v14139_v40, %s11797_s18  ;;  %6573 = vst.msk [vmem:[#allocation4 + $0xa4] sm:$0xf] %vm5018_vm2, %v14521_v27  ;;  %v8987_v40 = vpack.c.bf16 %v8955_v8, %v8955_v8 }
 0x517   : > { %v14547_v34 = vld [vmem:[#allocation4 + $0x13c] sm:$0xf]  ;;  %5275 = vst.msk [vmem:[#allocation4 + $0x174] sm:$0xf] %vm5243_vm3, %v14450_v57  ;;  %v11643_v57 = vld [vmem:[%s16322_s3] sm:$0xff]  ;;  %v14564_v32 = vpop.permute.xlu1 %7601 }
 0x518   : > { %8265 = vst.msk [vmem:[#allocation4 + $0x13c] sm:$0xf] %vm5018_vm2, %v16570_v5  ;;  %7099 = vmatpush.bf16.msrb.mxu1 %v11643_v57  ;;  %v5919_v58 = vpop.permute.xlu0 %5918  ;;  %v6511_v5 = vld [vmem:[#allocation2 + $0x111] sm:$0xff] }
 0x519   : > { %v10982_v17 = vld [vmem:[#allocation4 + $0x98] sm:$0xf]  ;;  %5500 = vst.msk [vmem:[#allocation4 + $0x174] sm:$0xf] %vm5468_vm4, %v16571_v25  ;;  %v8204_v25 = vld [vmem:[#allocation2 + $0x201] sm:$0xff] }
 0x51a   : > { %9019 = vst.msk [vmem:[#allocation4 + $0x98] sm:$0xf] %vm5018_vm2, %v8987_v40 }
 0x51b   : > { %5725 = vst.msk [vmem:[#allocation4 + $0x174] sm:$0xf] %vm5693_vm5, %v16572_v52  ;;  %6161 = vrot.lane.b32.xlu2 %v5543_v16, %s11796_s17  ;;  %v6510_v16 = vld [vmem:[#allocation2 + $0x101] sm:$0xff] }
 0x51c   : > { %5274 = vst.msk [vmem:[#allocation4 + $0x168] sm:$0xf] %vm5243_vm3, %v14472_v42  ;;  %v16574_v42 = vld [vmem:[#allocation19_spill] sm:$0xff] }
 0x51d   : > { %v11615_v14 = vld [vmem:[#allocation4 + $0xa0] sm:$0xf0]  ;;  %5499 = vst.msk [vmem:[#allocation4 + $0x168] sm:$0xf] %vm5468_vm4, %v16573_v51  ;;  %6159 = vrot.lane.b32.xlu1 %v5542_v30, %s11796_s17  ;;  %v14570_v8 = vpop.permute.xlu2 %5605  ;;  %v14580_v30 = vpack.c.bf16 %v6510_v16, %v6510_v16  ;;  %v11652_v52 = vld [vmem:[%s16322_s3 + $0x48] sm:$0xff]  ;;  %v8236_v16 = vpack.c.bf16 %v8204_v25, %v8204_v25 }
 0x51e   : > { %v10983_v9 = vor.u32 %v11615_v14, %v10982_v17  ;;  %9020 = vst.msk [vmem:[#allocation4 + $0xa4] sm:$0xf] %vm5018_vm2, %v8988_v45  ;;  %5392 = vrot.lane.b32.xlu0 %v14183_v15, %s11796_s17  ;;  %v6543_v17 = vpack.c.bf16 %v6511_v5, %v6511_v5  ;;  %v8958_v14 = vld [vmem:[#allocation3 + $0x111] sm:$0xff]  ;;  %7187 = vmatpush.bf16.msrb.mxu2 %v11652_v52  ;;  %v5512_v5 = vld [vmem:[#allocation2 + $0xc0] sm:$0xff] }
 0x51f   : > { %5724 = vst.msk [vmem:[#allocation4 + $0x168] sm:$0xf] %vm5693_vm5, %v16574_v42  ;;  %v8957_v42 = vld [vmem:[#allocation3 + $0x101] sm:$0xff]  ;;  %v14626_v25 = vpack.c.bf16 %v5512_v5, %v5512_v5 }
 0x520   : > { %11170 = vmatmul.msk.bf16.gmra.mxu3 %vm3261_vm0, %v10983_v9  ;;  %6494 = vst.msk [vmem:[#allocation4 + $0x16c] sm:$0xf] %vm5693_vm5, %v14489_v22  ;;  %v8205_v22 = vld [vmem:[#allocation2 + $0x211] sm:$0xff]  ;;  %v14612_v51 = vpop.permute.xlu0 %8815  ;;  %v16579_v9 = vld [vmem:[#allocation15_spill] sm:$0xff] }
 0x521   : > { %5472 = vst.msk [vmem:[#allocation4 + $0x24] sm:$0xf] %vm5468_vm4, %v5379_v44  ;;  %v8237_v57 = vpack.c.bf16 %v8205_v22, %v8205_v22  ;;  %v7407_v22 = vld [vmem:[#allocation3] sm:$0xff] }
 0x522   : > { %v14582_v40 = vld [vmem:[#allocation4 + $0x170] sm:$0xf0]  ;;  %6493 = vst.msk [vmem:[#allocation4 + $0x160] sm:$0xf] %vm5693_vm5, %v14500_v2  ;;  %v14599_v2 = vpop.permute.xlu1 %5376  ;;  %v6512_v5 = vld [vmem:[#allocation2 + $0x141] sm:$0xff] }
 0x523   : > { %16575 = vst [vmem:[#allocation50_spill] sm:$0xff] %v14582_v40  ;;  %7621 = vrot.lane.b32.xlu2 %v14239_v60, %s11797_s18 }
 0x524   : > { %7502 = vst.msk [vmem:[#allocation4 + $0x174] sm:$0xf] %vm5018_vm2, %v13983_v46 }
 0x525   : > { %7726 = vst.msk [vmem:[#allocation4 + $0x174] sm:$0xf] %vm5243_vm3, %v16576_v19  ;;  %7619 = vrot.lane.b32.xlu1 %v14183_v15, %s11797_s18  ;;  %v14601_v46 = vpop.permute.xlu2 %6149 }
 0x526   : > { %6574 = vst.msk [vmem:[#allocation4 + $0xb0] sm:$0xf] %vm5018_vm2, %v14580_v30  ;;  %v14596_v44 = vld [vmem:[#allocation4 + $0x168] sm:$0xf]  ;;  %5936 = vrot.lane.b32.xlu0 %v14183_v15, %s11797_s18 }
 0x527   : > { %16577 = vst [vmem:[#allocation63_spill] sm:$0xff] %v14596_v44  ;;  %v14610_v45 = vld [vmem:[#allocation4 + $0x16c] sm:$0xf]  ;;  %v7417_v44 = vld [vmem:[#allocation3 + $0xa0] sm:$0xff] }
 0x528   : > { %6575 = vst.msk [vmem:[#allocation4 + $0xbc] sm:$0xf] %vm5018_vm2, %v6543_v17  ;;  %v8989_v17 = vpack.c.bf16 %v8957_v42, %v8957_v42  ;;  %v16580_v42 = vld [vmem:[#allocation79_spill] sm:$0xff] }
 0x529   : > { %7501 = vst.msk [vmem:[#allocation4 + $0x168] sm:$0xf] %vm5018_vm2, %v13952_v3  ;;  %v14617_v15 = vld [vmem:[#allocation4 + $0x15c] sm:$0xf0]  ;;  %v8990_v3 = vpack.c.bf16 %v8958_v14, %v8958_v14 }
 0x52a   : > { %16578 = vst [vmem:[#allocation52_spill] sm:$0xff] %v14610_v45 }
 0x52b   : > { %7725 = vst.msk [vmem:[#allocation4 + $0x168] sm:$0xf] %vm5243_vm3, %v16579_v9  ;;  %5396 = vrot.lane.b32.xlu2 %v14432_v21, %s11796_s17  ;;  %v7439_v9 = vpack.c.bf16 %v7407_v22, %v7407_v22  ;;  %v14666_v22 = vpack.c.bf16 %v6512_v5, %v6512_v5 }
 0x52c   : > { %8269 = vst.msk [vmem:[#allocation4 + $0x16c] sm:$0xf] %vm5018_vm2, %v8237_v57 }
 0x52d   : > { %8268 = vst.msk [vmem:[#allocation4 + $0x160] sm:$0xf] %vm5018_vm2, %v8236_v16  ;;  %v10994_v19 = vld [vmem:[#allocation4 + $0xb0] sm:$0xf]  ;;  %5394 = vrot.lane.b32.xlu1 %v14239_v60, %s11796_s17  ;;  %v14632_v14 = vpop.permute.xlu2 %7609 }
 0x52e   : > { %5694 = vst.msk [vmem:[#allocation4] sm:$0xf] %vm5693_vm5, %v14525_v48  ;;  %v5921_v48 = vpop.permute.xlu1 %5920  ;;  %5619 = vrot.lane.b32.xlu0 %v14626_v25, %s11798_s23 }
 0x52f   : > { %6016 = vst.msk [vmem:[#allocation4 + $0x1c] sm:$0xf] %vm5243_vm3, %v14540_v47  ;;  %v11618_v52 = vld [vmem:[#allocation4 + $0xb8] sm:$0xf0]  ;;  %v5602_v47 = vpop.permute.xlu0 %5601 }
 0x530   : > { %9021 = vst.msk [vmem:[#allocation4 + $0xb0] sm:$0xf] %vm5018_vm2, %v8989_v17  ;;  %v10995_v57 = vor.u32 %v11618_v52, %v10994_v19  ;;  %v5513_v52 = vld [vmem:[#allocation2 + $0xd0] sm:$0xff] }
 0x531   : > { %9022 = vst.msk [vmem:[#allocation4 + $0xbc] sm:$0xf] %vm5018_vm2, %v8990_v3  ;;  %v11651_v3 = vld [vmem:[%s16322_s3 + $0x40] sm:$0xff] }
 0x532   : > { %5470 = vst.msk [vmem:[#allocation4 + $0xc] sm:$0xf] %vm5468_vm4, %v14542_v28  ;;  %11171 = vmatmul.msk.bf16.gmra.mxu3 %vm3261_vm0, %v10995_v57  ;;  %v16581_v28 = vld [vmem:[#allocation78_spill] sm:$0xff]  ;;  %7188 = vmatpush.bf16.msrb.mxu2 %v11651_v3 }
 0x533   : > { %5695 = vst.msk [vmem:[#allocation4 + $0xc] sm:$0xf] %vm5693_vm5, %v14397_v13  ;;  %5940 = vrot.lane.b32.xlu2 %v14432_v21, %s11797_s18  ;;  %v8959_v3 = vld [vmem:[#allocation3 + $0x141] sm:$0xff] }
 0x534   : > { %6014 = vst.msk [vmem:[#allocation4 + $0x4] sm:$0xf] %vm5243_vm3, %v5919_v58  ;;  %v5514_v58 = vld [vmem:[#allocation2 + $0xe0] sm:$0xff] }
 0x535   : > { %v10902_v16 = vld [vmem:[#allocation4] sm:$0xf]  ;;  %6239 = vst.msk [vmem:[#allocation4 + $0x4] sm:$0xf] %vm5468_vm4, %v14438_v54  ;;  %5938 = vrot.lane.b32.xlu1 %v14239_v60, %s11797_s18  ;;  %v5385_v54 = vpop.permute.xlu2 %5384  ;;  %v5546_v57 = vpack.c.bf16 %v5514_v58, %v5514_v58 }
 0x536   : > { %7471 = vst.msk [vmem:[#allocation4] sm:$0xf] %vm5018_vm2, %v7439_v9  ;;  %v14655_v13 = vpop.permute.xlu1 %8817  ;;  %6163 = vrot.lane.b32.xlu0 %v14626_v25, %s11796_s17  ;;  %v16582_v60 = vld [vmem:[#allocation82_spill] sm:$0xff]  ;;  %v16583_v9 = vld [vmem:[#allocation27_spill] sm:$0xff] }
 0x537   : > { %7695 = vst.msk [vmem:[#allocation4] sm:$0xf] %vm5243_vm3, %v16580_v42  ;;  %v6146_v19 = vpop.permute.xlu0 %6145  ;;  %v8175_v42 = vld [vmem:[#allocation2 + $0x11] sm:$0xff] }
 0x538   : > { %7919 = vst.msk [vmem:[#allocation4] sm:$0xf] %vm5468_vm4, %v16581_v28  ;;  %v16584_v28 = vld [vmem:[#allocation34_spill] sm:$0xff] }
 0x539   : > { %8143 = vst.msk [vmem:[#allocation4] sm:$0xf] %vm5693_vm5, %v13815_v50 }
 0x53a   : > { %v11596_v17 = vld [vmem:[#allocation4 + $0x8] sm:$0xf0]  ;;  %6464 = vst.msk [vmem:[#allocation4 + $0x4] sm:$0xf] %vm5693_vm5, %v13845_v37  ;;  %v5545_v37 = vpack.c.bf16 %v5513_v52, %v5513_v52 }
 0x53b   : > { %7472 = vst.msk [vmem:[#allocation4 + $0xc] sm:$0xf] %vm5018_vm2, %v16582_v60  ;;  %v10903_v50 = vor.u32 %v11596_v17, %v10902_v16  ;;  %5623 = vrot.lane.b32.xlu2 %v5546_v57, %s11798_s23  ;;  %v8207_v16 = vpack.c.bf16 %v8175_v42, %v8175_v42  ;;  %v16585_v60 = vld [vmem:[#allocation21_spill] sm:$0xff] }
 0x53c   : > { %7696 = vst.msk [vmem:[#allocation4 + $0xc] sm:$0xf] %vm5243_vm3, %v14564_v32 }
 0x53d   : > { %7920 = vst.msk [vmem:[#allocation4 + $0xc] sm:$0xf] %vm5468_vm4, %v16583_v9  ;;  %7100 = vmatmul.bf16.vlgmr.msrb.gmra.mxu1 %v10903_v50  ;;  %5621 = vrot.lane.b32.xlu1 %v5545_v37, %s11798_s23  ;;  %v5929_v58 = vpop.permute.xlu2 %5928  ;;  %v16586_v50 = vld [vmem:[#allocation36_spill] sm:$0xff] }
 0x53e   : > { %8144 = vst.msk [vmem:[#allocation4 + $0xc] sm:$0xf] %vm5693_vm5, %v16584_v28  ;;  %v5604_v5 = vpop.permute.xlu1 %5603  ;;  %7623 = vrot.lane.b32.xlu0 %v14432_v21, %s11797_s18  ;;  %v16587_v21 = vld [vmem:[#allocation17_spill] sm:$0xff]  ;;  %v16589_v28 = vld [vmem:[#allocation84_spill] sm:$0xff] }
 0x53f   : > { %6576 = vst.msk [vmem:[#allocation4 + $0xc8] sm:$0xf] %vm5018_vm2, %v14666_v22  ;;  %v7606_v17 = vpop.permute.xlu0 %7605 }
 0x540   : > { %5471 = vst.msk [vmem:[#allocation4 + $0x18] sm:$0xf] %vm5468_vm4, %v14599_v2  ;;  %v8991_v2 = vpack.c.bf16 %v8959_v3, %v8959_v3 }
 0x541   : > { %v11595_v32 = vld [vmem:[#allocation4 + $0x4] sm:$0xf]  ;;  %6015 = vst.msk [vmem:[#allocation4 + $0x10] sm:$0xf] %vm5243_vm3, %v5921_v48 }
 0x542   : > { %8239 = vst.msk [vmem:[#allocation4 + $0x4] sm:$0xf] %vm5018_vm2, %v8207_v16  ;;  %v16591_v16 = vld [vmem:[#allocation97_spill] sm:$0xff] }
 0x543   : > { %8463 = vst.msk [vmem:[#allocation4 + $0x4] sm:$0xf] %vm5243_vm3, %v16585_v60  ;;  %6167 = vrot.lane.b32.xlu2 %v5546_v57, %s11796_s17  ;;  %v8176_v57 = vld [vmem:[#allocation2 + $0x21] sm:$0xff] }
 0x544   : > { %8687 = vst.msk [vmem:[#allocation4 + $0x4] sm:$0xf] %vm5468_vm4, %v16586_v50 }
 0x545   : > { %8911 = vst.msk [vmem:[#allocation4 + $0x4] sm:$0xf] %vm5693_vm5, %v14612_v51  ;;  %6165 = vrot.lane.b32.xlu1 %v5545_v37, %s11796_s17  ;;  %v14698_v42 = vpop.permute.xlu2 %5611  ;;  %v16588_v51 = vld [vmem:[#allocation40_spill] sm:$0xff]  ;;  %v8208_v37 = vpack.c.bf16 %v8176_v57, %v8176_v57  ;;  %v16597_v57 = vld [vmem:[#allocation22_spill] sm:$0xff] }
 0x546   : > { %v11006_v48 = vld [vmem:[#allocation4 + $0xc8] sm:$0xf]  ;;  %5696 = vst.msk [vmem:[#allocation4 + $0x18] sm:$0xf] %vm5693_vm5, %v5602_v47  ;;  %v6148_v9 = vpop.permute.xlu1 %6147  ;;  %5398 = vrot.lane.b32.xlu0 %v14436_v6, %s11796_s17 }
 0x547   : > { %v11007_v52 = vor.u32 %v16587_v21, %v11006_v48  ;;  %9023 = vst.msk [vmem:[#allocation4 + $0xc8] sm:$0xf] %vm5018_vm2, %v8991_v2  ;;  %v5381_v47 = vpop.permute.xlu0 %5380  ;;  %v16592_v2 = vld [vmem:[#allocation31_spill] sm:$0xff]  ;;  %v16593_v21 = vld [vmem:[#allocation96_spill] sm:$0xff] }
 0x548   : > { %5475 = vst.msk [vmem:[#allocation4 + $0x48] sm:$0xf] %vm5468_vm4, %v5385_v54 }
 0x549   : > { %11172 = vmatmul.msk.bf16.gmra.mxu3 %vm3261_vm0, %v11007_v52  ;;  %6240 = vst.msk [vmem:[#allocation4 + $0x10] sm:$0xf] %vm5468_vm4, %v6146_v19  ;;  %v16590_v19 = vld [vmem:[#allocation28_spill] sm:$0xff] }
 0x54a   : > { %6465 = vst.msk [vmem:[#allocation4 + $0x10] sm:$0xf] %vm5693_vm5, %v16588_v51  ;;  %v5515_v52 = vld [vmem:[#allocation2 + $0xf0] sm:$0xff] }
 0x54b   : > { %5697 = vst.msk [vmem:[#allocation4 + $0x24] sm:$0xf] %vm5693_vm5, %v5604_v5  ;;  %7627 = vrot.lane.b32.xlu2 %v14512_v29, %s11797_s18 }
 0x54c   : > { %6019 = vst.msk [vmem:[#allocation4 + $0x40] sm:$0xf] %vm5243_vm3, %v5929_v58 }
 0x54d   : > { %v10914_v54 = vld [vmem:[#allocation4 + $0x18] sm:$0xf]  ;;  %6241 = vst.msk [vmem:[#allocation4 + $0x1c] sm:$0xf] %vm5468_vm4, %v6148_v9  ;;  %7625 = vrot.lane.b32.xlu1 %v14436_v6, %s11797_s18  ;;  %v14719_v3 = vpop.permute.xlu2 %6155 }
 0x54e   : > { %7473 = vst.msk [vmem:[#allocation4 + $0x18] sm:$0xf] %vm5018_vm2, %v16589_v28  ;;  %v7608_v58 = vpop.permute.xlu1 %7607  ;;  %5942 = vrot.lane.b32.xlu0 %v14436_v6, %s11797_s18  ;;  %v16594_v9 = vld [vmem:[#allocation85_spill] sm:$0xff]  ;;  %v16595_v6 = vld [vmem:[#allocation20_spill] sm:$0xff] }
 0x54f   : > { %7697 = vst.msk [vmem:[#allocation4 + $0x18] sm:$0xf] %vm5243_vm3, %v14478_v55  ;;  %v5925_v50 = vpop.permute.xlu0 %5924 }
 0x550   : > { %7921 = vst.msk [vmem:[#allocation4 + $0x18] sm:$0xf] %vm5468_vm4, %v16590_v19 }
 0x551   : > { %8145 = vst.msk [vmem:[#allocation4 + $0x18] sm:$0xf] %vm5693_vm5, %v16591_v16  ;;  %v10904_v5 = vld [vmem:[#allocation4 + $0xc] sm:$0xf0] }
 0x552   : > { %8240 = vst.msk [vmem:[#allocation4 + $0x10] sm:$0xf] %vm5018_vm2, %v8208_v37  ;;  %v11599_v55 = vld [vmem:[#allocation4 + $0x20] sm:$0xf0]  ;;  %v10907_v60 = vor.u32 %v11595_v32, %v10904_v5  ;;  %v16596_v32 = vld [vmem:[#allocation25_spill] sm:$0xff] }
 0x553   : > { %8464 = vst.msk [vmem:[#allocation4 + $0x10] sm:$0xf] %vm5243_vm3, %v16592_v2  ;;  %v10915_v48 = vor.u32 %v11599_v55, %v10914_v54  ;;  %5402 = vrot.lane.b32.xlu2 %v14521_v27, %s11796_s17  ;;  %v11019_v51 = vor.u32 %v16596_v32, %v16595_v6  ;;  %v14737_v54 = vpack.c.bf16 %v5515_v52, %v5515_v52  ;;  %v8177_v16 = vld [vmem:[#allocation2 + $0x31] sm:$0xff]  ;;  %v16600_v5 = vld [vmem:[#allocation46_spill] sm:$0xff] }
 0x554   : > { %8688 = vst.msk [vmem:[#allocation4 + $0x10] sm:$0xf] %vm5468_vm4, %v16593_v21  ;;  %7189 = vmatmul.bf16.vlgmr.msrb.gmra.mxu2 %v10907_v60  ;;  %v8209_v55 = vpack.c.bf16 %v8177_v16, %v8177_v16  ;;  %v16601_v2 = vld [vmem:[#allocation42_spill] sm:$0xff]  ;;  %v16602_v52 = vld [vmem:[#allocation101_spill] sm:$0xff] }
 0x555   : > { %8912 = vst.msk [vmem:[#allocation4 + $0x10] sm:$0xf] %vm5693_vm5, %v14655_v13  ;;  %7105 = vmatmul.bf16.gmra.mxu1 %v10915_v48  ;;  %5400 = vrot.lane.b32.xlu1 %v14512_v29, %s11796_s17  ;;  %v16598_v13 = vld [vmem:[#allocation100_spill] sm:$0xff]  ;;  %v14746_v19 = vpop.permute.xlu2 %7615  ;;  %v8178_v21 = vld [vmem:[#allocation2 + $0x41] sm:$0xff] }
 0x556   : > { %7474 = vst.msk [vmem:[#allocation4 + $0x24] sm:$0xf] %vm5018_vm2, %v16594_v9  ;;  %v5383_v28 = vpop.permute.xlu1 %5382  ;;  %5625 = vrot.lane.b32.xlu0 %v14737_v54, %s11798_s23  ;;  %v16603_v9 = vld [vmem:[#allocation86_spill] sm:$0xff]  ;;  %v14776_v6 = vpack.c.bf16 %v8178_v21, %v8178_v21  ;;  %v14788_v21 = vpop.f32.mrf.mxu3 }
 0x557   : > { %7698 = vst.msk [vmem:[#allocation4 + $0x24] sm:$0xf] %vm5243_vm3, %v7606_v17  ;;  %v16599_v17 = vld [vmem:[#allocation33_spill] sm:$0xff]  ;;  %v5608_v37 = vpop.permute.xlu0 %5607  ;;  %v16607_v16 = vld [vmem:[#allocation30_spill] sm:$0xff] }
 0x558   : > { %7922 = vst.msk [vmem:[#allocation4 + $0x24] sm:$0xf] %vm5468_vm4, %v16597_v57  ;;  %v16605_v57 = vld [vmem:[#allocation26_spill] sm:$0xff] }
 0x559   : > { %11173 = vmatmul.msk.bf16.gmra.mxu3 %vm3261_vm0, %v11019_v51  ;;  %8146 = vst.msk [vmem:[#allocation4 + $0x24] sm:$0xf] %vm5693_vm5, %v16598_v13  ;;  %v16604_v51 = vld [vmem:[#allocation24_spill] sm:$0xff] }
 0x55a   : > { %6466 = vst.msk [vmem:[#allocation4 + $0x1c] sm:$0xf] %vm5693_vm5, %v16599_v17  ;;  %v11031_v13 = vor.u32 %v16605_v57, %v16604_v51  ;;  %v8968_v51 = vld [vmem:[#allocation3 + $0x1d1] sm:$0xff] }
 0x55b   : > { %5473 = vst.msk [vmem:[#allocation4 + $0x30] sm:$0xf] %vm5468_vm4, %v5381_v47  ;;  %5946 = vrot.lane.b32.xlu2 %v14521_v27, %s11797_s18  ;;  %v5734_v57 = vld [vmem:[#allocation3 + $0x90] sm:$0xff] }
 0x55c   : > { %5698 = vst.msk [vmem:[#allocation4 + $0x30] sm:$0xf] %vm5693_vm5, %v14570_v8 }
 0x55d   : > { %6017 = vst.msk [vmem:[#allocation4 + $0x28] sm:$0xf] %vm5243_vm3, %v5925_v50  ;;  %5944 = vrot.lane.b32.xlu1 %v14512_v29, %s11797_s18  ;;  %v5391_v60 = vpop.permute.xlu2 %5390  ;;  %v5517_v50 = vld [vmem:[#allocation2 + $0x130] sm:$0xff] }
 0x55e   : > { %6242 = vst.msk [vmem:[#allocation4 + $0x28] sm:$0xf] %vm5468_vm4, %v14601_v46  ;;  %v5927_v8 = vpop.permute.xlu1 %5926  ;;  %6169 = vrot.lane.b32.xlu0 %v14737_v54, %s11796_s17  ;;  %v5549_v29 = vpack.c.bf16 %v5517_v50, %v5517_v50  ;;  %v5516_v50 = vld [vmem:[#allocation2 + $0x100] sm:$0xff] }
 0x55f   : > { %6467 = vst.msk [vmem:[#allocation4 + $0x28] sm:$0xf] %vm5693_vm5, %v16600_v5  ;;  %v6152_v46 = vpop.permute.xlu0 %6151 }
 0x560   : > { %5474 = vst.msk [vmem:[#allocation4 + $0x3c] sm:$0xf] %vm5468_vm4, %v5383_v28  ;;  %v16606_v28 = vld [vmem:[#allocation38_spill] sm:$0xff] }
 0x561   : > { %v11598_v47 = vld [vmem:[#allocation4 + $0x1c] sm:$0xf]  ;;  %5699 = vst.msk [vmem:[#allocation4 + $0x3c] sm:$0xf] %vm5693_vm5, %v5608_v37 }
 0x562   : > { %8241 = vst.msk [vmem:[#allocation4 + $0x1c] sm:$0xf] %vm5018_vm2, %v8209_v55 }
 0x563   : > { %8465 = vst.msk [vmem:[#allocation4 + $0x1c] sm:$0xf] %vm5243_vm3, %v16601_v2  ;;  %v10926_v48 = vld [vmem:[#allocation4 + $0x30] sm:$0xf]  ;;  %5629 = vrot.lane.b32.xlu2 %v5549_v29, %s11798_s23  ;;  %v5548_v29 = vpack.c.bf16 %v5516_v50, %v5516_v50 }
 0x564   : > { %8689 = vst.msk [vmem:[#allocation4 + $0x1c] sm:$0xf] %vm5468_vm4, %v16602_v52  ;;  %v7520_v2 = vld [vmem:[#allocation2 + $0x131] sm:$0xff]  ;;  %v16609_v52 = vld [vmem:[#allocation87_spill] sm:$0xff] }
 0x565   : > { %7475 = vst.msk [vmem:[#allocation4 + $0x30] sm:$0xf] %vm5018_vm2, %v16603_v9  ;;  %v5935_v55 = vpop.permute.xlu2 %5934  ;;  %v16610_v9 = vld [vmem:[#allocation48_spill] sm:$0xff]  ;;  %5627 = vrot.lane.b32.xlu1 %v5548_v29, %s11798_s23 }
 0x566   : > { %7699 = vst.msk [vmem:[#allocation4 + $0x30] sm:$0xf] %vm5243_vm3, %v7608_v58  ;;  %v10916_v32 = vld [vmem:[#allocation4 + $0x24] sm:$0xf0]  ;;  %v5610_v5 = vpop.permute.xlu1 %5609  ;;  %7629 = vrot.lane.b32.xlu0 %v14521_v27, %s11797_s18 }
 0x567   : > { %7923 = vst.msk [vmem:[#allocation4 + $0x30] sm:$0xf] %vm5468_vm4, %v16606_v28  ;;  %v10919_v17 = vor.u32 %v11598_v47, %v10916_v32  ;;  %v7612_v47 = vpop.permute.xlu0 %7611  ;;  %v14799_v32 = vpack.c.bf16 %v7520_v2, %v7520_v2  ;;  %v16611_v27 = vld [vmem:[#allocation103_spill] sm:$0xff]  ;;  %v16615_v2 = vld [vmem:[#allocation32_spill] sm:$0xff] }
 0x568   : > { %8242 = vst.msk [vmem:[#allocation4 + $0x28] sm:$0xf] %vm5018_vm2, %v14776_v6  ;;  %v11602_v37 = vld [vmem:[#allocation4 + $0x38] sm:$0xf0] }
 0x569   : > { %11174 = vmatmul.msk.bf16.gmra.mxu3 %vm3261_vm0, %v11031_v13  ;;  %8466 = vst.msk [vmem:[#allocation4 + $0x28] sm:$0xf] %vm5243_vm3, %v16607_v16  ;;  %7194 = vmatmul.bf16.gmra.mxu2 %v10919_v17  ;;  %v10927_v58 = vor.u32 %v11602_v37, %v10926_v48  ;;  %v8967_v48 = vld [vmem:[#allocation3 + $0x1c1] sm:$0xff]  ;;  %v9000_v13 = vpack.c.bf16 %v8968_v51, %v8968_v51 }
 0x56a   : > { %16608 = vst [vmem:[#allocation64_spill] sm:$0xff] %v14788_v21  ;;  %v14816_v37 = vpack.c.bf16 %v5734_v57, %v5734_v57  ;;  %v6522_v51 = vld [vmem:[#allocation2 + $0x1e1] sm:$0xff]  ;;  %v8970_v21 = vld [vmem:[#allocation3 + $0x1f1] sm:$0xff] }
 0x56b   : > { %7476 = vst.msk [vmem:[#allocation4 + $0x3c] sm:$0xf] %vm5018_vm2, %v16609_v52  ;;  %7110 = vmatmul.bf16.gmra.mxu1 %v10927_v58  ;;  %7633 = vrot.lane.b32.xlu2 %v14799_v32, %s11797_s18  ;;  %v14820_v58 = vld [vmem:[#allocation4 + $0x130] sm:$0xf0]  ;;  %v16617_v57 = vld [vmem:[#allocation51_spill] sm:$0xff] }
 0x56c   : > { %7700 = vst.msk [vmem:[#allocation4 + $0x3c] sm:$0xf] %vm5243_vm3, %v14632_v14  ;;  %v8999_v14 = vpack.c.bf16 %v8967_v48, %v8967_v48  ;;  %v16616_v48 = vld [vmem:[#allocation102_spill] sm:$0xff] }
 0x56d   : > { %7924 = vst.msk [vmem:[#allocation4 + $0x3c] sm:$0xf] %vm5468_vm4, %v16610_v9  ;;  %v14810_v17 = vpop.permute.xlu2 %5617  ;;  %6171 = vrot.lane.b32.xlu1 %v5548_v29, %s11796_s17 }
 0x56e   : > { %6018 = vst.msk [vmem:[#allocation4 + $0x34] sm:$0xf] %vm5243_vm3, %v5927_v8  ;;  %v6154_v28 = vpop.permute.xlu1 %6153  ;;  %v16612_v8 = vld [vmem:[#allocation98_spill] sm:$0xff]  ;;  %5948 = vrot.lane.b32.xlu0 %v14580_v30, %s11797_s18  ;;  %v16614_v30 = vld [vmem:[#allocation29_spill] sm:$0xff] }
 0x56f   : > { %5028 = vst.msk [vmem:[#allocation4 + $0x6c] sm:$0xf] %vm5018_vm2, %v14466_v4  ;;  %v14814_v4 = vld [vmem:[#allocation4 + $0x128] sm:$0xf]  ;;  %v5387_v16 = vpop.permute.xlu0 %5386  ;;  %v11043_v9 = vor.u32 %v16615_v2, %v16614_v30  ;;  %v6554_v30 = vpack.c.bf16 %v6522_v51, %v6522_v51 }
 0x570   : > { %5253 = vst.msk [vmem:[#allocation4 + $0x6c] sm:$0xf] %vm5243_vm3, %v16611_v27 }
 0x571   : > { %5478 = vst.msk [vmem:[#allocation4 + $0x6c] sm:$0xf] %vm5468_vm4, %v5391_v60  ;;  %v4961_v60 = vld [vmem:[#allocation2 + $0x70] sm:$0xff] }
 0x572   : > { %6243 = vst.msk [vmem:[#allocation4 + $0x34] sm:$0xf] %vm5468_vm4, %v6152_v46  ;;  %v14823_v46 = vpop.f32.mrf.mxu3  ;;  %v4993_v50 = vpack.c.bf16 %v4961_v60, %v4961_v60  ;;  %v7414_v60 = vld [vmem:[#allocation3 + $0x70] sm:$0xff] }
 0x573   : > { %6468 = vst.msk [vmem:[#allocation4 + $0x34] sm:$0xf] %vm5693_vm5, %v16612_v8  ;;  %5408 = vrot.lane.b32.xlu2 %v14666_v22, %s11796_s17 }
 0x574   : > { %9031 = vst.msk [vmem:[#allocation4 + $0x128] sm:$0xf] %vm5018_vm2, %v8999_v14  ;;  %v5518_v14 = vld [vmem:[#allocation2 + $0x140] sm:$0xff] }
 0x575   : > { %16613 = vst [vmem:[#allocation58_spill] sm:$0xff] %v14823_v46  ;;  %v14841_v29 = vpop.permute.xlu2 %6161  ;;  %5406 = vrot.lane.b32.xlu1 %v14799_v32, %s11796_s17 }
 0x576   : > { %9032 = vst.msk [vmem:[#allocation4 + $0x134] sm:$0xf] %vm5018_vm2, %v9000_v13  ;;  %v14846_v13 = vpack.c.bf16 %v5518_v14, %v5518_v14 }
 0x577   : > { %5700 = vst.msk [vmem:[#allocation4 + $0x48] sm:$0xf] %vm5693_vm5, %v5610_v5  ;;  %v14839_v5 = vpop.permute.xlu1 %7613  ;;  %v5931_v27 = vpop.permute.xlu0 %5930 }
 0x578   : > { %5798 = vst.msk [vmem:[#allocation4 + $0x64] sm:$0xf] %vm5018_vm2, %v14816_v37  ;;  %5631 = vrot.lane.b32.xlu0 %v14846_v13, %s11798_s23 }
 0x579   : > { %6022 = vst.msk [vmem:[#allocation4 + $0x64] sm:$0xf] %vm5243_vm3, %v5935_v55  ;;  %11175 = vmatmul.msk.bf16.gmra.mxu3 %vm3261_vm0, %v11043_v9  ;;  %v6523_v55 = vld [vmem:[#allocation2 + $0x1f1] sm:$0xff] }
 0x57a   : > { %6244 = vst.msk [vmem:[#allocation4 + $0x40] sm:$0xf] %vm5468_vm4, %v6154_v28  ;;  %v11716_v28 = vld [vmem:[%s16322_s3 + $0x38] sm:$0xff]  ;;  %v14858_v2 = vpop.f32.mrf.mxu3  ;;  %v6555_v9 = vpack.c.bf16 %v6523_v55, %v6523_v55  ;;  %v11601_v14 = vld [vmem:[#allocation4 + $0x34] sm:$0xf] }
 0x57b   : > { %6469 = vst.msk [vmem:[#allocation4 + $0x40] sm:$0xf] %vm5693_vm5, %v16616_v48  ;;  %9539 = vmatpush.bf16.msra.mxu3 %v11716_v28  ;;  %5952 = vrot.lane.b32.xlu2 %v14666_v22, %s11797_s18  ;;  %v14865_v48 = vpack.c.bf16 %v7414_v60, %v7414_v60  ;;  %v8969_v22 = vld [vmem:[#allocation3 + $0x1e1] sm:$0xff] }
 0x57c   : > { %5026 = vst.msk [vmem:[#allocation4 + $0x54] sm:$0xf] %vm5018_vm2, %v4993_v50  ;;  %v16618_v50 = vld [vmem:[#allocation88_spill] sm:$0xff] }
 0x57d   : > { %5251 = vst.msk [vmem:[#allocation4 + $0x54] sm:$0xf] %vm5243_vm3, %v16617_v57  ;;  %v4962_v57 = vld [vmem:[#allocation2 + $0x80] sm:$0xff]  ;;  %5950 = vrot.lane.b32.xlu1 %v14799_v32, %s11797_s18 }
 0x57e   : > { %v10938_v8 = vld [vmem:[#allocation4 + $0x48] sm:$0xf]  ;;  %5476 = vst.msk [vmem:[#allocation4 + $0x54] sm:$0xf] %vm5468_vm4, %v5387_v16  ;;  %v4994_v60 = vpack.c.bf16 %v4962_v57, %v4962_v57  ;;  %v6525_v57 = vld [vmem:[#allocation2 + $0x211] sm:$0xff] }
 0x57f   : > { %7477 = vst.msk [vmem:[#allocation4 + $0x48] sm:$0xf] %vm5018_vm2, %v16618_v50  ;;  %v16620_v16 = vld [vmem:[#allocation99_spill] sm:$0xff]  ;;  %v5614_v55 = vpop.permute.xlu0 %5613 }
 0x580   : > { %16619 = vst [vmem:[#allocation56_spill] sm:$0xff] %v14858_v2  ;;  %v5389_v2 = vpop.permute.xlu1 %5388  ;;  %6175 = vrot.lane.b32.xlu0 %v14846_v13, %s11796_s17 }
 0x581   : > { %7701 = vst.msk [vmem:[#allocation4 + $0x48] sm:$0xf] %vm5243_vm3, %v7612_v47  ;;  %v14870_v47 = vpop.permute.xlu2 %7621 }
 0x582   : > { %7925 = vst.msk [vmem:[#allocation4 + $0x48] sm:$0xf] %vm5468_vm4, %v16620_v16  ;;  %v10928_v51 = vld [vmem:[#allocation4 + $0x3c] sm:$0xf0]  ;;  %v14889_v32 = vpop.f32.mrf.mxu3 }
 0x583   : > { %5701 = vst.msk [vmem:[#allocation4 + $0x54] sm:$0xf] %vm5693_vm5, %v14698_v42  ;;  %v10931_v28 = vor.u32 %v11601_v14, %v10928_v51  ;;  %v9001_v42 = vpack.c.bf16 %v8969_v22, %v8969_v22  ;;  %8819 = vrot.lane.b32.xlu2 %v14776_v6, %s11798_s23  ;;  %v7415_v6 = vld [vmem:[#allocation3 + $0x80] sm:$0xff] }
 0x584   : > { %6586 = vst.msk [vmem:[#allocation4 + $0x140] sm:$0xf] %vm5018_vm2, %v6554_v30  ;;  %v9002_v30 = vpack.c.bf16 %v8970_v21, %v8970_v21  ;;  %v6524_v21 = vld [vmem:[#allocation2 + $0x201] sm:$0xff] }
 0x585   : > { %6587 = vst.msk [vmem:[#allocation4 + $0x14c] sm:$0xf] %vm5018_vm2, %v6555_v9  ;;  %7199 = vmatmul.bf16.gmra.mxu2 %v10931_v28  ;;  %v16621_v9 = vld [vmem:[#allocation54_spill] sm:$0xff]  ;;  %v11726_v28 = vld [vmem:[%s16322_s3 + $0x88] sm:$0xff]  ;;  %8597 = vrot.lane.b32.xlu1 %v16609_v52, %s11796_s17 }
 0x586   : > { %5796 = vst.msk [vmem:[#allocation4 + $0x4c] sm:$0xf] %vm5018_vm2, %v14865_v48  ;;  %9723 = vmatpush.bf16.msra.mxu2 %v11726_v28 }
 0x587   : > { %6020 = vst.msk [vmem:[#allocation4 + $0x4c] sm:$0xf] %vm5243_vm3, %v5931_v27  ;;  %v11055_v27 = vor.u32 %v14820_v58, %v14814_v4  ;;  %v6158_v22 = vpop.permute.xlu0 %6157 }
 0x588   : > { %6245 = vst.msk [vmem:[#allocation4 + $0x4c] sm:$0xf] %vm5468_vm4, %v14719_v3  ;;  %v5933_v4 = vpop.permute.xlu1 %5932 }
 0x589   : > { %6470 = vst.msk [vmem:[#allocation4 + $0x4c] sm:$0xf] %vm5693_vm5, %v16621_v9  ;;  %11176 = vmatmul.msk.bf16.gmra.mxu3 %vm3261_vm0, %v11055_v27  ;;  %v5397_v58 = vpop.permute.xlu2 %5396  ;;  %v8722_v9 = vld [vmem:[#allocation2 + $0x51] sm:$0xff]  ;;  %v6557_v27 = vpack.c.bf16 %v6525_v57, %v6525_v57 }
 0x58a   : > { %v11605_v16 = vld [vmem:[#allocation4 + $0x50] sm:$0xf0]  ;;  %5027 = vst.msk [vmem:[#allocation4 + $0x60] sm:$0xf] %vm5018_vm2, %v4994_v60 }
 0x58b   : > { %16622 = vst [vmem:[#allocation55_spill] sm:$0xff] %v14889_v32  ;;  %v14891_v14 = vld [vmem:[#allocation4 + $0x140] sm:$0xf]  ;;  %v10939_v3 = vor.u32 %v11605_v16, %v10938_v8  ;;  %v11724_v8 = vld [vmem:[%s16322_s3 + $0x78] sm:$0xff]  ;;  %v11715_v60 = vld [vmem:[%s16322_s3 + $0x30] sm:$0xff]  ;;  %v14911_v16 = vpack.c.bf16 %v8722_v9, %v8722_v9  ;;  %8057 = vrot.lane.b32.xlu2 %v16618_v50, %s11798_s23 }
 0x58c   : > { %7478 = vst.msk [vmem:[#allocation4 + $0x54] sm:$0xf] %vm5018_vm2, %v14865_v48  ;;  %v11636_v51 = vld [vmem:[#allocation4 + $0x148] sm:$0xf0]  ;;  %9628 = vmatpush.bf16.msra.mxu1 %v11724_v8  ;;  %9540 = vmatpush.bf16.msra.mxu3 %v11715_v60  ;;  %v8972_v57 = vld [vmem:[#allocation3 + $0x211] sm:$0xff]  ;;  %v14936_v60 = vpop.f32.mrf.mxu3 }
 0x58d   : > { %9033 = vst.msk [vmem:[#allocation4 + $0x140] sm:$0xf] %vm5018_vm2, %v9001_v42  ;;  %7115 = vmatmul.bf16.gmra.mxu1 %v10939_v3  ;;  %v6556_v42 = vpack.c.bf16 %v6524_v21, %v6524_v21  ;;  %v14914_v3 = vpack.c.bf16 %v7415_v6, %v7415_v6  ;;  %8821 = vrot.lane.b32.xlu0 %v14911_v16, %s11798_s23  ;;  %v8275_v6 = vld [vmem:[#allocation3 + $0x51] sm:$0xff] }
 0x58e   : > { %9034 = vst.msk [vmem:[#allocation4 + $0x14c] sm:$0xf] %vm5018_vm2, %v9002_v30  ;;  %v16623_v30 = vld [vmem:[#allocation35_spill] sm:$0xff]  ;;  %v16625_v9 = vld [vmem:[#allocation44_spill] sm:$0xff]  ;;  %8055 = vrot.lane.b32.xlu1 %v16609_v52, %s11798_s23 }
 0x58f   : > { %7702 = vst.msk [vmem:[#allocation4 + $0x54] sm:$0xf] %vm5243_vm3, %v14839_v5  ;;  %v11714_v5 = vld [vmem:[%s16322_s3 + $0x28] sm:$0xff]  ;;  %v14934_v8 = vpop.permute.xlu0 %7617 }
 0x590   : > { %5252 = vst.msk [vmem:[#allocation4 + $0x60] sm:$0xf] %vm5243_vm3, %v16623_v30  ;;  %v5616_v21 = vpop.permute.xlu1 %5615  ;;  %9541 = vmatpush.bf16.msra.mxu3 %v11714_v5  ;;  %v8307_v30 = vpack.c.bf16 %v8275_v6, %v8275_v6  ;;  %v9004_v5 = vpack.c.bf16 %v8972_v57, %v8972_v57  ;;  %v6526_v52 = vld [vmem:[#allocation2 + $0x221] sm:$0xff] }
 0x591   : > { %5477 = vst.msk [vmem:[#allocation4 + $0x60] sm:$0xf] %vm5468_vm4, %v5389_v2  ;;  %v8971_v2 = vld [vmem:[#allocation3 + $0x201] sm:$0xff]  ;;  %v5941_v28 = vpop.permute.xlu2 %5940 }
 0x592   : > { %5702 = vst.msk [vmem:[#allocation4 + $0x60] sm:$0xf] %vm5693_vm5, %v5614_v55  ;;  %v11713_v55 = vld [vmem:[%s16322_s3 + $0x20] sm:$0xff] }
 0x593   : > { %6588 = vst.msk [vmem:[#allocation4 + $0x158] sm:$0xf] %vm5018_vm2, %v6556_v42  ;;  %v9003_v42 = vpack.c.bf16 %v8971_v2, %v8971_v2  ;;  %8599 = vrot.lane.b32.xlu2 %v16618_v50, %s11796_s17  ;;  %v6527_v50 = vld [vmem:[#allocation2 + $0x231] sm:$0xff]  ;;  %v8276_v57 = vld [vmem:[#allocation3 + $0x61] sm:$0xff] }
 0x594   : > { %6589 = vst.msk [vmem:[#allocation4 + $0x164] sm:$0xf] %vm5018_vm2, %v6557_v27  ;;  %9542 = vmatpush.bf16.msra.mxu3 %v11713_v55  ;;  %v14980_v32 = vpop.f32.mrf.mxu3 }
 0x595   : > { %5797 = vst.msk [vmem:[#allocation4 + $0x58] sm:$0xf] %vm5018_vm2, %v14914_v3  ;;  %8375 = vrot.lane.b32.xlu0 %v8307_v30, %s11797_s18  ;;  %v8308_v30 = vpack.c.bf16 %v8276_v57, %v8276_v57  ;;  %v11604_v57 = vld [vmem:[#allocation4 + $0x4c] sm:$0xf] }
 0x596   : > { %6021 = vst.msk [vmem:[#allocation4 + $0x58] sm:$0xf] %vm5243_vm3, %v5933_v4  ;;  %v5737_v4 = vld [vmem:[#allocation3 + $0xc0] sm:$0xff] }
 0x597   : > { %16624 = vst [vmem:[#allocation66_spill] sm:$0xff] %v14936_v60  ;;  %v14962_v55 = vpack.c.bf16 %v5737_v4, %v5737_v4  ;;  %v6559_v4 = vpack.c.bf16 %v6527_v50, %v6527_v50  ;;  %8377 = vrot.lane.b32.xlu1 %v8308_v30, %s11797_s18  ;;  %v11710_v50 = vld [vmem:[%s16322_s3 + $0x8] sm:$0xff] }
 0x598   : > { %5031 = vst.msk [vmem:[#allocation4 + $0x90] sm:$0xf] %vm5018_vm2, %v14626_v25  ;;  %v11067_v25 = vor.u32 %v11636_v51, %v14891_v14  ;;  %v6160_v6 = vpop.permute.xlu1 %6159  ;;  %v11712_v51 = vld [vmem:[%s16322_s3 + $0x18] sm:$0xff] }
 0x599   : > { %5256 = vst.msk [vmem:[#allocation4 + $0x90] sm:$0xf] %vm5243_vm3, %v16625_v9  ;;  %v14942_v27 = vld [vmem:[#allocation4 + $0x60] sm:$0xf]  ;;  %v14965_v14 = vpop.permute.xlu2 %5623  ;;  %v6558_v9 = vpack.c.bf16 %v6526_v52, %v6526_v52  ;;  %9543 = vmatpush.bf16.msra.mxu3 %v11712_v51 }
 0x59a   : > { %5481 = vst.msk [vmem:[#allocation4 + $0x90] sm:$0xf] %vm5468_vm4, %v5397_v58  ;;  %v14955_v2 = vld [vmem:[#allocation4 + $0x158] sm:$0xf]  ;;  %11177 = vmatmul.msk.bf16.gmra.mxu3 %vm3261_vm0, %v11067_v25  ;;  %v4964_v25 = vld [vmem:[#allocation2 + $0xa0] sm:$0xff] }
 0x59b   : > { %7479 = vst.msk [vmem:[#allocation4 + $0x60] sm:$0xf] %vm5018_vm2, %v14914_v3  ;;  %v14957_v58 = vld [vmem:[#allocation4 + $0x160] sm:$0xf0] }
 0x59c   : > { %7703 = vst.msk [vmem:[#allocation4 + $0x60] sm:$0xf] %vm5243_vm3, %v14746_v19  ;;  %v14967_v19 = vpop.permute.xlu0 %5392  ;;  %v8973_v52 = vld [vmem:[#allocation3 + $0x221] sm:$0xff] }
 0x59d   : > { %9035 = vst.msk [vmem:[#allocation4 + $0x158] sm:$0xf] %vm5018_vm2, %v9003_v42  ;;  %v16626_v42 = vld [vmem:[#allocation37_spill] sm:$0xff]  ;;  %8601 = vrot.lane.b32.xlu0 %v14865_v48, %s11796_s17  ;;  %v8723_v51 = vld [vmem:[#allocation2 + $0x61] sm:$0xff]  ;;  %v9005_v46 = vpack.c.bf16 %v8973_v52, %v8973_v52 }
 0x59e   : > { %9036 = vst.msk [vmem:[#allocation4 + $0x164] sm:$0xf] %vm5018_vm2, %v9004_v5  ;;  %v8724_v5 = vld [vmem:[#allocation2 + $0x71] sm:$0xff]  ;;  %v15001_v45 = vpack.c.bf16 %v8723_v51, %v8723_v51 }
 0x59f   : > { %6246 = vst.msk [vmem:[#allocation4 + $0x58] sm:$0xf] %vm5468_vm4, %v6158_v22  ;;  %v11711_v22 = vld [vmem:[%s16322_s3 + $0x10] sm:$0xff]  ;;  %v14978_v60 = vpack.c.bf16 %v8724_v5, %v8724_v5  ;;  %v16629_v51 = vld [vmem:[#allocation49_spill] sm:$0xff] }
 0x5a0   : > { %6471 = vst.msk [vmem:[#allocation4 + $0x58] sm:$0xf] %vm5693_vm5, %v16626_v42  ;;  %9544 = vmatpush.bf16.msra.mxu3 %v11711_v22  ;;  %v7620_v42 = vpop.permute.xlu1 %7619  ;;  %v16628_v5 = vld [vmem:[#allocation104_spill] sm:$0xff]  ;;  %8823 = vrot.lane.b32.xlu1 %v15001_v45, %s11798_s23 }
 0x5a1   : > { %5703 = vst.msk [vmem:[#allocation4 + $0x6c] sm:$0xf] %vm5693_vm5, %v5616_v21  ;;  %8825 = vrot.lane.b32.xlu2 %v14978_v60, %s11798_s23  ;;  %v4996_v21 = vpack.c.bf16 %v4964_v25, %v4964_v25 }
 0x5a2   : > { %16627 = vst [vmem:[#allocation67_spill] sm:$0xff] %v14980_v32 }
 0x5a3   : > { %5801 = vst.msk [vmem:[#allocation4 + $0x88] sm:$0xf] %vm5018_vm2, %v14962_v55 }
 0x5a4   : > { %6025 = vst.msk [vmem:[#allocation4 + $0x88] sm:$0xf] %vm5243_vm3, %v5941_v28  ;;  %v8974_v28 = vld [vmem:[#allocation3 + $0x231] sm:$0xff]  ;;  %v5937_v25 = vpop.permute.xlu0 %5936  ;;  %9545 = vmatpush.bf16.msra.mxu3 %v11710_v50 }
 0x5a5   : > { %6590 = vst.msk [vmem:[#allocation4 + $0x170] sm:$0xf] %vm5018_vm2, %v6558_v9  ;;  %v14998_v9 = vpop.permute.xlu2 %6167 }
 0x5a6   : > { %6591 = vst.msk [vmem:[#allocation4 + $0x17c] sm:$0xf] %vm5018_vm2, %v6559_v4  ;;  %v7734_v4 = vld [vmem:[#allocation3 + $0x71] sm:$0xff] }
 0x5a7   : > { %6247 = vst.msk [vmem:[#allocation4 + $0x64] sm:$0xf] %vm5468_vm4, %v6160_v6  ;;  %v10940_v30 = vld [vmem:[#allocation4 + $0x54] sm:$0xf0]  ;;  %v9006_v6 = vpack.c.bf16 %v8974_v28, %v8974_v28  ;;  %v8278_v28 = vld [vmem:[#allocation3 + $0x81] sm:$0xff] }
 0x5a8   : > { %6472 = vst.msk [vmem:[#allocation4 + $0x64] sm:$0xf] %vm5693_vm5, %v16628_v5  ;;  %v11608_v32 = vld [vmem:[#allocation4 + $0x68] sm:$0xf0]  ;;  %v10943_v22 = vor.u32 %v11604_v57, %v10940_v30  ;;  %v11709_v5 = vld [vmem:[%s16322_s3] sm:$0xff]  ;;  %v4965_v57 = vld [vmem:[#allocation2 + $0xb0] sm:$0xff]  ;;  %8059 = vrot.lane.b32.xlu1 %v14865_v48, %s11798_s23 }
 0x5a9   : > { %5029 = vst.msk [vmem:[#allocation4 + $0x78] sm:$0xf] %vm5018_vm2, %v4996_v21  ;;  %v10951_v40 = vor.u32 %v11608_v32, %v14942_v27  ;;  %v7766_v21 = vpack.c.bf16 %v7734_v4, %v7734_v4  ;;  %8061 = vrot.lane.b32.xlu2 %v14914_v3, %s11798_s23  ;;  %v15017_v32 = vpop.f32.mrf.mxu3  ;;  %v11079_v27 = vor.u32 %v14957_v58, %v14955_v2  ;;  %v11723_v58 = vld [vmem:[%s16322_s3 + $0x70] sm:$0xff] }
 0x5aa   : > { %7480 = vst.msk [vmem:[#allocation4 + $0x6c] sm:$0xf] %vm5018_vm2, %v14816_v37  ;;  %7204 = vmatmul.bf16.gmra.mxu2 %v10943_v22  ;;  %9546 = vmatpush.bf16.msra.mxu3 %v11709_v5  ;;  %v8310_v4 = vpack.c.bf16 %v8278_v28, %v8278_v28  ;;  %v8726_v22 = vld [vmem:[#allocation2 + $0x91] sm:$0xff] }
 0x5ab   : > { %7704 = vst.msk [vmem:[#allocation4 + $0x6c] sm:$0xf] %vm5243_vm3, %v14934_v8  ;;  %7120 = vmatmul.bf16.gmra.mxu1 %v10951_v40  ;;  %v15022_v8 = vpack.c.bf16 %v7417_v44, %v7417_v44  ;;  %7837 = vrot.lane.b32.xlu0 %v7766_v21, %s11796_s17  ;;  %v5395_v40 = vpop.permute.xlu1 %5394  ;;  %v4997_v44 = vpack.c.bf16 %v4965_v57, %v4965_v57  ;;  %v5740_v57 = vld [vmem:[#allocation3 + $0xf0] sm:$0xff] }
 0x5ac   : > { %v11090_v52 = vld [vmem:[#allocation4 + $0x170] sm:$0xf]  ;;  %5254 = vst.msk [vmem:[#allocation4 + $0x78] sm:$0xf] %vm5243_vm3, %v16629_v51  ;;  %11178 = vmatmul.msk.bf16.gmra.mxu3 %vm3261_vm0, %v11079_v27  ;;  %9629 = vmatpush.bf16.msra.mxu1 %v11723_v58 }
 0x5ad   : > { %v11642_v50 = vld [vmem:[#allocation4 + $0x178] sm:$0xf0]  ;;  %9037 = vst.msk [vmem:[#allocation4 + $0x170] sm:$0xf] %vm5018_vm2, %v9005_v46  ;;  %v15031_v2 = vpop.permute.xlu2 %7627  ;;  %v5620_v46 = vpop.permute.xlu0 %5619  ;;  %v4967_v28 = vld [vmem:[#allocation2 + $0xd0] sm:$0xff] }
 0x5ae   : > { %9038 = vst.msk [vmem:[#allocation4 + $0x17c] sm:$0xf] %vm5018_vm2, %v9006_v6  ;;  %v11091_v27 = vor.u32 %v11642_v50, %v11090_v52 }
 0x5af   : > { %5479 = vst.msk [vmem:[#allocation4 + $0x78] sm:$0xf] %vm5468_vm4, %v14967_v19  ;;  %v16630_v19 = vld [vmem:[#allocation39_spill] sm:$0xff]  ;;  %v11607_v6 = vld [vmem:[#allocation4 + $0x64] sm:$0xf] }
 0x5b0   : > { %5704 = vst.msk [vmem:[#allocation4 + $0x78] sm:$0xf] %vm5693_vm5, %v14810_v17  ;;  %v7418_v17 = vld [vmem:[#allocation3 + $0xb0] sm:$0xff]  ;;  %8381 = vrot.lane.b32.xlu1 %v8310_v4, %s11797_s18 }
 0x5b1   : > { %5799 = vst.msk [vmem:[#allocation4 + $0x70] sm:$0xf] %vm5018_vm2, %v15022_v8  ;;  %8603 = vrot.lane.b32.xlu2 %v14914_v3, %s11796_s17  ;;  %v15054_v48 = vpack.c.bf16 %v7418_v17, %v7418_v17 }
 0x5b2   : > { %6023 = vst.msk [vmem:[#allocation4 + $0x70] sm:$0xf] %vm5243_vm3, %v5937_v25 }
 0x5b3   : > { %6248 = vst.msk [vmem:[#allocation4 + $0x70] sm:$0xf] %vm5468_vm4, %v14841_v29  ;;  %8379 = vrot.lane.b32.xlu0 %v7766_v21, %s11797_s18  ;;  %v15051_v29 = vpop.f32.mrf.mxu3  ;;  %v15063_v21 = vpack.c.bf16 %v8726_v22, %v8726_v22  ;;  %v8280_v22 = vld [vmem:[#allocation3 + $0xa1] sm:$0xff] }
 0x5b4   : > { %6473 = vst.msk [vmem:[#allocation4 + $0x70] sm:$0xf] %vm5693_vm5, %v14131_v0  ;;  %v5939_v0 = vpop.permute.xlu1 %5938 }
 0x5b5   : > { %5030 = vst.msk [vmem:[#allocation4 + $0x84] sm:$0xf] %vm5018_vm2, %v4997_v44  ;;  %v5403_v3 = vpop.permute.xlu2 %5402  ;;  %v6164_v25 = vpop.permute.xlu0 %6163  ;;  %v15081_v44 = vpack.c.bf16 %v5740_v57, %v5740_v57  ;;  %v7423_v57 = vld [vmem:[#allocation3 + $0x120] sm:$0xff] }
 0x5b6   : > { %5255 = vst.msk [vmem:[#allocation4 + $0x84] sm:$0xf] %vm5243_vm3, %v16630_v19  ;;  %v8725_v19 = vld [vmem:[#allocation2 + $0x81] sm:$0xff] }
 0x5b7   : > { %v10962_v30 = vld [vmem:[#allocation4 + $0x78] sm:$0xf]  ;;  %5480 = vst.msk [vmem:[#allocation4 + $0x84] sm:$0xf] %vm5468_vm4, %v5395_v40 }
 0x5b8   : > { %7481 = vst.msk [vmem:[#allocation4 + $0x78] sm:$0xf] %vm5018_vm2, %v15022_v8 }
 0x5b9   : > { %7705 = vst.msk [vmem:[#allocation4 + $0x78] sm:$0xf] %vm5243_vm3, %v7620_v42  ;;  %8829 = vrot.lane.b32.xlu2 %v15063_v21, %s11798_s23  ;;  %v16631_v42 = vld [vmem:[#allocation105_spill] sm:$0xff] }
 0x5ba   : > { %5705 = vst.msk [vmem:[#allocation4 + $0x84] sm:$0xf] %vm5693_vm5, %v5620_v46  ;;  %v16632_v46 = vld [vmem:[#allocation41_spill] sm:$0xff] }
 0x5bb   : > { %v10952_v5 = vld [vmem:[#allocation4 + $0x6c] sm:$0xf0]  ;;  %5800 = vst.msk [vmem:[#allocation4 + $0x7c] sm:$0xf] %vm5018_vm2, %v15054_v48  ;;  %8605 = vrot.lane.b32.xlu0 %v14816_v37, %s11796_s17 }
 0x5bc   : > { %v10955_v51 = vor.u32 %v11607_v6, %v10952_v5  ;;  %6024 = vst.msk [vmem:[#allocation4 + $0x7c] sm:$0xf] %vm5243_vm3, %v5939_v0  ;;  %11179 = vmatmul.msk.bf16.gmra.mxu3 %vm3261_vm0, %v11091_v27  ;;  %v5622_v40 = vpop.permute.xlu1 %5621  ;;  %v15087_v0 = vpack.c.bf16 %v8725_v19, %v8725_v19  ;;  %v11182_v6 = vld [vmem:[#allocation4] sm:$0xf]  ;;  %v16633_v5 = vld [vmem:[#allocation47_spill] sm:$0xff]  ;;  %v7455_v19 = vpack.c.bf16 %v7423_v57, %v7423_v57 }
 0x5bd   : > { %5034 = vst.msk [vmem:[#allocation4 + $0xb4] sm:$0xf] %vm5018_vm2, %v14737_v54  ;;  %v5947_v52 = vpop.permute.xlu2 %5946  ;;  %v15077_v54 = vpop.f32.mrf.mxu3  ;;  %v11662_v27 = vld [vmem:[#allocation4 + $0x8] sm:$0xf0] }
 0x5be   : > { %7209 = vmatmul.bf16.gmra.mxu2 %v10955_v51  ;;  %5259 = vst.msk [vmem:[#allocation4 + $0xb4] sm:$0xf] %vm5243_vm3, %v16631_v42  ;;  %v7624_v58 = vpop.permute.xlu0 %7623  ;;  %8827 = vrot.lane.b32.xlu1 %v15087_v0, %s11798_s23 }
 0x5bf   : > { %5484 = vst.msk [vmem:[#allocation4 + $0xb4] sm:$0xf] %vm5468_vm4, %v5403_v3  ;;  %v4999_v3 = vpack.c.bf16 %v4967_v28, %v4967_v28 }
 0x5c0   : > { %6249 = vst.msk [vmem:[#allocation4 + $0x7c] sm:$0xf] %vm5468_vm4, %v6164_v25  ;;  %v7736_v25 = vld [vmem:[#allocation3 + $0x91] sm:$0xff] }
 0x5c1   : > { %v11611_v50 = vld [vmem:[#allocation4 + $0x80] sm:$0xf0]  ;;  %6474 = vst.msk [vmem:[#allocation4 + $0x7c] sm:$0xf] %vm5693_vm5, %v16632_v46  ;;  %8063 = vrot.lane.b32.xlu2 %v14816_v37, %s11798_s23  ;;  %v7420_v37 = vld [vmem:[#allocation3 + $0xd0] sm:$0xff] }
 0x5c2   : > { %7482 = vst.msk [vmem:[#allocation4 + $0x84] sm:$0xf] %vm5018_vm2, %v15054_v48  ;;  %v10963_v17 = vor.u32 %v11611_v50, %v10962_v30  ;;  %v15107_v50 = vpack.c.bf16 %v8280_v22, %v8280_v22  ;;  %v15111_v46 = vpack.c.bf16 %v7420_v37, %v7420_v37  ;;  %v16635_v22 = vld [vmem:[#allocation80_spill] sm:$0xff] }
 0x5c3   : > { %7706 = vst.msk [vmem:[#allocation4 + $0x84] sm:$0xf] %vm5243_vm3, %v14870_v47  ;;  %7839 = vrot.lane.b32.xlu0 %v8310_v4, %s11796_s17 }
 0x5c4   : > { %7125 = vmatmul.bf16.gmra.mxu1 %v10963_v17  ;;  %5706 = vst.msk [vmem:[#allocation4 + $0x90] sm:$0xf] %vm5693_vm5, %v5622_v40  ;;  %v6166_v47 = vpop.permute.xlu1 %6165  ;;  %v16634_v40 = vld [vmem:[#allocation53_spill] sm:$0xff]  ;;  %v11183_v17 = vor.u32 %v11662_v27, %v11182_v6  ;;  %v11722_v6 = vld [vmem:[%s16322_s3 + $0x68] sm:$0xff] }
 0x5c5   : > { %5804 = vst.msk [vmem:[#allocation4 + $0xac] sm:$0xf] %vm5018_vm2, %v15081_v44  ;;  %v5630_v30 = vpop.permute.xlu2 %5629  ;;  %v15103_v42 = vpop.f32.mrf.mxu3  ;;  %9630 = vmatpush.bf16.msra.mxu1 %v11722_v6  ;;  %v11194_v6 = vld [vmem:[#allocation4 + $0x18] sm:$0xf] }
 0x5c6   : > { %6028 = vst.msk [vmem:[#allocation4 + $0xac] sm:$0xf] %vm5243_vm3, %v5947_v52  ;;  %v5399_v51 = vpop.permute.xlu0 %5398  ;;  %v7768_v52 = vpack.c.bf16 %v7736_v25, %v7736_v25 }
 0x5c7   : > { %5032 = vst.msk [vmem:[#allocation4 + $0x9c] sm:$0xf] %vm5018_vm2, %v4999_v3 }
 0x5c8   : > { %6250 = vst.msk [vmem:[#allocation4 + $0x88] sm:$0xf] %vm5468_vm4, %v6166_v47  ;;  %7841 = vrot.lane.b32.xlu1 %v7768_v52, %s11796_s17 }
 0x5c9   : > { %6475 = vst.msk [vmem:[#allocation4 + $0x88] sm:$0xf] %vm5693_vm5, %v16633_v5  ;;  %8385 = vrot.lane.b32.xlu2 %v15107_v50, %s11797_s18  ;;  %v8727_v5 = vld [vmem:[#allocation2 + $0xa1] sm:$0xff] }
 0x5ca   : > { %5710 = vst.msk [vmem:[#allocation4 + $0xc0] sm:$0xf] %vm5693_vm5, %v5630_v30  ;;  %v11610_v30 = vld [vmem:[#allocation4 + $0x7c] sm:$0xf]  ;;  %v15137_v27 = vpack.c.bf16 %v8727_v5, %v8727_v5 }
 0x5cb   : > { %v10974_v4 = vld [vmem:[#allocation4 + $0x90] sm:$0xf]  ;;  %5257 = vst.msk [vmem:[#allocation4 + $0x9c] sm:$0xf] %vm5243_vm3, %v16634_v40  ;;  %8065 = vrot.lane.b32.xlu0 %v15022_v8, %s11798_s23 }
 0x5cc   : > { %7483 = vst.msk [vmem:[#allocation4 + $0x90] sm:$0xf] %vm5018_vm2, %v14962_v55  ;;  %9547 = vmatmul.bf16.vlgmr.msra.gmra.mxu3 %v11183_v17  ;;  %v7626_v28 = vpop.permute.xlu1 %7625  ;;  %v15155_v17 = vld [vmem:[%s16323_s4] ss:$0 sm:$0xff] }
 0x5cd   : > { %7707 = vst.msk [vmem:[#allocation4 + $0x90] sm:$0xf] %vm5243_vm3, %v7624_v58  ;;  %v15122_v3 = vpop.permute.xlu2 %7633  ;;  %v15139_v37 = vpop.f32.mrf.mxu3 }
 0x5ce   : > { %5482 = vst.msk [vmem:[#allocation4 + $0x9c] sm:$0xf] %vm5468_vm4, %v5399_v51  ;;  %v5943_v47 = vpop.permute.xlu0 %5942  ;;  %v4968_v51 = vld [vmem:[#allocation2 + $0xe0] sm:$0xff] }
 0x5cf   : > { %5707 = vst.msk [vmem:[#allocation4 + $0x9c] sm:$0xf] %vm5693_vm5, %v14965_v14 }
 0x5d0   : > { %5802 = vst.msk [vmem:[#allocation4 + $0x94] sm:$0xf] %vm5018_vm2, %v15111_v46  ;;  %v10964_v25 = vld [vmem:[#allocation4 + $0x84] sm:$0xf0]  ;;  %8383 = vrot.lane.b32.xlu1 %v7768_v52, %s11797_s18  ;;  %v7101_v52 = vpop.f32.mrf.mxu1 }
 0x5d1   : > { %v15126_v58 = vld [vmem:[#allocation4 + $0xc0] sm:$0xf]  ;;  %5037 = vst.msk [vmem:[#allocation4 + $0xd8] sm:$0xf] %vm5018_vm2, %v14846_v13  ;;  %v10967_v14 = vor.u32 %v11610_v30, %v10964_v25  ;;  %v5000_v13 = vpack.c.bf16 %v4968_v51, %v4968_v51  ;;  %8831 = vrot.lane.b32.xlu2 %v15137_v27, %s11798_s23  ;;  %v7738_v30 = vld [vmem:[#allocation3 + $0xb1] sm:$0xff]  ;;  %v16636_v25 = vld [vmem:[#allocation43_spill] sm:$0xff] }
 0x5d2   : > { %7487 = vst.msk [vmem:[#allocation4 + $0xc0] sm:$0xf] %vm5018_vm2, %v7455_v19  ;;  %v7421_v19 = vld [vmem:[#allocation3 + $0xe0] sm:$0xff]  ;;  %v7770_v5 = vpack.c.bf16 %v7738_v30, %v7738_v30  ;;  %v16638_v30 = vld [vmem:[#allocation83_spill] sm:$0xff] }
 0x5d3   : > { %7711 = vst.msk [vmem:[#allocation4 + $0xc0] sm:$0xf] %vm5243_vm3, %v16635_v22  ;;  %7214 = vmatmul.bf16.gmra.mxu2 %v10967_v14  ;;  %8607 = vrot.lane.b32.xlu0 %v15022_v8, %s11796_s17  ;;  %v8728_v8 = vld [vmem:[#allocation2 + $0xb1] sm:$0xff]  ;;  %v5743_v22 = vld [vmem:[#allocation3 + $0x140] sm:$0xff]  ;;  %v7102_v14 = vadd.f32 %v15155_v17, %v7101_v52 }
 0x5d4   : > { %6026 = vst.msk [vmem:[#allocation4 + $0x94] sm:$0xf] %vm5243_vm3, %v5943_v47 }
 0x5d5   : > { %6251 = vst.msk [vmem:[#allocation4 + $0x94] sm:$0xf] %vm5468_vm4, %v14998_v9  ;;  %v5401_v9 = vpop.permute.xlu1 %5400 }
 0x5d6   : > { %v11614_v57 = vld [vmem:[#allocation4 + $0x98] sm:$0xf0]  ;;  %6476 = vst.msk [vmem:[#allocation4 + $0x94] sm:$0xf] %vm5693_vm5, %v14187_v43  ;;  %v5409_v43 = vpop.permute.xlu2 %5408  ;;  %v5626_v47 = vpop.permute.xlu0 %5625 }
 0x5d7   : > { %7484 = vst.msk [vmem:[#allocation4 + $0x9c] sm:$0xf] %vm5018_vm2, %v15111_v46  ;;  %v10975_v40 = vor.u32 %v11614_v57, %v10974_v4  ;;  %v11665_v4 = vld [vmem:[#allocation4 + $0x20] sm:$0xf0]  ;;  %v15168_v57 = vpack.c.bf16 %v8728_v8, %v8728_v8 }
 0x5d8   : > { %7708 = vst.msk [vmem:[#allocation4 + $0x9c] sm:$0xf] %vm5243_vm3, %v7626_v28  ;;  %v15165_v28 = vpack.c.bf16 %v7421_v19, %v7421_v19  ;;  %v11195_v51 = vor.u32 %v11665_v4, %v11194_v6  ;;  %8609 = vrot.lane.b32.xlu1 %v15054_v48, %s11796_s17 }
 0x5d9   : > { %7130 = vmatmul.bf16.gmra.mxu1 %v10975_v40  ;;  %5033 = vst.msk [vmem:[#allocation4 + $0xa8] sm:$0xf] %vm5018_vm2, %v5000_v13  ;;  %v7190_v13 = vpop.f32.mrf.mxu2  ;;  %7845 = vrot.lane.b32.xlu2 %v7770_v5, %s11796_s17 }
 0x5da   : > { %5258 = vst.msk [vmem:[#allocation4 + $0xa8] sm:$0xf] %vm5243_vm3, %v16636_v25  ;;  %v15170_v40 = vadd.f32 %v7190_v13, %v7102_v14  ;;  %v16637_v25 = vld [vmem:[#allocation81_spill] sm:$0xff] }
 0x5db   : > { %5483 = vst.msk [vmem:[#allocation4 + $0xa8] sm:$0xf] %vm5468_vm4, %v5401_v9  ;;  %v15179_v9 = vpop.f32.mrf.mxu3  ;;  %8833 = vrot.lane.b32.xlu0 %v15168_v57, %s11798_s23 }
 0x5dc   : > { %5262 = vst.msk [vmem:[#allocation4 + $0xd8] sm:$0xf] %vm5243_vm3, %v14209_v11  ;;  %v15177_v11 = vpack.c.bf16 %v5743_v22, %v5743_v22  ;;  %9552 = vmatmul.bf16.gmra.mxu3 %v11195_v51  ;;  %v16639_v22 = vld [vmem:[#allocation45_spill] sm:$0xff] }
 0x5dd   : > { %5487 = vst.msk [vmem:[#allocation4 + $0xd8] sm:$0xf] %vm5468_vm4, %v5409_v43  ;;  %v5945_v43 = vpop.permute.xlu1 %5944 }
 0x5de   : > { %5712 = vst.msk [vmem:[#allocation4 + $0xd8] sm:$0xf] %vm5693_vm5, %v16637_v25  ;;  %v5953_v52 = vpop.permute.xlu2 %5952  ;;  %v6170_v19 = vpop.permute.xlu0 %6169 }
 0x5df   : > { %5708 = vst.msk [vmem:[#allocation4 + $0xa8] sm:$0xf] %vm5693_vm5, %v5626_v47  ;;  %v15194_v47 = vpop.f32.mrf.mxu1 }
 0x5e0   : > { %5803 = vst.msk [vmem:[#allocation4 + $0xa0] sm:$0xf] %vm5018_vm2, %v15165_v28  ;;  %7843 = vrot.lane.b32.xlu1 %v15107_v50, %s11796_s17  ;;  %v8282_v50 = vld [vmem:[#allocation3 + $0xc1] sm:$0xff] }
 0x5e1   : > { %6027 = vst.msk [vmem:[#allocation4 + $0xa0] sm:$0xf] %vm5243_vm3, %v5945_v43  ;;  %8387 = vrot.lane.b32.xlu2 %v7770_v5, %s11797_s18  ;;  %v15208_v6 = vpop.f32.mrf.mxu2  ;;  %v5741_v5 = vld [vmem:[#allocation3 + $0x100] sm:$0xff] }
 0x5e2   : > { %5807 = vst.msk [vmem:[#allocation4 + $0xd0] sm:$0xf] %vm5018_vm2, %v15177_v11  ;;  %v15212_v51 = vpack.c.bf16 %v5741_v5, %v5741_v5 }
 0x5e3   : > { %6031 = vst.msk [vmem:[#allocation4 + $0xd0] sm:$0xf] %vm5243_vm3, %v5953_v52  ;;  %8067 = vrot.lane.b32.xlu0 %v15054_v48, %s11798_s23  ;;  %v8314_v48 = vpack.c.bf16 %v8282_v50, %v8282_v50  ;;  %v4971_v50 = vld [vmem:[#allocation2 + $0x130] sm:$0xff] }
 0x5e4   : > { %6256 = vst.msk [vmem:[#allocation4 + $0xd0] sm:$0xf] %vm5468_vm4, %v16638_v30 }
 0x5e5   : > { %6481 = vst.msk [vmem:[#allocation4 + $0xd0] sm:$0xf] %vm5693_vm5, %v14237_v26  ;;  %v5628_v8 = vpop.permute.xlu1 %5627 }
 0x5e6   : > { %v10986_v4 = vld [vmem:[#allocation4 + $0xa8] sm:$0xf]  ;;  %6252 = vst.msk [vmem:[#allocation4 + $0xa0] sm:$0xf] %vm5468_vm4, %v6170_v19  ;;  %v8820_v26 = vpop.permute.xlu2 %8819  ;;  %v7630_v14 = vpop.permute.xlu0 %7629 }
 0x5e7   : > { %7485 = vst.msk [vmem:[#allocation4 + $0xa8] sm:$0xf] %vm5018_vm2, %v15165_v28 }
 0x5e8   : > { %7709 = vst.msk [vmem:[#allocation4 + $0xa8] sm:$0xf] %vm5243_vm3, %v15031_v2  ;;  %v7106_v2 = vpop.f32.mrf.mxu1  ;;  %8069 = vrot.lane.b32.xlu1 %v14962_v55, %s11798_s23 }
 0x5e9   : > { %6477 = vst.msk [vmem:[#allocation4 + $0xa0] sm:$0xf] %vm5693_vm5, %v16639_v22  ;;  %8613 = vrot.lane.b32.xlu2 %v15111_v46, %s11796_s17  ;;  %v7107_v52 = vadd.f32 %v15155_v17, %v7106_v2  ;;  %v8729_v22 = vld [vmem:[#allocation2 + $0xc1] sm:$0xff] }
 0x5ea   : > { %5709 = vst.msk [vmem:[#allocation4 + $0xb4] sm:$0xf] %vm5693_vm5, %v5628_v8  ;;  %v8761_v2 = vpack.c.bf16 %v8729_v22, %v8729_v22 }
 0x5eb   : > { %8913 = vst.msk [vmem:[#allocation4 + $0x1c] sm:$0xf] %vm5693_vm5, %v8820_v26  ;;  %8389 = vrot.lane.b32.xlu0 %v8314_v48, %s11797_s18 }
 0x5ec   : > { %8243 = vst.msk [vmem:[#allocation4 + $0x34] sm:$0xf] %vm5018_vm2, %v14911_v16  ;;  %v11613_v16 = vld [vmem:[#allocation4 + $0x94] sm:$0xf] }
 0x5ed   : > { %5805 = vst.msk [vmem:[#allocation4 + $0xb8] sm:$0xf] %vm5018_vm2, %v15212_v51  ;;  %v6172_v13 = vpop.permute.xlu1 %6171 }
 0x5ee   : > { %8244 = vst.msk [vmem:[#allocation4 + $0x40] sm:$0xf] %vm5018_vm2, %v15001_v45  ;;  %v8058_v43 = vpop.permute.xlu2 %8057  ;;  %v5949_v8 = vpop.permute.xlu0 %5948 }
 0x5ef   : > { %8248 = vst.msk [vmem:[#allocation4 + $0x70] sm:$0xf] %vm5018_vm2, %v15137_v27  ;;  %v7195_v45 = vpop.f32.mrf.mxu2  ;;  %v11721_v27 = vld [vmem:[%s16322_s3 + $0x60] sm:$0xff] }
 0x5f0   : > { %v10976_v25 = vld [vmem:[#allocation4 + $0x9c] sm:$0xf0]  ;;  %6253 = vst.msk [vmem:[#allocation4 + $0xac] sm:$0xf] %vm5468_vm4, %v6172_v13  ;;  %v15236_v5 = vadd.f32 %v7195_v45, %v7107_v52  ;;  %9631 = vmatpush.bf16.msra.mxu1 %v11721_v27  ;;  %v16640_v13 = vld [vmem:[#allocation75_spill] sm:$0xff]  ;;  %8611 = vrot.lane.b32.xlu1 %v14962_v55, %s11796_s17  ;;  %v16642_v52 = vld [vmem:[#allocation57_spill] sm:$0xff] }
 0x5f1   : > { %v11617_v19 = vld [vmem:[#allocation4 + $0xb0] sm:$0xf0]  ;;  %v10979_v30 = vor.u32 %v11613_v16, %v10976_v25  ;;  %6478 = vst.msk [vmem:[#allocation4 + $0xac] sm:$0xf] %vm5693_vm5, %v14189_v24  ;;  %v5003_v24 = vpack.c.bf16 %v4971_v50, %v4971_v50  ;;  %7847 = vrot.lane.b32.xlu2 %v8314_v48, %s11796_s17  ;;  %v16641_v16 = vld [vmem:[#allocation77_spill] sm:$0xff]  ;;  %v15270_v50 = vpop.f32.mrf.mxu1 }
 0x5f2   : > { %7486 = vst.msk [vmem:[#allocation4 + $0xb4] sm:$0xf] %vm5018_vm2, %v15081_v44  ;;  %v10987_v26 = vor.u32 %v11617_v19, %v10986_v4  ;;  %v7424_v4 = vld [vmem:[#allocation3 + $0x130] sm:$0xff] }
 0x5f3   : > { %7710 = vst.msk [vmem:[#allocation4 + $0xb4] sm:$0xf] %vm5243_vm3, %v7630_v14  ;;  %7219 = vmatmul.bf16.gmra.mxu2 %v10979_v30  ;;  %8835 = vrot.lane.b32.xlu0 %v8761_v2, %s11798_s23  ;;  %v8730_v55 = vld [vmem:[#allocation2 + $0xd1] sm:$0xff] }
 0x5f4   : > { %8148 = vst.msk [vmem:[#allocation4 + $0x3c] sm:$0xf] %vm5693_vm5, %v8058_v43  ;;  %7135 = vmatmul.bf16.gmra.mxu1 %v10987_v26  ;;  %v15252_v43 = vpack.c.bf16 %v7424_v4, %v7424_v4  ;;  %v7740_v48 = vld [vmem:[#allocation3 + $0xd1] sm:$0xff] }
 0x5f5   : > { %6029 = vst.msk [vmem:[#allocation4 + $0xb8] sm:$0xf] %vm5243_vm3, %v5949_v8  ;;  %v5407_v14 = vpop.permute.xlu1 %5406  ;;  %v8762_v8 = vpack.c.bf16 %v8730_v55, %v8730_v55  ;;  %v7772_v45 = vpack.c.bf16 %v7740_v48, %v7740_v48 }
 0x5f6   : > { %6254 = vst.msk [vmem:[#allocation4 + $0xb8] sm:$0xf] %vm5468_vm4, %v16640_v13  ;;  %v15250_v25 = vpop.permute.xlu2 %8599  ;;  %v5632_v19 = vpop.permute.xlu0 %5631  ;;  %v16643_v13 = vld [vmem:[#allocation59_spill] sm:$0xff] }
 0x5f7   : > { %6479 = vst.msk [vmem:[#allocation4 + $0xb8] sm:$0xf] %vm5693_vm5, %v16641_v16 }
 0x5f8   : > { %5036 = vst.msk [vmem:[#allocation4 + $0xcc] sm:$0xf] %vm5018_vm2, %v5003_v24  ;;  %v11616_v30 = vld [vmem:[#allocation4 + $0xac] sm:$0xf]  ;;  %8837 = vrot.lane.b32.xlu1 %v8762_v8, %s11798_s23 }
 0x5f9   : > { %5261 = vst.msk [vmem:[#allocation4 + $0xcc] sm:$0xf] %vm5243_vm3, %v16642_v52  ;;  %8073 = vrot.lane.b32.xlu2 %v15165_v28, %s11798_s23 }
 0x5fa   : > { %5486 = vst.msk [vmem:[#allocation4 + $0xcc] sm:$0xf] %vm5468_vm4, %v5407_v14  ;;  %v8284_v14 = vld [vmem:[#allocation3 + $0xe1] sm:$0xff] }
 0x5fb   : > { %5711 = vst.msk [vmem:[#allocation4 + $0xcc] sm:$0xf] %vm5693_vm5, %v5632_v19  ;;  %7849 = vrot.lane.b32.xlu0 %v7772_v45, %s11796_s17  ;;  %v8316_v48 = vpack.c.bf16 %v8284_v14, %v8284_v14 }
 0x5fc   : > { %5806 = vst.msk [vmem:[#allocation4 + $0xc4] sm:$0xf] %vm5018_vm2, %v15252_v43 }
 0x5fd   : > { %8245 = vst.msk [vmem:[#allocation4 + $0x4c] sm:$0xf] %vm5018_vm2, %v14978_v60  ;;  %v5951_v22 = vpop.permute.xlu1 %5950 }
 0x5fe   : > { %v10988_v26 = vld [vmem:[#allocation4 + $0xb4] sm:$0xf0]  ;;  %8246 = vst.msk [vmem:[#allocation4 + $0x58] sm:$0xf] %vm5018_vm2, %v15087_v0  ;;  %v15273_v60 = vpop.permute.xlu2 %8825  ;;  %v6176_v24 = vpop.permute.xlu0 %6175 }
 0x5ff   : > { %v10991_v27 = vor.u32 %v11616_v30, %v10988_v26  ;;  %8249 = vst.msk [vmem:[#allocation4 + $0x7c] sm:$0xf] %vm5018_vm2, %v15168_v57  ;;  %v15281_v57 = vpop.f32.mrf.mxu2 }
 0x600   : > { %6030 = vst.msk [vmem:[#allocation4 + $0xc4] sm:$0xf] %vm5243_vm3, %v5951_v22  ;;  %8071 = vrot.lane.b32.xlu1 %v15111_v46, %s11798_s23  ;;  %v8732_v46 = vld [vmem:[#allocation2 + $0xf1] sm:$0xff] }
 0x601   : > { %8247 = vst.msk [vmem:[#allocation4 + $0x64] sm:$0xf] %vm5018_vm2, %v15063_v21  ;;  %8615 = vrot.lane.b32.xlu2 %v15165_v28, %s11796_s17  ;;  %v11725_v28 = vld [vmem:[%s16322_s3 + $0x80] sm:$0xff]  ;;  %v8764_v52 = vpack.c.bf16 %v8732_v46, %v8732_v46 }
 0x602   : > { %v11620_v4 = vld [vmem:[#allocation4 + $0xc8] sm:$0xf0]  ;;  %6255 = vst.msk [vmem:[#allocation4 + $0xc4] sm:$0xf] %vm5468_vm4, %v6176_v24  ;;  %9724 = vmatpush.bf16.msra.mxu2 %v11725_v28  ;;  %v7742_v28 = vld [vmem:[#allocation3 + $0xf1] sm:$0xff] }
 0x603   : > { %7488 = vst.msk [vmem:[#allocation4 + $0xcc] sm:$0xf] %vm5018_vm2, %v15252_v43  ;;  %7224 = vmatmul.bf16.gmra.mxu2 %v10991_v27  ;;  %v10999_v0 = vor.u32 %v11620_v4, %v15126_v58  ;;  %8391 = vrot.lane.b32.xlu0 %v7772_v45, %s11797_s18  ;;  %v7111_v58 = vpop.f32.mrf.mxu1  ;;  %v7425_v27 = vld [vmem:[#allocation3 + $0x140] sm:$0xff]  ;;  %v11010_v4 = vld [vmem:[#allocation4 + $0xd8] sm:$0xf] }
 0x604   : > { %7712 = vst.msk [vmem:[#allocation4 + $0xcc] sm:$0xf] %vm5243_vm3, %v15122_v3 }
 0x605   : > { %6480 = vst.msk [vmem:[#allocation4 + $0xc4] sm:$0xf] %vm5693_vm5, %v16643_v13  ;;  %7140 = vmatmul.bf16.gmra.mxu1 %v10999_v0  ;;  %v8598_v21 = vpop.permute.xlu1 %8597  ;;  %v11720_v0 = vld [vmem:[%s16322_s3 + $0x58] sm:$0xff]  ;;  %v8731_v13 = vld [vmem:[#allocation2 + $0xe1] sm:$0xff] }
 0x606   : > { %8250 = vst.msk [vmem:[#allocation4 + $0x88] sm:$0xf] %vm5018_vm2, %v8761_v2  ;;  %v15295_v3 = vpop.permute.xlu2 %8061  ;;  %v8822_v16 = vpop.permute.xlu0 %8821  ;;  %v7112_v2 = vadd.f32 %v15155_v17, %v7111_v58  ;;  %v8763_v14 = vpack.c.bf16 %v8731_v13, %v8731_v13  ;;  %9632 = vmatpush.bf16.msra.mxu1 %v11720_v0  ;;  %v11023_v0 = vor.u32 %v14326_v20, %v14207_v59  ;;  %v7744_v20 = vld [vmem:[#allocation3 + $0x131] sm:$0xff] }
 0x607   : > { %8251 = vst.msk [vmem:[#allocation4 + $0x94] sm:$0xf] %vm5018_vm2, %v8762_v8  ;;  %v11000_v8 = vld [vmem:[#allocation4 + $0xcc] sm:$0xf0]  ;;  %v15316_v58 = vpop.f32.mrf.mxu3 }
 0x608   : > { %8690 = vst.msk [vmem:[#allocation4 + $0x28] sm:$0xf] %vm5468_vm4, %v8598_v21  ;;  %v7200_v19 = vpop.f32.mrf.mxu2  ;;  %8393 = vrot.lane.b32.xlu1 %v8316_v48, %s11797_s18  ;;  %v7457_v21 = vpack.c.bf16 %v7425_v27, %v7425_v27 }
 0x609   : > { %8914 = vst.msk [vmem:[#allocation4 + $0x28] sm:$0xf] %vm5693_vm5, %v8822_v16  ;;  %v15302_v30 = vadd.f32 %v7200_v19, %v7112_v2  ;;  %8841 = vrot.lane.b32.xlu2 %v8764_v52, %s11798_s23  ;;  %v11011_v16 = vor.u32 %v14246_v36, %v11010_v4  ;;  %v8286_v2 = vld [vmem:[#allocation3 + $0x101] sm:$0xff]  ;;  %v11668_v19 = vld [vmem:[#allocation4 + $0x38] sm:$0xf0] }
 0x60a   : > { %8253 = vst.msk [vmem:[#allocation4 + $0xac] sm:$0xf] %vm5018_vm2, %v8764_v52  ;;  %v8733_v4 = vld [vmem:[#allocation2 + $0x101] sm:$0xff] }
 0x60b   : > { %8617 = vrot.lane.b32.xlu0 %v15081_v44, %s11796_s17  ;;  %7489 = vst.msk [vmem:[#allocation4 + $0xd8] sm:$0xf] %vm5018_vm2, %v7457_v21  ;;  %v15342_v27 = vpop.f32.mrf.mxu1  ;;  %v8765_v13 = vpack.c.bf16 %v8733_v4, %v8733_v4  ;;  %v11719_v4 = vld [vmem:[%s16322_s3 + $0x50] sm:$0xff] }
 0x60c   : > { %v11619_v55 = vld [vmem:[#allocation4 + $0xc4] sm:$0xf]  ;;  %8252 = vst.msk [vmem:[#allocation4 + $0xa0] sm:$0xf] %vm5018_vm2, %v8763_v14  ;;  %9633 = vmatpush.bf16.msra.mxu1 %v11719_v4  ;;  %v8736_v4 = vld [vmem:[#allocation2 + $0x151] sm:$0xff] }
 0x60d   : > { %v11003_v45 = vor.u32 %v11619_v55, %v11000_v8  ;;  %v8056_v26 = vpop.permute.xlu1 %8055  ;;  %v7774_v8 = vpack.c.bf16 %v7742_v28, %v7742_v28  ;;  %8254 = vst.msk [vmem:[#allocation4 + $0xb8] sm:$0xf] %vm5018_vm2, %v8765_v13  ;;  %v7776_v28 = vpack.c.bf16 %v7744_v20, %v7744_v20  ;;  %v8288_v20 = vld [vmem:[#allocation3 + $0x141] sm:$0xff] }
 0x60e   : > { %8147 = vst.msk [vmem:[#allocation4 + $0x30] sm:$0xf] %vm5693_vm5, %v8056_v26  ;;  %v15310_v22 = vpop.permute.xlu2 %8603  ;;  %v8376_v24 = vpop.permute.xlu0 %8375 }
 0x60f   : > { %8467 = vst.msk [vmem:[#allocation4 + $0x34] sm:$0xf] %vm5243_vm3, %v8376_v24 }
 0x610   : > { %8691 = vst.msk [vmem:[#allocation4 + $0x34] sm:$0xf] %vm5468_vm4, %v15250_v25  ;;  %8839 = vrot.lane.b32.xlu1 %v8763_v14, %s11798_s23  ;;  %v15352_v21 = vpop.f32.mrf.mxu2  ;;  %v8734_v14 = vld [vmem:[#allocation2 + $0x111] sm:$0xff] }
 0x611   : > { %8075 = vrot.lane.b32.xlu2 %v15081_v44, %s11798_s23  ;;  %v8318_v44 = vpack.c.bf16 %v8286_v2, %v8286_v2 }
 0x613   : > { %7229 = vmatmul.bf16.gmra.mxu2 %v11003_v45  ;;  %7851 = vrot.lane.b32.xlu0 %v8316_v48, %s11796_s17  ;;  %v15333_v45 = vpop.f32.mrf.mxu3 }
 0x615   : > { %7145 = vmatmul.bf16.gmra.mxu1 %v11011_v16  ;;  %v8378_v46 = vpop.permute.xlu1 %8377  ;;  %v11206_v52 = vld [vmem:[#allocation4 + $0x30] sm:$0xf] }
 0x616   : > { %8468 = vst.msk [vmem:[#allocation4 + $0x40] sm:$0xf] %vm5243_vm3, %v8378_v46  ;;  %v15328_v25 = vpop.permute.xlu2 %8829  ;;  %v8602_v36 = vpop.permute.xlu0 %8601  ;;  %v11207_v55 = vor.u32 %v11668_v19, %v11206_v52  ;;  %v8510_v16 = vld [vmem:[#allocation3 + $0x110] sm:$0xff] }
 0x617   : > { %8692 = vst.msk [vmem:[#allocation4 + $0x40] sm:$0xf] %vm5468_vm4, %v8602_v36  ;;  %v8542_v46 = vpack.c.bf16 %v8510_v16, %v8510_v16  ;;  %v8766_v36 = vpack.c.bf16 %v8734_v14, %v8734_v14 }
 0x618   : > { %8916 = vst.msk [vmem:[#allocation4 + $0x40] sm:$0xf] %vm5693_vm5, %v15273_v60  ;;  %9557 = vmatmul.bf16.gmra.mxu3 %v11207_v55  ;;  %7853 = vrot.lane.b32.xlu1 %v7774_v8, %s11796_s17  ;;  %v11015_v60 = vor.u32 %v14265_v12, %v14228_v1 }
 0x619   : > { %8397 = vrot.lane.b32.xlu2 %v8318_v44, %s11797_s18 }
 0x61b   : > { %8077 = vrot.lane.b32.xlu0 %v15212_v51, %s11798_s23 }
 0x61d   : > { %v8824_v48 = vpop.permute.xlu1 %8823 }
 0x61e   : > { %8915 = vst.msk [vmem:[#allocation4 + $0x34] sm:$0xf] %vm5693_vm5, %v8824_v48  ;;  %v15340_v26 = vpop.permute.xlu2 %8063  ;;  %v7838_v24 = vpop.permute.xlu0 %7837 }
 0x61f   : > { %7926 = vst.msk [vmem:[#allocation4 + $0x54] sm:$0xf] %vm5468_vm4, %v7838_v24  ;;  %v11035_v24 = vor.u32 %v14260_v56, %v14306_v23 }
 0x620   : > { %8150 = vst.msk [vmem:[#allocation4 + $0x54] sm:$0xf] %vm5693_vm5, %v15295_v3  ;;  %8395 = vrot.lane.b32.xlu1 %v7774_v8, %s11797_s18  ;;  %v7116_v3 = vpop.f32.mrf.mxu1  ;;  %v11027_v8 = vor.u32 %v14349_v53, %v14339_v41 }
 0x621   : > { %8843 = vrot.lane.b32.xlu2 %v8765_v13, %s11798_s23  ;;  %v7117_v2 = vadd.f32 %v15155_v17, %v7116_v3  ;;  %v7743_v13 = vld [vmem:[#allocation3 + $0x121] sm:$0xff]  ;;  %v8512_v3 = vld [vmem:[#allocation3 + $0x150] sm:$0xff] }
 0x622   : > { %v7775_v53 = vpack.c.bf16 %v7743_v13, %v7743_v13  ;;  %v8544_v16 = vpack.c.bf16 %v8512_v3, %v8512_v3 }
 0x623   : > { %7234 = vmatmul.bf16.gmra.mxu2 %v11015_v60  ;;  %8619 = vrot.lane.b32.xlu0 %v15212_v51, %s11796_s17  ;;  %v15363_v51 = vpop.f32.mrf.mxu3 }
 0x625   : > { %7150 = vmatmul.bf16.gmra.mxu1 %v11023_v0  ;;  %v8060_v1 = vpop.permute.xlu1 %8059 }
 0x626   : > { %8149 = vst.msk [vmem:[#allocation4 + $0x48] sm:$0xf] %vm5693_vm5, %v8060_v1  ;;  %v8386_v12 = vpop.permute.xlu2 %8385  ;;  %v8380_v59 = vpop.permute.xlu0 %8379 }
 0x627   : > { %8472 = vst.msk [vmem:[#allocation4 + $0x70] sm:$0xf] %vm5243_vm3, %v8386_v12  ;;  %v11671_v0 = vld [vmem:[#allocation4 + $0x50] sm:$0xf0] }
 0x628   : > { %8469 = vst.msk [vmem:[#allocation4 + $0x4c] sm:$0xf] %vm5243_vm3, %v8380_v59  ;;  %8621 = vrot.lane.b32.xlu1 %v8542_v46, %s11796_s17  ;;  %v15377_v48 = vpop.f32.mrf.mxu1 }
 0x629   : > { %8693 = vst.msk [vmem:[#allocation4 + $0x4c] sm:$0xf] %vm5468_vm4, %v15310_v22  ;;  %7857 = vrot.lane.b32.xlu2 %v7776_v28, %s11796_s17 }
 0x62b   : > { %8845 = vrot.lane.b32.xlu0 %v8766_v36, %s11798_s23  ;;  %v15387_v1 = vpop.f32.mrf.mxu3 }
 0x62d   : > { %v7205_v52 = vpop.f32.mrf.mxu2  ;;  %v8382_v55 = vpop.permute.xlu1 %8381  ;;  %v11218_v60 = vld [vmem:[#allocation4 + $0x48] sm:$0xf] }
 0x62e   : > { %v15368_v19 = vadd.f32 %v7205_v52, %v7117_v2  ;;  %8470 = vst.msk [vmem:[#allocation4 + $0x58] sm:$0xf] %vm5243_vm3, %v8382_v55  ;;  %v15372_v22 = vpop.permute.xlu2 %8831  ;;  %v8606_v44 = vpop.permute.xlu0 %8605  ;;  %v11219_v41 = vor.u32 %v11671_v0, %v11218_v60  ;;  %v11047_v55 = vor.u32 %v14386_v62, %v14419_v7  ;;  %v7970_v62 = vld [vmem:[#allocation3 + $0x160] sm:$0xff] }
 0x62f   : > { %8694 = vst.msk [vmem:[#allocation4 + $0x58] sm:$0xf] %vm5468_vm4, %v8606_v44 }
 0x630   : > { %8918 = vst.msk [vmem:[#allocation4 + $0x58] sm:$0xf] %vm5693_vm5, %v15328_v25  ;;  %9562 = vmatmul.bf16.gmra.mxu3 %v11219_v41  ;;  %7855 = vrot.lane.b32.xlu1 %v7775_v53, %s11796_s17  ;;  %v7121_v59 = vpop.f32.mrf.mxu1  ;;  %v8002_v53 = vpack.c.bf16 %v7970_v62, %v7970_v62 }
 0x631   : > { %8399 = vrot.lane.b32.xlu2 %v7776_v28, %s11797_s18  ;;  %v7122_v46 = vadd.f32 %v15155_v17, %v7121_v59 }
 0x633   : > { %7239 = vmatmul.bf16.gmra.mxu2 %v11027_v8  ;;  %8079 = vrot.lane.b32.xlu0 %v15252_v43, %s11798_s23  ;;  %v8320_v43 = vpack.c.bf16 %v8288_v20, %v8288_v20  ;;  %v7746_v8 = vld [vmem:[#allocation3 + $0x151] sm:$0xff]  ;;  %v15413_v44 = vpop.f32.mrf.mxu3  ;;  %v11051_v20 = vor.u32 %v14444_v39, %v14343_v63 }
 0x635   : > { %7155 = vmatmul.bf16.gmra.mxu1 %v11035_v24  ;;  %v8828_v25 = vpop.permute.xlu1 %8827  ;;  %v15393_v23 = vpop.f32.mrf.mxu2 }
 0x636   : > { %8917 = vst.msk [vmem:[#allocation4 + $0x4c] sm:$0xf] %vm5693_vm5, %v8828_v25  ;;  %v7846_v56 = vpop.permute.xlu2 %7845  ;;  %v7840_v12 = vpop.permute.xlu0 %7839 }
 0x637   : > { %7930 = vst.msk [vmem:[#allocation4 + $0x84] sm:$0xf] %vm5468_vm4, %v7846_v56  ;;  %v8768_v56 = vpack.c.bf16 %v8736_v4, %v8736_v4 }
 0x638   : > { %7927 = vst.msk [vmem:[#allocation4 + $0x60] sm:$0xf] %vm5468_vm4, %v7840_v12  ;;  %8081 = vrot.lane.b32.xlu1 %v15177_v11, %s11798_s23  ;;  %v15415_v60 = vpop.f32.mrf.mxu1 }
 0x639   : > { %8151 = vst.msk [vmem:[#allocation4 + $0x60] sm:$0xf] %vm5693_vm5, %v15340_v26  ;;  %8625 = vrot.lane.b32.xlu2 %v8544_v16, %s11796_s17  ;;  %v11039_v26 = vor.u32 %v14282_v31, %v14468_v33  ;;  %v7778_v31 = vpack.c.bf16 %v7746_v8, %v7746_v8  ;;  %v8290_v8 = vld [vmem:[#allocation3 + $0x161] sm:$0xff] }
 0x63b   : > { %8401 = vrot.lane.b32.xlu0 %v8320_v43, %s11797_s18  ;;  %v15430_v12 = vpop.f32.mrf.mxu3 }
 0x63d   : > { %v7842_v14 = vpop.permute.xlu1 %7841 }
 0x63e   : > { %7928 = vst.msk [vmem:[#allocation4 + $0x6c] sm:$0xf] %vm5468_vm4, %v7842_v14  ;;  %v8388_v36 = vpop.permute.xlu2 %8387  ;;  %v8066_v52 = vpop.permute.xlu0 %8065  ;;  %v11059_v14 = vor.u32 %v14519_v49, %v14319_v61  ;;  %v8738_v49 = vld [vmem:[#allocation2 + $0x171] sm:$0xff] }
 0x63f   : > { %8473 = vst.msk [vmem:[#allocation4 + $0x7c] sm:$0xf] %vm5243_vm3, %v8388_v36 }
 0x640   : > { %8152 = vst.msk [vmem:[#allocation4 + $0x6c] sm:$0xf] %vm5693_vm5, %v8066_v52  ;;  %8623 = vrot.lane.b32.xlu1 %v15177_v11, %s11796_s17  ;;  %v11230_v0 = vld [vmem:[#allocation4 + $0x60] sm:$0xf]  ;;  %v11718_v11 = vld [vmem:[%s16322_s3 + $0x48] sm:$0xff] }
 0x641   : > { %v7210_v28 = vpop.f32.mrf.mxu2  ;;  %7859 = vrot.lane.b32.xlu2 %v8320_v43, %s11796_s17  ;;  %v7126_v25 = vpop.f32.mrf.mxu1  ;;  %9634 = vmatpush.bf16.msra.mxu1 %v11718_v11  ;;  %v8737_v11 = vld [vmem:[#allocation2 + $0x161] sm:$0xff] }
 0x642   : > { %v15408_v2 = vadd.f32 %v7210_v28, %v7122_v46  ;;  %v8514_v46 = vld [vmem:[#allocation3 + $0x170] sm:$0xff]  ;;  %v7127_v28 = vadd.f32 %v15155_v17, %v7126_v25  ;;  %v11071_v25 = vor.u32 %v14405_v10, %v14502_v38 }
 0x643   : > { %7244 = vmatmul.bf16.gmra.mxu2 %v11039_v26  ;;  %7861 = vrot.lane.b32.xlu0 %v7778_v31, %s11796_s17  ;;  %v8546_v36 = vpack.c.bf16 %v8514_v46, %v8514_v46  ;;  %v15459_v62 = vpop.f32.mrf.mxu3 }
 0x645   : > { %7160 = vmatmul.bf16.gmra.mxu1 %v11047_v55  ;;  %v8384_v33 = vpop.permute.xlu1 %8383 }
 0x646   : > { %v15421_v24 = vpop.permute.xlu2 %8613  ;;  %8471 = vst.msk [vmem:[#allocation4 + $0x64] sm:$0xf] %vm5243_vm3, %v8384_v33  ;;  %v8608_v7 = vpop.permute.xlu0 %8607  ;;  %v8322_v33 = vpack.c.bf16 %v8290_v8, %v8290_v8 }
 0x647   : > { %8695 = vst.msk [vmem:[#allocation4 + $0x64] sm:$0xf] %vm5468_vm4, %v8608_v7  ;;  %v11674_v13 = vld [vmem:[#allocation4 + $0x68] sm:$0xf0] }
 0x648   : > { %8919 = vst.msk [vmem:[#allocation4 + $0x64] sm:$0xf] %vm5693_vm5, %v15372_v22  ;;  %v11231_v41 = vor.u32 %v11674_v13, %v11230_v0  ;;  %8849 = vrot.lane.b32.xlu1 %v8768_v56, %s11798_s23  ;;  %v11063_v0 = vor.u32 %v14547_v34, %v14532_v35  ;;  %v7972_v56 = vld [vmem:[#allocation3 + $0x180] sm:$0xff]  ;;  %v8769_v35 = vpack.c.bf16 %v8737_v11, %v8737_v11  ;;  %v15476_v34 = vld [vmem:[#allocation4 + $0x174] sm:$0xf0] }
 0x649   : > { %8085 = vrot.lane.b32.xlu2 %v8002_v53, %s11798_s23  ;;  %v15433_v3 = vpop.f32.mrf.mxu2  ;;  %v15446_v26 = vpop.f32.mrf.mxu1  ;;  %v16645_v11 = vld [vmem:[#allocation50_spill] sm:$0xff] }
 0x64a   : > { %9567 = vmatmul.bf16.gmra.mxu3 %v11231_v41  ;;  %v8749_v41 = vld [vmem:[#allocation2 + $0x221] sm:$0xff] }
 0x64b   : > { %8403 = vrot.lane.b32.xlu0 %v7778_v31, %s11797_s18  ;;  %v11717_v31 = vld [vmem:[%s16322_s3 + $0x40] sm:$0xff] }
 0x64c   : > { %9635 = vmatpush.bf16.msra.mxu1 %v11717_v31  ;;  %v11075_v31 = vor.u32 %v14452_v18, %v14617_v15 }
 0x64d   : > { %v8610_v22 = vpop.permute.xlu1 %8609 }
 0x64e   : > { %v7848_v59 = vpop.permute.xlu2 %7847  ;;  %8696 = vst.msk [vmem:[#allocation4 + $0x70] sm:$0xf] %vm5468_vm4, %v8610_v22  ;;  %v8834_v43 = vpop.permute.xlu0 %8833  ;;  %v15474_v22 = vpack.c.bf16 %v8749_v41, %v8749_v41 }
 0x64f   : > { %7931 = vst.msk [vmem:[#allocation4 + $0x90] sm:$0xf] %vm5468_vm4, %v7848_v59  ;;  %v8004_v59 = vpack.c.bf16 %v7972_v56, %v7972_v56  ;;  %v8740_v56 = vld [vmem:[#allocation2 + $0x191] sm:$0xff] }
 0x650   : > { %8920 = vst.msk [vmem:[#allocation4 + $0x70] sm:$0xf] %vm5693_vm5, %v8834_v43  ;;  %8083 = vrot.lane.b32.xlu1 %v8544_v16, %s11798_s23  ;;  %v8770_v16 = vpack.c.bf16 %v8738_v49, %v8738_v49 }
 0x651   : > { %8627 = vrot.lane.b32.xlu2 %v8002_v53, %s11796_s17  ;;  %8270 = vst.msk [vmem:[#allocation4 + $0x178] sm:$0xf] %vm5018_vm2, %v15474_v22 }
 0x653   : > { %7249 = vmatmul.bf16.gmra.mxu2 %v11051_v20  ;;  %8629 = vrot.lane.b32.xlu0 %v8546_v36, %s11796_s17  ;;  %v15482_v20 = vpop.f32.mrf.mxu3 }
 0x655   : > { %7165 = vmatmul.bf16.gmra.mxu1 %v11059_v14  ;;  %v7844_v39 = vpop.permute.xlu1 %7843 }
 0x656   : > { %v7215_v63 = vpop.f32.mrf.mxu2  ;;  %7929 = vst.msk [vmem:[#allocation4 + $0x78] sm:$0xf] %vm5468_vm4, %v7844_v39  ;;  %v15453_v61 = vpop.permute.xlu2 %8073 }
 0x657   : > { %v15450_v52 = vadd.f32 %v7215_v63, %v7127_v28  ;;  %v8068_v55 = vpop.permute.xlu0 %8067  ;;  %v7131_v7 = vpop.f32.mrf.mxu1  ;;  %v7748_v63 = vld [vmem:[#allocation3 + $0x171] sm:$0xff] }
 0x658   : > { %8153 = vst.msk [vmem:[#allocation4 + $0x78] sm:$0xf] %vm5693_vm5, %v8068_v55  ;;  %8405 = vrot.lane.b32.xlu1 %v8322_v33, %s11797_s18  ;;  %v7780_v49 = vpack.c.bf16 %v7748_v63, %v7748_v63  ;;  %v7132_v15 = vadd.f32 %v15155_v17, %v7131_v7 }
 0x659   : > { %8853 = vrot.lane.b32.xlu2 %v8770_v16, %s11798_s23 }
 0x65b   : > { %7863 = vrot.lane.b32.xlu0 %v8322_v33, %s11796_s17  ;;  %v15504_v41 = vpop.f32.mrf.mxu3 }
 0x65d   : > { %v8070_v4 = vpop.permute.xlu1 %8069 }
 0x65e   : > { %8154 = vst.msk [vmem:[#allocation4 + $0x84] sm:$0xf] %vm5693_vm5, %v8070_v4  ;;  %v15467_v13 = vpop.permute.xlu2 %8615  ;;  %v15491_v55 = vpop.f32.mrf.mxu2  ;;  %v8739_v4 = vld [vmem:[#allocation2 + $0x181] sm:$0xff] }
 0x65f   : > { %v8390_v53 = vpop.permute.xlu0 %8389  ;;  %v11242_v38 = vld [vmem:[#allocation4 + $0x78] sm:$0xf]  ;;  %v7133_v43 = vpop.f32.mrf.mxu1  ;;  %v8771_v18 = vpack.c.bf16 %v8739_v4, %v8739_v4 }
 0x660   : > { %8474 = vst.msk [vmem:[#allocation4 + $0x88] sm:$0xf] %vm5243_vm3, %v8390_v53  ;;  %8851 = vrot.lane.b32.xlu1 %v8769_v35, %s11798_s23  ;;  %v16644_v53 = vld [vmem:[#allocation63_spill] sm:$0xff] }
 0x661   : > { %8698 = vst.msk [vmem:[#allocation4 + $0x88] sm:$0xf] %vm5468_vm4, %v15421_v24  ;;  %8087 = vrot.lane.b32.xlu2 %v8546_v36, %s11798_s23  ;;  %v8292_v36 = vld [vmem:[#allocation3 + $0x181] sm:$0xff] }
 0x662   : > { %v15489_v39 = vpack.c.bf16 %v8292_v36, %v8292_v36  ;;  %v7521_v35 = vld [vmem:[#allocation2 + $0x141] sm:$0xff]  ;;  %v8191_v36 = vld [vmem:[#allocation2 + $0x131] sm:$0xff] }
 0x663   : > { %7254 = vmatmul.bf16.gmra.mxu2 %v11063_v0  ;;  %8089 = vrot.lane.b32.xlu0 %v8004_v59, %s11798_s23  ;;  %v15524_v4 = vpop.f32.mrf.mxu3 }
 0x665   : > { %7170 = vmatmul.bf16.gmra.mxu1 %v11071_v25  ;;  %v8612_v10 = vpop.permute.xlu1 %8611  ;;  %v11677_v24 = vld [vmem:[#allocation4 + $0x80] sm:$0xf0]  ;;  %v11083_v25 = vor.u32 %v16645_v11, %v16644_v53 }
 0x666   : > { %8697 = vst.msk [vmem:[#allocation4 + $0x7c] sm:$0xf] %vm5468_vm4, %v8612_v10  ;;  %v15486_v14 = vpop.permute.xlu2 %8841  ;;  %v11243_v46 = vor.u32 %v11677_v24, %v11242_v38  ;;  %v8772_v10 = vpack.c.bf16 %v8740_v56, %v8740_v56  ;;  %v15513_v38 = vpack.c.bf16 %v7521_v35, %v7521_v35  ;;  %v11184_v35 = vld [vmem:[#allocation4 + $0xc] sm:$0xf0] }
 0x667   : > { %v8836_v28 = vpop.permute.xlu0 %8835 }
 0x668   : > { %8921 = vst.msk [vmem:[#allocation4 + $0x7c] sm:$0xf] %vm5693_vm5, %v8836_v28  ;;  %9572 = vmatmul.bf16.gmra.mxu3 %v11243_v46  ;;  %7865 = vrot.lane.b32.xlu1 %v7780_v49, %s11796_s17  ;;  %v7750_v28 = vld [vmem:[#allocation3 + $0x191] sm:$0xff] }
 0x669   : > { %8409 = vrot.lane.b32.xlu2 %v15489_v39, %s11797_s18  ;;  %8256 = vst.msk [vmem:[#allocation4 + $0xd0] sm:$0xf] %vm5018_vm2, %v15513_v38 }
 0x66b   : > { %8631 = vrot.lane.b32.xlu0 %v8004_v59, %s11796_s17 }
 0x66d   : > { %v8838_v8 = vpop.permute.xlu1 %8837 }
 0x66e   : > { %8922 = vst.msk [vmem:[#allocation4 + $0x88] sm:$0xf] %vm5693_vm5, %v8838_v8  ;;  %v15500_v16 = vpop.permute.xlu2 %8075  ;;  %v8516_v8 = vld [vmem:[#allocation3 + $0x190] sm:$0xff] }
 0x66f   : > { %v7850_v0 = vpop.permute.xlu0 %7849  ;;  %v8548_v53 = vpack.c.bf16 %v8516_v8, %v8516_v8 }
 0x670   : > { %7932 = vst.msk [vmem:[#allocation4 + $0x9c] sm:$0xf] %vm5468_vm4, %v7850_v0  ;;  %8407 = vrot.lane.b32.xlu1 %v7780_v49, %s11797_s18  ;;  %v7782_v49 = vpack.c.bf16 %v7750_v28, %v7750_v28  ;;  %v7134_v0 = vadd.f32 %v15155_v17, %v7133_v43  ;;  %v16646_v43 = vld [vmem:[#allocation52_spill] sm:$0xff] }
 0x671   : > { %v15502_v33 = vpop.f32.mrf.mxu1  ;;  %8156 = vst.msk [vmem:[#allocation4 + $0x9c] sm:$0xf] %vm5693_vm5, %v15453_v61  ;;  %8855 = vrot.lane.b32.xlu2 %v8771_v18, %s11798_s23 }
 0x673   : > { %7259 = vmatmul.bf16.gmra.mxu2 %v11075_v31  ;;  %8857 = vrot.lane.b32.xlu0 %v8772_v10, %s11798_s23  ;;  %v8223_v31 = vpack.c.bf16 %v8191_v36, %v8191_v36  ;;  %v11087_v10 = vor.u32 %v16646_v43, %v15476_v34  ;;  %v11663_v43 = vld [vmem:[#allocation4 + $0x10] sm:$0xf0] }
 0x675   : > { %7175 = vmatmul.bf16.gmra.mxu1 %v11083_v25  ;;  %v8072_v46 = vpop.permute.xlu1 %8071  ;;  %8255 = vst.msk [vmem:[#allocation4 + $0xc4] sm:$0xf] %vm5018_vm2, %v8223_v31  ;;  %v8294_v31 = vld [vmem:[#allocation3 + $0x1a1] sm:$0xff] }
 0x676   : > { %v7220_v59 = vpop.f32.mrf.mxu2  ;;  %8155 = vst.msk [vmem:[#allocation4 + $0x90] sm:$0xf] %vm5693_vm5, %v8072_v46  ;;  %v8398_v61 = vpop.permute.xlu2 %8397 }
 0x677   : > { %v7221_v24 = vadd.f32 %v7220_v59, %v7132_v15  ;;  %8478 = vst.msk [vmem:[#allocation4 + $0xb8] sm:$0xf] %vm5243_vm3, %v8398_v61  ;;  %v8392_v63 = vpop.permute.xlu0 %8391  ;;  %v11661_v61 = vld [vmem:[#allocation4 + $0x4] sm:$0xf] }
 0x678   : > { %8475 = vst.msk [vmem:[#allocation4 + $0x94] sm:$0xf] %vm5243_vm3, %v8392_v63  ;;  %8633 = vrot.lane.b32.xlu1 %v8548_v53, %s11796_s17  ;;  %v11680_v15 = vld [vmem:[#allocation4 + $0x98] sm:$0xf0]  ;;  %v11187_v8 = vor.u32 %v11661_v61, %v11184_v35  ;;  %v11196_v61 = vld [vmem:[#allocation4 + $0x24] sm:$0xf0] }
 0x679   : > { %v7138_v7 = vpop.f32.mrf.mxu1  ;;  %8699 = vst.msk [vmem:[#allocation4 + $0x94] sm:$0xf] %vm5468_vm4, %v15467_v13  ;;  %7869 = vrot.lane.b32.xlu2 %v7782_v49, %s11796_s17  ;;  %v7310_v25 = vadd.f32 %v15316_v58, %v7221_v24 }
 0x67b   : > { %8091 = vrot.lane.b32.xlu0 %v8548_v53, %s11798_s23  ;;  %v7371_v28 = vmax.f32 %v7310_v25, 0.0  ;;  %v8326_v53 = vpack.c.bf16 %v8294_v31, %v8294_v31  ;;  %v11664_v31 = vld [vmem:[#allocation4 + $0x1c] sm:$0xf] }
 0x67d   : > { %v8394_v18 = vpop.permute.xlu1 %8393  ;;  %v11254_v13 = vld [vmem:[#allocation4 + $0x90] sm:$0xf] }
 0x67e   : > { %v7222_v11 = vpop.f32.mrf.mxu2  ;;  %8476 = vst.msk [vmem:[#allocation4 + $0xa0] sm:$0xf] %vm5243_vm3, %v8394_v18  ;;  %v15536_v46 = vpop.permute.xlu2 %8843  ;;  %v11255_v36 = vor.u32 %v11680_v15, %v11254_v13  ;;  %v7974_v15 = vld [vmem:[#allocation3 + $0x1a0] sm:$0xff] }
 0x67f   : > { %v7223_v56 = vadd.f32 %v7222_v11, %v7134_v0  ;;  %v8618_v58 = vpop.permute.xlu0 %8617  ;;  %v15546_v11 = vpop.f32.mrf.mxu3  ;;  %v8006_v35 = vpack.c.bf16 %v7974_v15, %v7974_v15 }
 0x680   : > { %8700 = vst.msk [vmem:[#allocation4 + $0xa0] sm:$0xf] %vm5468_vm4, %v8618_v58  ;;  %9577 = vmatmul.bf16.gmra.mxu3 %v11255_v36  ;;  %7867 = vrot.lane.b32.xlu1 %v15489_v39, %s11796_s17  ;;  %v7139_v39 = vadd.f32 %v15155_v17, %v7138_v7  ;;  %v11190_v58 = vld [vmem:[#allocation4 + $0x8] sm:$0xf] }
 0x681   : > { %v7312_v59 = vadd.f32 %v15333_v45, %v7223_v56  ;;  %8924 = vst.msk [vmem:[#allocation4 + $0xa0] sm:$0xf] %vm5693_vm5, %v15486_v14  ;;  %v7137_v45 = vadd.f32 %v15155_v17, %v15502_v33  ;;  %8411 = vrot.lane.b32.xlu2 %v7782_v49, %s11797_s18  ;;  %v8518_v33 = vld [vmem:[#allocation3 + $0x1b0] sm:$0xff]  ;;  %v11191_v7 = vor.u32 %v11663_v43, %v11190_v58 }
 0x682   : > { %v7141_v24 = vpop.f32.mrf.mxu1  ;;  %v15556_v49 = vpack.c.bf16 %v8518_v33, %v8518_v33  ;;  %v8742_v58 = vld [vmem:[#allocation2 + $0x1b1] sm:$0xff] }
 0x683   : > { %v7372_v63 = vmax.f32 %v7312_v59, 0.0  ;;  %7264 = vmatmul.bf16.gmra.mxu2 %v11087_v10  ;;  %8413 = vrot.lane.b32.xlu0 %v8326_v53, %s11797_s18 }
 0x685   : > { %v15543_v34 = vmax.f32 %v7371_v28, %v7372_v63  ;;  %9636 = vmatmul.bf16.vlgmr.msra.gmra.mxu1 %v11187_v8  ;;  %v8840_v56 = vpop.permute.xlu1 %8839 }
 0x686   : > { %v7225_v0 = vpop.f32.mrf.mxu2  ;;  %8923 = vst.msk [vmem:[#allocation4 + $0x94] sm:$0xf] %vm5693_vm5, %v8840_v56  ;;  %v7858_v14 = vpop.permute.xlu2 %7857 }
 0x687   : > { %v7226_v25 = vadd.f32 %v7225_v0, %v7137_v45  ;;  %7936 = vst.msk [vmem:[#allocation4 + $0xcc] sm:$0xf] %vm5468_vm4, %v7858_v14  ;;  %v7852_v18 = vpop.permute.xlu0 %7851  ;;  %v15565_v28 = vpop.f32.mrf.mxu3 }
 0x688   : > { %7933 = vst.msk [vmem:[#allocation4 + $0xa8] sm:$0xf] %vm5468_vm4, %v7852_v18  ;;  %8093 = vrot.lane.b32.xlu1 %v8006_v35, %s11798_s23 }
 0x689   : > { %8157 = vst.msk [vmem:[#allocation4 + $0xa8] sm:$0xf] %vm5693_vm5, %v15500_v16  ;;  %8637 = vrot.lane.b32.xlu2 %v15556_v49, %s11796_s17  ;;  %v7315_v10 = vadd.f32 %v15363_v51, %v7226_v25  ;;  %v11199_v25 = vor.u32 %v11664_v31, %v11196_v61 }
 0x68a   : > { %v7143_v13 = vpop.f32.mrf.mxu1 }
 0x68b   : > { %7635 = vrot.lane.b32.xlu0 %v15513_v38, %s11797_s18  ;;  %v7373_v45 = vmax.f32 %v7315_v10, 0.0 }
 0x68d   : > { %v7854_v16 = vpop.permute.xlu1 %7853 }
 0x68e   : > { %v7227_v59 = vpop.f32.mrf.mxu2  ;;  %7934 = vst.msk [vmem:[#allocation4 + $0xb4] sm:$0xf] %vm5468_vm4, %v7854_v16  ;;  %v8400_v63 = vpop.permute.xlu2 %8399  ;;  %v8741_v16 = vld [vmem:[#allocation2 + $0x1a1] sm:$0xff] }
 0x68f   : > { %v7228_v36 = vadd.f32 %v7227_v59, %v7139_v39  ;;  %8479 = vst.msk [vmem:[#allocation4 + $0xc4] sm:$0xf] %vm5243_vm3, %v8400_v63  ;;  %v8078_v51 = vpop.permute.xlu0 %8077  ;;  %v7976_v59 = vld [vmem:[#allocation3 + $0x1c0] sm:$0xff]  ;;  %v15588_v61 = vpop.f32.mrf.mxu3  ;;  %v11666_v63 = vld [vmem:[#allocation4 + $0x28] sm:$0xf0] }
 0x690   : > { %8158 = vst.msk [vmem:[#allocation4 + $0xb4] sm:$0xf] %vm5693_vm5, %v8078_v51  ;;  %8635 = vrot.lane.b32.xlu1 %v8006_v35, %s11796_s17  ;;  %v11266_v10 = vld [vmem:[#allocation4 + $0xa8] sm:$0xf]  ;;  %v8773_v51 = vpack.c.bf16 %v8741_v16, %v8741_v16 }
 0x691   : > { %v7317_v17 = vadd.f32 %v15387_v1, %v7228_v36  ;;  %v15575_v1 = vld [vmem:[%s16323_s4] ss:$0 sm:$0xff]  ;;  %7871 = vrot.lane.b32.xlu2 %v8326_v53, %s11796_s17 }
 0x692   : > { %v7146_v8 = vpop.f32.mrf.mxu1  ;;  %v7142_v56 = vadd.f32 %v15575_v1, %v7141_v24  ;;  %v7144_v35 = vadd.f32 %v15575_v1, %v7143_v13 }
 0x693   : > { %v7374_v0 = vmax.f32 %v7317_v17, 0.0  ;;  %11444 = vmatmul.msk.bf16.vlgmr.msra.gmra.mxu2 %vm3261_vm0, %v11191_v7  ;;  %8847 = vrot.lane.b32.xlu0 %v15513_v38, %s11798_s23  ;;  %v8008_v38 = vpack.c.bf16 %v7976_v59, %v7976_v59  ;;  %v8774_v17 = vpack.c.bf16 %v8742_v58, %v8742_v58  ;;  %v7147_v58 = vadd.f32 %v15575_v1, %v7146_v8 }
 0x695   : > { %v15578_v14 = vmax.f32 %v7373_v45, %v7374_v0  ;;  %9641 = vmatmul.bf16.gmra.mxu1 %v11199_v25  ;;  %v8396_v15 = vpop.permute.xlu1 %8395  ;;  %v11202_v0 = vld [vmem:[#allocation4 + $0x20] sm:$0xf] }
 0x696   : > { %v7230_v33 = vpop.f32.mrf.mxu2  ;;  %8477 = vst.msk [vmem:[#allocation4 + $0xac] sm:$0xf] %vm5243_vm3, %v8396_v15  ;;  %v15585_v39 = vpop.permute.xlu2 %8625  ;;  %v11203_v13 = vor.u32 %v11666_v63, %v11202_v0 }
 0x697   : > { %v7231_v18 = vadd.f32 %v7230_v33, %v7142_v56  ;;  %v8620_v43 = vpop.permute.xlu0 %8619  ;;  %v11683_v36 = vld [vmem:[#allocation4 + $0xb0] sm:$0xf0] }
 0x698   : > { %8701 = vst.msk [vmem:[#allocation4 + $0xac] sm:$0xf] %vm5468_vm4, %v8620_v43  ;;  %v11267_v53 = vor.u32 %v11683_v36, %v11266_v10  ;;  %8861 = vrot.lane.b32.xlu1 %v8774_v17, %s11798_s23  ;;  %v11208_v43 = vld [vmem:[#allocation4 + $0x3c] sm:$0xf0]  ;;  %v7752_v36 = vld [vmem:[#allocation3 + $0x1b1] sm:$0xff] }
 0x699   : > { %8925 = vst.msk [vmem:[#allocation4 + $0xac] sm:$0xf] %vm5693_vm5, %v15536_v46  ;;  %8097 = vrot.lane.b32.xlu2 %v8008_v38, %s11798_s23  ;;  %v7320_v31 = vadd.f32 %v15413_v44, %v7231_v18  ;;  %v11667_v46 = vld [vmem:[#allocation4 + $0x34] sm:$0xf] }
 0x69a   : > { %v7148_v24 = vpop.f32.mrf.mxu1  ;;  %9582 = vmatmul.bf16.gmra.mxu3 %v11267_v53  ;;  %v11211_v18 = vor.u32 %v11667_v46, %v11208_v43  ;;  %v11214_v43 = vld [vmem:[#allocation4 + $0x38] sm:$0xf] }
 0x69b   : > { %8859 = vrot.lane.b32.xlu0 %v8773_v51, %s11798_s23  ;;  %v7375_v10 = vmax.f32 %v7320_v31, 0.0  ;;  %v8744_v51 = vld [vmem:[#allocation2 + $0x1d1] sm:$0xff] }
 0x69c   : > { %v8776_v0 = vpack.c.bf16 %v8744_v51, %v8744_v51 }
 0x69d   : > { %v8622_v25 = vpop.permute.xlu1 %8621 }
 0x69e   : > { %v7232_v7 = vpop.f32.mrf.mxu2  ;;  %8702 = vst.msk [vmem:[#allocation4 + $0xb8] sm:$0xf] %vm5468_vm4, %v8622_v25  ;;  %v15599_v33 = vpop.permute.xlu2 %7859 }
 0x69f   : > { %v7233_v45 = vadd.f32 %v7232_v7, %v7144_v35  ;;  %v8846_v15 = vpop.permute.xlu0 %8845  ;;  %v7784_v35 = vpack.c.bf16 %v7752_v36, %v7752_v36 }
 0x6a0   : > { %8926 = vst.msk [vmem:[#allocation4 + $0xb8] sm:$0xf] %vm5693_vm5, %v8846_v15  ;;  %8095 = vrot.lane.b32.xlu1 %v15556_v49, %s11798_s23 }
 0x6a1   : > { %v7322_v56 = vadd.f32 %v15430_v12, %v7233_v45  ;;  %v15606_v12 = vpop.f32.mrf.mxu3  ;;  %8639 = vrot.lane.b32.xlu2 %v8008_v38, %s11796_s17  ;;  %v8296_v45 = vld [vmem:[#allocation3 + $0x1c1] sm:$0xff]  ;;  %v7149_v38 = vadd.f32 %v15575_v1, %v7148_v24 }
 0x6a2   : > { %v7151_v59 = vpop.f32.mrf.mxu1  ;;  %v8328_v25 = vpack.c.bf16 %v8296_v45, %v8296_v45 }
 0x6a3   : > { %v7376_v44 = vmax.f32 %v7322_v56, 0.0  ;;  %11445 = vmatmul.msk.bf16.gmra.mxu2 %vm3261_vm0, %v11203_v13  ;;  %7873 = vrot.lane.b32.xlu0 %v7784_v35, %s11796_s17  ;;  %v11669_v56 = vld [vmem:[#allocation4 + $0x40] sm:$0xf0]  ;;  %v7152_v45 = vadd.f32 %v15575_v1, %v7151_v59 }
 0x6a5   : > { %v15604_v53 = vmax.f32 %v7375_v10, %v7376_v44  ;;  %9646 = vmatmul.bf16.gmra.mxu1 %v11211_v18  ;;  %v7856_v7 = vpop.permute.xlu1 %7855  ;;  %v11670_v10 = vld [vmem:[#allocation4 + $0x4c] sm:$0xf]  ;;  %v11215_v18 = vor.u32 %v11669_v56, %v11214_v43 }
 0x6a6   : > { %v7235_v16 = vpop.f32.mrf.mxu2  ;;  %v8086_v63 = vpop.permute.xlu2 %8085  ;;  %7935 = vst.msk [vmem:[#allocation4 + $0xc0] sm:$0xf] %vm5468_vm4, %v7856_v7  ;;  %v8743_v7 = vld [vmem:[#allocation2 + $0x1c1] sm:$0xff] }
 0x6a7   : > { %v7236_v17 = vadd.f32 %v7235_v16, %v7147_v58  ;;  %v8080_v8 = vpop.permute.xlu0 %8079  ;;  %v7977_v58 = vld [vmem:[#allocation3 + $0x1d0] sm:$0xff] }
 0x6a8   : > { %8159 = vst.msk [vmem:[#allocation4 + $0xc0] sm:$0xf] %vm5693_vm5, %v8080_v8  ;;  %8417 = vrot.lane.b32.xlu1 %v8328_v25, %s11797_s18 }
 0x6a9   : > { %8865 = vrot.lane.b32.xlu2 %v8776_v0, %s11798_s23  ;;  %v7325_v49 = vadd.f32 %v15459_v62, %v7236_v17  ;;  %v15618_v15 = vpop.f32.mrf.mxu3  ;;  %v11220_v17 = vld [vmem:[#allocation4 + $0x54] sm:$0xf0] }
 0x6aa   : > { %v7153_v31 = vpop.f32.mrf.mxu1 }
 0x6ab   : > { %8415 = vrot.lane.b32.xlu0 %v7784_v35, %s11797_s18  ;;  %v7377_v51 = vmax.f32 %v7325_v49, 0.0  ;;  %v11223_v35 = vor.u32 %v11670_v10, %v11220_v17  ;;  %v8298_v10 = vld [vmem:[#allocation3 + $0x1e1] sm:$0xff]  ;;  %v7154_v17 = vadd.f32 %v15575_v1, %v7153_v31 }
 0x6ad   : > { %v8082_v24 = vpop.permute.xlu1 %8081 }
 0x6ae   : > { %v7237_v46 = vpop.f32.mrf.mxu2  ;;  %v15622_v36 = vpop.permute.xlu2 %8627  ;;  %8160 = vst.msk [vmem:[#allocation4 + $0xcc] sm:$0xf] %vm5693_vm5, %v8082_v24 }
 0x6af   : > { %v7238_v13 = vadd.f32 %v7237_v46, %v7149_v38  ;;  %v8402_v16 = vpop.permute.xlu0 %8401  ;;  %v8775_v38 = vpack.c.bf16 %v8743_v7, %v8743_v7  ;;  %v11278_v43 = vld [vmem:[#allocation4 + $0xc0] sm:$0xf] }
 0x6b0   : > { %8480 = vst.msk [vmem:[#allocation4 + $0xd0] sm:$0xf] %vm5243_vm3, %v8402_v16  ;;  %v15644_v16 = vpack.c.bf16 %v8298_v10, %v8298_v10  ;;  %v11673_v10 = vld [vmem:[#allocation4 + $0x64] sm:$0xf] }
 0x6b1   : > { %v7327_v44 = vadd.f32 %v15482_v20, %v7238_v13  ;;  %8704 = vst.msk [vmem:[#allocation4 + $0xd0] sm:$0xf] %vm5468_vm4, %v15585_v39  ;;  %v8009_v20 = vpack.c.bf16 %v7977_v58, %v7977_v58  ;;  %8863 = vrot.lane.b32.xlu1 %v8775_v38, %s11798_s23  ;;  %v15640_v24 = vpop.f32.mrf.mxu3 }
 0x6b2   : > { %v15625_v62 = vpop.f32.mrf.mxu1 }
 0x6b3   : > { %v7378_v8 = vmax.f32 %v7327_v44, 0.0  ;;  %11446 = vmatmul.msk.bf16.gmra.mxu2 %vm3261_vm0, %v11215_v18  ;;  %8099 = vrot.lane.b32.xlu2 %v8009_v20, %s11798_s23  ;;  %v7754_v18 = vld [vmem:[#allocation3 + $0x1d1] sm:$0xff] }
 0x6b4   : > { %8641 = vrot.lane.b32.xlu0 %v8009_v20, %s11796_s17  ;;  %v7786_v7 = vpack.c.bf16 %v7754_v18, %v7754_v18 }
 0x6b5   : > { %v15632_v0 = vmax.f32 %v7377_v51, %v7378_v8  ;;  %9651 = vmatmul.bf16.gmra.mxu1 %v11223_v35  ;;  %v8624_v49 = vpop.permute.xlu1 %8623  ;;  %v11686_v39 = vld [vmem:[#allocation4 + $0xc8] sm:$0xf0]  ;;  %v11672_v8 = vld [vmem:[#allocation4 + $0x58] sm:$0xf0] }
 0x6b6   : > { %v7240_v46 = vpop.f32.mrf.mxu2  ;;  %v15637_v13 = vpop.permute.xlu2 %8853  ;;  %8703 = vst.msk [vmem:[#allocation4 + $0xc4] sm:$0xf] %vm5468_vm4, %v8624_v49  ;;  %v11279_v44 = vor.u32 %v11686_v39, %v11278_v43  ;;  %v8745_v43 = vld [vmem:[#allocation2 + $0x1e1] sm:$0xff] }
 0x6b7   : > { %16647 = vst [vmem:[#allocation61_spill] sm:$0xff] %v15632_v0  ;;  %v7241_v56 = vadd.f32 %v7240_v46, %v7152_v45  ;;  %v7862_v59 = vpop.permute.xlu0 %7861  ;;  %v11226_v45 = vld [vmem:[#allocation4 + $0x50] sm:$0xf] }
 0x6b8   : > { %7938 = vst.msk [vmem:[#allocation4 + $0xe4] sm:$0xf] %vm5468_vm4, %v7862_v59  ;;  %9587 = vmatmul.bf16.gmra.mxu3 %v11279_v44  ;;  %v11227_v46 = vor.u32 %v11672_v8, %v11226_v45  ;;  %v7978_v44 = vld [vmem:[#allocation3 + $0x1e0] sm:$0xff] }
 0x6b9   : > { %8162 = vst.msk [vmem:[#allocation4 + $0xe4] sm:$0xf] %vm5693_vm5, %v8086_v63  ;;  %v7330_v35 = vadd.f32 %v15504_v41, %v7241_v56  ;;  %7877 = vrot.lane.b32.xlu1 %v7786_v7, %s11796_s17  ;;  %v11232_v63 = vld [vmem:[#allocation4 + $0x6c] sm:$0xf0]  ;;  %v15660_v18 = vpop.f32.mrf.mxu3 }
 0x6ba   : > { %v7158_v58 = vpop.f32.mrf.mxu1 }
 0x6bb   : > { %8421 = vrot.lane.b32.xlu2 %v15644_v16, %s11797_s18  ;;  %v7379_v59 = vmax.f32 %v7330_v35, 0.0  ;;  %v8010_v35 = vpack.c.bf16 %v7978_v44, %v7978_v44  ;;  %v11238_v44 = vld [vmem:[#allocation4 + $0x68] sm:$0xf] }
 0x6bc   : > { %7875 = vrot.lane.b32.xlu0 %v8328_v25, %s11796_s17  ;;  %v11235_v25 = vor.u32 %v11673_v10, %v11232_v63  ;;  %v7756_v63 = vld [vmem:[#allocation3 + $0x1f1] sm:$0xff] }
 0x6bd   : > { %v8850_v49 = vpop.permute.xlu1 %8849 }
 0x6be   : > { %v7242_v51 = vpop.f32.mrf.mxu2  ;;  %v15653_v31 = vpop.permute.xlu2 %8087  ;;  %8928 = vst.msk [vmem:[#allocation4 + $0xd0] sm:$0xf] %vm5693_vm5, %v8850_v49  ;;  %v7788_v49 = vpack.c.bf16 %v7756_v63, %v7756_v63 }
 0x6bf   : > { %v7243_v20 = vadd.f32 %v7242_v51, %v7154_v17  ;;  %v8404_v39 = vpop.permute.xlu0 %8403  ;;  %v7157_v17 = vadd.f32 %v15575_v1, %v15625_v62  ;;  %v8522_v62 = vld [vmem:[#allocation3 + $0x1f0] sm:$0xff] }
 0x6c0   : > { %8481 = vst.msk [vmem:[#allocation4 + $0xdc] sm:$0xf] %vm5243_vm3, %v8404_v39  ;;  %v8554_v39 = vpack.c.bf16 %v8522_v62, %v8522_v62  ;;  %v11676_v62 = vld [vmem:[#allocation4 + $0x7c] sm:$0xf] }
 0x6c1   : > { %v7332_v38 = vadd.f32 %v15524_v4, %v7243_v20  ;;  %8705 = vst.msk [vmem:[#allocation4 + $0xdc] sm:$0xf] %vm5468_vm4, %v15622_v36  ;;  %v8777_v4 = vpack.c.bf16 %v8745_v43, %v8745_v43  ;;  %8419 = vrot.lane.b32.xlu1 %v7786_v7, %s11797_s18  ;;  %v7159_v43 = vadd.f32 %v15575_v1, %v7158_v58  ;;  %v15674_v7 = vpop.f32.mrf.mxu3 }
 0x6c2   : > { %v7161_v56 = vpop.f32.mrf.mxu1 }
 0x6c3   : > { %v7380_v41 = vmax.f32 %v7332_v38, 0.0  ;;  %11447 = vmatmul.msk.bf16.gmra.mxu2 %vm3261_vm0, %v11227_v46  ;;  %8867 = vrot.lane.b32.xlu2 %v8777_v4, %s11798_s23  ;;  %v11244_v4 = vld [vmem:[#allocation4 + $0x84] sm:$0xf0] }
 0x6c4   : > { %8101 = vrot.lane.b32.xlu0 %v8010_v35, %s11798_s23 }
 0x6c5   : > { %v15664_v51 = vmax.f32 %v7379_v59, %v7380_v41  ;;  %9656 = vmatmul.bf16.gmra.mxu1 %v11235_v25  ;;  %v15669_v45 = vpop.permute.xlu1 %8083  ;;  %v11675_v59 = vld [vmem:[#allocation4 + $0x70] sm:$0xf0] }
 0x6c6   : > { %v7245_v8 = vpop.f32.mrf.mxu2  ;;  %v8410_v36 = vpop.permute.xlu2 %8409 }
 0x6c7   : > { %16648 = vst [vmem:[#allocation73_spill] sm:$0xff] %v15664_v51  ;;  %v7246_v20 = vadd.f32 %v7245_v8, %v7157_v17  ;;  %v8630_v38 = vpop.permute.xlu0 %8629  ;;  %v11239_v8 = vor.u32 %v11675_v59, %v11238_v44 }
 0x6c8   : > { %8484 = vst.msk [vmem:[#allocation4 + $0x100] sm:$0xf] %vm5243_vm3, %v8410_v36 }
 0x6c9   : > { %v7335_v41 = vadd.f32 %v15546_v11, %v7246_v20  ;;  %8645 = vrot.lane.b32.xlu1 %v8554_v39, %s11796_s17  ;;  %v11247_v20 = vor.u32 %v11676_v62, %v11244_v4  ;;  %v11679_v62 = vld [vmem:[#allocation4 + $0x94] sm:$0xf] }
 0x6ca   : > { %v7163_v46 = vpop.f32.mrf.mxu1 }
 0x6cb   : > { %7881 = vrot.lane.b32.xlu2 %v7788_v49, %s11796_s17  ;;  %v7381_v51 = vmax.f32 %v7335_v41, 0.0  ;;  %v7164_v44 = vadd.f32 %v15575_v1, %v7163_v46  ;;  %v7757_v46 = vld [vmem:[#allocation3 + $0x201] sm:$0xff] }
 0x6cc   : > { %8643 = vrot.lane.b32.xlu0 %v8010_v35, %s11796_s17  ;;  %v8746_v35 = vld [vmem:[#allocation2 + $0x1f1] sm:$0xff] }
 0x6cd   : > { %v8406_v58 = vpop.permute.xlu1 %8405 }
 0x6ce   : > { %v7247_v10 = vpop.f32.mrf.mxu2  ;;  %8482 = vst.msk [vmem:[#allocation4 + $0xe8] sm:$0xf] %vm5243_vm3, %v8406_v58  ;;  %v15681_v36 = vpop.permute.xlu2 %8855 }
 0x6cf   : > { %v7248_v25 = vadd.f32 %v7247_v10, %v7159_v43  ;;  %v7864_v63 = vpop.permute.xlu0 %7863  ;;  %8706 = vst.msk [vmem:[#allocation4 + $0xe8] sm:$0xf] %vm5468_vm4, %v8630_v38  ;;  %v8778_v38 = vpack.c.bf16 %v8746_v35, %v8746_v35 }
 0x6d0   : > { %8930 = vst.msk [vmem:[#allocation4 + $0xe8] sm:$0xf] %vm5693_vm5, %v15637_v13  ;;  %v15697_v13 = vpop.f32.mrf.mxu3 }
 0x6d1   : > { %v7337_v17 = vadd.f32 %v15565_v28, %v7248_v25  ;;  %v7162_v28 = vadd.f32 %v15575_v1, %v7161_v56  ;;  %7939 = vst.msk [vmem:[#allocation4 + $0xf0] sm:$0xf] %vm5468_vm4, %v7864_v63  ;;  %7879 = vrot.lane.b32.xlu1 %v15644_v16, %s11796_s17  ;;  %v8524_v56 = vld [vmem:[#allocation3 + $0x210] sm:$0xff]  ;;  %v7980_v25 = vld [vmem:[#allocation3 + $0x200] sm:$0xff] }
 0x6d2   : > { %v7166_v11 = vpop.f32.mrf.mxu1  ;;  %8163 = vst.msk [vmem:[#allocation4 + $0xf0] sm:$0xf] %vm5693_vm5, %v15653_v31  ;;  %v8012_v4 = vpack.c.bf16 %v7980_v25, %v7980_v25  ;;  %v11250_v63 = vld [vmem:[#allocation4 + $0x80] sm:$0xf] }
 0x6d3   : > { %v7382_v0 = vmax.f32 %v7337_v17, 0.0  ;;  %11448 = vmatmul.msk.bf16.gmra.mxu2 %vm3261_vm0, %v11239_v8  ;;  %8423 = vrot.lane.b32.xlu2 %v7788_v49, %s11797_s18  ;;  %v15701_v49 = vpack.c.bf16 %v8524_v56, %v8524_v56  ;;  %v11678_v17 = vld [vmem:[#allocation4 + $0x88] sm:$0xf0]  ;;  %v7167_v25 = vadd.f32 %v15575_v1, %v7166_v11 }
 0x6d4   : > { %8869 = vrot.lane.b32.xlu0 %v8778_v38, %s11798_s23  ;;  %v11251_v35 = vor.u32 %v11678_v17, %v11250_v63 }
 0x6d5   : > { %v15688_v43 = vmax.f32 %v7381_v51, %v7382_v0  ;;  %9661 = vmatmul.bf16.gmra.mxu1 %v11247_v20  ;;  %v8852_v0 = vpop.permute.xlu1 %8851 }
 0x6d6   : > { %v7250_v10 = vpop.f32.mrf.mxu2  ;;  %8929 = vst.msk [vmem:[#allocation4 + $0xdc] sm:$0xf] %vm5693_vm5, %v8852_v0  ;;  %v7870_v51 = vpop.permute.xlu2 %7869  ;;  %v11256_v0 = vld [vmem:[#allocation4 + $0x9c] sm:$0xf0] }
 0x6d7   : > { %v7251_v59 = vadd.f32 %v7250_v10, %v7162_v28  ;;  %v8090_v41 = vpop.permute.xlu0 %8089  ;;  %7942 = vst.msk [vmem:[#allocation4 + $0x114] sm:$0xf] %vm5468_vm4, %v7870_v51  ;;  %v11259_v51 = vor.u32 %v11679_v62, %v11256_v0  ;;  %v8748_v62 = vld [vmem:[#allocation2 + $0x211] sm:$0xff]  ;;  %v11681_v0 = vld [vmem:[#allocation4 + $0xa0] sm:$0xf0] }
 0x6d8   : > { %v15711_v56 = vpop.f32.mrf.mxu3 }
 0x6d9   : > { %v7340_v8 = vadd.f32 %v15588_v61, %v7251_v59  ;;  %8105 = vrot.lane.b32.xlu1 %v8012_v4, %s11798_s23 }
 0x6da   : > { %v7168_v31 = vpop.f32.mrf.mxu1 }
 0x6db   : > { %8649 = vrot.lane.b32.xlu2 %v15701_v49, %s11796_s17  ;;  %v7383_v61 = vmax.f32 %v7340_v8, 0.0 }
 0x6dc   : > { %8103 = vrot.lane.b32.xlu0 %v8554_v39, %s11798_s23 }
 0x6dd   : > { %v7866_v28 = vpop.permute.xlu1 %7865 }
 0x6de   : > { %v7252_v16 = vpop.f32.mrf.mxu2  ;;  %7940 = vst.msk [vmem:[#allocation4 + $0xfc] sm:$0xf] %vm5468_vm4, %v7866_v28  ;;  %v8412_v10 = vpop.permute.xlu2 %8411 }
 0x6df   : > { %v7253_v58 = vadd.f32 %v7252_v16, %v7164_v44  ;;  %v8632_v38 = vpop.permute.xlu0 %8631  ;;  %8164 = vst.msk [vmem:[#allocation4 + $0xfc] sm:$0xf] %vm5693_vm5, %v8090_v41  ;;  %v7982_v41 = vld [vmem:[#allocation3 + $0x220] sm:$0xff] }
 0x6e0   : > { %8485 = vst.msk [vmem:[#allocation4 + $0x10c] sm:$0xf] %vm5243_vm3, %v8412_v10  ;;  %v9548_v28 = vpop.f32.mrf.mxu3 }
 0x6e1   : > { %v7342_v20 = vadd.f32 %v15606_v12, %v7253_v58  ;;  %v7789_v12 = vpack.c.bf16 %v7757_v46, %v7757_v46  ;;  %8647 = vrot.lane.b32.xlu1 %v8012_v4, %s11796_s17  ;;  %v7169_v4 = vadd.f32 %v15575_v1, %v7168_v31  ;;  %v8780_v46 = vpack.c.bf16 %v8748_v62, %v8748_v62 }
 0x6e2   : > { %v7171_v39 = vpop.f32.mrf.mxu1 }
 0x6e3   : > { %v7384_v59 = vmax.f32 %v7342_v20, 0.0  ;;  %11449 = vmatmul.msk.bf16.gmra.mxu2 %vm3261_vm0, %v11251_v35  ;;  %7883 = vrot.lane.b32.xlu2 %v7789_v12, %s11796_s17  ;;  %v8747_v20 = vld [vmem:[#allocation2 + $0x201] sm:$0xff]  ;;  %v8014_v35 = vpack.c.bf16 %v7982_v41, %v7982_v41  ;;  %v11682_v41 = vld [vmem:[#allocation4 + $0xac] sm:$0xf] }
 0x6e4   : > { %8425 = vrot.lane.b32.xlu0 %v7789_v12, %s11797_s18  ;;  %v11268_v12 = vld [vmem:[#allocation4 + $0xb4] sm:$0xf0] }
 0x6e5   : > { %v15717_v44 = vmax.f32 %v7383_v61, %v7384_v59  ;;  %9666 = vmatmul.bf16.gmra.mxu1 %v11259_v51  ;;  %v8408_v8 = vpop.permute.xlu1 %8407  ;;  %v8779_v61 = vpack.c.bf16 %v8747_v20, %v8747_v20 }
 0x6e6   : > { %v7255_v16 = vpop.f32.mrf.mxu2  ;;  %8483 = vst.msk [vmem:[#allocation4 + $0xf4] sm:$0xf] %vm5243_vm3, %v8408_v8  ;;  %v8638_v58 = vpop.permute.xlu2 %8637 }
 0x6e7   : > { %v7256_v17 = vadd.f32 %v7255_v16, %v7167_v25  ;;  %v8858_v63 = vpop.permute.xlu0 %8857  ;;  %8707 = vst.msk [vmem:[#allocation4 + $0xf4] sm:$0xf] %vm5468_vm4, %v8632_v38  ;;  %v11262_v38 = vld [vmem:[#allocation4 + $0x98] sm:$0xf] }
 0x6e8   : > { %8931 = vst.msk [vmem:[#allocation4 + $0xf4] sm:$0xf] %vm5693_vm5, %v15681_v36  ;;  %v11263_v25 = vor.u32 %v11681_v0, %v11262_v38  ;;  %v8302_v38 = vld [vmem:[#allocation3 + $0x221] sm:$0xff] }
 0x6e9   : > { %v7345_v59 = vadd.f32 %v15618_v15, %v7256_v17  ;;  %8873 = vrot.lane.b32.xlu1 %v8780_v46, %s11798_s23  ;;  %v11271_v17 = vor.u32 %v11682_v41, %v11268_v12 }
 0x6ea   : > { %v7173_v11 = vpop.f32.mrf.mxu1 }
 0x6eb   : > { %8109 = vrot.lane.b32.xlu2 %v8014_v35, %s11798_s23  ;;  %v7385_v62 = vmax.f32 %v7345_v59, 0.0 }
 0x6ec   : > { %8871 = vrot.lane.b32.xlu0 %v8779_v61, %s11798_s23  ;;  %v15740_v61 = vpop.f32.mrf.mxu3 }
 0x6ed   : > { %v8634_v16 = vpop.permute.xlu1 %8633 }
 0x6ee   : > { %v7257_v10 = vpop.f32.mrf.mxu2  ;;  %8708 = vst.msk [vmem:[#allocation4 + $0x100] sm:$0xf] %vm5468_vm4, %v8634_v16  ;;  %v7872_v31 = vpop.permute.xlu2 %7871  ;;  %v11274_v16 = vld [vmem:[#allocation4 + $0xb0] sm:$0xf] }
 0x6ef   : > { %v7258_v51 = vadd.f32 %v7257_v10, %v7169_v4  ;;  %v8092_v8 = vpop.permute.xlu0 %8091  ;;  %8932 = vst.msk [vmem:[#allocation4 + $0x100] sm:$0xf] %vm5693_vm5, %v8858_v63  ;;  %v7758_v4 = vld [vmem:[#allocation3 + $0x211] sm:$0xff] }
 0x6f0   : > { %7943 = vst.msk [vmem:[#allocation4 + $0x120] sm:$0xf] %vm5468_vm4, %v7872_v31  ;;  %v7790_v0 = vpack.c.bf16 %v7758_v4, %v7758_v4  ;;  %v11684_v31 = vld [vmem:[#allocation4 + $0xb8] sm:$0xf0] }
 0x6f1   : > { %v7347_v36 = vadd.f32 %v15640_v24, %v7258_v51  ;;  %v7172_v24 = vadd.f32 %v15575_v1, %v7171_v39  ;;  %8107 = vrot.lane.b32.xlu1 %v15701_v49, %s11798_s23  ;;  %v15755_v49 = vld [vmem:[%s16323_s4] ss:$0 sm:$0xff] }
 0x6f2   : > { %v7176_v15 = vpop.f32.mrf.mxu1  ;;  %v9549_v4 = vadd.f32 %v15755_v49, %v9548_v28 }
 0x6f3   : > { %v7386_v20 = vmax.f32 %v7347_v36, 0.0  ;;  %11450 = vmatmul.msk.bf16.gmra.mxu2 %vm3261_vm0, %v11263_v25  ;;  %8651 = vrot.lane.b32.xlu2 %v8014_v35, %s11796_s17  ;;  %v7174_v35 = vadd.f32 %v15575_v1, %v7173_v11  ;;  %v8334_v36 = vpack.c.bf16 %v8302_v38, %v8302_v38 }
 0x6f4   : > { %7885 = vrot.lane.b32.xlu0 %v7790_v0, %s11796_s17 }
 0x6f5   : > { %v15737_v46 = vmax.f32 %v7385_v62, %v7386_v20  ;;  %9671 = vmatmul.bf16.gmra.mxu1 %v11271_v17  ;;  %v7868_v63 = vpop.permute.xlu1 %7867  ;;  %v8526_v17 = vld [vmem:[#allocation3 + $0x230] sm:$0xff] }
 0x6f6   : > { %v7260_v10 = vpop.f32.mrf.mxu2  ;;  %7941 = vst.msk [vmem:[#allocation4 + $0x108] sm:$0xf] %vm5468_vm4, %v7868_v63  ;;  %v15746_v51 = vpop.permute.xlu2 %8097 }
 0x6f7   : > { %v7261_v59 = vadd.f32 %v7260_v10, %v7172_v24  ;;  %v8414_v39 = vpop.permute.xlu0 %8413  ;;  %8165 = vst.msk [vmem:[#allocation4 + $0x108] sm:$0xf] %vm5693_vm5, %v8092_v8  ;;  %v9553_v8 = vpop.f32.mrf.mxu3 }
 0x6f8   : > { %8486 = vst.msk [vmem:[#allocation4 + $0x118] sm:$0xf] %vm5243_vm3, %v8414_v39  ;;  %v7177_v39 = vadd.f32 %v15575_v1, %v7176_v15 }
 0x6f9   : > { %8710 = vst.msk [vmem:[#allocation4 + $0x118] sm:$0xf] %vm5468_vm4, %v8638_v58  ;;  %v7350_v41 = vadd.f32 %v15660_v18, %v7261_v59  ;;  %8429 = vrot.lane.b32.xlu1 %v8334_v36, %s11797_s18  ;;  %v11275_v58 = vor.u32 %v11684_v31, %v11274_v16  ;;  %v8558_v59 = vpack.c.bf16 %v8526_v17, %v8526_v17 }
 0x6fa   : > { %v7178_v12 = vpop.f32.mrf.mxu1 }
 0x6fb   : > { %v7387_v63 = vmax.f32 %v7350_v41, 0.0 }
 0x6fc   : > { %8427 = vrot.lane.b32.xlu0 %v7790_v0, %s11797_s18 }
 0x6fd   : > { %v8094_v20 = vpop.permute.xlu1 %8093 }
 0x6fe   : > { %v7262_v25 = vpop.f32.mrf.mxu2  ;;  %8166 = vst.msk [vmem:[#allocation4 + $0x114] sm:$0xf] %vm5693_vm5, %v8094_v20  ;;  %v15763_v24 = vpop.permute.xlu2 %8639  ;;  %v11286_v20 = vld [vmem:[#allocation4 + $0xc8] sm:$0xf] }
 0x6ff   : > { %v7263_v62 = vadd.f32 %v7262_v25, %v7174_v35  ;;  %v7636_v10 = vpop.permute.xlu0 %7635  ;;  %v8750_v35 = vld [vmem:[#allocation2 + $0x231] sm:$0xff]  ;;  %v15781_v31 = vpop.f32.mrf.mxu3 }
 0x700   : > { %7713 = vst.msk [vmem:[#allocation4 + $0xd8] sm:$0xf] %vm5243_vm3, %v7636_v10  ;;  %v8782_v25 = vpack.c.bf16 %v8750_v35, %v8750_v35  ;;  %v11687_v10 = vld [vmem:[#allocation4 + $0xd0] sm:$0xf0]  ;;  %v11280_v35 = vld [vmem:[#allocation4 + $0xcc] sm:$0xf0] }
 0x701   : > { %v7352_v11 = vadd.f32 %v15674_v7, %v7263_v62  ;;  %7937 = vst.msk [vmem:[#allocation4 + $0xd8] sm:$0xf] %vm5468_vm4, %v15599_v33  ;;  %8875 = vrot.lane.b32.xlu1 %v15474_v22, %s11798_s23  ;;  %v11689_v62 = vld [vmem:[#allocation4 + $0xe0] sm:$0xf0]  ;;  %v7179_v22 = vadd.f32 %v15575_v1, %v7178_v12 }
 0x702   : > { %v9637_v0 = vpop.f32.mrf.mxu1  ;;  %8161 = vst.msk [vmem:[#allocation4 + $0xd8] sm:$0xf] %vm5693_vm5, %v15669_v45  ;;  %8877 = vrot.lane.b32.xlu2 %v8782_v25, %s11798_s23 }
 0x703   : > { %v7388_v18 = vmax.f32 %v7352_v11, 0.0  ;;  %11451 = vmatmul.msk.bf16.gmra.mxu2 %vm3261_vm0, %v11275_v58  ;;  %v9638_v7 = vadd.f32 %v9637_v0, %v9549_v4 }
 0x704   : > { %8653 = vrot.lane.b32.xlu0 %v8558_v59, %s11796_s17  ;;  %v9554_v59 = vadd.f32 %v15755_v49, %v9553_v8  ;;  %v7104_v8 = vadd.f32 %v15575_v1, %v15194_v47 }
 0x705   : > { %v15770_v28 = vmax.f32 %v7387_v63, %v7388_v18  ;;  %v8636_v16 = vpop.permute.xlu1 %8635  ;;  %v11287_v18 = vor.u32 %v11687_v10, %v11286_v20  ;;  %v16649_v10 = vld [vmem:[#allocation58_spill] sm:$0xff] }
 0x706   : > { %v7265_v38 = vpop.f32.mrf.mxu2  ;;  %8709 = vst.msk [vmem:[#allocation4 + $0x10c] sm:$0xf] %vm5468_vm4, %v8636_v16  ;;  %v15779_v33 = vpop.permute.xlu2 %8865 }
 0x707   : > { %v7266_v36 = vadd.f32 %v7265_v38, %v7177_v39  ;;  %v8848_v15 = vpop.permute.xlu0 %8847  ;;  %v9558_v25 = vpop.f32.mrf.mxu3 }
 0x708   : > { %8927 = vst.msk [vmem:[#allocation4 + $0xc4] sm:$0xf] %vm5693_vm5, %v8848_v15 }
 0x709   : > { %v11290_v41 = vld [vmem:[#allocation4 + $0xd8] sm:$0xf]  ;;  %v7355_v17 = vadd.f32 %v15697_v13, %v7266_v36 }
 0x70a   : > { %v9639_v45 = vpop.f32.mrf.mxu1  ;;  %v11291_v11 = vor.u32 %v11689_v62, %v11290_v41 }
 0x70b   : > { %v7389_v16 = vmax.f32 %v7355_v17, 0.0 }
 0x70c   : > { %9592 = vmatmul.bf16.gmra.mxu3 %v11291_v11 }
 0x70d   : > { %v8862_v0 = vpop.permute.xlu1 %8861 }
 0x70e   : > { %v7267_v58 = vpop.f32.mrf.mxu2  ;;  %8934 = vst.msk [vmem:[#allocation4 + $0x118] sm:$0xf] %vm5693_vm5, %v8862_v0  ;;  %v15789_v39 = vpop.permute.xlu2 %8099  ;;  %v11302_v0 = vld [vmem:[#allocation4 + $0xf0] sm:$0xf] }
 0x70f   : > { %v7268_v4 = vadd.f32 %v7267_v58, %v7179_v22  ;;  %v8860_v38 = vpop.permute.xlu0 %8859  ;;  %v11685_v12 = vld [vmem:[#allocation4 + $0xc4] sm:$0xf]  ;;  %v7193_v22 = vadd.f32 %v15208_v6, %v7104_v8  ;;  %v16650_v6 = vld [vmem:[#allocation64_spill] sm:$0xff] }
 0x710   : > { %8933 = vst.msk [vmem:[#allocation4 + $0x10c] sm:$0xf] %vm5693_vm5, %v8860_v38 }
 0x711   : > { %v7357_v63 = vadd.f32 %v15711_v56, %v7268_v4  ;;  %v11283_v56 = vor.u32 %v11685_v12, %v11280_v35  ;;  %v11692_v4 = vld [vmem:[#allocation4 + $0xf8] sm:$0xf0] }
 0x712   : > { %v9642_v13 = vpop.f32.mrf.mxu1  ;;  %v11303_v12 = vor.u32 %v11692_v4, %v11302_v0 }
 0x713   : > { %v7390_v15 = vmax.f32 %v7357_v63, 0.0  ;;  %11452 = vmatmul.msk.bf16.gmra.mxu2 %vm3261_vm0, %v11287_v18  ;;  %v9643_v36 = vadd.f32 %v9642_v13, %v9554_v59  ;;  %9676 = vmatmul.bf16.gmra.mxu1 %v11283_v56  ;;  %v7282_v63 = vadd.f32 %v16649_v10, %v7193_v22  ;;  %v9551_v18 = vadd.f32 %v15755_v49, %v15740_v61  ;;  %v15806_v59 = vpop.f32.mrf.mxu3  ;;  %v11298_v13 = vld [vmem:[#allocation4 + $0xe0] sm:$0xf]  ;;  %v11688_v56 = vld [vmem:[#allocation4 + $0xdc] sm:$0xf] }
 0x715   : > { %v15795_v41 = vmax.f32 %v7389_v16, %v7390_v15  ;;  %v8096_v58 = vpop.permute.xlu1 %8095  ;;  %v9640_v38 = vadd.f32 %v9639_v45, %v9551_v18  ;;  %v11690_v16 = vld [vmem:[#allocation4 + $0xe8] sm:$0xf0]  ;;  %v7360_v15 = vmax.f32 %v7282_v63, 0.0 }
 0x716   : > { %v9726_v62 = vpop.f32.mrf.mxu2  ;;  %8167 = vst.msk [vmem:[#allocation4 + $0x120] sm:$0xf] %vm5693_vm5, %v8096_v58  ;;  %v8422_v20 = vpop.permute.xlu2 %8421  ;;  %v11299_v58 = vor.u32 %v11690_v16, %v11298_v13  ;;  %v16651_v13 = vld [vmem:[#allocation55_spill] sm:$0xff] }
 0x717   : > { %v9727_v11 = vadd.f32 %v9726_v62, %v9638_v7  ;;  %v7874_v17 = vpop.permute.xlu0 %7873  ;;  %8490 = vst.msk [vmem:[#allocation4 + $0x148] sm:$0xf] %vm5243_vm3, %v8422_v20  ;;  %v7280_v7 = vadd.f32 %v16650_v6, %v15170_v40  ;;  %v9559_v40 = vadd.f32 %v15755_v49, %v9558_v25  ;;  %v7109_v25 = vadd.f32 %v15575_v1, %v15270_v50 }
 0x718   : > { %7944 = vst.msk [vmem:[#allocation4 + $0x12c] sm:$0xf] %vm5468_vm4, %v7874_v17  ;;  %v11292_v17 = vld [vmem:[#allocation4 + $0xe4] sm:$0xf0] }
 0x719   : > { %8168 = vst.msk [vmem:[#allocation4 + $0x12c] sm:$0xf] %vm5693_vm5, %v15746_v51  ;;  %v7359_v8 = vmax.f32 %v7280_v7, 0.0  ;;  %v9806_v62 = vmax.f32 %v9727_v11, 0.0  ;;  %v11295_v18 = vor.u32 %v11688_v56, %v11292_v17  ;;  %v9556_v56 = vadd.f32 %v15755_v49, %v15781_v31  ;;  %v11310_v17 = vld [vmem:[#allocation4 + $0xf8] sm:$0xf] }
 0x71a   : > { %v9644_v47 = vpop.f32.mrf.mxu1 }
 0x71b   : > { %v7391_v4 = vmax.f32 %v7359_v8, %v7360_v15  ;;  %v9563_v0 = vpop.f32.mrf.mxu3  ;;  %v11314_v8 = vld [vmem:[#allocation4 + $0x108] sm:$0xf] }
 0x71c   : > { %9597 = vmatmul.bf16.gmra.mxu3 %v11303_v12 }
 0x71d   : > { %v8418_v20 = vpop.permute.xlu1 %8417 }
 0x71e   : > { %v9728_v35 = vpop.f32.mrf.mxu2  ;;  %8488 = vst.msk [vmem:[#allocation4 + $0x130] sm:$0xf] %vm5243_vm3, %v8418_v20  ;;  %v15812_v45 = vpop.permute.xlu2 %8867  ;;  %v11693_v20 = vld [vmem:[#allocation4 + $0x100] sm:$0xf0] }
 0x71f   : > { %v9729_v61 = vadd.f32 %v9728_v35, %v9640_v38  ;;  %v8416_v51 = vpop.permute.xlu0 %8415  ;;  %v7198_v38 = vadd.f32 %v15281_v57, %v7109_v25  ;;  %v16652_v57 = vld [vmem:[#allocation56_spill] sm:$0xff]  ;;  %v11311_v25 = vor.u32 %v11693_v20, %v11310_v17 }
 0x720   : > { %8487 = vst.msk [vmem:[#allocation4 + $0x124] sm:$0xf] %vm5243_vm3, %v8416_v51 }
 0x721   : > { %v9807_v22 = vmax.f32 %v9729_v61, 0.0  ;;  %8711 = vst.msk [vmem:[#allocation4 + $0x124] sm:$0xf] %vm5468_vm4, %v15763_v24  ;;  %v11695_v61 = vld [vmem:[#allocation4 + $0x110] sm:$0xf0]  ;;  %v7287_v24 = vadd.f32 %v16651_v13, %v7198_v38  ;;  %v7114_v13 = vadd.f32 %v15575_v1, %v15342_v27  ;;  %v16653_v1 = vld [vmem:[#allocation67_spill] sm:$0xff] }
 0x722   : > { %v9647_v63 = vpop.f32.mrf.mxu1  ;;  %v11691_v38 = vld [vmem:[#allocation4 + $0xf4] sm:$0xf]  ;;  %v11698_v27 = vld [vmem:[#allocation4 + $0x128] sm:$0xf0] }
 0x723   : > { %v9838_v10 = vmax.f32 %v9806_v62, %v9807_v22  ;;  %11453 = vmatmul.msk.bf16.gmra.mxu2 %vm3261_vm0, %v11299_v58  ;;  %v9648_v11 = vadd.f32 %v9647_v63, %v9559_v40  ;;  %9681 = vmatmul.bf16.gmra.mxu1 %v11295_v18  ;;  %v9645_v62 = vadd.f32 %v9644_v47, %v9556_v56  ;;  %v7362_v40 = vmax.f32 %v7287_v24, 0.0  ;;  %v15833_v51 = vpop.f32.mrf.mxu3 }
 0x724   : > { %v11315_v22 = vor.u32 %v11695_v61, %v11314_v8  ;;  %v7203_v56 = vadd.f32 %v15352_v21, %v7114_v13  ;;  %v16654_v21 = vld [vmem:[#allocation66_spill] sm:$0xff] }
 0x725   : > { %v15820_v6 = vmax.f32 %v7391_v4, %v9838_v10  ;;  %v8864_v35 = vpop.permute.xlu1 %8863  ;;  %v11304_v4 = vld [vmem:[#allocation4 + $0xfc] sm:$0xf0] }
 0x726   : > { %v9731_v7 = vpop.f32.mrf.mxu2  ;;  %8935 = vst.msk [vmem:[#allocation4 + $0x124] sm:$0xf] %vm5693_vm5, %v8864_v35  ;;  %v7882_v16 = vpop.permute.xlu2 %7881  ;;  %v11307_v61 = vor.u32 %v11691_v38, %v11304_v4  ;;  %v7292_v20 = vadd.f32 %v16653_v1, %v7203_v56  ;;  %v15869_v56 = vld [vmem:[%s16323_s4] ss:$0 sm:$0xff] }
 0x727   : > { %v9732_v12 = vadd.f32 %v9731_v7, %v9643_v36  ;;  %v8642_v15 = vpop.permute.xlu0 %8641  ;;  %7948 = vst.msk [vmem:[#allocation4 + $0x15c] sm:$0xf] %vm5468_vm4, %v7882_v16  ;;  %v7285_v36 = vadd.f32 %v16652_v57, %v15236_v5  ;;  %v9564_v5 = vadd.f32 %v15755_v49, %v9563_v0 }
 0x728   : > { %8712 = vst.msk [vmem:[#allocation4 + $0x130] sm:$0xf] %vm5468_vm4, %v8642_v15 }
 0x729   : > { %8936 = vst.msk [vmem:[#allocation4 + $0x130] sm:$0xf] %vm5693_vm5, %v15779_v33  ;;  %v7361_v10 = vmax.f32 %v7285_v36, 0.0  ;;  %v9808_v63 = vmax.f32 %v9732_v12, 0.0 }
 0x72a   : > { %v9649_v50 = vpop.f32.mrf.mxu1 }
 0x72b   : > { %v7392_v35 = vmax.f32 %v7361_v10, %v7362_v40  ;;  %v15847_v8 = vpop.f32.mrf.mxu3  ;;  %v11696_v10 = vld [vmem:[#allocation4 + $0x118] sm:$0xf0] }
 0x72c   : > { %9602 = vmatmul.bf16.gmra.mxu3 %v11315_v22 }
 0x72d   : > { %v7878_v7 = vpop.permute.xlu1 %7877 }
 0x72e   : > { %v9733_v58 = vpop.f32.mrf.mxu2  ;;  %7946 = vst.msk [vmem:[#allocation4 + $0x144] sm:$0xf] %vm5468_vm4, %v7878_v7  ;;  %v8424_v33 = vpop.permute.xlu2 %8423  ;;  %v11694_v7 = vld [vmem:[#allocation4 + $0x10c] sm:$0xf] }
 0x72f   : > { %v9734_v31 = vadd.f32 %v9733_v58, %v9645_v62  ;;  %v7876_v47 = vpop.permute.xlu0 %7875  ;;  %8491 = vst.msk [vmem:[#allocation4 + $0x154] sm:$0xf] %vm5243_vm3, %v8424_v33  ;;  %v11326_v58 = vld [vmem:[#allocation4 + $0x120] sm:$0xf] }
 0x730   : > { %7945 = vst.msk [vmem:[#allocation4 + $0x138] sm:$0xf] %vm5468_vm4, %v7876_v47  ;;  %v11327_v17 = vor.u32 %v11698_v27, %v11326_v58 }
 0x731   : > { %v9809_v18 = vmax.f32 %v9734_v31, 0.0  ;;  %8169 = vst.msk [vmem:[#allocation4 + $0x138] sm:$0xf] %vm5693_vm5, %v15789_v39  ;;  %v9561_v39 = vadd.f32 %v15755_v49, %v15806_v59  ;;  %v7290_v31 = vadd.f32 %v16654_v21, %v15302_v30 }
 0x732   : > { %v9652_v15 = vpop.f32.mrf.mxu1 }
 0x733   : > { %v9839_v16 = vmax.f32 %v9808_v63, %v9809_v18  ;;  %11454 = vmatmul.msk.bf16.gmra.mxu2 %vm3261_vm0, %v11311_v25  ;;  %v9653_v12 = vadd.f32 %v9652_v15, %v9564_v5  ;;  %9686 = vmatmul.bf16.gmra.mxu1 %v11307_v61  ;;  %v7364_v63 = vmax.f32 %v7292_v20, 0.0  ;;  %v11322_v25 = vld [vmem:[#allocation4 + $0x110] sm:$0xf]  ;;  %v11316_v5 = vld [vmem:[#allocation4 + $0x114] sm:$0xf0]  ;;  %v7363_v33 = vmax.f32 %v7290_v31, 0.0  ;;  %v15858_v47 = vpop.f32.mrf.mxu3 }
 0x735   : > { %v15842_v0 = vmax.f32 %v7392_v35, %v9839_v16  ;;  %v8420_v36 = vpop.permute.xlu1 %8419  ;;  %v11323_v35 = vor.u32 %v11696_v10, %v11322_v25  ;;  %v7393_v15 = vmax.f32 %v7363_v33, %v7364_v63  ;;  %v11699_v10 = vld [vmem:[#allocation4 + $0x130] sm:$0xf0]  ;;  %v11334_v25 = vld [vmem:[#allocation4 + $0x128] sm:$0xf] }
 0x736   : > { %v9736_v24 = vpop.f32.mrf.mxu2  ;;  %8489 = vst.msk [vmem:[#allocation4 + $0x13c] sm:$0xf] %vm5243_vm3, %v8420_v36  ;;  %v15850_v62 = vpop.permute.xlu2 %8649 }
 0x737   : > { %v9737_v57 = vadd.f32 %v9736_v24, %v9648_v11  ;;  %v8102_v22 = vpop.permute.xlu0 %8101  ;;  %v9650_v11 = vadd.f32 %v9649_v50, %v9561_v39  ;;  %v11319_v24 = vor.u32 %v11694_v7, %v11316_v5  ;;  %v11328_v7 = vld [vmem:[#allocation4 + $0x12c] sm:$0xf0] }
 0x738   : > { %8170 = vst.msk [vmem:[#allocation4 + $0x144] sm:$0xf] %vm5693_vm5, %v8102_v22 }
 0x739   : > { %v9810_v59 = vmax.f32 %v9737_v57, 0.0  ;;  %v7119_v57 = vadd.f32 %v15869_v56, %v15377_v48  ;;  %v9566_v48 = vadd.f32 %v15755_v49, %v15833_v51 }
 0x73a   : > { %v9654_v40 = vpop.f32.mrf.mxu1 }
 0x73b   : > { %v7208_v58 = vadd.f32 %v15393_v23, %v7119_v57  ;;  %v15878_v20 = vpop.f32.mrf.mxu3  ;;  %v9655_v23 = vadd.f32 %v9654_v40, %v9566_v48 }
 0x73c   : > { %9607 = vmatmul.bf16.gmra.mxu3 %v11327_v17 }
 0x73d   : > { %v8646_v16 = vpop.permute.xlu1 %8645  ;;  %v7297_v31 = vadd.f32 %v15051_v29, %v7208_v58  ;;  %v11697_v29 = vld [vmem:[#allocation4 + $0x124] sm:$0xf] }
 0x73e   : > { %v9738_v4 = vpop.f32.mrf.mxu2  ;;  %8714 = vst.msk [vmem:[#allocation4 + $0x148] sm:$0xf] %vm5468_vm4, %v8646_v16  ;;  %v7884_v30 = vpop.permute.xlu2 %7883 }
 0x73f   : > { %v9739_v18 = vadd.f32 %v9738_v4, %v9650_v11  ;;  %v8644_v50 = vpop.permute.xlu0 %8643  ;;  %7949 = vst.msk [vmem:[#allocation4 + $0x168] sm:$0xf] %vm5468_vm4, %v7884_v30  ;;  %v11701_v21 = vld [vmem:[#allocation4 + $0x140] sm:$0xf0]  ;;  %v7295_v11 = vadd.f32 %v15017_v32, %v15368_v19  ;;  %v7366_v63 = vmax.f32 %v7297_v31, 0.0 }
 0x740   : > { %8713 = vst.msk [vmem:[#allocation4 + $0x13c] sm:$0xf] %vm5468_vm4, %v8644_v50 }
 0x741   : > { %v9811_v38 = vmax.f32 %v9739_v18, 0.0  ;;  %8937 = vst.msk [vmem:[#allocation4 + $0x13c] sm:$0xf] %vm5693_vm5, %v15812_v45  ;;  %v11338_v45 = vld [vmem:[#allocation4 + $0x138] sm:$0xf]  ;;  %v7365_v5 = vmax.f32 %v7295_v11, 0.0 }
 0x742   : > { %v15863_v13 = vpop.f32.mrf.mxu1  ;;  %v11339_v17 = vor.u32 %v11701_v21, %v11338_v45  ;;  %v11346_v21 = vld [vmem:[#allocation4 + $0x140] sm:$0xf] }
 0x743   : > { %v9840_v61 = vmax.f32 %v9810_v59, %v9811_v38  ;;  %11455 = vmatmul.msk.bf16.gmra.mxu2 %vm3261_vm0, %v11323_v35  ;;  %9691 = vmatmul.bf16.gmra.mxu1 %v11319_v24  ;;  %v11335_v59 = vor.u32 %v11699_v10, %v11334_v25  ;;  %v7394_v19 = vmax.f32 %v7365_v5, %v7366_v63  ;;  %v15892_v16 = vpop.f32.mrf.mxu3 }
 0x744   : > { %v11331_v35 = vor.u32 %v11697_v29, %v11328_v7 }
 0x745   : > { %v15873_v36 = vmax.f32 %v7393_v15, %v9840_v61  ;;  %v7880_v1 = vpop.permute.xlu1 %7879 }
 0x746   : > { %v9741_v22 = vpop.f32.mrf.mxu2  ;;  %7947 = vst.msk [vmem:[#allocation4 + $0x150] sm:$0xf] %vm5468_vm4, %v7880_v1  ;;  %v8110_v63 = vpop.permute.xlu2 %8109 }
 0x747   : > { %v9742_v27 = vadd.f32 %v9741_v22, %v9653_v12  ;;  %v8870_v39 = vpop.permute.xlu0 %8869 }
 0x748   : > { %8938 = vst.msk [vmem:[#allocation4 + $0x148] sm:$0xf] %vm5693_vm5, %v8870_v39  ;;  %v11702_v39 = vld [vmem:[#allocation4 + $0x148] sm:$0xf0] }
 0x749   : > { %v9812_v51 = vmax.f32 %v9742_v27, 0.0  ;;  %v11347_v45 = vor.u32 %v11702_v39, %v11346_v21  ;;  %v7124_v21 = vadd.f32 %v15869_v56, %v15415_v60 }
 0x74a   : > { %v15887_v12 = vpop.f32.mrf.mxu1 }
 0x74b   : > { %v15902_v58 = vpop.f32.mrf.mxu3 }
 0x74c   : > { %9612 = vmatmul.bf16.gmra.mxu3 %v11339_v17  ;;  %v11700_v17 = vld [vmem:[#allocation4 + $0x13c] sm:$0xf] }
 0x74d   : > { %v8106_v38 = vpop.permute.xlu1 %8105 }
 0x74e   : > { %v9743_v4 = vpop.f32.mrf.mxu2  ;;  %8172 = vst.msk [vmem:[#allocation4 + $0x15c] sm:$0xf] %vm5693_vm5, %v8106_v38 }
 0x74f   : > { %v9744_v18 = vadd.f32 %v9743_v4, %v9655_v23  ;;  %v8104_v32 = vpop.permute.xlu0 %8103  ;;  %v11340_v31 = vld [vmem:[#allocation4 + $0x144] sm:$0xf0] }
 0x750   : > { %8171 = vst.msk [vmem:[#allocation4 + $0x150] sm:$0xf] %vm5693_vm5, %v8104_v32  ;;  %v11343_v4 = vor.u32 %v11700_v17, %v11340_v31  ;;  %v8652_v32 = vpop.permute.xlu2 %8651  ;;  %v9571_v31 = vadd.f32 %v15755_v49, %v15858_v47 }
 0x751   : > { %v9813_v33 = vmax.f32 %v9744_v18, 0.0 }
 0x752   : > { %v15898_v15 = vpop.f32.mrf.mxu1 }
 0x753   : > { %v9841_v40 = vmax.f32 %v9812_v51, %v9813_v33  ;;  %11456 = vmatmul.msk.bf16.gmra.mxu2 %vm3261_vm0, %v11335_v59  ;;  %9696 = vmatmul.bf16.gmra.mxu1 %v11331_v35  ;;  %v11705_v51 = vld [vmem:[#allocation4 + $0x160] sm:$0xf0]  ;;  %v11358_v33 = vld [vmem:[#allocation4 + $0x158] sm:$0xf] }
 0x755   : > { %v15894_v30 = vmax.f32 %v7394_v19, %v9841_v40  ;;  %v8648_v61 = vpop.permute.xlu1 %8647  ;;  %v11704_v22 = vld [vmem:[#allocation4 + $0x158] sm:$0xf0]  ;;  %v11359_v19 = vor.u32 %v11705_v51, %v11358_v33 }
 0x756   : > { %v15896_v50 = vpop.f32.mrf.mxu2  ;;  %8715 = vst.msk [vmem:[#allocation4 + $0x154] sm:$0xf] %vm5468_vm4, %v8648_v61 }
 0x757   : > { %v8426_v24 = vpop.permute.xlu0 %8425  ;;  %v11350_v57 = vld [vmem:[#allocation4 + $0x150] sm:$0xf] }
 0x758   : > { %8492 = vst.msk [vmem:[#allocation4 + $0x160] sm:$0xf] %vm5243_vm3, %v8426_v24  ;;  %v11351_v27 = vor.u32 %v11704_v22, %v11350_v57 }
 0x759   : > { %8716 = vst.msk [vmem:[#allocation4 + $0x160] sm:$0xf] %vm5468_vm4, %v15850_v62  ;;  %v9580_v62 = vpop.f32.mrf.mxu3 }
 0x75a   : > { %v9664_v48 = vpop.f32.mrf.mxu1  ;;  %v9581_v33 = vadd.f32 %v15755_v49, %v9580_v62  ;;  %v7305_v62 = vadd.f32 %v15139_v37, %v15450_v52 }
 0x75c   : > { %9617 = vmatmul.bf16.gmra.mxu3 %v11351_v27 }
 0x75d   : > { %v8874_v11 = vpop.permute.xlu1 %8873 }
 0x75e   : > { %v15906_v1 = vpop.f32.mrf.mxu2  ;;  %8940 = vst.msk [vmem:[#allocation4 + $0x160] sm:$0xf] %vm5693_vm5, %v8874_v11  ;;  %v7129_v11 = vadd.f32 %v15869_v56, %v15446_v26  ;;  %v9574_v26 = vadd.f32 %v15755_v49, %v15878_v20  ;;  %v11370_v20 = vld [vmem:[#allocation4 + $0x170] sm:$0xf] }
 0x75f   : > { %v8872_v23 = vpop.permute.xlu0 %8871 }
 0x760   : > { %8939 = vst.msk [vmem:[#allocation4 + $0x154] sm:$0xf] %vm5693_vm5, %v8872_v23  ;;  %v9576_v23 = vadd.f32 %v15755_v49, %v15892_v16  ;;  %v7218_v47 = vadd.f32 %v15491_v55, %v7129_v11 }
 0x761   : > { %v15916_v7 = vpop.f32.mrf.mxu3 }
 0x762   : > { %v15912_v29 = vpop.f32.mrf.mxu1  ;;  %v9665_v56 = vadd.f32 %v9664_v48, %v9576_v23  ;;  %v11708_v48 = vld [vmem:[#allocation4 + $0x178] sm:$0xf0] }
 0x763   : > { %11457 = vmatmul.msk.bf16.gmra.mxu2 %vm3261_vm0, %v11347_v45  ;;  %9701 = vmatmul.bf16.gmra.mxu1 %v11343_v4  ;;  %v8878_v4 = vpop.permute.xlu2 %8877 }
 0x765   : > { %v8108_v18 = vpop.permute.xlu1 %8107  ;;  %v11352_v38 = vld [vmem:[#allocation4 + $0x15c] sm:$0xf0] }
 0x766   : > { %v9751_v10 = vpop.f32.mrf.mxu2  ;;  %8173 = vst.msk [vmem:[#allocation4 + $0x168] sm:$0xf] %vm5693_vm5, %v8108_v18  ;;  %v9569_v18 = vadd.f32 %v15755_v49, %v15847_v8  ;;  %v9663_v8 = vadd.f32 %v15898_v15, %v9574_v26  ;;  %v9579_v15 = vadd.f32 %v15755_v49, %v15902_v58 }
 0x767   : > { %v7886_v25 = vpop.permute.xlu0 %7885  ;;  %v11703_v59 = vld [vmem:[#allocation4 + $0x154] sm:$0xf] }
 0x768   : > { %7950 = vst.msk [vmem:[#allocation4 + $0x174] sm:$0xf] %vm5468_vm4, %v7886_v25  ;;  %v11355_v24 = vor.u32 %v11703_v59, %v11352_v38  ;;  %v9660_v25 = vadd.f32 %v15887_v12, %v9571_v31  ;;  %v9658_v16 = vadd.f32 %v15863_v13, %v9569_v18  ;;  %v7307_v38 = vadd.f32 %v15179_v9, %v7218_v47 }
 0x769   : > { %8174 = vst.msk [vmem:[#allocation4 + $0x174] sm:$0xf] %vm5693_vm5, %v8110_v63  ;;  %v9585_v45 = vpop.f32.mrf.mxu3  ;;  %v7213_v63 = vadd.f32 %v15433_v3, %v7124_v21  ;;  %v9668_v9 = vadd.f32 %v15912_v29, %v9579_v15  ;;  %v7369_v31 = vmax.f32 %v7305_v62, 0.0  ;;  %v9584_v29 = vadd.f32 %v15755_v49, %v15916_v7 }
 0x76a   : > { %v9669_v27 = vpop.f32.mrf.mxu1  ;;  %v9749_v3 = vadd.f32 %v15906_v1, %v9660_v25  ;;  %v9747_v55 = vadd.f32 %v15896_v50, %v9658_v16  ;;  %v7300_v1 = vadd.f32 %v15077_v54, %v15408_v2  ;;  %v10132_v16 = vrot.slane %v15842_v0, 6 }
 0x76b   : > { %v7302_v51 = vadd.f32 %v15103_v42, %v7213_v63  ;;  %v9670_v42 = vadd.f32 %v9669_v27, %v9581_v33  ;;  %v10131_v7 = vrot.slane %v15820_v6, 7 }
 0x76c   : > { %v7367_v2 = vmax.f32 %v7300_v1, 0.0  ;;  %v9998_v1 = vrot.slane %v15873_v36, 1 }
 0x76d   : > { %v8430_v40 = vpop.permute.xlu1 %8429  ;;  %v11362_v35 = vld [vmem:[#allocation4 + $0x168] sm:$0xf] }
 0x76e   : > { %v9753_v5 = vpop.f32.mrf.mxu2  ;;  %8494 = vst.msk [vmem:[#allocation4 + $0x178] sm:$0xf] %vm5243_vm3, %v8430_v40  ;;  %v11371_v40 = vor.u32 %v11708_v48, %v11370_v20  ;;  %v9996_v20 = vrot.slane %v15842_v0, 2 }
 0x76f   : > { %v8428_v61 = vpop.permute.xlu0 %8427  ;;  %v9754_v12 = vadd.f32 %v9753_v5, %v9665_v56 }
 0x770   : > { %8493 = vst.msk [vmem:[#allocation4 + $0x16c] sm:$0xf] %vm5243_vm3, %v8428_v61  ;;  %v11707_v57 = vld [vmem:[#allocation4 + $0x170] sm:$0xf0]  ;;  %v7368_v61 = vmax.f32 %v7302_v51, 0.0  ;;  %v10064_v51 = vrot.slane %v15842_v0, 4 }
 0x771   : > { %8717 = vst.msk [vmem:[#allocation4 + $0x16c] sm:$0xf] %vm5468_vm4, %v8652_v32  ;;  %v11363_v22 = vor.u32 %v11707_v57, %v11362_v35  ;;  %v9752_v32 = vadd.f32 %v9751_v10, %v9663_v8  ;;  %v9588_v5 = vpop.f32.mrf.mxu3  ;;  %v9817_v50 = vmax.f32 %v9754_v12, 0.0  ;;  %v7370_v57 = vmax.f32 %v7307_v38, 0.0 }
 0x772   : > { %v9672_v13 = vpop.f32.mrf.mxu1  ;;  %v7395_v37 = vmax.f32 %v7367_v2, %v7368_v61  ;;  %v9589_v25 = vadd.f32 %v15755_v49, %v9588_v5  ;;  %v10136_v8 = vrot.slane %v15894_v30, 4 }
 0x773   : > { %11458 = vmatmul.msk.bf16.gmra.mxu2 %vm3261_vm0, %v11359_v19  ;;  %9706 = vmatmul.bf16.gmra.mxu1 %v11355_v24  ;;  %v9815_v19 = vmax.f32 %v9749_v3, 0.0  ;;  %v9814_v24 = vmax.f32 %v9747_v55, 0.0 }
 0x774   : > { %9622 = vmatmul.bf16.gmra.mxu3 %v11363_v22  ;;  %v9816_v22 = vmax.f32 %v9752_v32, 0.0  ;;  %v10133_v32 = vsel %vm9887_vm6, %v10132_v16, %v10131_v7  ;;  %v9928_v16 = vrot.slane %v15873_v36, 7  ;;  %v9930_v7 = vrot.slane %v15894_v30, 6 }
 0x775   : > { %v8876_v17 = vpop.permute.xlu1 %8875  ;;  %v9842_v58 = vmax.f32 %v9814_v24, %v9815_v19  ;;  %v10068_v19 = vrot.slane %v15894_v30, 2 }
 0x776   : > { %v9756_v39 = vpop.f32.mrf.mxu2  ;;  %8941 = vst.msk [vmem:[#allocation4 + $0x16c] sm:$0xf] %vm5693_vm5, %v8876_v17  ;;  %v9843_v11 = vmax.f32 %v9816_v22, %v9817_v50  ;;  %v7396_v17 = vmax.f32 %v7369_v31, %v7370_v57 }
 0x777   : > { %v8654_v60 = vpop.permute.xlu0 %8653  ;;  %v9757_v21 = vadd.f32 %v9756_v39, %v9668_v9  ;;  %v15958_v63 = vmax.f32 %v7395_v37, %v9842_v58  ;;  %v9673_v39 = vadd.f32 %v9672_v13, %v9584_v29  ;;  %v10066_v13 = vrot.slane %v15873_v36, 3 }
 0x778   : > { %8718 = vst.msk [vmem:[#allocation4 + $0x178] sm:$0xf] %vm5468_vm4, %v8654_v60  ;;  %v15961_v60 = vmax.f32 %v7396_v17, %v9843_v11 }
 0x779   : > { %8942 = vst.msk [vmem:[#allocation4 + $0x178] sm:$0xf] %vm5693_vm5, %v8878_v4  ;;  %v9586_v4 = vadd.f32 %v15755_v49, %v9585_v45  ;;  %v9818_v18 = vmax.f32 %v9757_v21, 0.0  ;;  %v15963_v26 = vpop.f32.mrf.mxu3  ;;  %v10134_v45 = vrot.slane %v15873_v36, 5  ;;  %v10138_v12 = vrot.slane %v15958_v63, 3 }
 0x77a   : > { %v9674_v47 = vpop.f32.mrf.mxu1  ;;  %v10140_v55 = vrot.slane %v15961_v60, 2  ;;  %v10003_v9 = vrot.slane %v15961_v60, 6 }
 0x77b   : > { %v9675_v3 = vadd.f32 %v9674_v47, %v9586_v4  ;;  %v10135_v5 = vsel %vm9890_vm7, %v10134_v45, %v10133_v32  ;;  %v9934_v32 = vrot.slane %v15961_v60, 4 }
 0x77c   : > { %v10137_v62 = vsel %vm9893_vm8, %v10136_v8, %v10135_v5 }
 0x77d   : > { %v11706_v35 = vld [vmem:[#allocation4 + $0x16c] sm:$0xf]  ;;  %v10139_v22 = vsel %vm9896_vm9, %v10138_v12, %v10137_v62  ;;  %v9591_v12 = vadd.f32 %v15755_v49, %v15963_v26 }
 0x77e   : > { %v9758_v59 = vpop.f32.mrf.mxu2  ;;  %v10141_v4 = vsel %vm9899_vm10, %v10140_v55, %v10139_v22  ;;  %v9932_v55 = vrot.slane %v15958_v63, 5 }
 0x77f   : > { %v9759_v10 = vadd.f32 %v9758_v59, %v9670_v42  ;;  %v10063_v59 = vrot.slane %v15820_v6, 5  ;;  %v9995_v42 = vrot.slane %v15820_v6, 3 }
 0x780   : > { %v11364_v54 = vld [vmem:[#allocation4 + $0x174] sm:$0xf0] }
 0x781   : > { %v11367_v27 = vor.u32 %v11706_v35, %v11364_v54  ;;  %v9819_v52 = vmax.f32 %v9759_v10, 0.0  ;;  %v10065_v50 = vsel %vm9887_vm6, %v10064_v51, %v10063_v59  ;;  %v9997_v24 = vsel %vm9887_vm6, %v9996_v20, %v9995_v42 }
 0x782   : > { %v10067_v2 = vsel %vm9890_vm7, %v10066_v13, %v10065_v50  ;;  %v9999_v58 = vsel %vm9890_vm7, %v9998_v1, %v9997_v24 }
 0x783   : > { %11459 = vmatmul.msk.bf16.gmra.mxu2 %vm3261_vm0, %v11371_v40  ;;  %9711 = vmatmul.bf16.gmra.mxu1 %v11367_v27  ;;  %v9844_v56 = vmax.f32 %v9818_v18, %v9819_v52  ;;  %v10001_v40 = vrot.slane %v15958_v63, 7  ;;  %v10069_v31 = vsel %vm9893_vm8, %v10068_v19, %v10067_v2  ;;  %v10000_v11 = vsel %vm9893_vm8, %v15894_v30, %v9999_v58 }
 0x785   : > { %v15975_v48 = vmax.f32 %v15543_v34, %v9844_v56  ;;  %v10070_v34 = vrot.slane %v15958_v63, 1  ;;  %v9926_v56 = vrot.slane %v15820_v6, 1 }
 0x786   : > { %v9761_v23 = vpop.f32.mrf.mxu2 }
 0x787   : > { %v9762_v33 = vadd.f32 %v9761_v23, %v9673_v39  ;;  %v10142_v54 = vrot.slane %v15975_v48, 1  ;;  %v10071_v37 = vsel %vm9896_vm9, %v10070_v34, %v10069_v31  ;;  %v10073_v52 = vrot.slane %v15975_v48, 7 }
 0x788   : > { %v10002_v23 = vsel %vm9896_vm9, %v10001_v40, %v10000_v11  ;;  %v10005_v17 = vrot.slane %v15975_v48, 5  ;;  %v10072_v18 = vsel %vm9899_vm10, %v15961_v60, %v10071_v37 }
 0x789   : > { %v9820_v35 = vmax.f32 %v9762_v33, 0.0  ;;  %v10143_v47 = vsel %vm9902_vm12, %v10142_v54, %v10141_v4  ;;  %v10074_v51 = vsel %vm9902_vm12, %v10073_v52, %v10072_v18 }
 0x78e   : > { %v9763_v38 = vpop.f32.mrf.mxu2 }
 0x78f   : > { %v9764_v15 = vadd.f32 %v9763_v38, %v9675_v3  ;;  %v9593_v10 = vpop.f32.mrf.mxu3  ;;  %v9927_v38 = vsel %vm9887_vm6, %v15842_v0, %v9926_v56 }
 0x790   : > { %v9677_v57 = vpop.f32.mrf.mxu1  ;;  %v9929_v1 = vsel %vm9890_vm7, %v9928_v16, %v9927_v38  ;;  %v9594_v24 = vadd.f32 %v15755_v49, %v9593_v10 }
 0x791   : > { %v9821_v61 = vmax.f32 %v9764_v15, 0.0  ;;  %v9678_v27 = vadd.f32 %v9677_v57, %v9589_v25  ;;  %v10004_v25 = vsel %vm9899_vm10, %v10003_v9, %v10002_v23  ;;  %v9936_v15 = vrot.slane %v15975_v48, 3 }
 0x792   : > { %v10006_v33 = vsel %vm9902_vm12, %v10005_v17, %v10004_v25  ;;  %v9931_v19 = vsel %vm9893_vm8, %v9930_v7, %v9929_v1  ;;  %v16655_v7 = vld [vmem:[#allocation61_spill] sm:$0xff] }
 0x793   : > { %v9845_v21 = vmax.f32 %v9820_v35, %v9821_v61  ;;  %v9933_v62 = vsel %vm9896_vm9, %v9932_v55, %v9931_v19 }
 0x794   : > { %v9935_v50 = vsel %vm9899_vm10, %v9934_v32, %v9933_v62 }
 0x795   : > { %v16001_v29 = vmax.f32 %v15578_v14, %v9845_v21  ;;  %v9937_v40 = vsel %vm9902_vm12, %v9936_v15, %v9935_v50  ;;  %v16656_v15 = vld [vmem:[#allocation73_spill] sm:$0xff] }
 0x796   : > { %v9766_v39 = vpop.f32.mrf.mxu2 }
 0x797   : > { %v9767_v45 = vadd.f32 %v9766_v39, %v9678_v27  ;;  %v10144_v14 = vsel %vm9905_vm11, %v16001_v29, %v10143_v47  ;;  %v10075_v3 = vrot.slane %v16001_v29, 6  ;;  %v10007_v8 = vrot.slane %v16001_v29, 4  ;;  %v9595_v26 = vpop.f32.mrf.mxu3 }
 0x798   : > { %10159 = vrot.lane.b32.xlu0 %v10144_v14, %s11796_s17  ;;  %v9679_v13 = vpop.f32.mrf.mxu1  ;;  %v9938_v42 = vrot.slane %v16001_v29, 2  ;;  %v9596_v11 = vadd.f32 %v15755_v49, %v9595_v26 }
 0x799   : > { %v10076_v59 = vsel %vm9905_vm11, %v10075_v3, %v10074_v51  ;;  %v10008_v20 = vsel %vm9905_vm11, %v10007_v8, %v10006_v33  ;;  %v9680_v5 = vadd.f32 %v9679_v13, %v9591_v12  ;;  %v9822_v9 = vmax.f32 %v9767_v45, 0.0 }
 0x79a   : > { %10091 = vrot.lane.b32.xlu2 %v10076_v59, %s11796_s17  ;;  %10023 = vrot.lane.b32.xlu1 %v10008_v20, %s11796_s17  ;;  %v9939_v61 = vsel %vm9905_vm11, %v9938_v42, %v9937_v40 }
 0x79e   : > { %v9768_v34 = vpop.f32.mrf.mxu2 }
 0x79f   : > { %v9769_v35 = vadd.f32 %v9768_v34, %v9680_v5  ;;  %v9598_v22 = vpop.f32.mrf.mxu3 }
 0x7a0   : > { %9954 = vrot.lane.b32.xlu0 %v9939_v61, %s11796_s17  ;;  %v9682_v54 = vpop.f32.mrf.mxu1  ;;  %v9599_v10 = vadd.f32 %v15755_v49, %v9598_v22 }
 0x7a1   : > { %v9823_v57 = vmax.f32 %v9769_v35, 0.0  ;;  %v9683_v58 = vadd.f32 %v9682_v54, %v9594_v24 }
 0x7a3   : > { %v9846_v2 = vmax.f32 %v9822_v9, %v9823_v57 }
 0x7a5   : > { %v16039_v21 = vmax.f32 %v15604_v53, %v9846_v2 }
 0x7a6   : > { %v9771_v27 = vpop.f32.mrf.mxu2 }
 0x7a7   : > { %v9772_v31 = vadd.f32 %v9771_v27, %v9683_v58  ;;  %v9600_v37 = vpop.f32.mrf.mxu3 }
 0x7a8   : > { %v9684_v52 = vpop.f32.mrf.mxu1  ;;  %v9601_v3 = vadd.f32 %v15755_v49, %v9600_v37 }
 0x7a9   : > { %v9685_v23 = vadd.f32 %v9684_v52, %v9596_v11  ;;  %v9824_v18 = vmax.f32 %v9772_v31, 0.0 }
 0x7ae   : > { %v9773_v17 = vpop.f32.mrf.mxu2 }
 0x7af   : > { %v9774_v4 = vadd.f32 %v9773_v17, %v9685_v23  ;;  %v9603_v39 = vpop.f32.mrf.mxu3  ;;  %v16058_v17 = vld [vmem:[%s16323_s4] ss:$0 sm:$0xff] }
 0x7b0   : > { %v9687_v47 = vpop.f32.mrf.mxu1  ;;  %v9604_v59 = vadd.f32 %v15755_v49, %v9603_v39 }
 0x7b1   : > { %v9825_v25 = vmax.f32 %v9774_v4, 0.0  ;;  %v9688_v16 = vadd.f32 %v9687_v47, %v9599_v10 }
 0x7b3   : > { %v9847_v56 = vmax.f32 %v9824_v18, %v9825_v25 }
 0x7b5   : > { %v16044_v53 = vmax.f32 %v16655_v7, %v9847_v56 }
 0x7b6   : > { %v9776_v45 = vpop.f32.mrf.mxu2 }
 0x7b7   : > { %v9777_v14 = vadd.f32 %v9776_v45, %v9688_v16  ;;  %v9605_v8 = vpop.f32.mrf.mxu3 }
 0x7b8   : > { %v9689_v12 = vpop.f32.mrf.mxu1  ;;  %v9606_v62 = vadd.f32 %v15755_v49, %v9605_v8 }
 0x7b9   : > { %v9690_v51 = vadd.f32 %v9689_v12, %v9601_v3  ;;  %v9826_v20 = vmax.f32 %v9777_v14, 0.0  ;;  %v9886_v12 = vrot.slane %v15842_v0, 7 }
 0x7be   : > { %v9778_v33 = vpop.f32.mrf.mxu2 }
 0x7bf   : > { %v9779_v55 = vadd.f32 %v9778_v33, %v9690_v51  ;;  %v9608_v13 = vpop.f32.mrf.mxu3  ;;  %v9889_v51 = vrot.slane %v15873_v36, 6  ;;  %v9892_v33 = vrot.slane %v15894_v30, 5 }
 0x7c0   : > { %v9692_v32 = vpop.f32.mrf.mxu1  ;;  %v9609_v18 = vadd.f32 %v16058_v17, %v9608_v13 }
 0x7c1   : > { %v9827_v38 = vmax.f32 %v9779_v55, 0.0  ;;  %v9693_v1 = vadd.f32 %v9692_v32, %v9604_v59  ;;  %v9888_v32 = vsel %vm9887_vm6, %v9886_v12, %v15820_v6 }
 0x7c3   : > { %v9848_v26 = vmax.f32 %v9826_v20, %v9827_v38  ;;  %v9895_v20 = vrot.slane %v15958_v63, 4 }
 0x7c5   : > { %v16049_v5 = vmax.f32 %v16656_v15, %v9848_v26  ;;  %v9898_v26 = vrot.slane %v15961_v60, 3  ;;  %v9901_v15 = vrot.slane %v15975_v48, 2 }
 0x7c6   : > { %v9781_v19 = vpop.f32.mrf.mxu2 }
 0x7c7   : > { %v9782_v42 = vadd.f32 %v9781_v19, %v9693_v1  ;;  %v9610_v40 = vpop.f32.mrf.mxu3  ;;  %v9891_v1 = vsel %vm9890_vm7, %v9889_v51, %v9888_v32  ;;  %v10080_v12 = vrot.slane %v16049_v5, 3  ;;  %v10009_v32 = vrot.slane %v16039_v21, 3 }
 0x7c8   : > { %v9694_v50 = vpop.f32.mrf.mxu1  ;;  %v9611_v4 = vadd.f32 %v16058_v17, %v9610_v40 }
 0x7c9   : > { %v9695_v34 = vadd.f32 %v9694_v50, %v9606_v62  ;;  %v9828_v24 = vmax.f32 %v9782_v42, 0.0  ;;  %v9894_v42 = vsel %vm9893_vm8, %v9892_v33, %v9891_v1  ;;  %v9904_v62 = vrot.slane %v16001_v29, 1 }
 0x7ca   : > { %v9897_v40 = vsel %vm9896_vm9, %v9895_v20, %v9894_v42  ;;  %v10012_v1 = vrot.slane %v16049_v5, 1 }
 0x7ce   : > { %v9783_v35 = vpop.f32.mrf.mxu2 }
 0x7cf   : > { %v9784_v61 = vadd.f32 %v9783_v35, %v9695_v34  ;;  %v9613_v58 = vpop.f32.mrf.mxu3 }
 0x7d0   : > { %v9697_v57 = vpop.f32.mrf.mxu1  ;;  %v9614_v39 = vadd.f32 %v16058_v17, %v9613_v58 }
 0x7d1   : > { %v9829_v9 = vmax.f32 %v9784_v61, 0.0  ;;  %v9698_v56 = vadd.f32 %v9697_v57, %v9609_v18  ;;  %v9900_v61 = vsel %vm9899_vm10, %v9898_v26, %v9897_v40  ;;  %v10010_v26 = vrot.slane %v16044_v53, 2 }
 0x7d2   : > { %v9903_v57 = vsel %vm9902_vm12, %v9901_v15, %v9900_v61  ;;  %v9963_v15 = vrot.slane %v15820_v6, 2  ;;  %v9969_v40 = vrot.slane %v15958_v63, 6 }
 0x7d3   : > { %v9849_v22 = vmax.f32 %v9828_v24, %v9829_v9 }
 0x7d5   : > { %v16053_v54 = vmax.f32 %v15688_v43, %v9849_v22 }
 0x7d6   : > { %v9786_v2 = vpop.f32.mrf.mxu2 }
 0x7d7   : > { %v9615_v11 = vpop.f32.mrf.mxu3  ;;  %v9787_v3 = vadd.f32 %v9786_v2, %v9698_v56  ;;  %v9906_v2 = vsel %vm9905_vm11, %v9904_v62, %v9903_v57 }
 0x7d8   : > { %v9699_v27 = vpop.f32.mrf.mxu1  ;;  %v9616_v43 = vadd.f32 %v16058_v17, %v9615_v11  ;;  %9924 = vst.msk [vmem:[%s16081_s30] sm:$0xff] %vm9923_vm13, %v9906_v2  ;;  %v9973_v2 = vrot.slane %v15975_v48, 4 }
 0x7d9   : > { %v9700_v25 = vadd.f32 %v9699_v27, %v9611_v4  ;;  %v9830_v19 = vmax.f32 %v9787_v3, 0.0 }
 0x7de   : > { %v9788_v31 = vpop.f32.mrf.mxu2 }
 0x7df   : > { %v9618_v23 = vpop.f32.mrf.mxu3  ;;  %v9789_v45 = vadd.f32 %v9788_v31, %v9700_v25 }
 0x7e0   : > { %v9702_v37 = vpop.f32.mrf.mxu1  ;;  %v9619_v24 = vadd.f32 %v16058_v17, %v9618_v23  ;;  %v9909_v23 = vrot.slane %v16049_v5, 6 }
 0x7e1   : > { %v9703_v16 = vadd.f32 %v9702_v37, %v9614_v39  ;;  %v9831_v38 = vmax.f32 %v9789_v45, 0.0 }
 0x7e3   : > { %v9850_v35 = vmax.f32 %v9830_v19, %v9831_v38  ;;  %v9964_v19 = vrot.slane %v15842_v0, 1 }
 0x7e5   : > { %v16091_v11 = vmax.f32 %v15717_v44, %v9850_v35 }
 0x7e6   : > { %v9791_v49 = vpop.f32.mrf.mxu2 }
 0x7e7   : > { %v9620_v8 = vpop.f32.mrf.mxu3  ;;  %v9792_v55 = vadd.f32 %v9791_v49, %v9703_v16  ;;  %v9913_v18 = vrot.slane %v16091_v11, 4 }
 0x7e8   : > { %v9704_v52 = vpop.f32.mrf.mxu1  ;;  %v9621_v58 = vadd.f32 %v16058_v17, %v9620_v8  ;;  %v10077_v8 = vrot.slane %v16039_v21, 5 }
 0x7e9   : > { %v9705_v47 = vadd.f32 %v9704_v52, %v9616_v43  ;;  %v9832_v50 = vmax.f32 %v9792_v55, 0.0  ;;  %v9907_v52 = vrot.slane %v16044_v53, 7  ;;  %v9911_v43 = vrot.slane %v16053_v54, 5 }
 0x7ea   : > { %v10082_v55 = vrot.slane %v16053_v54, 2 }
 0x7eb   : > { %v9908_v39 = vsel %vm9887_vm6, %v9907_v52, %v16039_v21  ;;  %v9975_v52 = vrot.slane %v16001_v29, 3 }
 0x7ee   : > { %v9793_v10 = vpop.f32.mrf.mxu2 }
 0x7ef   : > { %v9794_v14 = vadd.f32 %v9793_v10, %v9705_v47  ;;  %v10078_v47 = vrot.slane %v16044_v53, 4 }
 0x7f0   : > { %v9707_v7 = vpop.f32.mrf.mxu1 }
 0x7f1   : > { %v9833_v13 = vmax.f32 %v9794_v14, 0.0  ;;  %v9708_v27 = vadd.f32 %v9707_v7, %v9619_v24  ;;  %v10079_v38 = vsel %vm9887_vm6, %v10078_v47, %v10077_v8  ;;  %v9965_v24 = vsel %vm9887_vm6, %v9964_v19, %v9963_v15 }
 0x7f2   : > { %v10081_v62 = vsel %vm9890_vm7, %v10080_v12, %v10079_v38 }
 0x7f3   : > { %v9851_v9 = vmax.f32 %v9832_v50, %v9833_v13  ;;  %v10015_v50 = vrot.slane %v16091_v11, 7 }
 0x7f5   : > { %v16094_v37 = vmax.f32 %v15737_v46, %v9851_v9  ;;  %v9910_v46 = vsel %vm9890_vm7, %v9909_v23, %v9908_v39  ;;  %v10011_v39 = vsel %vm9887_vm6, %v10010_v26, %v10009_v32 }
 0x7f6   : > { %v9796_v59 = vpop.f32.mrf.mxu2  ;;  %v9912_v7 = vsel %vm9893_vm8, %v9911_v43, %v9910_v46  ;;  %v9944_v43 = vrot.slane %v16053_v54, 6 }
 0x7f7   : > { %v9623_v22 = vpop.f32.mrf.mxu3  ;;  %v9797_v4 = vadd.f32 %v9796_v59, %v9708_v27  ;;  %v9915_v44 = vrot.slane %v16094_v37, 3  ;;  %v9914_v3 = vsel %vm9896_vm9, %v9913_v18, %v9912_v7  ;;  %v10084_v59 = vrot.slane %v16091_v11, 1 }
 0x7f8   : > { %v9709_v34 = vpop.f32.mrf.mxu1  ;;  %v9624_v45 = vadd.f32 %v16058_v17, %v9623_v22  ;;  %v10017_v57 = vrot.slane %v16094_v37, 6  ;;  %v9966_v22 = vsel %vm9890_vm7, %v15873_v36, %v9965_v24  ;;  %v9940_v27 = vrot.slane %v16039_v21, 1 }
 0x7f9   : > { %v9710_v49 = vadd.f32 %v9709_v34, %v9621_v58  ;;  %v9834_v56 = vmax.f32 %v9797_v4, 0.0  ;;  %v16111_v33 = vsel %vm9899_vm10, %v9915_v44, %v9914_v3  ;;  %v9967_v34 = vrot.slane %v15894_v30, 7 }
 0x7fa   : > { %v10083_v4 = vsel %vm9893_vm8, %v10082_v55, %v10081_v62  ;;  %v9941_v44 = vsel %vm9887_vm6, %v16044_v53, %v9940_v27  ;;  %v10146_v62 = vrot.slane %v16044_v53, 6 }
 0x7fb   : > { %v10085_v12 = vsel %vm9896_vm9, %v10084_v59, %v10083_v4 }
 0x7fc   : > { %v10086_v59 = vsel %vm9899_vm10, %v16094_v37, %v10085_v12 }
 0x7fe   : > { %v9798_v31 = vpop.f32.mrf.mxu2 }
 0x7ff   : > { %v9799_v25 = vadd.f32 %v9798_v31, %v9710_v49  ;;  %v9625_v14 = vpop.f32.mrf.mxu3  ;;  %v9942_v31 = vrot.slane %v16049_v5, 7  ;;  %v9968_v49 = vsel %vm9893_vm8, %v9967_v34, %v9966_v22  ;;  %v10148_v34 = vrot.slane %v16049_v5, 5 }
 0x800   : > { %v9712_v10 = vpop.f32.mrf.mxu1  ;;  %v9626_v13 = vadd.f32 %v16058_v17, %v9625_v14  ;;  %v9971_v17 = vrot.slane %v15961_v60, 5  ;;  %v9948_v14 = vrot.slane %v16094_v37, 4 }
 0x801   : > { %v9835_v51 = vmax.f32 %v9799_v25, 0.0  ;;  %v9713_v20 = vadd.f32 %v9712_v10, %v9624_v45  ;;  %v9970_v10 = vsel %vm9896_vm9, %v9969_v40, %v9968_v49  ;;  %v9943_v45 = vsel %vm9890_vm7, %v9942_v31, %v9941_v44 }
 0x802   : > { %v9972_v46 = vsel %vm9899_vm10, %v9971_v17, %v9970_v10  ;;  %v9945_v55 = vsel %vm9893_vm8, %v9944_v43, %v9943_v45  ;;  %v10150_v31 = vrot.slane %v16053_v54, 4  ;;  %v10152_v49 = vrot.slane %v16091_v11, 3 }
 0x803   : > { %v9852_v35 = vmax.f32 %v9834_v56, %v9835_v51  ;;  %v9974_v7 = vsel %vm9902_vm12, %v9973_v2, %v9972_v46 }
 0x804   : > { %v9976_v3 = vsel %vm9905_vm11, %v9975_v52, %v9974_v7  ;;  %v9981_v7 = vrot.slane %v16053_v54, 7 }
 0x805   : > { %v16140_v18 = vmax.f32 %v15770_v28, %v9852_v35  ;;  %v10013_v28 = vsel %vm9890_vm7, %v10012_v1, %v10011_v39  ;;  %9993 = vst.msk [vmem:[%s16081_s30 + $0x8] sm:$0xff] %vm9923_vm13, %v9976_v3 }
 0x806   : > { %v9801_v16 = vpop.f32.mrf.mxu2  ;;  %v10014_v51 = vsel %vm9893_vm8, %v16053_v54, %v10013_v28  ;;  %v9983_v28 = vrot.slane %v16091_v11, 6 }
 0x807   : > { %v9802_v9 = vadd.f32 %v9801_v16, %v9713_v20  ;;  %v9946_v16 = vrot.slane %v16091_v11, 5  ;;  %v9917_v20 = vrot.slane %v16140_v18, 2  ;;  %v10087_v38 = vrot.slane %v16140_v18, 7 }
 0x808   : > { %v9714_v42 = vpop.f32.mrf.mxu1  ;;  %v10019_v32 = vrot.slane %v16140_v18, 5  ;;  %v9950_v26 = vrot.slane %v16140_v18, 3  ;;  %v10016_v1 = vsel %vm9896_vm9, %v10015_v50, %v10014_v51  ;;  %v10156_v43 = vrot.slane %v16140_v18, 1 }
 0x809   : > { %v9715_v61 = vadd.f32 %v9714_v42, %v9626_v13  ;;  %v9836_v47 = vmax.f32 %v9802_v9, 0.0  ;;  %v9947_v15 = vsel %vm9896_vm9, %v9946_v16, %v9945_v55  ;;  %v10018_v19 = vsel %vm9899_vm10, %v10017_v57, %v10016_v1 }
 0x80a   : > { %v16142_v25 = vpop.permute.xlu0 %10159  ;;  %v9949_v42 = vsel %vm9899_vm10, %v9948_v14, %v9947_v15  ;;  %v10088_v24 = vsel %vm9902_vm12, %v10087_v38, %v10086_v59  ;;  %v10020_v17 = vsel %vm9902_vm12, %v10019_v32, %v10018_v19  ;;  %v9977_v16 = vrot.slane %v16039_v21, 2  ;;  %v10092_v59 = vpop.permute.xlu2 %10091 }
 0x80b   : > { %v9951_v9 = vsel %vm9902_vm12, %v9950_v26, %v9949_v42  ;;  %v9985_v14 = vrot.slane %v16094_v37, 5  ;;  %v10031_v1 = vrot.slane %v15820_v6, 4  ;;  %v10032_v15 = vrot.slane %v15842_v0, 3 }
 0x80c   : > { %v10024_v26 = vpop.permute.xlu1 %10023  ;;  %v10034_v19 = vrot.slane %v15873_v36, 2  ;;  %v10036_v42 = vrot.slane %v15894_v30, 1 }
 0x80d   : > { %10029 = vst.msk [vmem:[%s16081_s30 + $0x8] sm:$0xff] %vm9960_vm14, %v10024_v26 }
 0x80e   : > { %v9803_v58 = vpop.f32.mrf.mxu2 }
 0x80f   : > { %v9804_v23 = vadd.f32 %v9803_v58, %v9715_v61  ;;  %v9918_v61 = vsel %vm9902_vm12, %v9917_v20, %v16111_v33  ;;  %v10145_v33 = vrot.slane %v16039_v21, 7 }
 0x811   : > { %v9837_v56 = vmax.f32 %v9804_v23, 0.0  ;;  %v10147_v52 = vsel %vm9887_vm6, %v10146_v62, %v10145_v33  ;;  %v10154_v23 = vrot.slane %v16094_v37, 2  ;;  %v10039_v62 = vrot.slane %v15961_v60, 7 }
 0x812   : > { %v9955_v27 = vpop.permute.xlu0 %9954  ;;  %v10149_v4 = vsel %vm9890_vm7, %v10148_v34, %v10147_v52  ;;  %v10041_v34 = vrot.slane %v15975_v48, 6  ;;  %v10100_v33 = vrot.slane %v15842_v0, 5  ;;  %v10102_v52 = vrot.slane %v15873_v36, 4 }
 0x813   : > { %v9853_v8 = vmax.f32 %v9836_v47, %v9837_v56  ;;  %9961 = vst.msk [vmem:[%s16081_s30] sm:$0xff] %vm9960_vm14, %v9955_v27  ;;  %v10151_v10 = vsel %vm9893_vm8, %v10150_v31, %v10149_v4  ;;  %v9978_v56 = vrot.slane %v16044_v53, 1  ;;  %v10099_v27 = vrot.slane %v15820_v6, 6 }
 0x814   : > { %v10153_v39 = vsel %vm9896_vm9, %v10152_v49, %v10151_v10  ;;  %v10106_v6 = vrot.slane %v15958_v63, 2 }
 0x815   : > { %v16165_v13 = vmax.f32 %v15795_v41, %v9853_v8  ;;  %v10155_v44 = vsel %vm9899_vm10, %v10154_v23, %v10153_v39  ;;  %v9979_v45 = vsel %vm9887_vm6, %v9978_v56, %v9977_v16  ;;  %v9987_v8 = vrot.slane %v16140_v18, 4 }
 0x816   : > { %v10157_v46 = vsel %vm9902_vm12, %v10156_v43, %v10155_v44  ;;  %v9980_v3 = vsel %vm9890_vm7, %v16049_v5, %v9979_v45  ;;  %v10104_v23 = vrot.slane %v15894_v30, 3  ;;  %v10101_v39 = vsel %vm9887_vm6, %v10100_v33, %v10099_v27 }
 0x817   : > { %v9919_v40 = vrot.slane %v16165_v13, 1  ;;  %v10089_v41 = vrot.slane %v16165_v13, 6  ;;  %v10021_v35 = vrot.slane %v16165_v13, 4  ;;  %v9952_v50 = vrot.slane %v16165_v13, 2 }
 0x818   : > { %v10158_v47 = vsel %vm9905_vm11, %v16165_v13, %v10157_v46  ;;  %v9982_v12 = vsel %vm9893_vm8, %v9981_v7, %v9980_v3  ;;  %v9989_v20 = vrot.slane %v16165_v13, 3  ;;  %v10103_v36 = vsel %vm9890_vm7, %v10102_v52, %v10101_v39 }
 0x819   : > { %v9920_v57 = vsel %vm9905_vm11, %v9919_v40, %v9918_v61  ;;  %v10090_v22 = vsel %vm9905_vm11, %v10089_v41, %v10088_v24  ;;  %v10022_v2 = vsel %vm9905_vm11, %v10021_v35, %v10020_v17  ;;  %v9953_v58 = vsel %vm9905_vm11, %v9952_v50, %v9951_v9 }
 0x81a   : > { %9925 = vst.msk [vmem:[%s16081_s30 + $0x20] sm:$0xff] %vm9923_vm13, %v9920_v57  ;;  %10093 = vrot.lane.b32.xlu0 %v10090_v22, %s11796_s17  ;;  %10025 = vrot.lane.b32.xlu2 %v10022_v2, %s11796_s17  ;;  %v9984_v51 = vsel %vm9896_vm9, %v9983_v28, %v9982_v12  ;;  %v10043_v40 = vrot.slane %v16001_v29, 5  ;;  %v10045_v41 = vrot.slane %v16039_v21, 4  ;;  %v10033_v35 = vsel %vm9887_vm6, %v10032_v15, %v10031_v1 }
 0x81b   : > { %9956 = vrot.lane.b32.xlu1 %v9953_v58, %s11796_s17  ;;  %v9986_v55 = vsel %vm9899_vm10, %v9985_v14, %v9984_v51  ;;  %v10046_v50 = vrot.slane %v16044_v53, 3  ;;  %v10048_v61 = vrot.slane %v16049_v5, 2  ;;  %v10050_v24 = vrot.slane %v16053_v54, 1 }
 0x81c   : > { %v9988_v38 = vsel %vm9902_vm12, %v9987_v8, %v9986_v55  ;;  %v10035_v17 = vsel %vm9890_vm7, %v10034_v19, %v10033_v35  ;;  %v10053_v9 = vrot.slane %v16094_v37, 7  ;;  %v10055_v57 = vrot.slane %v16140_v18, 6 }
 0x81d   : > { %v9990_v32 = vsel %vm9905_vm11, %v9989_v20, %v9988_v38  ;;  %v10057_v22 = vrot.slane %v16165_v13, 5  ;;  %v10037_v2 = vsel %vm9893_vm8, %v10036_v42, %v10035_v17  ;;  %v10047_v58 = vsel %vm9887_vm6, %v10046_v50, %v10045_v41 }
 0x81e   : > { %9994 = vst.msk [vmem:[%s16081_s30 + $0x28] sm:$0xff] %vm9923_vm13, %v9990_v32  ;;  %v10038_v31 = vsel %vm9896_vm9, %v15958_v63, %v10037_v2  ;;  %v10049_v49 = vsel %vm9890_vm7, %v10048_v61, %v10047_v58  ;;  %v10108_v30 = vrot.slane %v15961_v60, 1  ;;  %v10105_v56 = vsel %vm9893_vm8, %v10104_v23, %v10103_v36 }
 0x81f   : > { %v10040_v43 = vsel %vm9899_vm10, %v10039_v62, %v10038_v31  ;;  %v10051_v10 = vsel %vm9893_vm8, %v10050_v24, %v10049_v49  ;;  %v10111_v63 = vrot.slane %v16001_v29, 7  ;;  %v10107_v7 = vsel %vm9896_vm9, %v10106_v6, %v10105_v56 }
 0x820   : > { %v10042_v0 = vsel %vm9902_vm12, %v10041_v34, %v10040_v43  ;;  %v10052_v44 = vsel %vm9896_vm9, %v16091_v11, %v10051_v10  ;;  %v10113_v28 = vrot.slane %v16039_v21, 6  ;;  %v10114_v60 = vrot.slane %v16044_v53, 5 }
 0x821   : > { %v10044_v46 = vsel %vm9905_vm11, %v10043_v40, %v10042_v0  ;;  %v10109_v14 = vsel %vm9899_vm10, %v10108_v30, %v10107_v7  ;;  %v10116_v3 = vrot.slane %v16049_v5, 4  ;;  %v10118_v8 = vrot.slane %v16053_v54, 3 }
 0x822   : > { %10061 = vst.msk [vmem:[%s16081_s30 + $0x10] sm:$0xff] %vm9923_vm13, %v10044_v46  ;;  %v10110_v29 = vsel %vm9902_vm12, %v15975_v48, %v10109_v14  ;;  %v10115_v21 = vsel %vm9887_vm6, %v10114_v60, %v10113_v28  ;;  %v10120_v12 = vrot.slane %v16091_v11, 2  ;;  %v10122_v53 = vrot.slane %v16094_v37, 1 }
 0x823   : > { %10161 = vrot.lane.b32.xlu1 %v10158_v47, %s11796_s17  ;;  %v10054_v47 = vsel %vm9899_vm10, %v10053_v9, %v10052_v44  ;;  %10097 = vst.msk [vmem:[%s16081_s30 + $0x10] sm:$0xff] %vm9960_vm14, %v10092_v59  ;;  %v10112_v5 = vsel %vm9905_vm11, %v10111_v63, %v10110_v29  ;;  %v10117_v54 = vsel %vm9890_vm7, %v10116_v3, %v10115_v21  ;;  %v10125_v55 = vrot.slane %v16165_v13, 7 }
 0x824   : > { %v10056_v16 = vsel %vm9902_vm12, %v10055_v57, %v10054_v47  ;;  %v10119_v51 = vsel %vm9893_vm8, %v10118_v8, %v10117_v54  ;;  %10129 = vst.msk [vmem:[%s16081_s30 + $0x18] sm:$0xff] %vm9923_vm13, %v10112_v5 }
 0x825   : > { %v10058_v45 = vsel %vm9905_vm11, %v10057_v22, %v10056_v16  ;;  %v10121_v48 = vsel %vm9896_vm9, %v10120_v12, %v10119_v51  ;;  %10165 = vst.msk [vmem:[%s16081_s30 + $0x18] sm:$0xff] %vm9960_vm14, %v16142_v25 }
 0x826   : > { %10062 = vst.msk [vmem:[%s16081_s30 + $0x30] sm:$0xff] %vm9923_vm13, %v10058_v45  ;;  %v10123_v11 = vsel %vm9899_vm10, %v10122_v53, %v10121_v48 }
 0x827   : > { %v10124_v37 = vsel %vm9902_vm12, %v16140_v18, %v10123_v11 }
 0x828   : > { %v10126_v20 = vsel %vm9905_vm11, %v10125_v55, %v10124_v37 }
 0x829   : > { %10130 = vst.msk [vmem:[%s16081_s30 + $0x38] sm:$0xff] %vm9923_vm13, %v10126_v20 }
 0x874   : > { %v10026_v4 = vpop.permute.xlu2 %10025 }
 0x875   : > { %10030 = vst.msk [vmem:[%s16081_s30 + $0x28] sm:$0xff] %vm9960_vm14, %v10026_v4 }
 0x88c   : > { %v10094_v38 = vpop.permute.xlu0 %10093 }
 0x88d   : > { %v9957_v32 = vpop.permute.xlu1 %9956  ;;  %10098 = vst.msk [vmem:[%s16081_s30 + $0x30] sm:$0xff] %vm9960_vm14, %v10094_v38 }
 0x88e   : > { %9962 = vst.msk [vmem:[%s16081_s30 + $0x20] sm:$0xff] %vm9960_vm14, %v9957_v32 }
 0x895   : > { %v10162_v13 = vpop.permute.xlu1 %10161 }
 0x896   : > { %10166 = vst.msk [vmem:[%s16081_s30 + $0x38] sm:$0xff] %vm9960_vm14, %v10162_v13 }
 0x897 PF: > { %p12_p9 = scmp.ge.s32.totalorder %s11846_s22, 4   ;;  %s16657_s18 = smov %s11789_s19 }
 0x898   : > { %s16658_s19 = smov %s11855_s25  ;;  %s16659_s20 = smov %s11846_s22 }
 0x899   :  { %14 = sbr.rel (!%p12_p9) target bundleno = 2 (0x2), region = 135 }

</bundles_post_ra>
